<compile_context>
chip_gen: v7x
topology: tpu7x:2x2x1
jax: 0.10.0
libtpu: 0.0.40
codegen_flags: <defaults>
</compile_context>

<pallas_src>
import jax
import jax.numpy as jnp
from jax import lax
from jax.experimental import pallas as pl
from jax.experimental.pallas import tpu as pltpu

HIDDEN = 128          # LSTM hidden size (from module)
N_OPS = 8             # len(operation_space) -- small synthetic op space
N_PROB = 11           # fc_prob output dim
N_MAG = 10            # fc_magnitude output dim
N_HEADS = N_OPS + N_PROB + N_MAG   # 29
HEAD_PAD = 32                       # padded head width (lane-friendlier than 29)


def _fused_controller_kernel(x_ref, wih0_ref, b0_ref, wblk_ref, b1_ref,
                             wh_ref, bh_ref, out_ref, gx_scr, h1_scr):
    """Entire RNNController forward in one kernel invocation.

    x_ref:    (S*B, I)   f32  flattened input sequence
    wih0_ref: (I, 4H)    f32  layer-0 input weights   (gate order [i,f,o,g])
    b0_ref:   (1, 4H)    f32  layer-0 bias (b_ih + b_hh)
    wblk_ref: (2H, 8H)   bf16 fused recurrent RHS [[Whh0, Wih1],[0, Whh1]]
    b1_ref:   (1, 4H)    f32  layer-1 bias (b_ih + b_hh)
    wh_ref:   (H, 32)    f32  [W_op | W_prob | W_mag] zero-padded to 32 cols
    bh_ref:   (1, 32)    f32  matching padded bias
    out_ref:  (S*B, 32)  f32  padded head outputs
    gx_scr:   (S, B, 4H) f32  x@Wih0 + b0 for every timestep
    h1_scr:   (S, B, H)  f32  top-layer hidden states (feeds the heads matmul)
    """
    S, B, _ = gx_scr.shape
    H = HIDDEN
    H3, H4 = 3 * H, 4 * H

    # ---- Prologue: non-recurrent layer-0 input gates for the whole sequence --------
    gx = jnp.dot(x_ref[...], wih0_ref[...],
                 preferred_element_type=jnp.float32) + b0_ref[...]
    gx_scr[...] = gx.reshape(S, B, H4)

    def half_cell(g, c_prev):
        # gate layout (reordered): [ i | f | o | g ] -> one sigmoid slab + one tanh slab.
        sg = jax.nn.sigmoid(g[:, :H3])
        tg = jnp.tanh(g[:, H3:])
        c_new = sg[:, H:2 * H] * c_prev + sg[:, :H] * tg
        h_new = sg[:, 2 * H:H3] * jnp.tanh(c_new)
        return h_new, c_new

    zeros = jnp.zeros((B, H), jnp.float32)

    # t = 0, layer 0: initial LSTM state is zero, so the gates are just gx[0].
    h0, c0 = half_cell(gx_scr[0], zeros)

    def step(t, carry):
        # carry on entry: h0(t), c0(t), h1(t-1), c1(t-1)
        h0, c0, h1, c1 = carry
        lhs = jnp.concatenate([h0, h1], axis=-1).astype(jnp.bfloat16)        # (B, 2H)
        # Single fused MXU push per step; weights stream from VMEM (not hoisted).
        r = jnp.dot(lhs, wblk_ref[...], preferred_element_type=jnp.float32)  # (B, 8H)
        # Layer-1 gates at t and layer-0 gates at t+1 -- data-independent, so their
        # sigmoid/tanh slabs pipeline back-to-back on the EUP.
        h1n, c1n = half_cell(r[:, H4:] + b1_ref[...], c1)
        h0n, c0n = half_cell(r[:, :H4] + gx_scr[t + 1], c0)
        h1_scr[t] = h1n
        return (h0n, c0n, h1n, c1n)

    h0, c0, h1, c1 = lax.fori_loop(0, S - 1, step, (h0, c0, zeros, zeros),
                                   unroll=True)

    # Final timestep (t = S-1): only the layer-1 half of the fused result is needed.
    lhs = jnp.concatenate([h0, h1], axis=-1).astype(jnp.bfloat16)
    r = jnp.dot(lhs, wblk_ref[...], preferred_element_type=jnp.float32)
    h1n, _ = half_cell(r[:, H4:] + b1_ref[...], c1)
    h1_scr[S - 1] = h1n

    # ---- Epilogue: fused (ops | probs | mags) heads over the whole sequence --------
    h1_all = h1_scr[...].reshape(S * B, H)
    out_ref[...] = (jnp.dot(h1_all, wh_ref[...],
                            preferred_element_type=jnp.float32) + bh_ref[...])


def rnn_controller_forward(x, kp):
    """x: (seq_len, batch, input_size) f32; kp: output of prepare_params().

    Returns (ops, probs, mags) matching the PyTorch module's forward.
    """
    S, B, I = x.shape
    H = HIDDEN
    x_flat = x.reshape(S * B, I)   # leading-dim merge: free in XLA

    grid_spec = pltpu.PrefetchScalarGridSpec(
        num_scalar_prefetch=0,
        grid=(1,),                 # one sequential invocation; recurrence is serial
        in_specs=[
            pl.BlockSpec((S * B, I), lambda i: (0, 0)),          # x (flattened)
            pl.BlockSpec((I, 4 * H), lambda i: (0, 0)),          # Wih0 (reordered)
            pl.BlockSpec((1, 4 * H), lambda i: (0, 0)),          # b0
            pl.BlockSpec((2 * H, 8 * H), lambda i: (0, 0)),      # fused recurrent RHS (bf16)
            pl.BlockSpec((1, 4 * H), lambda i: (0, 0)),          # b1
            pl.BlockSpec((H, HEAD_PAD), lambda i: (0, 0)),       # heads weights (padded)
            pl.BlockSpec((1, HEAD_PAD), lambda i: (0, 0)),       # heads bias (padded)
        ],
        out_specs=pl.BlockSpec((S * B, HEAD_PAD), lambda i: (0, 0)),
        scratch_shapes=[
            pltpu.VMEM((S, B, 4 * H), jnp.float32),   # gx = x@Wih0 + b0
            pltpu.VMEM((S, B, H), jnp.float32),       # h1 sequence for the heads matmul
        ],
    )
    heads = pl.pallas_call(
        _fused_controller_kernel,
        out_shape=jax.ShapeDtypeStruct((S * B, HEAD_PAD), jnp.float32),
        grid_spec=grid_spec,
        compiler_params=pltpu.CompilerParams(
            dimension_semantics=("arbitrary",)),
    )(x_flat, kp["wih0"], kp["b0"], kp["wblk"], kp["b1"], kp["wh"], kp["bh"])

    heads = heads.reshape(S, B, HEAD_PAD)
    ops = heads[..., :N_OPS]
    probs = heads[..., N_OPS:N_OPS + N_PROB]
    mags = heads[..., N_OPS + N_PROB:N_HEADS]
    return ops, probs, mags


def init_params(key, input_size):
    """Raw parameters: PyTorch gate order [i,f,g,o], (in_dim, out_dim) matrices,
    biases are (b_ih + b_hh) folded into one (1, 4H) row."""
    H = HIDDEN
    ks = jax.random.split(key, 12)
    u = lambda k, shape: jax.random.uniform(k, shape, jnp.float32, -0.1, 0.1)
    return {
        "wih0": u(ks[0], (input_size, 4 * H)),
        "whh0": u(ks[1], (H, 4 * H)),
        "b0":   u(ks[2], (1, 4 * H)),
        "wih1": u(ks[3], (H, 4 * H)),
        "whh1": u(ks[4], (H, 4 * H)),
        "b1":   u(ks[5], (1, 4 * H)),
        "wop":  u(ks[6], (H, N_OPS)),
        "bop":  u(ks[7], (1, N_OPS)),
        "wpr":  u(ks[8], (H, N_PROB)),
        "bpr":  u(ks[9], (1, N_PROB)),
        "wmg":  u(ks[10], (H, N_MAG)),
        "bmg":  u(ks[11], (1, N_MAG)),
    }


def prepare_params(p):
    """One-time packing of raw params into the kernel layout (run OUTSIDE the jitted fwd).

    - gate columns [i,f,g,o] -> [i,f,o,g] so sigmoid/tanh slabs are contiguous
    - fused recurrent RHS [[Whh0, Wih1],[0, Whh1]] cast to bf16
    - heads weights/biases concatenated and zero-padded to HEAD_PAD lanes
    """
    H = HIDDEN
    perm = jnp.concatenate([jnp.arange(0, 2 * H),
                            jnp.arange(3 * H, 4 * H),
                            jnp.arange(2 * H, 3 * H)])
    re = lambda w: w[:, perm]
    wblk = jnp.concatenate([
        jnp.concatenate([re(p["whh0"]), re(p["wih1"])], axis=1),
        jnp.concatenate([jnp.zeros((H, 4 * H), jnp.float32), re(p["whh1"])], axis=1),
    ], axis=0).astype(jnp.bfloat16)
    wh = jnp.concatenate([p["wop"], p["wpr"], p["wmg"]], axis=1)
    bh = jnp.concatenate([p["bop"], p["bpr"], p["bmg"]], axis=1)
    pad = HEAD_PAD - N_HEADS
    return {
        "wih0": re(p["wih0"]),
        "b0":   re(p["b0"]),
        "wblk": wblk,
        "b1":   re(p["b1"]),
        "wh":   jnp.pad(wh, ((0, 0), (0, pad))),
        "bh":   jnp.pad(bh, ((0, 0), (0, pad))),
    }


def reference_forward(x, p):
    """Pure-JAX reference of the same 2-layer LSTM + heads (uses the RAW params)."""
    S, B, I = x.shape
    H = HIDDEN
    hp = lax.Precision.HIGHEST

    def cell(x_in, h, c, wih, whh, b):
        g = (jnp.dot(x_in, wih, precision=hp)
             + jnp.dot(h, whh, precision=hp) + b)
        i = jax.nn.sigmoid(g[:, 0 * H:1 * H])
        f = jax.nn.sigmoid(g[:, 1 * H:2 * H])
        gg = jnp.tanh(g[:, 2 * H:3 * H])
        o = jax.nn.sigmoid(g[:, 3 * H:4 * H])
        c_new = f * c + i * gg
        return o * jnp.tanh(c_new), c_new

    def step(carry, x_t):
        h0, c0, h1, c1 = carry
        h0, c0 = cell(x_t, h0, c0, p["wih0"], p["whh0"], p["b0"])
        h1, c1 = cell(h0, h1, c1, p["wih1"], p["whh1"], p["b1"])
        return (h0, c0, h1, c1), h1

    z = jnp.zeros((B, H), jnp.float32)
    _, hs = lax.scan(step, (z, z, z, z), x)
    ops = jnp.dot(hs, p["wop"], precision=hp) + p["bop"]
    probs = jnp.dot(hs, p["wpr"], precision=hp) + p["bpr"]
    mags = jnp.dot(hs, p["wmg"], precision=hp) + p["bmg"]
    return ops, probs, mags


if __name__ == "__main__":
    SEQ, BATCH, INPUT = 8, 8, N_OPS   # input_size == len(operation_space)
    key = jax.random.PRNGKey(0)
    kx, kparam = jax.random.split(key)
    x = jax.random.normal(kx, (SEQ, BATCH, INPUT), jnp.float32)

    raw_params = init_params(kparam, INPUT)
    kernel_params = prepare_params(raw_params)   # one-time prep, outside the jitted fwd

    fwd = jax.jit(rnn_controller_forward)
    ops, probs, mags = jax.block_until_ready(fwd(x, kernel_params))

    ops_r, probs_r, mags_r = reference_forward(x, raw_params)
    assert ops.shape == (SEQ, BATCH, N_OPS)
    assert probs.shape == (SEQ, BATCH, N_PROB)
    assert mags.shape == (SEQ, BATCH, N_MAG)
    # bf16 recurrent-matmul operands with f32 accumulation -> tolerance ~1e-2.
    assert jnp.allclose(ops, ops_r, atol=1e-2)
    assert jnp.allclose(probs, probs_r, atol=1e-2)
    assert jnp.allclose(mags, mags_r, atol=1e-2)

    print("KERNEL_OK")
</pallas_src>

<mosaic_0001>
module attributes {stable_mosaic.version = 11 : i64} {
  func.func @_fused_controller_kernel(%arg0: i32, %arg1: memref<64x8xf32, #tpu.memory_space<vmem>>, %arg2: memref<8x512xf32, #tpu.memory_space<vmem>>, %arg3: memref<1x512xf32, #tpu.memory_space<vmem>>, %arg4: memref<256x1024xbf16, #tpu.memory_space<vmem>>, %arg5: memref<1x512xf32, #tpu.memory_space<vmem>>, %arg6: memref<128x32xf32, #tpu.memory_space<vmem>>, %arg7: memref<1x32xf32, #tpu.memory_space<vmem>>, %arg8: memref<64x32xf32, #tpu.memory_space<vmem>>, %arg9: memref<8x8x512xf32, #tpu.memory_space<vmem>>, %arg10: memref<8x8x128xf32, #tpu.memory_space<vmem>>) attributes {dimension_semantics = [#tpu.dimension_semantics<arbitrary>], iteration_bounds = array<i64: 1>, scalar_prefetch = 0 : i64, scratch_operands = 2 : i64, tpu.core_type = #tpu.core_type<tc>, window_params = [{pipeline_mode = #tpu.pipeline_mode<synchronous>, transform_indices = @transform_0, window_bounds = array<i64: 64, 8>}, {pipeline_mode = #tpu.pipeline_mode<synchronous>, transform_indices = @transform_1, window_bounds = array<i64: 8, 512>}, {pipeline_mode = #tpu.pipeline_mode<synchronous>, transform_indices = @transform_2, window_bounds = array<i64: 1, 512>}, {pipeline_mode = #tpu.pipeline_mode<synchronous>, transform_indices = @transform_3, window_bounds = array<i64: 256, 1024>}, {pipeline_mode = #tpu.pipeline_mode<synchronous>, transform_indices = @transform_4, window_bounds = array<i64: 1, 512>}, {pipeline_mode = #tpu.pipeline_mode<synchronous>, transform_indices = @transform_5, window_bounds = array<i64: 128, 32>}, {pipeline_mode = #tpu.pipeline_mode<synchronous>, transform_indices = @transform_6, window_bounds = array<i64: 1, 32>}, {pipeline_mode = #tpu.pipeline_mode<synchronous>, transform_indices = @transform_7, window_bounds = array<i64: 64, 32>}]} {
    %c0 = arith.constant 0 : index
    %c0_0 = arith.constant 0 : index
    %0 = vector.load %arg1[%c0, %c0_0] : memref<64x8xf32, #tpu.memory_space<vmem>>, vector<64x8xf32>
    %c0_1 = arith.constant 0 : index
    %c0_2 = arith.constant 0 : index
    %1 = vector.load %arg2[%c0_1, %c0_2] : memref<8x512xf32, #tpu.memory_space<vmem>>, vector<8x512xf32>
    %cst = arith.constant dense<0.000000e+00> : vector<64x512xf32>
    %2 = tpu.matmul %0, %1, %cst {dimension_numbers = #tpu.dot_dimension_numbers<[1], [0], [0], [1], [0, 0, 1, 1], [], []>} : vector<64x8xf32>, vector<8x512xf32>, vector<64x512xf32> -> vector<64x512xf32>
    %c0_3 = arith.constant 0 : index
    %c0_4 = arith.constant 0 : index
    %3 = vector.load %arg3[%c0_3, %c0_4] : memref<1x512xf32, #tpu.memory_space<vmem>>, vector<1x512xf32>
    %4 = vector.broadcast %3 : vector<1x512xf32> to vector<64x512xf32>
    %5 = arith.addf %2, %4 : vector<64x512xf32>
    %6 = vector.shape_cast %5 : vector<64x512xf32> to vector<8x8x512xf32>
    %c0_5 = arith.constant 0 : index
    %c0_6 = arith.constant 0 : index
    %c0_7 = arith.constant 0 : index
    %7 = vector.load %arg9[%c0_5, %c0_6, %c0_7] : memref<8x8x512xf32, #tpu.memory_space<vmem>>, vector<8x8x512xf32>
    tpu.vector_store %arg9[%c0_5, %c0_6, %c0_7], %6 {strides = array<i32>} : memref<8x8x512xf32, #tpu.memory_space<vmem>>, vector<8x8x512xf32>,
    %cst_8 = arith.constant 0.000000e+00 : f32
    %8 = vector.broadcast %cst_8 : f32 to vector<8x128xf32>
    %c0_9 = arith.constant 0 : index
    %c0_10 = arith.constant 0 : index
    %c0_11 = arith.constant 0 : index
    %9 = vector.load %arg9[%c0_9, %c0_10, %c0_11] : memref<8x8x512xf32, #tpu.memory_space<vmem>>, vector<1x8x512xf32>
    %10 = vector.shape_cast %9 : vector<1x8x512xf32> to vector<8x512xf32>
    %11 = vector.extract_strided_slice %10 {offsets = [0, 0], sizes = [8, 384], strides = [1, 1]} : vector<8x512xf32> to vector<8x384xf32>
    %12 = arith.negf %11 : vector<8x384xf32>
    %13 = math.exp %12 : vector<8x384xf32>
    %cst_12 = arith.constant 1.000000e+00 : f32
    %14 = vector.broadcast %cst_12 : f32 to vector<8x384xf32>
    %15 = arith.addf %14, %13 : vector<8x384xf32>
    %16 = arith.divf %14, %15 : vector<8x384xf32>
    %17 = vector.extract_strided_slice %10 {offsets = [0, 384], sizes = [8, 128], strides = [1, 1]} : vector<8x512xf32> to vector<8x128xf32>
    %18 = math.tanh %17 : vector<8x128xf32>
    %19 = vector.extract_strided_slice %16 {offsets = [0, 128], sizes = [8, 128], strides = [1, 1]} : vector<8x384xf32> to vector<8x128xf32>
    %20 = arith.mulf %19, %8 : vector<8x128xf32>
    %21 = vector.extract_strided_slice %16 {offsets = [0, 0], sizes = [8, 128], strides = [1, 1]} : vector<8x384xf32> to vector<8x128xf32>
    %22 = arith.mulf %21, %18 : vector<8x128xf32>
    %23 = arith.addf %20, %22 : vector<8x128xf32>
    %24 = vector.extract_strided_slice %16 {offsets = [0, 256], sizes = [8, 128], strides = [1, 1]} : vector<8x384xf32> to vector<8x128xf32>
    %25 = math.tanh %23 : vector<8x128xf32>
    %26 = arith.mulf %24, %25 : vector<8x128xf32>
    %c0_i32 = arith.constant 0 : i32
    %27 = tpu.concatenate %26, %8 in 1 : vector<8x128xf32>, vector<8x128xf32> -> vector<8x256xf32>
    %28 = arith.truncf %27 : vector<8x256xf32> to vector<8x256xbf16>
    %c0_13 = arith.constant 0 : index
    %c0_14 = arith.constant 0 : index
    %29 = vector.load %arg4[%c0_13, %c0_14] : memref<256x1024xbf16, #tpu.memory_space<vmem>>, vector<256x1024xbf16>
    %cst_15 = arith.constant dense<0.000000e+00> : vector<8x1024xf32>
    %30 = tpu.matmul %28, %29, %cst_15 {dimension_numbers = #tpu.dot_dimension_numbers<[1], [0], [0], [1], [0, 0, 1, 1], [], []>} : vector<8x256xbf16>, vector<256x1024xbf16>, vector<8x1024xf32> -> vector<8x1024xf32>
    %31 = vector.extract_strided_slice %30 {offsets = [0, 512], sizes = [8, 512], strides = [1, 1]} : vector<8x1024xf32> to vector<8x512xf32>
    %c0_16 = arith.constant 0 : index
    %c0_17 = arith.constant 0 : index
    %32 = vector.load %arg5[%c0_16, %c0_17] : memref<1x512xf32, #tpu.memory_space<vmem>>, vector<1x512xf32>
    %33 = vector.broadcast %32 : vector<1x512xf32> to vector<8x512xf32>
    %34 = arith.addf %31, %33 : vector<8x512xf32>
    %35 = vector.extract_strided_slice %34 {offsets = [0, 0], sizes = [8, 384], strides = [1, 1]} : vector<8x512xf32> to vector<8x384xf32>
    %36 = arith.negf %35 : vector<8x384xf32>
    %37 = math.exp %36 : vector<8x384xf32>
    %cst_18 = arith.constant 1.000000e+00 : f32
    %38 = vector.broadcast %cst_18 : f32 to vector<8x384xf32>
    %39 = arith.addf %38, %37 : vector<8x384xf32>
    %40 = arith.divf %38, %39 : vector<8x384xf32>
    %41 = vector.extract_strided_slice %34 {offsets = [0, 384], sizes = [8, 128], strides = [1, 1]} : vector<8x512xf32> to vector<8x128xf32>
    %42 = math.tanh %41 : vector<8x128xf32>
    %43 = vector.extract_strided_slice %40 {offsets = [0, 128], sizes = [8, 128], strides = [1, 1]} : vector<8x384xf32> to vector<8x128xf32>
    %44 = arith.mulf %43, %8 : vector<8x128xf32>
    %45 = vector.extract_strided_slice %40 {offsets = [0, 0], sizes = [8, 128], strides = [1, 1]} : vector<8x384xf32> to vector<8x128xf32>
    %46 = arith.mulf %45, %42 : vector<8x128xf32>
    %47 = arith.addf %44, %46 : vector<8x128xf32>
    %48 = vector.extract_strided_slice %40 {offsets = [0, 256], sizes = [8, 128], strides = [1, 1]} : vector<8x384xf32> to vector<8x128xf32>
    %49 = math.tanh %47 : vector<8x128xf32>
    %50 = arith.mulf %48, %49 : vector<8x128xf32>
    %51 = vector.extract_strided_slice %30 {offsets = [0, 0], sizes = [8, 512], strides = [1, 1]} : vector<8x1024xf32> to vector<8x512xf32>
    %c1_i32 = arith.constant 1 : i32
    %52 = arith.addi %c0_i32, %c1_i32 : i32
    %53 = arith.index_cast %52 : i32 to index
    %c0_19 = arith.constant 0 : index
    %c0_20 = arith.constant 0 : index
    %54 = vector.load %arg9[%53, %c0_19, %c0_20] : memref<8x8x512xf32, #tpu.memory_space<vmem>>, vector<1x8x512xf32>
    %55 = vector.shape_cast %54 : vector<1x8x512xf32> to vector<8x512xf32>
    %56 = arith.addf %51, %55 : vector<8x512xf32>
    %57 = vector.extract_strided_slice %56 {offsets = [0, 0], sizes = [8, 384], strides = [1, 1]} : vector<8x512xf32> to vector<8x384xf32>
    %58 = arith.negf %57 : vector<8x384xf32>
    %59 = math.exp %58 : vector<8x384xf32>
    %cst_21 = arith.constant 1.000000e+00 : f32
    %60 = vector.broadcast %cst_21 : f32 to vector<8x384xf32>
    %61 = arith.addf %60, %59 : vector<8x384xf32>
    %62 = arith.divf %60, %61 : vector<8x384xf32>
    %63 = vector.extract_strided_slice %56 {offsets = [0, 384], sizes = [8, 128], strides = [1, 1]} : vector<8x512xf32> to vector<8x128xf32>
    %64 = math.tanh %63 : vector<8x128xf32>
    %65 = vector.extract_strided_slice %62 {offsets = [0, 128], sizes = [8, 128], strides = [1, 1]} : vector<8x384xf32> to vector<8x128xf32>
    %66 = arith.mulf %65, %23 : vector<8x128xf32>
    %67 = vector.extract_strided_slice %62 {offsets = [0, 0], sizes = [8, 128], strides = [1, 1]} : vector<8x384xf32> to vector<8x128xf32>
    %68 = arith.mulf %67, %64 : vector<8x128xf32>
    %69 = arith.addf %66, %68 : vector<8x128xf32>
    %70 = vector.extract_strided_slice %62 {offsets = [0, 256], sizes = [8, 128], strides = [1, 1]} : vector<8x384xf32> to vector<8x128xf32>
    %71 = math.tanh %69 : vector<8x128xf32>
    %72 = arith.mulf %70, %71 : vector<8x128xf32>
    %73 = arith.index_cast %c0_i32 : i32 to index
    %c0_22 = arith.constant 0 : index
    %c0_23 = arith.constant 0 : index
    %74 = vector.load %arg10[%73, %c0_22, %c0_23] : memref<8x8x128xf32, #tpu.memory_space<vmem>>, vector<1x8x128xf32>
    %75 = vector.shape_cast %74 : vector<1x8x128xf32> to vector<8x128xf32>
    %76 = vector.shape_cast %50 : vector<8x128xf32> to vector<1x8x128xf32>
    tpu.vector_store %arg10[%73, %c0_22, %c0_23], %76 {strides = array<i32>} : memref<8x8x128xf32, #tpu.memory_space<vmem>>, vector<1x8x128xf32>,
    %c1_i32_24 = arith.constant 1 : i32
    %77 = tpu.concatenate %72, %50 in 1 : vector<8x128xf32>, vector<8x128xf32> -> vector<8x256xf32>
    %78 = arith.truncf %77 : vector<8x256xf32> to vector<8x256xbf16>
    %c0_25 = arith.constant 0 : index
    %c0_26 = arith.constant 0 : index
    %79 = vector.load %arg4[%c0_25, %c0_26] : memref<256x1024xbf16, #tpu.memory_space<vmem>>, vector<256x1024xbf16>
    %cst_27 = arith.constant dense<0.000000e+00> : vector<8x1024xf32>
    %80 = tpu.matmul %78, %79, %cst_27 {dimension_numbers = #tpu.dot_dimension_numbers<[1], [0], [0], [1], [0, 0, 1, 1], [], []>} : vector<8x256xbf16>, vector<256x1024xbf16>, vector<8x1024xf32> -> vector<8x1024xf32>
    %81 = vector.extract_strided_slice %80 {offsets = [0, 512], sizes = [8, 512], strides = [1, 1]} : vector<8x1024xf32> to vector<8x512xf32>
    %c0_28 = arith.constant 0 : index
    %c0_29 = arith.constant 0 : index
    %82 = vector.load %arg5[%c0_28, %c0_29] : memref<1x512xf32, #tpu.memory_space<vmem>>, vector<1x512xf32>
    %83 = vector.broadcast %82 : vector<1x512xf32> to vector<8x512xf32>
    %84 = arith.addf %81, %83 : vector<8x512xf32>
    %85 = vector.extract_strided_slice %84 {offsets = [0, 0], sizes = [8, 384], strides = [1, 1]} : vector<8x512xf32> to vector<8x384xf32>
    %86 = arith.negf %85 : vector<8x384xf32>
    %87 = math.exp %86 : vector<8x384xf32>
    %cst_30 = arith.constant 1.000000e+00 : f32
    %88 = vector.broadcast %cst_30 : f32 to vector<8x384xf32>
    %89 = arith.addf %88, %87 : vector<8x384xf32>
    %90 = arith.divf %88, %89 : vector<8x384xf32>
    %91 = vector.extract_strided_slice %84 {offsets = [0, 384], sizes = [8, 128], strides = [1, 1]} : vector<8x512xf32> to vector<8x128xf32>
    %92 = math.tanh %91 : vector<8x128xf32>
    %93 = vector.extract_strided_slice %90 {offsets = [0, 128], sizes = [8, 128], strides = [1, 1]} : vector<8x384xf32> to vector<8x128xf32>
    %94 = arith.mulf %93, %47 : vector<8x128xf32>
    %95 = vector.extract_strided_slice %90 {offsets = [0, 0], sizes = [8, 128], strides = [1, 1]} : vector<8x384xf32> to vector<8x128xf32>
    %96 = arith.mulf %95, %92 : vector<8x128xf32>
    %97 = arith.addf %94, %96 : vector<8x128xf32>
    %98 = vector.extract_strided_slice %90 {offsets = [0, 256], sizes = [8, 128], strides = [1, 1]} : vector<8x384xf32> to vector<8x128xf32>
    %99 = math.tanh %97 : vector<8x128xf32>
    %100 = arith.mulf %98, %99 : vector<8x128xf32>
    %101 = vector.extract_strided_slice %80 {offsets = [0, 0], sizes = [8, 512], strides = [1, 1]} : vector<8x1024xf32> to vector<8x512xf32>
    %c1_i32_31 = arith.constant 1 : i32
    %102 = arith.addi %c1_i32_24, %c1_i32_31 : i32
    %103 = arith.index_cast %102 : i32 to index
    %c0_32 = arith.constant 0 : index
    %c0_33 = arith.constant 0 : index
    %104 = vector.load %arg9[%103, %c0_32, %c0_33] : memref<8x8x512xf32, #tpu.memory_space<vmem>>, vector<1x8x512xf32>
    %105 = vector.shape_cast %104 : vector<1x8x512xf32> to vector<8x512xf32>
    %106 = arith.addf %101, %105 : vector<8x512xf32>
    %107 = vector.extract_strided_slice %106 {offsets = [0, 0], sizes = [8, 384], strides = [1, 1]} : vector<8x512xf32> to vector<8x384xf32>
    %108 = arith.negf %107 : vector<8x384xf32>
    %109 = math.exp %108 : vector<8x384xf32>
    %cst_34 = arith.constant 1.000000e+00 : f32
    %110 = vector.broadcast %cst_34 : f32 to vector<8x384xf32>
    %111 = arith.addf %110, %109 : vector<8x384xf32>
    %112 = arith.divf %110, %111 : vector<8x384xf32>
    %113 = vector.extract_strided_slice %106 {offsets = [0, 384], sizes = [8, 128], strides = [1, 1]} : vector<8x512xf32> to vector<8x128xf32>
    %114 = math.tanh %113 : vector<8x128xf32>
    %115 = vector.extract_strided_slice %112 {offsets = [0, 128], sizes = [8, 128], strides = [1, 1]} : vector<8x384xf32> to vector<8x128xf32>
    %116 = arith.mulf %115, %69 : vector<8x128xf32>
    %117 = vector.extract_strided_slice %112 {offsets = [0, 0], sizes = [8, 128], strides = [1, 1]} : vector<8x384xf32> to vector<8x128xf32>
    %118 = arith.mulf %117, %114 : vector<8x128xf32>
    %119 = arith.addf %116, %118 : vector<8x128xf32>
    %120 = vector.extract_strided_slice %112 {offsets = [0, 256], sizes = [8, 128], strides = [1, 1]} : vector<8x384xf32> to vector<8x128xf32>
    %121 = math.tanh %119 : vector<8x128xf32>
    %122 = arith.mulf %120, %121 : vector<8x128xf32>
    %123 = arith.index_cast %c1_i32_24 : i32 to index
    %c0_35 = arith.constant 0 : index
    %c0_36 = arith.constant 0 : index
    %124 = vector.load %arg10[%123, %c0_35, %c0_36] : memref<8x8x128xf32, #tpu.memory_space<vmem>>, vector<1x8x128xf32>
    %125 = vector.shape_cast %124 : vector<1x8x128xf32> to vector<8x128xf32>
    %126 = vector.shape_cast %100 : vector<8x128xf32> to vector<1x8x128xf32>
    tpu.vector_store %arg10[%123, %c0_35, %c0_36], %126 {strides = array<i32>} : memref<8x8x128xf32, #tpu.memory_space<vmem>>, vector<1x8x128xf32>,
    %c2_i32 = arith.constant 2 : i32
    %127 = tpu.concatenate %122, %100 in 1 : vector<8x128xf32>, vector<8x128xf32> -> vector<8x256xf32>
    %128 = arith.truncf %127 : vector<8x256xf32> to vector<8x256xbf16>
    %c0_37 = arith.constant 0 : index
    %c0_38 = arith.constant 0 : index
    %129 = vector.load %arg4[%c0_37, %c0_38] : memref<256x1024xbf16, #tpu.memory_space<vmem>>, vector<256x1024xbf16>
    %cst_39 = arith.constant dense<0.000000e+00> : vector<8x1024xf32>
    %130 = tpu.matmul %128, %129, %cst_39 {dimension_numbers = #tpu.dot_dimension_numbers<[1], [0], [0], [1], [0, 0, 1, 1], [], []>} : vector<8x256xbf16>, vector<256x1024xbf16>, vector<8x1024xf32> -> vector<8x1024xf32>
    %131 = vector.extract_strided_slice %130 {offsets = [0, 512], sizes = [8, 512], strides = [1, 1]} : vector<8x1024xf32> to vector<8x512xf32>
    %c0_40 = arith.constant 0 : index
    %c0_41 = arith.constant 0 : index
    %132 = vector.load %arg5[%c0_40, %c0_41] : memref<1x512xf32, #tpu.memory_space<vmem>>, vector<1x512xf32>
    %133 = vector.broadcast %132 : vector<1x512xf32> to vector<8x512xf32>
    %134 = arith.addf %131, %133 : vector<8x512xf32>
    %135 = vector.extract_strided_slice %134 {offsets = [0, 0], sizes = [8, 384], strides = [1, 1]} : vector<8x512xf32> to vector<8x384xf32>
    %136 = arith.negf %135 : vector<8x384xf32>
    %137 = math.exp %136 : vector<8x384xf32>
    %cst_42 = arith.constant 1.000000e+00 : f32
    %138 = vector.broadcast %cst_42 : f32 to vector<8x384xf32>
    %139 = arith.addf %138, %137 : vector<8x384xf32>
    %140 = arith.divf %138, %139 : vector<8x384xf32>
    %141 = vector.extract_strided_slice %134 {offsets = [0, 384], sizes = [8, 128], strides = [1, 1]} : vector<8x512xf32> to vector<8x128xf32>
    %142 = math.tanh %141 : vector<8x128xf32>
    %143 = vector.extract_strided_slice %140 {offsets = [0, 128], sizes = [8, 128], strides = [1, 1]} : vector<8x384xf32> to vector<8x128xf32>
    %144 = arith.mulf %143, %97 : vector<8x128xf32>
    %145 = vector.extract_strided_slice %140 {offsets = [0, 0], sizes = [8, 128], strides = [1, 1]} : vector<8x384xf32> to vector<8x128xf32>
    %146 = arith.mulf %145, %142 : vector<8x128xf32>
    %147 = arith.addf %144, %146 : vector<8x128xf32>
    %148 = vector.extract_strided_slice %140 {offsets = [0, 256], sizes = [8, 128], strides = [1, 1]} : vector<8x384xf32> to vector<8x128xf32>
    %149 = math.tanh %147 : vector<8x128xf32>
    %150 = arith.mulf %148, %149 : vector<8x128xf32>
    %151 = vector.extract_strided_slice %130 {offsets = [0, 0], sizes = [8, 512], strides = [1, 1]} : vector<8x1024xf32> to vector<8x512xf32>
    %c1_i32_43 = arith.constant 1 : i32
    %152 = arith.addi %c2_i32, %c1_i32_43 : i32
    %153 = arith.index_cast %152 : i32 to index
    %c0_44 = arith.constant 0 : index
    %c0_45 = arith.constant 0 : index
    %154 = vector.load %arg9[%153, %c0_44, %c0_45] : memref<8x8x512xf32, #tpu.memory_space<vmem>>, vector<1x8x512xf32>
    %155 = vector.shape_cast %154 : vector<1x8x512xf32> to vector<8x512xf32>
    %156 = arith.addf %151, %155 : vector<8x512xf32>
    %157 = vector.extract_strided_slice %156 {offsets = [0, 0], sizes = [8, 384], strides = [1, 1]} : vector<8x512xf32> to vector<8x384xf32>
    %158 = arith.negf %157 : vector<8x384xf32>
    %159 = math.exp %158 : vector<8x384xf32>
    %cst_46 = arith.constant 1.000000e+00 : f32
    %160 = vector.broadcast %cst_46 : f32 to vector<8x384xf32>
    %161 = arith.addf %160, %159 : vector<8x384xf32>
    %162 = arith.divf %160, %161 : vector<8x384xf32>
    %163 = vector.extract_strided_slice %156 {offsets = [0, 384], sizes = [8, 128], strides = [1, 1]} : vector<8x512xf32> to vector<8x128xf32>
    %164 = math.tanh %163 : vector<8x128xf32>
    %165 = vector.extract_strided_slice %162 {offsets = [0, 128], sizes = [8, 128], strides = [1, 1]} : vector<8x384xf32> to vector<8x128xf32>
    %166 = arith.mulf %165, %119 : vector<8x128xf32>
    %167 = vector.extract_strided_slice %162 {offsets = [0, 0], sizes = [8, 128], strides = [1, 1]} : vector<8x384xf32> to vector<8x128xf32>
    %168 = arith.mulf %167, %164 : vector<8x128xf32>
    %169 = arith.addf %166, %168 : vector<8x128xf32>
    %170 = vector.extract_strided_slice %162 {offsets = [0, 256], sizes = [8, 128], strides = [1, 1]} : vector<8x384xf32> to vector<8x128xf32>
    %171 = math.tanh %169 : vector<8x128xf32>
    %172 = arith.mulf %170, %171 : vector<8x128xf32>
    %173 = arith.index_cast %c2_i32 : i32 to index
    %c0_47 = arith.constant 0 : index
    %c0_48 = arith.constant 0 : index
    %174 = vector.load %arg10[%173, %c0_47, %c0_48] : memref<8x8x128xf32, #tpu.memory_space<vmem>>, vector<1x8x128xf32>
    %175 = vector.shape_cast %174 : vector<1x8x128xf32> to vector<8x128xf32>
    %176 = vector.shape_cast %150 : vector<8x128xf32> to vector<1x8x128xf32>
    tpu.vector_store %arg10[%173, %c0_47, %c0_48], %176 {strides = array<i32>} : memref<8x8x128xf32, #tpu.memory_space<vmem>>, vector<1x8x128xf32>,
    %c3_i32 = arith.constant 3 : i32
    %177 = tpu.concatenate %172, %150 in 1 : vector<8x128xf32>, vector<8x128xf32> -> vector<8x256xf32>
    %178 = arith.truncf %177 : vector<8x256xf32> to vector<8x256xbf16>
    %c0_49 = arith.constant 0 : index
    %c0_50 = arith.constant 0 : index
    %179 = vector.load %arg4[%c0_49, %c0_50] : memref<256x1024xbf16, #tpu.memory_space<vmem>>, vector<256x1024xbf16>
    %cst_51 = arith.constant dense<0.000000e+00> : vector<8x1024xf32>
    %180 = tpu.matmul %178, %179, %cst_51 {dimension_numbers = #tpu.dot_dimension_numbers<[1], [0], [0], [1], [0, 0, 1, 1], [], []>} : vector<8x256xbf16>, vector<256x1024xbf16>, vector<8x1024xf32> -> vector<8x1024xf32>
    %181 = vector.extract_strided_slice %180 {offsets = [0, 512], sizes = [8, 512], strides = [1, 1]} : vector<8x1024xf32> to vector<8x512xf32>
    %c0_52 = arith.constant 0 : index
    %c0_53 = arith.constant 0 : index
    %182 = vector.load %arg5[%c0_52, %c0_53] : memref<1x512xf32, #tpu.memory_space<vmem>>, vector<1x512xf32>
    %183 = vector.broadcast %182 : vector<1x512xf32> to vector<8x512xf32>
    %184 = arith.addf %181, %183 : vector<8x512xf32>
    %185 = vector.extract_strided_slice %184 {offsets = [0, 0], sizes = [8, 384], strides = [1, 1]} : vector<8x512xf32> to vector<8x384xf32>
    %186 = arith.negf %185 : vector<8x384xf32>
    %187 = math.exp %186 : vector<8x384xf32>
    %cst_54 = arith.constant 1.000000e+00 : f32
    %188 = vector.broadcast %cst_54 : f32 to vector<8x384xf32>
    %189 = arith.addf %188, %187 : vector<8x384xf32>
    %190 = arith.divf %188, %189 : vector<8x384xf32>
    %191 = vector.extract_strided_slice %184 {offsets = [0, 384], sizes = [8, 128], strides = [1, 1]} : vector<8x512xf32> to vector<8x128xf32>
    %192 = math.tanh %191 : vector<8x128xf32>
    %193 = vector.extract_strided_slice %190 {offsets = [0, 128], sizes = [8, 128], strides = [1, 1]} : vector<8x384xf32> to vector<8x128xf32>
    %194 = arith.mulf %193, %147 : vector<8x128xf32>
    %195 = vector.extract_strided_slice %190 {offsets = [0, 0], sizes = [8, 128], strides = [1, 1]} : vector<8x384xf32> to vector<8x128xf32>
    %196 = arith.mulf %195, %192 : vector<8x128xf32>
    %197 = arith.addf %194, %196 : vector<8x128xf32>
    %198 = vector.extract_strided_slice %190 {offsets = [0, 256], sizes = [8, 128], strides = [1, 1]} : vector<8x384xf32> to vector<8x128xf32>
    %199 = math.tanh %197 : vector<8x128xf32>
    %200 = arith.mulf %198, %199 : vector<8x128xf32>
    %201 = vector.extract_strided_slice %180 {offsets = [0, 0], sizes = [8, 512], strides = [1, 1]} : vector<8x1024xf32> to vector<8x512xf32>
    %c1_i32_55 = arith.constant 1 : i32
    %202 = arith.addi %c3_i32, %c1_i32_55 : i32
    %203 = arith.index_cast %202 : i32 to index
    %c0_56 = arith.constant 0 : index
    %c0_57 = arith.constant 0 : index
    %204 = vector.load %arg9[%203, %c0_56, %c0_57] : memref<8x8x512xf32, #tpu.memory_space<vmem>>, vector<1x8x512xf32>
    %205 = vector.shape_cast %204 : vector<1x8x512xf32> to vector<8x512xf32>
    %206 = arith.addf %201, %205 : vector<8x512xf32>
    %207 = vector.extract_strided_slice %206 {offsets = [0, 0], sizes = [8, 384], strides = [1, 1]} : vector<8x512xf32> to vector<8x384xf32>
    %208 = arith.negf %207 : vector<8x384xf32>
    %209 = math.exp %208 : vector<8x384xf32>
    %cst_58 = arith.constant 1.000000e+00 : f32
    %210 = vector.broadcast %cst_58 : f32 to vector<8x384xf32>
    %211 = arith.addf %210, %209 : vector<8x384xf32>
    %212 = arith.divf %210, %211 : vector<8x384xf32>
    %213 = vector.extract_strided_slice %206 {offsets = [0, 384], sizes = [8, 128], strides = [1, 1]} : vector<8x512xf32> to vector<8x128xf32>
    %214 = math.tanh %213 : vector<8x128xf32>
    %215 = vector.extract_strided_slice %212 {offsets = [0, 128], sizes = [8, 128], strides = [1, 1]} : vector<8x384xf32> to vector<8x128xf32>
    %216 = arith.mulf %215, %169 : vector<8x128xf32>
    %217 = vector.extract_strided_slice %212 {offsets = [0, 0], sizes = [8, 128], strides = [1, 1]} : vector<8x384xf32> to vector<8x128xf32>
    %218 = arith.mulf %217, %214 : vector<8x128xf32>
    %219 = arith.addf %216, %218 : vector<8x128xf32>
    %220 = vector.extract_strided_slice %212 {offsets = [0, 256], sizes = [8, 128], strides = [1, 1]} : vector<8x384xf32> to vector<8x128xf32>
    %221 = math.tanh %219 : vector<8x128xf32>
    %222 = arith.mulf %220, %221 : vector<8x128xf32>
    %223 = arith.index_cast %c3_i32 : i32 to index
    %c0_59 = arith.constant 0 : index
    %c0_60 = arith.constant 0 : index
    %224 = vector.load %arg10[%223, %c0_59, %c0_60] : memref<8x8x128xf32, #tpu.memory_space<vmem>>, vector<1x8x128xf32>
    %225 = vector.shape_cast %224 : vector<1x8x128xf32> to vector<8x128xf32>
    %226 = vector.shape_cast %200 : vector<8x128xf32> to vector<1x8x128xf32>
    tpu.vector_store %arg10[%223, %c0_59, %c0_60], %226 {strides = array<i32>} : memref<8x8x128xf32, #tpu.memory_space<vmem>>, vector<1x8x128xf32>,
    %c4_i32 = arith.constant 4 : i32
    %227 = tpu.concatenate %222, %200 in 1 : vector<8x128xf32>, vector<8x128xf32> -> vector<8x256xf32>
    %228 = arith.truncf %227 : vector<8x256xf32> to vector<8x256xbf16>
    %c0_61 = arith.constant 0 : index
    %c0_62 = arith.constant 0 : index
    %229 = vector.load %arg4[%c0_61, %c0_62] : memref<256x1024xbf16, #tpu.memory_space<vmem>>, vector<256x1024xbf16>
    %cst_63 = arith.constant dense<0.000000e+00> : vector<8x1024xf32>
    %230 = tpu.matmul %228, %229, %cst_63 {dimension_numbers = #tpu.dot_dimension_numbers<[1], [0], [0], [1], [0, 0, 1, 1], [], []>} : vector<8x256xbf16>, vector<256x1024xbf16>, vector<8x1024xf32> -> vector<8x1024xf32>
    %231 = vector.extract_strided_slice %230 {offsets = [0, 512], sizes = [8, 512], strides = [1, 1]} : vector<8x1024xf32> to vector<8x512xf32>
    %c0_64 = arith.constant 0 : index
    %c0_65 = arith.constant 0 : index
    %232 = vector.load %arg5[%c0_64, %c0_65] : memref<1x512xf32, #tpu.memory_space<vmem>>, vector<1x512xf32>
    %233 = vector.broadcast %232 : vector<1x512xf32> to vector<8x512xf32>
    %234 = arith.addf %231, %233 : vector<8x512xf32>
    %235 = vector.extract_strided_slice %234 {offsets = [0, 0], sizes = [8, 384], strides = [1, 1]} : vector<8x512xf32> to vector<8x384xf32>
    %236 = arith.negf %235 : vector<8x384xf32>
    %237 = math.exp %236 : vector<8x384xf32>
    %cst_66 = arith.constant 1.000000e+00 : f32
    %238 = vector.broadcast %cst_66 : f32 to vector<8x384xf32>
    %239 = arith.addf %238, %237 : vector<8x384xf32>
    %240 = arith.divf %238, %239 : vector<8x384xf32>
    %241 = vector.extract_strided_slice %234 {offsets = [0, 384], sizes = [8, 128], strides = [1, 1]} : vector<8x512xf32> to vector<8x128xf32>
    %242 = math.tanh %241 : vector<8x128xf32>
    %243 = vector.extract_strided_slice %240 {offsets = [0, 128], sizes = [8, 128], strides = [1, 1]} : vector<8x384xf32> to vector<8x128xf32>
    %244 = arith.mulf %243, %197 : vector<8x128xf32>
    %245 = vector.extract_strided_slice %240 {offsets = [0, 0], sizes = [8, 128], strides = [1, 1]} : vector<8x384xf32> to vector<8x128xf32>
    %246 = arith.mulf %245, %242 : vector<8x128xf32>
    %247 = arith.addf %244, %246 : vector<8x128xf32>
    %248 = vector.extract_strided_slice %240 {offsets = [0, 256], sizes = [8, 128], strides = [1, 1]} : vector<8x384xf32> to vector<8x128xf32>
    %249 = math.tanh %247 : vector<8x128xf32>
    %250 = arith.mulf %248, %249 : vector<8x128xf32>
    %251 = vector.extract_strided_slice %230 {offsets = [0, 0], sizes = [8, 512], strides = [1, 1]} : vector<8x1024xf32> to vector<8x512xf32>
    %c1_i32_67 = arith.constant 1 : i32
    %252 = arith.addi %c4_i32, %c1_i32_67 : i32
    %253 = arith.index_cast %252 : i32 to index
    %c0_68 = arith.constant 0 : index
    %c0_69 = arith.constant 0 : index
    %254 = vector.load %arg9[%253, %c0_68, %c0_69] : memref<8x8x512xf32, #tpu.memory_space<vmem>>, vector<1x8x512xf32>
    %255 = vector.shape_cast %254 : vector<1x8x512xf32> to vector<8x512xf32>
    %256 = arith.addf %251, %255 : vector<8x512xf32>
    %257 = vector.extract_strided_slice %256 {offsets = [0, 0], sizes = [8, 384], strides = [1, 1]} : vector<8x512xf32> to vector<8x384xf32>
    %258 = arith.negf %257 : vector<8x384xf32>
    %259 = math.exp %258 : vector<8x384xf32>
    %cst_70 = arith.constant 1.000000e+00 : f32
    %260 = vector.broadcast %cst_70 : f32 to vector<8x384xf32>
    %261 = arith.addf %260, %259 : vector<8x384xf32>
    %262 = arith.divf %260, %261 : vector<8x384xf32>
    %263 = vector.extract_strided_slice %256 {offsets = [0, 384], sizes = [8, 128], strides = [1, 1]} : vector<8x512xf32> to vector<8x128xf32>
    %264 = math.tanh %263 : vector<8x128xf32>
    %265 = vector.extract_strided_slice %262 {offsets = [0, 128], sizes = [8, 128], strides = [1, 1]} : vector<8x384xf32> to vector<8x128xf32>
    %266 = arith.mulf %265, %219 : vector<8x128xf32>
    %267 = vector.extract_strided_slice %262 {offsets = [0, 0], sizes = [8, 128], strides = [1, 1]} : vector<8x384xf32> to vector<8x128xf32>
    %268 = arith.mulf %267, %264 : vector<8x128xf32>
    %269 = arith.addf %266, %268 : vector<8x128xf32>
    %270 = vector.extract_strided_slice %262 {offsets = [0, 256], sizes = [8, 128], strides = [1, 1]} : vector<8x384xf32> to vector<8x128xf32>
    %271 = math.tanh %269 : vector<8x128xf32>
    %272 = arith.mulf %270, %271 : vector<8x128xf32>
    %273 = arith.index_cast %c4_i32 : i32 to index
    %c0_71 = arith.constant 0 : index
    %c0_72 = arith.constant 0 : index
    %274 = vector.load %arg10[%273, %c0_71, %c0_72] : memref<8x8x128xf32, #tpu.memory_space<vmem>>, vector<1x8x128xf32>
    %275 = vector.shape_cast %274 : vector<1x8x128xf32> to vector<8x128xf32>
    %276 = vector.shape_cast %250 : vector<8x128xf32> to vector<1x8x128xf32>
    tpu.vector_store %arg10[%273, %c0_71, %c0_72], %276 {strides = array<i32>} : memref<8x8x128xf32, #tpu.memory_space<vmem>>, vector<1x8x128xf32>,
    %c5_i32 = arith.constant 5 : i32
    %277 = tpu.concatenate %272, %250 in 1 : vector<8x128xf32>, vector<8x128xf32> -> vector<8x256xf32>
    %278 = arith.truncf %277 : vector<8x256xf32> to vector<8x256xbf16>
    %c0_73 = arith.constant 0 : index
    %c0_74 = arith.constant 0 : index
    %279 = vector.load %arg4[%c0_73, %c0_74] : memref<256x1024xbf16, #tpu.memory_space<vmem>>, vector<256x1024xbf16>
    %cst_75 = arith.constant dense<0.000000e+00> : vector<8x1024xf32>
    %280 = tpu.matmul %278, %279, %cst_75 {dimension_numbers = #tpu.dot_dimension_numbers<[1], [0], [0], [1], [0, 0, 1, 1], [], []>} : vector<8x256xbf16>, vector<256x1024xbf16>, vector<8x1024xf32> -> vector<8x1024xf32>
    %281 = vector.extract_strided_slice %280 {offsets = [0, 512], sizes = [8, 512], strides = [1, 1]} : vector<8x1024xf32> to vector<8x512xf32>
    %c0_76 = arith.constant 0 : index
    %c0_77 = arith.constant 0 : index
    %282 = vector.load %arg5[%c0_76, %c0_77] : memref<1x512xf32, #tpu.memory_space<vmem>>, vector<1x512xf32>
    %283 = vector.broadcast %282 : vector<1x512xf32> to vector<8x512xf32>
    %284 = arith.addf %281, %283 : vector<8x512xf32>
    %285 = vector.extract_strided_slice %284 {offsets = [0, 0], sizes = [8, 384], strides = [1, 1]} : vector<8x512xf32> to vector<8x384xf32>
    %286 = arith.negf %285 : vector<8x384xf32>
    %287 = math.exp %286 : vector<8x384xf32>
    %cst_78 = arith.constant 1.000000e+00 : f32
    %288 = vector.broadcast %cst_78 : f32 to vector<8x384xf32>
    %289 = arith.addf %288, %287 : vector<8x384xf32>
    %290 = arith.divf %288, %289 : vector<8x384xf32>
    %291 = vector.extract_strided_slice %284 {offsets = [0, 384], sizes = [8, 128], strides = [1, 1]} : vector<8x512xf32> to vector<8x128xf32>
    %292 = math.tanh %291 : vector<8x128xf32>
    %293 = vector.extract_strided_slice %290 {offsets = [0, 128], sizes = [8, 128], strides = [1, 1]} : vector<8x384xf32> to vector<8x128xf32>
    %294 = arith.mulf %293, %247 : vector<8x128xf32>
    %295 = vector.extract_strided_slice %290 {offsets = [0, 0], sizes = [8, 128], strides = [1, 1]} : vector<8x384xf32> to vector<8x128xf32>
    %296 = arith.mulf %295, %292 : vector<8x128xf32>
    %297 = arith.addf %294, %296 : vector<8x128xf32>
    %298 = vector.extract_strided_slice %290 {offsets = [0, 256], sizes = [8, 128], strides = [1, 1]} : vector<8x384xf32> to vector<8x128xf32>
    %299 = math.tanh %297 : vector<8x128xf32>
    %300 = arith.mulf %298, %299 : vector<8x128xf32>
    %301 = vector.extract_strided_slice %280 {offsets = [0, 0], sizes = [8, 512], strides = [1, 1]} : vector<8x1024xf32> to vector<8x512xf32>
    %c1_i32_79 = arith.constant 1 : i32
    %302 = arith.addi %c5_i32, %c1_i32_79 : i32
    %303 = arith.index_cast %302 : i32 to index
    %c0_80 = arith.constant 0 : index
    %c0_81 = arith.constant 0 : index
    %304 = vector.load %arg9[%303, %c0_80, %c0_81] : memref<8x8x512xf32, #tpu.memory_space<vmem>>, vector<1x8x512xf32>
    %305 = vector.shape_cast %304 : vector<1x8x512xf32> to vector<8x512xf32>
    %306 = arith.addf %301, %305 : vector<8x512xf32>
    %307 = vector.extract_strided_slice %306 {offsets = [0, 0], sizes = [8, 384], strides = [1, 1]} : vector<8x512xf32> to vector<8x384xf32>
    %308 = arith.negf %307 : vector<8x384xf32>
    %309 = math.exp %308 : vector<8x384xf32>
    %cst_82 = arith.constant 1.000000e+00 : f32
    %310 = vector.broadcast %cst_82 : f32 to vector<8x384xf32>
    %311 = arith.addf %310, %309 : vector<8x384xf32>
    %312 = arith.divf %310, %311 : vector<8x384xf32>
    %313 = vector.extract_strided_slice %306 {offsets = [0, 384], sizes = [8, 128], strides = [1, 1]} : vector<8x512xf32> to vector<8x128xf32>
    %314 = math.tanh %313 : vector<8x128xf32>
    %315 = vector.extract_strided_slice %312 {offsets = [0, 128], sizes = [8, 128], strides = [1, 1]} : vector<8x384xf32> to vector<8x128xf32>
    %316 = arith.mulf %315, %269 : vector<8x128xf32>
    %317 = vector.extract_strided_slice %312 {offsets = [0, 0], sizes = [8, 128], strides = [1, 1]} : vector<8x384xf32> to vector<8x128xf32>
    %318 = arith.mulf %317, %314 : vector<8x128xf32>
    %319 = arith.addf %316, %318 : vector<8x128xf32>
    %320 = vector.extract_strided_slice %312 {offsets = [0, 256], sizes = [8, 128], strides = [1, 1]} : vector<8x384xf32> to vector<8x128xf32>
    %321 = math.tanh %319 : vector<8x128xf32>
    %322 = arith.mulf %320, %321 : vector<8x128xf32>
    %323 = arith.index_cast %c5_i32 : i32 to index
    %c0_83 = arith.constant 0 : index
    %c0_84 = arith.constant 0 : index
    %324 = vector.load %arg10[%323, %c0_83, %c0_84] : memref<8x8x128xf32, #tpu.memory_space<vmem>>, vector<1x8x128xf32>
    %325 = vector.shape_cast %324 : vector<1x8x128xf32> to vector<8x128xf32>
    %326 = vector.shape_cast %300 : vector<8x128xf32> to vector<1x8x128xf32>
    tpu.vector_store %arg10[%323, %c0_83, %c0_84], %326 {strides = array<i32>} : memref<8x8x128xf32, #tpu.memory_space<vmem>>, vector<1x8x128xf32>,
    %c6_i32 = arith.constant 6 : i32
    %327 = tpu.concatenate %322, %300 in 1 : vector<8x128xf32>, vector<8x128xf32> -> vector<8x256xf32>
    %328 = arith.truncf %327 : vector<8x256xf32> to vector<8x256xbf16>
    %c0_85 = arith.constant 0 : index
    %c0_86 = arith.constant 0 : index
    %329 = vector.load %arg4[%c0_85, %c0_86] : memref<256x1024xbf16, #tpu.memory_space<vmem>>, vector<256x1024xbf16>
    %cst_87 = arith.constant dense<0.000000e+00> : vector<8x1024xf32>
    %330 = tpu.matmul %328, %329, %cst_87 {dimension_numbers = #tpu.dot_dimension_numbers<[1], [0], [0], [1], [0, 0, 1, 1], [], []>} : vector<8x256xbf16>, vector<256x1024xbf16>, vector<8x1024xf32> -> vector<8x1024xf32>
    %331 = vector.extract_strided_slice %330 {offsets = [0, 512], sizes = [8, 512], strides = [1, 1]} : vector<8x1024xf32> to vector<8x512xf32>
    %c0_88 = arith.constant 0 : index
    %c0_89 = arith.constant 0 : index
    %332 = vector.load %arg5[%c0_88, %c0_89] : memref<1x512xf32, #tpu.memory_space<vmem>>, vector<1x512xf32>
    %333 = vector.broadcast %332 : vector<1x512xf32> to vector<8x512xf32>
    %334 = arith.addf %331, %333 : vector<8x512xf32>
    %335 = vector.extract_strided_slice %334 {offsets = [0, 0], sizes = [8, 384], strides = [1, 1]} : vector<8x512xf32> to vector<8x384xf32>
    %336 = arith.negf %335 : vector<8x384xf32>
    %337 = math.exp %336 : vector<8x384xf32>
    %cst_90 = arith.constant 1.000000e+00 : f32
    %338 = vector.broadcast %cst_90 : f32 to vector<8x384xf32>
    %339 = arith.addf %338, %337 : vector<8x384xf32>
    %340 = arith.divf %338, %339 : vector<8x384xf32>
    %341 = vector.extract_strided_slice %334 {offsets = [0, 384], sizes = [8, 128], strides = [1, 1]} : vector<8x512xf32> to vector<8x128xf32>
    %342 = math.tanh %341 : vector<8x128xf32>
    %343 = vector.extract_strided_slice %340 {offsets = [0, 128], sizes = [8, 128], strides = [1, 1]} : vector<8x384xf32> to vector<8x128xf32>
    %344 = arith.mulf %343, %297 : vector<8x128xf32>
    %345 = vector.extract_strided_slice %340 {offsets = [0, 0], sizes = [8, 128], strides = [1, 1]} : vector<8x384xf32> to vector<8x128xf32>
    %346 = arith.mulf %345, %342 : vector<8x128xf32>
    %347 = arith.addf %344, %346 : vector<8x128xf32>
    %348 = vector.extract_strided_slice %340 {offsets = [0, 256], sizes = [8, 128], strides = [1, 1]} : vector<8x384xf32> to vector<8x128xf32>
    %349 = math.tanh %347 : vector<8x128xf32>
    %350 = arith.mulf %348, %349 : vector<8x128xf32>
    %351 = vector.extract_strided_slice %330 {offsets = [0, 0], sizes = [8, 512], strides = [1, 1]} : vector<8x1024xf32> to vector<8x512xf32>
    %c1_i32_91 = arith.constant 1 : i32
    %352 = arith.addi %c6_i32, %c1_i32_91 : i32
    %353 = arith.index_cast %352 : i32 to index
    %c0_92 = arith.constant 0 : index
    %c0_93 = arith.constant 0 : index
    %354 = vector.load %arg9[%353, %c0_92, %c0_93] : memref<8x8x512xf32, #tpu.memory_space<vmem>>, vector<1x8x512xf32>
    %355 = vector.shape_cast %354 : vector<1x8x512xf32> to vector<8x512xf32>
    %356 = arith.addf %351, %355 : vector<8x512xf32>
    %357 = vector.extract_strided_slice %356 {offsets = [0, 0], sizes = [8, 384], strides = [1, 1]} : vector<8x512xf32> to vector<8x384xf32>
    %358 = arith.negf %357 : vector<8x384xf32>
    %359 = math.exp %358 : vector<8x384xf32>
    %cst_94 = arith.constant 1.000000e+00 : f32
    %360 = vector.broadcast %cst_94 : f32 to vector<8x384xf32>
    %361 = arith.addf %360, %359 : vector<8x384xf32>
    %362 = arith.divf %360, %361 : vector<8x384xf32>
    %363 = vector.extract_strided_slice %356 {offsets = [0, 384], sizes = [8, 128], strides = [1, 1]} : vector<8x512xf32> to vector<8x128xf32>
    %364 = math.tanh %363 : vector<8x128xf32>
    %365 = vector.extract_strided_slice %362 {offsets = [0, 128], sizes = [8, 128], strides = [1, 1]} : vector<8x384xf32> to vector<8x128xf32>
    %366 = arith.mulf %365, %319 : vector<8x128xf32>
    %367 = vector.extract_strided_slice %362 {offsets = [0, 0], sizes = [8, 128], strides = [1, 1]} : vector<8x384xf32> to vector<8x128xf32>
    %368 = arith.mulf %367, %364 : vector<8x128xf32>
    %369 = arith.addf %366, %368 : vector<8x128xf32>
    %370 = vector.extract_strided_slice %362 {offsets = [0, 256], sizes = [8, 128], strides = [1, 1]} : vector<8x384xf32> to vector<8x128xf32>
    %371 = math.tanh %369 : vector<8x128xf32>
    %372 = arith.mulf %370, %371 : vector<8x128xf32>
    %373 = arith.index_cast %c6_i32 : i32 to index
    %c0_95 = arith.constant 0 : index
    %c0_96 = arith.constant 0 : index
    %374 = vector.load %arg10[%373, %c0_95, %c0_96] : memref<8x8x128xf32, #tpu.memory_space<vmem>>, vector<1x8x128xf32>
    %375 = vector.shape_cast %374 : vector<1x8x128xf32> to vector<8x128xf32>
    %376 = vector.shape_cast %350 : vector<8x128xf32> to vector<1x8x128xf32>
    tpu.vector_store %arg10[%373, %c0_95, %c0_96], %376 {strides = array<i32>} : memref<8x8x128xf32, #tpu.memory_space<vmem>>, vector<1x8x128xf32>,
    %c7_i32 = arith.constant 7 : i32
    %377 = tpu.concatenate %372, %350 in 1 : vector<8x128xf32>, vector<8x128xf32> -> vector<8x256xf32>
    %378 = arith.truncf %377 : vector<8x256xf32> to vector<8x256xbf16>
    %c0_97 = arith.constant 0 : index
    %c0_98 = arith.constant 0 : index
    %379 = vector.load %arg4[%c0_97, %c0_98] : memref<256x1024xbf16, #tpu.memory_space<vmem>>, vector<256x1024xbf16>
    %cst_99 = arith.constant dense<0.000000e+00> : vector<8x1024xf32>
    %380 = tpu.matmul %378, %379, %cst_99 {dimension_numbers = #tpu.dot_dimension_numbers<[1], [0], [0], [1], [0, 0, 1, 1], [], []>} : vector<8x256xbf16>, vector<256x1024xbf16>, vector<8x1024xf32> -> vector<8x1024xf32>
    %381 = vector.extract_strided_slice %380 {offsets = [0, 512], sizes = [8, 512], strides = [1, 1]} : vector<8x1024xf32> to vector<8x512xf32>
    %c0_100 = arith.constant 0 : index
    %c0_101 = arith.constant 0 : index
    %382 = vector.load %arg5[%c0_100, %c0_101] : memref<1x512xf32, #tpu.memory_space<vmem>>, vector<1x512xf32>
    %383 = vector.broadcast %382 : vector<1x512xf32> to vector<8x512xf32>
    %384 = arith.addf %381, %383 : vector<8x512xf32>
    %385 = vector.extract_strided_slice %384 {offsets = [0, 0], sizes = [8, 384], strides = [1, 1]} : vector<8x512xf32> to vector<8x384xf32>
    %386 = arith.negf %385 : vector<8x384xf32>
    %387 = math.exp %386 : vector<8x384xf32>
    %cst_102 = arith.constant 1.000000e+00 : f32
    %388 = vector.broadcast %cst_102 : f32 to vector<8x384xf32>
    %389 = arith.addf %388, %387 : vector<8x384xf32>
    %390 = arith.divf %388, %389 : vector<8x384xf32>
    %391 = vector.extract_strided_slice %384 {offsets = [0, 384], sizes = [8, 128], strides = [1, 1]} : vector<8x512xf32> to vector<8x128xf32>
    %392 = math.tanh %391 : vector<8x128xf32>
    %393 = vector.extract_strided_slice %390 {offsets = [0, 128], sizes = [8, 128], strides = [1, 1]} : vector<8x384xf32> to vector<8x128xf32>
    %394 = arith.mulf %393, %347 : vector<8x128xf32>
    %395 = vector.extract_strided_slice %390 {offsets = [0, 0], sizes = [8, 128], strides = [1, 1]} : vector<8x384xf32> to vector<8x128xf32>
    %396 = arith.mulf %395, %392 : vector<8x128xf32>
    %397 = arith.addf %394, %396 : vector<8x128xf32>
    %398 = vector.extract_strided_slice %390 {offsets = [0, 256], sizes = [8, 128], strides = [1, 1]} : vector<8x384xf32> to vector<8x128xf32>
    %399 = math.tanh %397 : vector<8x128xf32>
    %400 = arith.mulf %398, %399 : vector<8x128xf32>
    %c7 = arith.constant 7 : index
    %c0_103 = arith.constant 0 : index
    %c0_104 = arith.constant 0 : index
    %401 = vector.load %arg10[%c7, %c0_103, %c0_104] : memref<8x8x128xf32, #tpu.memory_space<vmem>>, vector<1x8x128xf32>
    %402 = vector.shape_cast %401 : vector<1x8x128xf32> to vector<8x128xf32>
    %403 = vector.shape_cast %400 : vector<8x128xf32> to vector<1x8x128xf32>
    tpu.vector_store %arg10[%c7, %c0_103, %c0_104], %403 {strides = array<i32>} : memref<8x8x128xf32, #tpu.memory_space<vmem>>, vector<1x8x128xf32>,
    %c0_105 = arith.constant 0 : index
    %c0_106 = arith.constant 0 : index
    %c0_107 = arith.constant 0 : index
    %404 = vector.load %arg10[%c0_105, %c0_106, %c0_107] : memref<8x8x128xf32, #tpu.memory_space<vmem>>, vector<8x8x128xf32>
    %405 = vector.shape_cast %404 : vector<8x8x128xf32> to vector<64x128xf32>
    %c0_108 = arith.constant 0 : index
    %c0_109 = arith.constant 0 : index
    %406 = vector.load %arg6[%c0_108, %c0_109] : memref<128x32xf32, #tpu.memory_space<vmem>>, vector<128x32xf32>
    %cst_110 = arith.constant dense<0.000000e+00> : vector<64x32xf32>
    %407 = tpu.matmul %405, %406, %cst_110 {dimension_numbers = #tpu.dot_dimension_numbers<[1], [0], [0], [1], [0, 0, 1, 1], [], []>} : vector<64x128xf32>, vector<128x32xf32>, vector<64x32xf32> -> vector<64x32xf32>
    %c0_111 = arith.constant 0 : index
    %c0_112 = arith.constant 0 : index
    %408 = vector.load %arg7[%c0_111, %c0_112] : memref<1x32xf32, #tpu.memory_space<vmem>>, vector<1x32xf32>
    %409 = vector.broadcast %408 : vector<1x32xf32> to vector<64x32xf32>
    %410 = arith.addf %407, %409 : vector<64x32xf32>
    %c0_113 = arith.constant 0 : index
    %c0_114 = arith.constant 0 : index
    %411 = vector.load %arg8[%c0_113, %c0_114] : memref<64x32xf32, #tpu.memory_space<vmem>>, vector<64x32xf32>
    tpu.vector_store %arg8[%c0_113, %c0_114], %410 {strides = array<i32>} : memref<64x32xf32, #tpu.memory_space<vmem>>, vector<64x32xf32>,
    return
  }
  func.func @transform_0(%arg0: i32) -> (i32, i32) {
    %c0_i32 = arith.constant 0 : i32
    %c0_i32_0 = arith.constant 0 : i32
    %c0_i32_1 = arith.constant 0 : i32
    return %c0_i32, %c0_i32_0 : i32, i32
  }
  func.func @transform_1(%arg0: i32) -> (i32, i32) {
    %c0_i32 = arith.constant 0 : i32
    %c0_i32_0 = arith.constant 0 : i32
    %c0_i32_1 = arith.constant 0 : i32
    return %c0_i32, %c0_i32_0 : i32, i32
  }
  func.func @transform_2(%arg0: i32) -> (i32, i32) {
    %c0_i32 = arith.constant 0 : i32
    %c0_i32_0 = arith.constant 0 : i32
    %c0_i32_1 = arith.constant 0 : i32
    return %c0_i32, %c0_i32_0 : i32, i32
  }
  func.func @transform_3(%arg0: i32) -> (i32, i32) {
    %c0_i32 = arith.constant 0 : i32
    %c0_i32_0 = arith.constant 0 : i32
    %c0_i32_1 = arith.constant 0 : i32
    return %c0_i32, %c0_i32_0 : i32, i32
  }
  func.func @transform_4(%arg0: i32) -> (i32, i32) {
    %c0_i32 = arith.constant 0 : i32
    %c0_i32_0 = arith.constant 0 : i32
    %c0_i32_1 = arith.constant 0 : i32
    return %c0_i32, %c0_i32_0 : i32, i32
  }
  func.func @transform_5(%arg0: i32) -> (i32, i32) {
    %c0_i32 = arith.constant 0 : i32
    %c0_i32_0 = arith.constant 0 : i32
    %c0_i32_1 = arith.constant 0 : i32
    return %c0_i32, %c0_i32_0 : i32, i32
  }
  func.func @transform_6(%arg0: i32) -> (i32, i32) {
    %c0_i32 = arith.constant 0 : i32
    %c0_i32_0 = arith.constant 0 : i32
    %c0_i32_1 = arith.constant 0 : i32
    return %c0_i32, %c0_i32_0 : i32, i32
  }
  func.func @transform_7(%arg0: i32) -> (i32, i32) {
    %c0_i32 = arith.constant 0 : i32
    %c0_i32_0 = arith.constant 0 : i32
    %c0_i32_1 = arith.constant 0 : i32
    return %c0_i32, %c0_i32_0 : i32, i32
  }
}

</mosaic_0001>

<bundles_post_ra>
// kernel: rnn_controller_forward.1
= control target key start
LH: loop header
LB: loop body
LE: loop exit
PB: predicated region body
PF: predicated region fallthrough
CT: control target
= control target key end

     0   :  { %12 = vsyncpa [#allocation5], 0  ;;  %s9613_s24 = smov [#allocation4]   ;;  %s11712_s0 = inlined_call_operand.vmem [shape: f32[64,8], index: 0, kind: input, shape index: {}]   ;;  %s11713_s1 = inlined_call_operand.vmem [shape: f32[8,512], index: 1, kind: input, shape index: {}]   ;;  %s11714_s2 = inlined_call_operand.vmem [shape: f32[1,512], index: 2, kind: input, shape index: {}]   ;;  %s11715_s3 = inlined_call_operand.hbm [shape: bf16[256,1024], index: 3, kind: input, shape index: {}]   ;;  %s11716_s4 = inlined_call_operand.vmem [shape: f32[1,512], index: 4, kind: input, shape index: {}]   ;;  %s11717_s5 = inlined_call_operand.vmem [shape: f32[128,32], index: 5, kind: input, shape index: {}]   ;;  %s11718_s6 = inlined_call_operand.vmem [shape: f32[1,32], index: 6, kind: input, shape index: {}]   ;;  %s11719_s7 = inlined_call_operand.vmem [shape: f32[64,32], index: 7, kind: output, shape index: {}]  }
   0x1   :  { %s24_s25 = sshll.u32 %s9613_s24, 4  ;;  %s9589_s28 = scalar_lea.hbm %s11715_s3, 16384  ;;  %s25_s25 = int_to_ptr.vmem [resolvable:$true] %s24_s25 }
   0x2   :  { %p9590_p0 = scmp.ne.s32.totalorder %s11715_s3, %s9589_s28  ;;  %p9593_p1 = scmp.lt.u32.totalorder %s9589_s28, %s11715_s3 }
   0x4   :  { %p9595_p2 = pnand %p9593_p1, %p9590_p0 }
   0x6   :  { %9598 = shalt.err (!%p9595_p2)
}
   0x7   :  { %s9599_s10 = scalar_lea.vmem %s25_s25, 16384  ;;  %p9604_p4 = scmp.lt.s32.totalorder %s25_s25, %s25_s25 }
   0x8   :  { %p9600_p3 = scmp.ne.s32.totalorder %s25_s25, %s9599_s10  ;;  %p9605_p5 = scmp.lt.s32.totalorder %s9599_s10, %s9599_s10 }
   0xa   :  { %p9606_p6 = por %p9605_p5, %p9604_p4 }
   0xc   :  { %p9607_p7 = pnand %p9606_p6, %p9600_p3 }
   0xe   :  { %9610 = shalt.err (!%p9607_p7)
}
   0xf   :  { %s9614_s11 = smov 512   ;;  %s9615_s12 = smov 32  }
  0x10   :  { %30 = dma.hbm_to_vmem [thread:$0]  %s11715_s3, 16384, %s25_s25, [#allocation5], %s9614_s11, %s9614_s11, %s9615_s12  }
  0x11   :  { %9611 = dma.done.wait [#allocation5], 16384  }
  0x12   :  { %9612 = vsyncadd [#allocation5], 4294950912  ;;  %v9616_v0 = vmov 0.0   ;;  %v49_v1 = vld [vmem:[%s11713_s1 + $0x8] sm:$0xff]  ;;  %v48_v2 = vld [vmem:[%s11713_s1] sm:$0xff]  ;;  %vm74_vm0 = vcmask 64512  }
  0x13   :  { %163 = vmatprep.mubr.f32.mxu0 %v9616_v0  ;;  %276 = vmatprep.mubr.f32.mxu1 %v9616_v0  ;;  %v40_v3 = vld [vmem:[%s11712_s0] sm:$0xff]  ;;  %v51_v4 = vld [vmem:[%s11713_s1 + $0x18] sm:$0xff]  ;;  %v50_v5 = vld [vmem:[%s11713_s1 + $0x10] sm:$0xff]  ;;  %vm8173_vm1 = vcmask 261120  }
  0x14   :  { %99 = vmatprep.subr.mxu0 %v49_v1  ;;  %v387_v6 = vld [vmem:[#allocation4] sm:$0xff]  ;;  %212 = vmatprep.subr.mxu1 %v51_v4  ;;  %v388_v8 = vld [vmem:[#allocation4 + $0x8] sm:$0xff] }
  0x15   :  { %100 = vmatpush1.msra.mxu0 %v48_v2  ;;  %v391_v7 = vld [vmem:[#allocation4 + $0x20] sm:$0xff]  ;;  %v392_v9 = vld [vmem:[#allocation4 + $0x28] sm:$0xff]  ;;  %213 = vmatpush1.msra.mxu1 %v50_v5 }
  0x16   :  { %8187 = vmatmul.mubr.msk.f32.vlgmr.msra.gmra.mrb[0].mxu0 %vm74_vm0, %v40_v3  ;;  %v8206_v10 = vcombine.low %v387_v6, %v391_v7  ;;  %v8207_v11 = vcombine.high %v387_v6, %v391_v7  ;;  %v8208_v12 = vcombine.low %v388_v8, %v392_v9  ;;  %v395_v13 = vld [vmem:[#allocation4 + $0x40] sm:$0xff]  ;;  %v396_v15 = vld [vmem:[#allocation4 + $0x48] sm:$0xff]  ;;  %8195 = vmatmul.mubr.msk.f32.vlgmr.msra.gmra.mrb[0].mxu1 %vm74_vm0, %v40_v3 }
  0x17   :  { %v399_v14 = vld [vmem:[#allocation4 + $0x60] sm:$0xff]  ;;  %v8209_v16 = vcombine.high %v388_v8, %v392_v9  ;;  %v400_v18 = vld [vmem:[#allocation4 + $0x68] sm:$0xff]  ;;  %169 = vmatprep.mubr.f32.mxu0 %v9616_v0  ;;  %282 = vmatprep.mubr.f32.mxu1 %v9616_v0 }
  0x18   :  { %v8215_v17 = vcombine.high %v395_v13, %v399_v14  ;;  %v403_v19 = vld [vmem:[#allocation4 + $0x80] sm:$0xff]  ;;  %1155 = vmatprep.subr.bf16.mxu0 %v8207_v11  ;;  %v8217_v21 = vcombine.high %v396_v15, %v400_v18  ;;  %v404_v22 = vld [vmem:[#allocation4 + $0x88] sm:$0xff]  ;;  %v8214_v24 = vcombine.low %v395_v13, %v399_v14  ;;  %v8216_v25 = vcombine.low %v396_v15, %v400_v18 }
  0x19   :  { %v407_v20 = vld [vmem:[#allocation4 + $0xa0] sm:$0xff]  ;;  %v408_v23 = vld [vmem:[#allocation4 + $0xa8] sm:$0xff]  ;;  %1196 = vmatprep.subr.bf16.mxu1 %v8209_v16  ;;  %1156 = vmatpush1.bf16.msra.mxu0 %v8206_v10 }
  0x1a   :  { %1197 = vmatpush1.bf16.msra.mxu1 %v8208_v12  ;;  %1157 = vmatprep.subr.bf16.mxu0 %v8215_v17  ;;  %v8223_v26 = vcombine.high %v403_v19, %v407_v20  ;;  %v8225_v27 = vcombine.high %v404_v22, %v408_v23  ;;  %v411_v28 = vld [vmem:[#allocation4 + $0xc0] sm:$0xff]  ;;  %v412_v30 = vld [vmem:[#allocation4 + $0xc8] sm:$0xff]  ;;  %v8222_v32 = vcombine.low %v403_v19, %v407_v20 }
  0x1b   :  { %1198 = vmatprep.subr.bf16.mxu1 %v8217_v21  ;;  %v415_v29 = vld [vmem:[#allocation4 + $0xe0] sm:$0xff]  ;;  %v416_v31 = vld [vmem:[#allocation4 + $0xe8] sm:$0xff]  ;;  %v8224_v33 = vcombine.low %v404_v22, %v408_v23 }
  0x1c   :  { %v8231_v34 = vcombine.high %v411_v28, %v415_v29  ;;  %v8233_v35 = vcombine.high %v412_v30, %v416_v31  ;;  %v8230_v36 = vcombine.low %v411_v28, %v415_v29  ;;  %v8232_v37 = vcombine.low %v412_v30, %v416_v31  ;;  %v419_v38 = vld [vmem:[#allocation4 + $0x100] sm:$0xff]  ;;  %v420_v40 = vld [vmem:[#allocation4 + $0x108] sm:$0xff]  ;;  %v42_v29 = vld [vmem:[%s11712_s0 + $0x10] sm:$0xff] }
  0x1d   :  { %1158 = vmatpush1.bf16.msra.mxu0 %v8214_v24  ;;  %v423_v39 = vld [vmem:[#allocation4 + $0x120] sm:$0xff]  ;;  %v424_v42 = vld [vmem:[#allocation4 + $0x128] sm:$0xff] }
  0x1e   :  { %1199 = vmatpush1.bf16.msra.mxu1 %v8216_v25  ;;  %1159 = vmatprep.subr.bf16.mxu0 %v8223_v26  ;;  %v8239_v41 = vcombine.high %v419_v38, %v423_v39  ;;  %v8238_v43 = vcombine.low %v419_v38, %v423_v39  ;;  %v8240_v44 = vcombine.low %v420_v40, %v424_v42  ;;  %v427_v46 = vld [vmem:[#allocation4 + $0x140] sm:$0xff]  ;;  %v428_v48 = vld [vmem:[#allocation4 + $0x148] sm:$0xff]  ;;  %v43_v38 = vld [vmem:[%s11712_s0 + $0x18] sm:$0xff] }
  0x1f   :  { %1200 = vmatprep.subr.bf16.mxu1 %v8225_v27  ;;  %v8241_v45 = vcombine.high %v420_v40, %v424_v42  ;;  %v431_v47 = vld [vmem:[#allocation4 + $0x160] sm:$0xff]  ;;  %v432_v50 = vld [vmem:[#allocation4 + $0x168] sm:$0xff] }
  0x20   :  { %v8247_v49 = vcombine.high %v427_v46, %v431_v47  ;;  %v8246_v51 = vcombine.low %v427_v46, %v431_v47  ;;  %v8248_v52 = vcombine.low %v428_v48, %v432_v50  ;;  %v8249_v53 = vcombine.high %v428_v48, %v432_v50  ;;  %v435_v54 = vld [vmem:[#allocation4 + $0x180] sm:$0xff]  ;;  %v436_v56 = vld [vmem:[#allocation4 + $0x188] sm:$0xff] }
  0x21   :  { %1160 = vmatpush1.bf16.msra.mxu0 %v8222_v32  ;;  %v439_v55 = vld [vmem:[#allocation4 + $0x1a0] sm:$0xff]  ;;  %v440_v58 = vld [vmem:[#allocation4 + $0x1a8] sm:$0xff] }
  0x22   :  { %1201 = vmatpush1.bf16.msra.mxu1 %v8224_v33  ;;  %1161 = vmatprep.subr.bf16.mxu0 %v8231_v34  ;;  %v8255_v57 = vcombine.high %v435_v54, %v439_v55  ;;  %v8254_v59 = vcombine.low %v435_v54, %v439_v55  ;;  %v8256_v60 = vcombine.low %v436_v56, %v440_v58  ;;  %v443_v62 = vld [vmem:[#allocation4 + $0x1c0] sm:$0xff]  ;;  %v444_v1 = vld [vmem:[#allocation4 + $0x1c8] sm:$0xff] }
  0x23   :  { %1202 = vmatprep.subr.bf16.mxu1 %v8233_v35  ;;  %v8257_v61 = vcombine.high %v436_v56, %v440_v58  ;;  %v447_v63 = vld [vmem:[#allocation4 + $0x1e0] sm:$0xff]  ;;  %v448_v3 = vld [vmem:[#allocation4 + $0x1e8] sm:$0xff] }
  0x24   :  { %v8263_v2 = vcombine.high %v443_v62, %v447_v63  ;;  %v8262_v4 = vcombine.low %v443_v62, %v447_v63  ;;  %v8264_v5 = vcombine.low %v444_v1, %v448_v3  ;;  %v8265_v6 = vcombine.high %v444_v1, %v448_v3  ;;  %v451_v7 = vld [vmem:[#allocation4 + $0x200] sm:$0xff]  ;;  %v452_v9 = vld [vmem:[#allocation4 + $0x208] sm:$0xff]  ;;  %v46_v63 = vld [vmem:[%s11712_s0 + $0x30] sm:$0xff] }
  0x25   :  { %1162 = vmatpush1.bf16.msra.mxu0 %v8230_v36  ;;  %v455_v8 = vld [vmem:[#allocation4 + $0x220] sm:$0xff]  ;;  %v456_v11 = vld [vmem:[#allocation4 + $0x228] sm:$0xff] }
  0x26   :  { %1203 = vmatpush1.bf16.msra.mxu1 %v8232_v37  ;;  %1163 = vmatprep.subr.bf16.mxu0 %v8239_v41  ;;  %v8271_v10 = vcombine.high %v451_v7, %v455_v8  ;;  %v8270_v12 = vcombine.low %v451_v7, %v455_v8  ;;  %v8272_v13 = vcombine.low %v452_v9, %v456_v11  ;;  %v459_v15 = vld [vmem:[#allocation4 + $0x240] sm:$0xff]  ;;  %v460_v17 = vld [vmem:[#allocation4 + $0x248] sm:$0xff] }
  0x27   :  { %1204 = vmatprep.subr.bf16.mxu1 %v8241_v45  ;;  %v8273_v14 = vcombine.high %v452_v9, %v456_v11  ;;  %v463_v16 = vld [vmem:[#allocation4 + $0x260] sm:$0xff]  ;;  %v464_v19 = vld [vmem:[#allocation4 + $0x268] sm:$0xff]  ;;  %v9729_v11 = vld [vmem:[#allocation4 + $0x30] sm:$0xff] }
  0x28   :  { %v8279_v18 = vcombine.high %v459_v15, %v463_v16  ;;  %v41_v20 = vld [vmem:[%s11712_s0 + $0x8] sm:$0xff]  ;;  %v8278_v21 = vcombine.low %v459_v15, %v463_v16  ;;  %v8280_v22 = vcombine.low %v460_v17, %v464_v19  ;;  %v8281_v23 = vcombine.high %v460_v17, %v464_v19  ;;  %v467_v24 = vld [vmem:[#allocation4 + $0x280] sm:$0xff]  ;;  %v47_v17 = vld [vmem:[%s11712_s0 + $0x38] sm:$0xff] }
  0x29   :  { %1164 = vmatpush1.bf16.msra.mxu0 %v8238_v43  ;;  %8196 = vmatmul.mubr.msk.f32.gmra.mrb[2].mxu1 %vm74_vm0, %v41_v20  ;;  %v471_v25 = vld [vmem:[#allocation4 + $0x2a0] sm:$0xff]  ;;  %v468_v26 = vld [vmem:[#allocation4 + $0x288] sm:$0xff] }
  0x2a   :  { %1205 = vmatpush1.bf16.msra.mxu1 %v8240_v44  ;;  %1165 = vmatprep.subr.bf16.mxu0 %v8247_v49  ;;  %v8287_v27 = vcombine.high %v467_v24, %v471_v25  ;;  %v472_v28 = vld [vmem:[#allocation4 + $0x2a8] sm:$0xff]  ;;  %v8286_v30 = vcombine.low %v467_v24, %v471_v25  ;;  %v475_v33 = vld [vmem:[#allocation4 + $0x2c0] sm:$0xff] }
  0x2b   :  { %1206 = vmatprep.subr.bf16.mxu1 %v8249_v53  ;;  %8188 = vmatmul.mubr.msk.f32.gmra.mrb[2].mxu0 %vm74_vm0, %v41_v20  ;;  %v8288_v31 = vcombine.low %v468_v26, %v472_v28  ;;  %v8289_v32 = vcombine.high %v468_v26, %v472_v28  ;;  %v479_v34 = vld [vmem:[#allocation4 + $0x2e0] sm:$0xff]  ;;  %v476_v35 = vld [vmem:[#allocation4 + $0x2c8] sm:$0xff] }
  0x2c   :  { %175 = vmatprep.mubr.f32.mxu0 %v9616_v0  ;;  %288 = vmatprep.mubr.f32.mxu1 %v9616_v0  ;;  %v8295_v36 = vcombine.high %v475_v33, %v479_v34  ;;  %v480_v37 = vld [vmem:[#allocation4 + $0x2e8] sm:$0xff]  ;;  %v8294_v39 = vcombine.low %v475_v33, %v479_v34  ;;  %v483_v42 = vld [vmem:[#allocation4 + $0x300] sm:$0xff] }
  0x2d   :  { %1166 = vmatpush1.bf16.msra.mxu0 %v8246_v51  ;;  %8197 = vmatmul.mubr.msk.f32.gmra.mrb[4].mxu1 %vm74_vm0, %v42_v29  ;;  %v8296_v40 = vcombine.low %v476_v35, %v480_v37  ;;  %v8297_v41 = vcombine.high %v476_v35, %v480_v37  ;;  %v487_v43 = vld [vmem:[#allocation4 + $0x320] sm:$0xff]  ;;  %v484_v44 = vld [vmem:[#allocation4 + $0x308] sm:$0xff] }
  0x2e   :  { %1207 = vmatpush1.bf16.msra.mxu1 %v8248_v52  ;;  %1167 = vmatprep.subr.bf16.mxu0 %v8255_v57  ;;  %v8303_v45 = vcombine.high %v483_v42, %v487_v43  ;;  %v488_v46 = vld [vmem:[#allocation4 + $0x328] sm:$0xff]  ;;  %v44_v47 = vld [vmem:[%s11712_s0 + $0x20] sm:$0xff]  ;;  %v8302_v48 = vcombine.low %v483_v42, %v487_v43 }
  0x2f   :  { %1208 = vmatprep.subr.bf16.mxu1 %v8257_v61  ;;  %8189 = vmatmul.mubr.msk.f32.gmra.mrb[4].mxu0 %vm74_vm0, %v42_v29  ;;  %v8304_v49 = vcombine.low %v484_v44, %v488_v46  ;;  %v8305_v50 = vcombine.high %v484_v44, %v488_v46  ;;  %v491_v51 = vld [vmem:[#allocation4 + $0x340] sm:$0xff]  ;;  %v492_v53 = vld [vmem:[#allocation4 + $0x348] sm:$0xff] }
  0x30   :  { %181 = vmatprep.mubr.f32.mxu0 %v9616_v0  ;;  %294 = vmatprep.mubr.f32.mxu1 %v9616_v0  ;;  %v495_v52 = vld [vmem:[#allocation4 + $0x360] sm:$0xff]  ;;  %v45_v54 = vld [vmem:[%s11712_s0 + $0x28] sm:$0xff] }
  0x31   :  { %1168 = vmatpush1.bf16.msra.mxu0 %v8254_v59  ;;  %8198 = vmatmul.mubr.msk.f32.gmra.mrb[6].mxu1 %vm74_vm0, %v43_v38  ;;  %v8310_v55 = vcombine.low %v491_v51, %v495_v52  ;;  %v8311_v56 = vcombine.high %v491_v51, %v495_v52  ;;  %v496_v57 = vld [vmem:[#allocation4 + $0x368] sm:$0xff]  ;;  %v503_v61 = vld [vmem:[#allocation4 + $0x3a0] sm:$0xff] }
  0x32   :  { %1209 = vmatpush1.bf16.msra.mxu1 %v8256_v60  ;;  %1169 = vmatprep.subr.bf16.mxu0 %v8263_v2  ;;  %v8312_v58 = vcombine.low %v492_v53, %v496_v57  ;;  %v8313_v59 = vcombine.high %v492_v53, %v496_v57  ;;  %v499_v60 = vld [vmem:[#allocation4 + $0x380] sm:$0xff]  ;;  %v500_v62 = vld [vmem:[#allocation4 + $0x388] sm:$0xff] }
  0x33   :  { %1210 = vmatprep.subr.bf16.mxu1 %v8265_v6  ;;  %8190 = vmatmul.mubr.msk.f32.gmra.mrb[6].mxu0 %vm74_vm0, %v43_v38  ;;  %v8319_v1 = vcombine.high %v499_v60, %v503_v61  ;;  %v504_v2 = vld [vmem:[#allocation4 + $0x3a8] sm:$0xff]  ;;  %v507_v3 = vld [vmem:[#allocation4 + $0x3c0] sm:$0xff]  ;;  %v8318_v8 = vcombine.low %v499_v60, %v503_v61  ;;  %v401_v60 = vld [vmem:[#allocation4 + $0x70] sm:$0xff] }
  0x34   :  { %187 = vmatprep.mubr.f32.mxu0 %v9616_v0  ;;  %300 = vmatprep.mubr.f32.mxu1 %v9616_v0  ;;  %v508_v6 = vld [vmem:[#allocation4 + $0x3c8] sm:$0xff]  ;;  %v8320_v9 = vcombine.low %v500_v62, %v504_v2  ;;  %v52_v26 = vld [vmem:[%s11714_s2] sm:$0xf]  ;;  %v398_v61 = vld [vmem:[#allocation4 + $0x58] sm:$0xff] }
  0x35   :  { %1170 = vmatpush1.bf16.msra.mxu0 %v8262_v4  ;;  %8199 = vmatmul.mubr.msk.f32.gmra.mrb[8].mxu1 %vm74_vm0, %v44_v47  ;;  %v8321_v4 = vcombine.high %v500_v62, %v504_v2  ;;  %v512_v7 = vld [vmem:[#allocation4 + $0x3e8] sm:$0xff]  ;;  %v402_v62 = vld [vmem:[#allocation4 + $0x78] sm:$0xff] }
  0x36   :  { %1211 = vmatpush1.bf16.msra.mxu1 %v8264_v5  ;;  %1171 = vmatprep.subr.bf16.mxu0 %v8271_v10  ;;  %v511_v5 = vld [vmem:[#allocation4 + $0x3e0] sm:$0xff]  ;;  %v9727_v10 = vld [vmem:[#allocation4 + $0x10] sm:$0xff]  ;;  %v8328_v20 = vcombine.low %v508_v6, %v512_v7 }
  0x37   :  { %1212 = vmatprep.subr.bf16.mxu1 %v8273_v14  ;;  %8191 = vmatmul.mubr.msk.f32.gmra.mrb[8].mxu0 %vm74_vm0, %v44_v47  ;;  %v9737_v14 = vld [vmem:[#allocation4 + $0x38] sm:$0xff]  ;;  %v8327_v15 = vcombine.high %v507_v3, %v511_v5  ;;  %v8326_v19 = vcombine.low %v507_v3, %v511_v5  ;;  %v8221_v3 = vcombine.high %v398_v61, %v402_v62  ;;  %v409_v5 = vld [vmem:[#allocation4 + $0xb0] sm:$0xff] }
  0x38   :  { %193 = vmatprep.mubr.f32.mxu0 %v9616_v0  ;;  %306 = vmatprep.mubr.f32.mxu1 %v9616_v0 }
  0x39   :  { %1172 = vmatpush1.bf16.msra.mxu0 %v8270_v12  ;;  %8200 = vmatmul.mubr.msk.f32.gmra.mrb[10].mxu1 %vm74_vm0, %v45_v54  ;;  %v9731_v12 = vld [vmem:[#allocation4 + $0x18] sm:$0xff] }
  0x3a   :  { %1213 = vmatpush1.bf16.msra.mxu1 %v8272_v13  ;;  %1173 = vmatprep.subr.bf16.mxu0 %v8279_v18  ;;  %v8210_v13 = vcombine.low %v9727_v10, %v9729_v11  ;;  %v8212_v16 = vcombine.low %v9731_v12, %v9737_v14  ;;  %v8329_v18 = vcombine.high %v508_v6, %v512_v7  ;;  %v406_v6 = vld [vmem:[#allocation4 + $0x98] sm:$0xff] }
  0x3b   :  { %1214 = vmatprep.subr.bf16.mxu1 %v8281_v23  ;;  %8192 = vmatmul.mubr.msk.f32.gmra.mrb[10].mxu0 %vm74_vm0, %v45_v54  ;;  %v9617_v23 = vmov 0.0|0.0   ;;  %v410_v7 = vld [vmem:[#allocation4 + $0xb8] sm:$0xff] }
  0x3c   :  { %199 = vmatprep.mubr.f32.mxu0 %v9616_v0  ;;  %312 = vmatprep.mubr.f32.mxu1 %v9616_v0 }
  0x3d   :  { %1174 = vmatpush1.bf16.msra.mxu0 %v8278_v21  ;;  %8201 = vmatmul.mubr.msk.f32.gmra.mrb[12].mxu1 %vm74_vm0, %v46_v63  ;;  %v8211_v21 = vcombine.high %v9727_v10, %v9729_v11  ;;  %v8228_v11 = vcombine.low %v406_v6, %v410_v7 }
  0x3e   :  { %1215 = vmatpush1.bf16.msra.mxu1 %v8280_v22  ;;  %1175 = vmatprep.subr.bf16.mxu0 %v8287_v27  ;;  %v8213_v22 = vcombine.high %v9731_v12, %v9737_v14  ;;  %v421_v14 = vld [vmem:[#allocation4 + $0x110] sm:$0xff] }
  0x3f   :  { %1216 = vmatprep.subr.bf16.mxu1 %v8289_v32  ;;  %8193 = vmatmul.mubr.msk.f32.gmra.mrb[12].mxu0 %vm74_vm0, %v46_v63 }
  0x40   :  { %205 = vmatprep.mubr.f32.mxu0 %v9616_v0  ;;  %318 = vmatprep.mubr.f32.mxu1 %v9616_v0  ;;  %v54_v0 = vlaneseq }
  0x41   :  { %1176 = vmatpush1.bf16.msra.mxu0 %v8286_v30  ;;  %8202 = vmatmul.mubr.msk.f32.gmra.mrb[14].mxu1 %vm74_vm0, %v47_v17 }
  0x42   :  { %1217 = vmatpush1.bf16.msra.mxu1 %v8288_v31  ;;  %1177 = vmatprep.subr.bf16.mxu0 %v8295_v36  ;;  %v55_v24 = vshrl.u32 %v54_v0, 7  ;;  %v426_v0 = vld [vmem:[#allocation4 + $0x138] sm:$0xff] }
  0x43   :  { %1218 = vmatprep.subr.bf16.mxu1 %v8297_v41  ;;  %8194 = vmatmul.mubr.msk.f32.gmra.mrb[14].mxu0 %vm74_vm0, %v47_v17  ;;  %v8229_v17 = vcombine.high %v406_v6, %v410_v7  ;;  %v461_v6 = vld [vmem:[#allocation4 + $0x250] sm:$0xff] }
  0x44   :  { %1187 = vmatprep.mubr.bf16.mxu0 %v9617_v23  ;;  %1228 = vmatprep.mubr.bf16.mxu1 %v9617_v23  ;;  %v9756_v25 = vsub.s32 0, %v55_v24  ;;  %v9761_v27 = vsub.s32 1, %v55_v24  ;;  %v9769_v30 = vsub.s32 2, %v55_v24  ;;  %v465_v7 = vld [vmem:[#allocation4 + $0x270] sm:$0xff] }
  0x45   :  { %1178 = vmatpush1.bf16.msra.mxu0 %v8294_v39 }
  0x46   :  { %1219 = vmatpush1.bf16.msra.mxu1 %v8296_v40  ;;  %1179 = vmatprep.subr.bf16.mxu0 %v8303_v45  ;;  %v9764_v28 = vrot.slane %v52_v26, %v9756_v25  ;;  %v9767_v29 = vrot.slane %v52_v26, %v9761_v27  ;;  %v9774_v38 = vrot.slane %v52_v26, %v9769_v30  ;;  %v9776_v40 = vsub.s32 3, %v55_v24 }
  0x47   :  { %1220 = vmatprep.subr.bf16.mxu1 %v8305_v50 }
  0x48   :  { %11977 = vst [vmem:[#allocation7_spill] sm:$0xff] %v9764_v28  ;;  %11978 = vst [vmem:[#allocation8_spill] sm:$0xff] %v9767_v29  ;;  %v9780_v42 = vrot.slane %v52_v26, %v9776_v40 }
  0x49   :  { %1180 = vmatpush1.bf16.msra.mxu0 %v8302_v48  ;;  %11979 = vst [vmem:[#allocation9_spill] sm:$0xff] %v9774_v38 }
  0x4a   :  { %1221 = vmatpush1.bf16.msra.mxu1 %v8304_v49  ;;  %1181 = vmatprep.subr.bf16.mxu0 %v8311_v56 }
  0x4b   :  { %1222 = vmatprep.subr.bf16.mxu1 %v8313_v59 }
  0x4d   :  { %1182 = vmatpush1.bf16.msra.mxu0 %v8310_v55 }
  0x4e   :  { %1223 = vmatpush1.bf16.msra.mxu1 %v8312_v58  ;;  %1183 = vmatprep.subr.bf16.mxu0 %v8319_v1  ;;  %v397_v58 = vld [vmem:[#allocation4 + $0x50] sm:$0xff] }
  0x4f   :  { %1224 = vmatprep.subr.bf16.mxu1 %v8321_v4  ;;  %v8219_v2 = vcombine.high %v397_v58, %v401_v60  ;;  %v405_v4 = vld [vmem:[#allocation4 + $0x90] sm:$0xff] }
  0x50   :  { %v8226_v10 = vcombine.low %v405_v4, %v409_v5 }
  0x51   :  { %1184 = vmatpush1.bf16.msra.mxu0 %v8318_v8  ;;  %v8218_v8 = vcombine.low %v397_v58, %v401_v60  ;;  %v453_v60 = vld [vmem:[#allocation4 + $0x210] sm:$0xff] }
  0x52   :  { %1225 = vmatpush1.bf16.msra.mxu1 %v8320_v9  ;;  %1185 = vmatprep.subr.bf16.mxu0 %v8327_v15  ;;  %v8220_v9 = vcombine.low %v398_v61, %v402_v62  ;;  %v8227_v15 = vcombine.high %v405_v4, %v409_v5  ;;  %v457_v61 = vld [vmem:[#allocation4 + $0x230] sm:$0xff]  ;;  %v454_v62 = vld [vmem:[#allocation4 + $0x218] sm:$0xff] }
  0x53   :  { %1226 = vmatprep.subr.bf16.mxu1 %v8329_v18  ;;  %v413_v18 = vld [vmem:[#allocation4 + $0xd0] sm:$0xff]  ;;  %v8275_v4 = vcombine.high %v453_v60, %v457_v61 }
  0x55   :  { %1186 = vmatpush1.bf16.msra.mxu0 %v8326_v19  ;;  %v417_v19 = vld [vmem:[#allocation4 + $0xf0] sm:$0xff] }
  0x56   :  { %1227 = vmatpush1.bf16.msra.mxu1 %v8328_v20  ;;  %1237 = vmatprep.subr.bf16.mxu0 %v8211_v21  ;;  %v414_v20 = vld [vmem:[#allocation4 + $0xd8] sm:$0xff]  ;;  %v8235_v12 = vcombine.high %v413_v18, %v417_v19  ;;  %v8234_v24 = vcombine.low %v413_v18, %v417_v19  ;;  %v8283_v18 = vcombine.high %v461_v6, %v465_v7 }
  0x57   :  { %1278 = vmatprep.subr.bf16.mxu1 %v8213_v22  ;;  %v418_v21 = vld [vmem:[#allocation4 + $0xf8] sm:$0xff] }
  0x58   :  { %v422_v22 = vld [vmem:[#allocation4 + $0x118] sm:$0xff]  ;;  %v8236_v26 = vcombine.low %v414_v20, %v418_v21 }
  0xe9   :  { %v165_v31 = vpop.f32.mrb[0].mxu0  ;;  %v278_v34 = vpop.f32.mrb[0].mxu1 }
  0xea   :  { %v166_v32 = vadd.f32 %v165_v31, %v9764_v28  ;;  %v167_v33 = vpop.f32.mrb[1].mxu0  ;;  %v280_v36 = vpop.f32.mrb[1].mxu1  ;;  %v279_v41 = vadd.f32 %v278_v34, %v9774_v38  ;;  %v430_v34 = vld [vmem:[#allocation4 + $0x158] sm:$0xff] }
  0xeb   :  { %v168_v35 = vadd.f32 %v167_v33, %v9767_v29  ;;  %v281_v44 = vadd.f32 %v280_v36, %v9780_v42  ;;  %v433_v33 = vld [vmem:[#allocation4 + $0x170] sm:$0xff] }
  0xec   :  { %v8203_v37 = vmul.f32 -1.442695, %v166_v32  ;;  %v8205_v43 = vmul.f32 -1.442695, %v279_v41  ;;  %v429_v32 = vld [vmem:[#allocation4 + $0x150] sm:$0xff] }
  0xed   :  { %v8204_v39 = vmul.f32 -1.442695, %v168_v35  ;;  %v434_v35 = vld [vmem:[#allocation4 + $0x178] sm:$0xff] }
  0xee   :  { %9333 = vpow2.f32 %v8203_v37  ;;  %v8244_v37 = vcombine.low %v422_v22, %v426_v0  ;;  %v8253_v41 = vcombine.high %v430_v34, %v434_v35 }
  0xef   :  { %9335 = vpow2.f32 %v8204_v39  ;;  %v8251_v39 = vcombine.high %v429_v32, %v433_v33 }
  0xf0   :  { %9337 = vpow2.f32 %v8205_v43  ;;  %v437_v43 = vld [vmem:[#allocation4 + $0x190] sm:$0xff] }
  0xf1   :  { %9339 = vtanh.f32 %v281_v44  ;;  %v441_v44 = vld [vmem:[#allocation4 + $0x1b0] sm:$0xff] }
  0xf8   :  { %v9334_v45 = vpop.eup %9333 }
  0xf9   :  { %v9336_v46 = vpop.eup %9335  ;;  %v370_v47 = vadd.f32 1.0, %v9334_v45  ;;  %v438_v45 = vld [vmem:[#allocation4 + $0x198] sm:$0xff] }
  0xfa   :  { %v371_v48 = vadd.f32 1.0, %v9336_v46  ;;  %v9338_v49 = vpop.eup %9337  ;;  %v442_v46 = vld [vmem:[#allocation4 + $0x1b8] sm:$0xff] }
  0xfb   :  { %9341 = vrcp.f32 %v370_v47  ;;  %v9340_v50 = vpop.eup %9339  ;;  %v372_v52 = vadd.f32 1.0, %v9338_v49  ;;  %v8250_v47 = vcombine.low %v429_v32, %v433_v33  ;;  %v8259_v49 = vcombine.high %v437_v43, %v441_v44 }
  0xfc   :  { %9343 = vrcp.f32 %v371_v48  ;;  %v8252_v48 = vcombine.low %v430_v34, %v434_v35  ;;  %v485_v34 = vld [vmem:[#allocation4 + $0x310] sm:$0xff] }
  0xfd   :  { %9345 = vrcp.f32 %v372_v52  ;;  %v449_v52 = vld [vmem:[#allocation4 + $0x1f0] sm:$0xff] }
  0xfe   :  { %v489_v35 = vld [vmem:[#allocation4 + $0x330] sm:$0xff] }
 0x105   :  { %v9342_v51 = vpop.eup %9341 }
 0x106   :  { %v9344_v53 = vpop.eup %9343  ;;  %v381_v54 = vmul.f32 %v9342_v51, %v9340_v50  ;;  %v8261_v50 = vcombine.high %v438_v45, %v442_v46  ;;  %v445_v51 = vld [vmem:[#allocation4 + $0x1d0] sm:$0xff] }
 0x107   :  { %v380_v55 = vmul.f32 0.0, %v9344_v53  ;;  %v9346_v57 = vpop.eup %9345  ;;  %v446_v53 = vld [vmem:[#allocation4 + $0x1d8] sm:$0xff]  ;;  %v8267_v58 = vcombine.high %v445_v51, %v449_v52 }
 0x109   :  { %v9783_v56 = vadd.f32 %v381_v54, %v380_v55  ;;  %v450_v54 = vld [vmem:[#allocation4 + $0x1f8] sm:$0xff]  ;;  %v8258_v55 = vcombine.low %v437_v43, %v441_v44  ;;  %v8307_v43 = vcombine.high %v485_v34, %v489_v35 }
 0x10b   :  { %9347 = vtanh.f32 %v9783_v56 }
 0x115   :  { %v9348_v59 = vpop.eup %9347 }
 0x116   :  { %v384_v63 = vmul.f32 %v9348_v59, %v9346_v57  ;;  %v8260_v57 = vcombine.low %v438_v45, %v442_v46  ;;  %v8269_v59 = vcombine.high %v446_v53, %v450_v54  ;;  %v493_v45 = vld [vmem:[#allocation4 + $0x350] sm:$0xff] }
 0x117   :  { %v497_v46 = vld [vmem:[#allocation4 + $0x370] sm:$0xff] }
 0x118   :  { %v9786_v1 = vpack.c.bf16 %v384_v63, %v384_v63  ;;  %v458_v63 = vld [vmem:[#allocation4 + $0x238] sm:$0xff] }
 0x119   :  { %v8277_v5 = vcombine.high %v454_v62, %v458_v63 }
 0x11a   :  { %1188 = vmatmul.mubr.bf16.vlgmr.msra.gmra.mrb[16].mxu0 %v9786_v1  ;;  %1229 = vmatmul.mubr.bf16.vlgmr.msra.gmra.mrb[16].mxu1 %v9786_v1 }
 0x11b   :  { %1238 = vmatpush1.bf16.msra.mxu0 %v8210_v13  ;;  %1279 = vmatpush1.bf16.msra.mxu1 %v8212_v16  ;;  %v8237_v13 = vcombine.high %v414_v20, %v418_v21  ;;  %v425_v16 = vld [vmem:[#allocation4 + $0x130] sm:$0xff] }
 0x11c   :  { %1239 = vmatprep.subr.bf16.mxu0 %v8219_v2  ;;  %1280 = vmatprep.subr.bf16.mxu1 %v8221_v3  ;;  %v8243_v31 = vcombine.high %v421_v14, %v425_v16  ;;  %v8242_v36 = vcombine.low %v421_v14, %v425_v16  ;;  %v8266_v2 = vcombine.low %v445_v51, %v449_v52  ;;  %v469_v20 = vld [vmem:[#allocation4 + $0x290] sm:$0xff] }
 0x11d   :  { %1269 = vmatprep.mubr.bf16.mxu0 %v9617_v23  ;;  %1310 = vmatprep.mubr.bf16.mxu1 %v9617_v23  ;;  %v8245_v23 = vcombine.high %v422_v22, %v426_v0  ;;  %v8268_v3 = vcombine.low %v446_v53, %v450_v54  ;;  %v473_v21 = vld [vmem:[#allocation4 + $0x2b0] sm:$0xff]  ;;  %v8315_v51 = vcombine.high %v493_v45, %v497_v46 }
 0x11e   :  { %v8291_v14 = vcombine.high %v469_v20, %v473_v21  ;;  %v477_v22 = vld [vmem:[#allocation4 + $0x2d0] sm:$0xff] }
 0x11f   :  { %1240 = vmatpush1.bf16.msra.mxu0 %v8218_v8  ;;  %1281 = vmatpush1.bf16.msra.mxu1 %v8220_v9  ;;  %v462_v8 = vld [vmem:[#allocation4 + $0x258] sm:$0xff]  ;;  %v481_v0 = vld [vmem:[#allocation4 + $0x2f0] sm:$0xff] }
 0x120   :  { %1241 = vmatprep.subr.bf16.mxu0 %v8227_v15  ;;  %1282 = vmatprep.subr.bf16.mxu1 %v8229_v17  ;;  %v466_v9 = vld [vmem:[#allocation4 + $0x278] sm:$0xff]  ;;  %v8274_v15 = vcombine.low %v453_v60, %v457_v61  ;;  %v8276_v17 = vcombine.low %v454_v62, %v458_v63  ;;  %v8299_v32 = vcombine.high %v477_v22, %v481_v0  ;;  %v501_v53 = vld [vmem:[#allocation4 + $0x390] sm:$0xff] }
 0x121   :  { %v8285_v19 = vcombine.high %v462_v8, %v466_v9  ;;  %v505_v54 = vld [vmem:[#allocation4 + $0x3b0] sm:$0xff] }
 0x122   :  { %v8323_v60 = vcombine.high %v501_v53, %v505_v54  ;;  %v509_v62 = vld [vmem:[#allocation4 + $0x3d0] sm:$0xff] }
 0x123   :  { %1242 = vmatpush1.bf16.msra.mxu0 %v8226_v10  ;;  %1283 = vmatpush1.bf16.msra.mxu1 %v8228_v11  ;;  %v470_v10 = vld [vmem:[#allocation4 + $0x298] sm:$0xff]  ;;  %v513_v63 = vld [vmem:[#allocation4 + $0x3f0] sm:$0xff] }
 0x124   :  { %1243 = vmatprep.subr.bf16.mxu0 %v8235_v12  ;;  %1284 = vmatprep.subr.bf16.mxu1 %v8237_v13  ;;  %v474_v11 = vld [vmem:[#allocation4 + $0x2b8] sm:$0xff]  ;;  %v8282_v12 = vcombine.low %v461_v6, %v465_v7  ;;  %v8284_v13 = vcombine.low %v462_v8, %v466_v9  ;;  %v8331_v6 = vcombine.high %v509_v62, %v513_v63  ;;  %v9798_v8 = vpop.f32.mrb[2].mxu0 }
 0x125   :  { %v8293_v16 = vcombine.high %v470_v10, %v474_v11  ;;  %v9800_v9 = vpop.f32.mrb[3].mxu0 }
 0x127   :  { %1244 = vmatpush1.bf16.msra.mxu0 %v8234_v24  ;;  %1285 = vmatpush1.bf16.msra.mxu1 %v8236_v26  ;;  %v478_v24 = vld [vmem:[#allocation4 + $0x2d8] sm:$0xff] }
 0x128   :  { %1245 = vmatprep.subr.bf16.mxu0 %v8243_v31  ;;  %1286 = vmatprep.subr.bf16.mxu1 %v8245_v23  ;;  %v482_v26 = vld [vmem:[#allocation4 + $0x2f8] sm:$0xff]  ;;  %v8290_v31 = vcombine.low %v469_v20, %v473_v21  ;;  %v8292_v23 = vcombine.low %v470_v10, %v474_v11  ;;  %v9806_v20 = vpop.f32.mrb[4].mxu0 }
 0x129   :  { %v8301_v33 = vcombine.high %v478_v24, %v482_v26  ;;  %11980 = vst [vmem:[#allocation10_spill] sm:$0xff] %v9806_v20  ;;  %v9808_v21 = vpop.f32.mrb[5].mxu0  ;;  %v1494_v20 = vld [vmem:[#allocation4 + $0x2c8] sm:$0xff] }
 0x12a   :  { %11981 = vst [vmem:[#allocation11_spill] sm:$0xff] %v9808_v21  ;;  %v1490_v21 = vld [vmem:[#allocation4 + $0x2a8] sm:$0xff] }
 0x12b   :  { %1246 = vmatpush1.bf16.msra.mxu0 %v8242_v36  ;;  %1287 = vmatpush1.bf16.msra.mxu1 %v8244_v37  ;;  %v486_v36 = vld [vmem:[#allocation4 + $0x318] sm:$0xff] }
 0x12c   :  { %1247 = vmatprep.subr.bf16.mxu0 %v8251_v39  ;;  %1288 = vmatprep.subr.bf16.mxu1 %v8253_v41  ;;  %v490_v37 = vld [vmem:[#allocation4 + $0x338] sm:$0xff]  ;;  %v8298_v39 = vcombine.low %v477_v22, %v481_v0  ;;  %v8300_v41 = vcombine.low %v478_v24, %v482_v26 }
 0x12d   :  { %v8309_v44 = vcombine.high %v486_v36, %v490_v37 }
 0x12f   :  { %1248 = vmatpush1.bf16.msra.mxu0 %v8250_v47  ;;  %1289 = vmatpush1.bf16.msra.mxu1 %v8252_v48  ;;  %v494_v47 = vld [vmem:[#allocation4 + $0x358] sm:$0xff] }
 0x130   :  { %1249 = vmatprep.subr.bf16.mxu0 %v8259_v49  ;;  %1290 = vmatprep.subr.bf16.mxu1 %v8261_v50  ;;  %v498_v48 = vld [vmem:[#allocation4 + $0x378] sm:$0xff]  ;;  %v8306_v49 = vcombine.low %v485_v34, %v489_v35  ;;  %v8308_v50 = vcombine.low %v486_v36, %v490_v37 }
 0x131   :  { %v8317_v52 = vcombine.high %v494_v47, %v498_v48 }
 0x133   :  { %1250 = vmatpush1.bf16.msra.mxu0 %v8258_v55  ;;  %1291 = vmatpush1.bf16.msra.mxu1 %v8260_v57  ;;  %v502_v55 = vld [vmem:[#allocation4 + $0x398] sm:$0xff] }
 0x134   :  { %1251 = vmatprep.subr.bf16.mxu0 %v8267_v58  ;;  %1292 = vmatprep.subr.bf16.mxu1 %v8269_v59  ;;  %v506_v57 = vld [vmem:[#allocation4 + $0x3b8] sm:$0xff]  ;;  %v8314_v58 = vcombine.low %v493_v45, %v497_v46  ;;  %v8316_v59 = vcombine.low %v494_v47, %v498_v48  ;;  %v1409_v45 = vld [vmem:[#allocation4 + $0x20] sm:$0xff]  ;;  %v1406_v46 = vld [vmem:[#allocation4 + $0x8] sm:$0xff] }
 0x135   :  { %v8325_v61 = vcombine.high %v502_v55, %v506_v57 }
 0x137   :  { %1252 = vmatpush1.bf16.msra.mxu0 %v8266_v2  ;;  %1293 = vmatpush1.bf16.msra.mxu1 %v8268_v3  ;;  %v510_v2 = vld [vmem:[#allocation4 + $0x3d8] sm:$0xff] }
 0x138   :  { %1253 = vmatprep.subr.bf16.mxu0 %v8275_v4  ;;  %1294 = vmatprep.subr.bf16.mxu1 %v8277_v5  ;;  %v514_v3 = vld [vmem:[#allocation4 + $0x3f8] sm:$0xff]  ;;  %v8322_v4 = vcombine.low %v501_v53, %v505_v54  ;;  %v8324_v5 = vcombine.low %v502_v55, %v506_v57  ;;  %v1414_v55 = vld [vmem:[#allocation4 + $0x48] sm:$0xff] }
 0x139   :  { %v8333_v7 = vcombine.high %v510_v2, %v514_v3  ;;  %v1418_v57 = vld [vmem:[#allocation4 + $0x68] sm:$0xff] }
 0x13b   :  { %1254 = vmatpush1.bf16.msra.mxu0 %v8274_v15  ;;  %1295 = vmatpush1.bf16.msra.mxu1 %v8276_v17  ;;  %v9802_v15 = vpop.f32.mrb[2].mxu1 }
 0x13c   :  { %1255 = vmatprep.subr.bf16.mxu0 %v8283_v18  ;;  %1296 = vmatprep.subr.bf16.mxu1 %v8285_v19  ;;  %v9804_v17 = vpop.f32.mrb[3].mxu1  ;;  %v8330_v18 = vcombine.low %v509_v62, %v513_v63  ;;  %v8332_v19 = vcombine.low %v510_v2, %v514_v3  ;;  %v1426_v62 = vld [vmem:[#allocation4 + $0xa8] sm:$0xff]  ;;  %v9875_v2 = vcombine.low %v1414_v55, %v1418_v57 }
 0x13d   :  { %v9810_v10 = vpop.f32.mrb[4].mxu1 }
 0x13e   :  { %11982 = vst [vmem:[#allocation12_spill] sm:$0xff] %v9810_v10  ;;  %v9812_v11 = vpop.f32.mrb[5].mxu1  ;;  %v1497_v10 = vld [vmem:[#allocation4 + $0x2e0] sm:$0xff] }
 0x13f   :  { %1256 = vmatpush1.bf16.msra.mxu0 %v8282_v12  ;;  %1297 = vmatpush1.bf16.msra.mxu1 %v8284_v13  ;;  %11983 = vst [vmem:[#allocation13_spill] sm:$0xff] %v9812_v11  ;;  %v9814_v12 = vpop.f32.mrb[6].mxu0 }
 0x140   :  { %1257 = vmatprep.subr.bf16.mxu0 %v8291_v14  ;;  %1298 = vmatprep.subr.bf16.mxu1 %v8293_v16  ;;  %11984 = vst [vmem:[#allocation14_spill] sm:$0xff] %v9814_v12  ;;  %v9816_v13 = vpop.f32.mrb[7].mxu0  ;;  %v9818_v14 = vpop.f32.mrb[6].mxu1  ;;  %v1486_v12 = vld [vmem:[#allocation4 + $0x288] sm:$0xff] }
 0x141   :  { %11985 = vst [vmem:[#allocation15_spill] sm:$0xff] %v9816_v13  ;;  %11986 = vst [vmem:[#allocation16_spill] sm:$0xff] %v9818_v14  ;;  %v9822_v16 = vpop.f32.mrb[7].mxu1  ;;  %v9824_v22 = vpop.f32.mrb[8].mxu0  ;;  %v1482_v13 = vld [vmem:[#allocation4 + $0x268] sm:$0xff]  ;;  %v1489_v14 = vld [vmem:[#allocation4 + $0x2a0] sm:$0xff] }
 0x142   :  { %11987 = vst [vmem:[#allocation17_spill] sm:$0xff] %v9822_v16  ;;  %11988 = vst [vmem:[#allocation18_spill] sm:$0xff] %v9824_v22  ;;  %v9826_v0 = vpop.f32.mrb[9].mxu0  ;;  %v9828_v24 = vpop.f32.mrb[8].mxu1  ;;  %v1478_v22 = vld [vmem:[#allocation4 + $0x248] sm:$0xff] }
 0x143   :  { %1258 = vmatpush1.bf16.msra.mxu0 %v8290_v31  ;;  %1299 = vmatpush1.bf16.msra.mxu1 %v8292_v23  ;;  %11989 = vst [vmem:[#allocation19_spill] sm:$0xff] %v9826_v0  ;;  %11990 = vst [vmem:[#allocation20_spill] sm:$0xff] %v9828_v24  ;;  %v9830_v26 = vpop.f32.mrb[9].mxu1  ;;  %v9832_v31 = vpop.f32.mrb[10].mxu0  ;;  %v1474_v0 = vld [vmem:[#allocation4 + $0x228] sm:$0xff]  ;;  %v1481_v24 = vld [vmem:[#allocation4 + $0x260] sm:$0xff] }
 0x144   :  { %1259 = vmatprep.subr.bf16.mxu0 %v8299_v32  ;;  %1300 = vmatprep.subr.bf16.mxu1 %v8301_v33  ;;  %11991 = vst [vmem:[#allocation21_spill] sm:$0xff] %v9830_v26  ;;  %11992 = vst [vmem:[#allocation22_spill] sm:$0xff] %v9832_v31  ;;  %v9834_v23 = vpop.f32.mrb[11].mxu0  ;;  %v9836_v32 = vpop.f32.mrb[10].mxu1  ;;  %v1470_v31 = vld [vmem:[#allocation4 + $0x208] sm:$0xff] }
 0x145   :  { %11993 = vst [vmem:[#allocation23_spill] sm:$0xff] %v9834_v23  ;;  %11994 = vst [vmem:[#allocation24_spill] sm:$0xff] %v9836_v32  ;;  %v9838_v33 = vpop.f32.mrb[11].mxu1  ;;  %v9840_v34 = vpop.f32.mrb[12].mxu0  ;;  %v1466_v23 = vld [vmem:[#allocation4 + $0x1e8] sm:$0xff]  ;;  %v1473_v32 = vld [vmem:[#allocation4 + $0x220] sm:$0xff] }
 0x146   :  { %11995 = vst [vmem:[#allocation25_spill] sm:$0xff] %v9838_v33  ;;  %11996 = vst [vmem:[#allocation26_spill] sm:$0xff] %v9840_v34  ;;  %v9844_v35 = vpop.f32.mrb[12].mxu1  ;;  %v1462_v34 = vld [vmem:[#allocation4 + $0x1c8] sm:$0xff] }
 0x147   :  { %1260 = vmatpush1.bf16.msra.mxu0 %v8298_v39  ;;  %1301 = vmatpush1.bf16.msra.mxu1 %v8300_v41  ;;  %11998 = vst [vmem:[#allocation28_spill] sm:$0xff] %v9844_v35  ;;  %v9846_v36 = vpop.f32.mrb[13].mxu1  ;;  %v1465_v35 = vld [vmem:[#allocation4 + $0x1e0] sm:$0xff] }
 0x148   :  { %1261 = vmatprep.subr.bf16.mxu0 %v8307_v43  ;;  %1302 = vmatprep.subr.bf16.mxu1 %v8309_v44  ;;  %11999 = vst [vmem:[#allocation29_spill] sm:$0xff] %v9846_v36  ;;  %v9852_v41 = vpop.f32.mrb[14].mxu1  ;;  %v1405_v44 = vld [vmem:[#allocation4] sm:$0xff] }
 0x149   :  { %12002 = vst [vmem:[#allocation32_spill] sm:$0xff] %v9852_v41  ;;  %v9854_v43 = vpop.f32.mrb[15].mxu1  ;;  %v9856_v47 = vcombine.low %v1405_v44, %v1409_v45  ;;  %v9858_v48 = vcombine.high %v1405_v44, %v1409_v45 }
 0x14a   :  { %12003 = vst [vmem:[#allocation33_spill] sm:$0xff] %v9854_v43 }
 0x14b   :  { %1262 = vmatpush1.bf16.msra.mxu0 %v8306_v49  ;;  %1303 = vmatpush1.bf16.msra.mxu1 %v8308_v50  ;;  %v1410_v49 = vld [vmem:[#allocation4 + $0x28] sm:$0xff]  ;;  %v1413_v50 = vld [vmem:[#allocation4 + $0x40] sm:$0xff] }
 0x14c   :  { %1263 = vmatprep.subr.bf16.mxu0 %v8315_v51  ;;  %1304 = vmatprep.subr.bf16.mxu1 %v8317_v52  ;;  %v1417_v51 = vld [vmem:[#allocation4 + $0x60] sm:$0xff]  ;;  %v9860_v52 = vcombine.low %v1406_v46, %v1410_v49  ;;  %v9862_v53 = vcombine.high %v1406_v46, %v1410_v49 }
 0x14d   :  { %v9864_v54 = vcombine.high %v1413_v50, %v1417_v51  ;;  %v9871_v63 = vcombine.low %v1413_v50, %v1417_v51  ;;  %v1437_v51 = vld [vmem:[#allocation4 + $0x100] sm:$0xff] }
 0x14f   :  { %1264 = vmatpush1.bf16.msra.mxu0 %v8314_v58  ;;  %1305 = vmatpush1.bf16.msra.mxu1 %v8316_v59  ;;  %v1421_v58 = vld [vmem:[#allocation4 + $0x80] sm:$0xff]  ;;  %v9867_v59 = vcombine.high %v1414_v55, %v1418_v57  ;;  %v1438_v57 = vld [vmem:[#allocation4 + $0x108] sm:$0xff] }
 0x150   :  { %1265 = vmatprep.subr.bf16.mxu0 %v8323_v60  ;;  %1306 = vmatprep.subr.bf16.mxu1 %v8325_v61  ;;  %v1425_v60 = vld [vmem:[#allocation4 + $0xa0] sm:$0xff]  ;;  %v1422_v61 = vld [vmem:[#allocation4 + $0x88] sm:$0xff] }
 0x151   :  { %v9877_v3 = vcombine.high %v1421_v58, %v1425_v60  ;;  %v9887_v44 = vcombine.low %v1422_v61, %v1426_v62  ;;  %v1441_v55 = vld [vmem:[#allocation4 + $0x120] sm:$0xff] }
 0x153   :  { %1266 = vmatpush1.bf16.msra.mxu0 %v8322_v4  ;;  %1307 = vmatpush1.bf16.msra.mxu1 %v8324_v5  ;;  %v9880_v4 = vcombine.high %v1422_v61, %v1426_v62  ;;  %v1429_v5 = vld [vmem:[#allocation4 + $0xc0] sm:$0xff]  ;;  %v9906_v61 = vcombine.low %v1437_v51, %v1441_v55 }
 0x154   :  { %1267 = vmatprep.subr.bf16.mxu0 %v8331_v6  ;;  %1308 = vmatprep.subr.bf16.mxu1 %v8333_v7  ;;  %v1433_v6 = vld [vmem:[#allocation4 + $0xe0] sm:$0xff]  ;;  %v1430_v7 = vld [vmem:[#allocation4 + $0xc8] sm:$0xff] }
 0x155   :  { %v9889_v45 = vcombine.high %v1429_v5, %v1433_v6  ;;  %v9895_v49 = vcombine.low %v1429_v5, %v1433_v6  ;;  %v1445_v6 = vld [vmem:[#allocation4 + $0x140] sm:$0xff] }
 0x157   :  { %1268 = vmatpush1.bf16.msra.mxu0 %v8330_v18  ;;  %1309 = vmatpush1.bf16.msra.mxu1 %v8332_v19  ;;  %v1434_v18 = vld [vmem:[#allocation4 + $0xe8] sm:$0xff]  ;;  %v9883_v19 = vcombine.low %v1421_v58, %v1425_v60  ;;  %v9904_v58 = vcombine.high %v1437_v51, %v1441_v55 }
 0x158   :  { %2173 = vmatprep.subr.bf16.mxu0 %v9858_v48  ;;  %2214 = vmatprep.subr.bf16.mxu1 %v9862_v53  ;;  %v9892_v46 = vcombine.high %v1430_v7, %v1434_v18  ;;  %v9899_v50 = vcombine.low %v1430_v7, %v1434_v18  ;;  %v1442_v60 = vld [vmem:[#allocation4 + $0x128] sm:$0xff]  ;;  %v1449_v7 = vld [vmem:[#allocation4 + $0x160] sm:$0xff] }
 0x159   :  { %v9908_v62 = vcombine.low %v1438_v57, %v1442_v60  ;;  %v9911_v5 = vcombine.high %v1438_v57, %v1442_v60  ;;  %v1446_v18 = vld [vmem:[#allocation4 + $0x148] sm:$0xff]  ;;  %v9915_v43 = vcombine.high %v1445_v6, %v1449_v7  ;;  %v9918_v51 = vcombine.low %v1445_v6, %v1449_v7  ;;  %v1453_v57 = vld [vmem:[#allocation4 + $0x180] sm:$0xff] }
 0x15a   :  { %1270 = vmatmul.mubr.bf16.vlgmr.msra.gmra.mrb[20].mxu0 %v9786_v1  ;;  %1311 = vmatmul.mubr.bf16.vlgmr.msra.gmra.mrb[20].mxu1 %v9786_v1  ;;  %v9842_v1 = vpop.f32.mrb[13].mxu0  ;;  %v1457_v60 = vld [vmem:[#allocation4 + $0x1a0] sm:$0xff] }
 0x15b   :  { %11997 = vst [vmem:[#allocation27_spill] sm:$0xff] %v9842_v1  ;;  %v9848_v37 = vpop.f32.mrb[14].mxu0  ;;  %2174 = vmatpush1.bf16.msra.mxu0 %v9856_v47  ;;  %2215 = vmatpush1.bf16.msra.mxu1 %v9860_v52  ;;  %v9927_v36 = vcombine.high %v1453_v57, %v1457_v60  ;;  %v1458_v1 = vld [vmem:[#allocation4 + $0x1a8] sm:$0xff]  ;;  %v9930_v6 = vcombine.low %v1453_v57, %v1457_v60 }
 0x15c   :  { %12000 = vst [vmem:[#allocation30_spill] sm:$0xff] %v9848_v37  ;;  %v9850_v39 = vpop.f32.mrb[15].mxu0  ;;  %2175 = vmatprep.subr.bf16.mxu0 %v9864_v54  ;;  %2216 = vmatprep.subr.bf16.mxu1 %v9867_v59  ;;  %v1454_v37 = vld [vmem:[#allocation4 + $0x188] sm:$0xff]  ;;  %v9944_v60 = vcombine.low %v1462_v34, %v1466_v23 }
 0x15d   :  { %12001 = vst [vmem:[#allocation31_spill] sm:$0xff] %v9850_v39  ;;  %v1450_v39 = vld [vmem:[#allocation4 + $0x168] sm:$0xff]  ;;  %v9932_v7 = vcombine.low %v1454_v37, %v1458_v1 }
 0x15e   :  { %v9920_v55 = vcombine.low %v1446_v18, %v1450_v39  ;;  %v9922_v41 = vcombine.high %v1446_v18, %v1450_v39  ;;  %v9934_v39 = vcombine.high %v1454_v37, %v1458_v1  ;;  %v1461_v18 = vld [vmem:[#allocation4 + $0x1c0] sm:$0xff]  ;;  %v9946_v1 = vcombine.high %v1462_v34, %v1466_v23 }
 0x15f   :  { %2176 = vmatpush1.bf16.msra.mxu0 %v9871_v63  ;;  %2217 = vmatpush1.bf16.msra.mxu1 %v9875_v2  ;;  %v9939_v33 = vcombine.high %v1461_v18, %v1465_v35  ;;  %v9942_v57 = vcombine.low %v1461_v18, %v1465_v35  ;;  %v1469_v37 = vld [vmem:[#allocation4 + $0x200] sm:$0xff]  ;;  %v9956_v18 = vcombine.low %v1470_v31, %v1474_v0 }
 0x160   :  { %2177 = vmatprep.subr.bf16.mxu0 %v9877_v3  ;;  %2218 = vmatprep.subr.bf16.mxu1 %v9880_v4  ;;  %v9951_v26 = vcombine.high %v1469_v37, %v1473_v32  ;;  %v9954_v35 = vcombine.low %v1469_v37, %v1473_v32  ;;  %v9958_v23 = vcombine.high %v1470_v31, %v1474_v0  ;;  %v1477_v34 = vld [vmem:[#allocation4 + $0x240] sm:$0xff] }
 0x161   :  { %12005 = vst [vmem:[#allocation35_spill] sm:$0xff] %v9956_v18  ;;  %v9963_v16 = vcombine.high %v1477_v34, %v1481_v24  ;;  %v9966_v32 = vcombine.low %v1477_v34, %v1481_v24  ;;  %v9968_v37 = vcombine.low %v1478_v22, %v1482_v13  ;;  %v9970_v0 = vcombine.high %v1478_v22, %v1482_v13  ;;  %v1485_v31 = vld [vmem:[#allocation4 + $0x280] sm:$0xff] }
 0x162   :  { %12004 = vst [vmem:[#allocation34_spill] sm:$0xff] %v9954_v35  ;;  %v9975_v11 = vcombine.high %v1485_v31, %v1489_v14  ;;  %v9978_v24 = vcombine.low %v1485_v31, %v1489_v14  ;;  %v9980_v34 = vcombine.low %v1486_v12, %v1490_v21  ;;  %v9982_v13 = vcombine.high %v1486_v12, %v1490_v21  ;;  %v1493_v22 = vld [vmem:[#allocation4 + $0x2c0] sm:$0xff] }
 0x163   :  { %2178 = vmatpush1.bf16.msra.mxu0 %v9883_v19  ;;  %2219 = vmatpush1.bf16.msra.mxu1 %v9887_v44  ;;  %12006 = vst [vmem:[#allocation36_spill] sm:$0xff] %v9963_v16  ;;  %12007 = vst [vmem:[#allocation37_spill] sm:$0xff] %v9966_v32  ;;  %v9990_v14 = vcombine.low %v1493_v22, %v1497_v10  ;;  %v1501_v12 = vld [vmem:[#allocation4 + $0x300] sm:$0xff] }
 0x164   :  { %2179 = vmatprep.subr.bf16.mxu0 %v9889_v45  ;;  %2220 = vmatprep.subr.bf16.mxu1 %v9892_v46  ;;  %12008 = vst [vmem:[#allocation38_spill] sm:$0xff] %v9968_v37  ;;  %12009 = vst [vmem:[#allocation39_spill] sm:$0xff] %v9970_v0 }
 0x165   :  { %12010 = vst [vmem:[#allocation40_spill] sm:$0xff] %v9975_v11  ;;  %12011 = vst [vmem:[#allocation41_spill] sm:$0xff] %v9978_v24 }
 0x166   :  { %12012 = vst [vmem:[#allocation42_spill] sm:$0xff] %v9980_v34  ;;  %12013 = vst [vmem:[#allocation43_spill] sm:$0xff] %v9982_v13 }
 0x167   :  { %2180 = vmatpush1.bf16.msra.mxu0 %v9895_v49  ;;  %2221 = vmatpush1.bf16.msra.mxu1 %v9899_v50  ;;  %12015 = vst [vmem:[#allocation45_spill] sm:$0xff] %v9990_v14 }
 0x168   :  { %2181 = vmatprep.subr.bf16.mxu0 %v9904_v58  ;;  %2222 = vmatprep.subr.bf16.mxu1 %v9911_v5 }
 0x16b   :  { %2182 = vmatpush1.bf16.msra.mxu0 %v9906_v61  ;;  %2223 = vmatpush1.bf16.msra.mxu1 %v9908_v62 }
 0x16c   :  { %2183 = vmatprep.subr.bf16.mxu0 %v9915_v43  ;;  %2224 = vmatprep.subr.bf16.mxu1 %v9922_v41 }
 0x16f   :  { %2184 = vmatpush1.bf16.msra.mxu0 %v9918_v51  ;;  %2225 = vmatpush1.bf16.msra.mxu1 %v9920_v55 }
 0x170   :  { %2185 = vmatprep.subr.bf16.mxu0 %v9927_v36  ;;  %2226 = vmatprep.subr.bf16.mxu1 %v9934_v39 }
 0x173   :  { %2186 = vmatpush1.bf16.msra.mxu0 %v9930_v6  ;;  %2227 = vmatpush1.bf16.msra.mxu1 %v9932_v7 }
 0x174   :  { %2187 = vmatprep.subr.bf16.mxu0 %v9939_v33  ;;  %2228 = vmatprep.subr.bf16.mxu1 %v9946_v1 }
 0x177   :  { %2188 = vmatpush1.bf16.msra.mxu0 %v9942_v57  ;;  %2229 = vmatpush1.bf16.msra.mxu1 %v9944_v60 }
 0x178   :  { %2189 = vmatprep.subr.bf16.mxu0 %v9951_v26  ;;  %2230 = vmatprep.subr.bf16.mxu1 %v9958_v23 }
 0x17b   :  { %2190 = vmatpush1.bf16.msra.mxu0 %v9954_v35  ;;  %2231 = vmatpush1.bf16.msra.mxu1 %v9956_v18  ;;  %v1530_v35 = vld [vmem:[#allocation4 + $0x3e8] sm:$0xff] }
 0x17c   :  { %2191 = vmatprep.subr.bf16.mxu0 %v9963_v16  ;;  %2232 = vmatprep.subr.bf16.mxu1 %v9970_v0  ;;  %v1498_v0 = vld [vmem:[#allocation4 + $0x2e8] sm:$0xff]  ;;  %v1525_v16 = vld [vmem:[#allocation4 + $0x3c0] sm:$0xff] }
 0x17d   :  { %v9992_v31 = vcombine.low %v1494_v20, %v1498_v0  ;;  %v9994_v21 = vcombine.high %v1494_v20, %v1498_v0  ;;  %v1509_v0 = vld [vmem:[#allocation4 + $0x340] sm:$0xff] }
 0x17f   :  { %2192 = vmatpush1.bf16.msra.mxu0 %v9966_v32  ;;  %2233 = vmatpush1.bf16.msra.mxu1 %v9968_v37  ;;  %v9987_v32 = vcombine.high %v1493_v22, %v1497_v10  ;;  %12016 = vst [vmem:[#allocation46_spill] sm:$0xff] %v9992_v31  ;;  %12017 = vst [vmem:[#allocation47_spill] sm:$0xff] %v9994_v21  ;;  %v1506_v37 = vld [vmem:[#allocation4 + $0x328] sm:$0xff] }
 0x180   :  { %2193 = vmatprep.subr.bf16.mxu0 %v9975_v11  ;;  %2234 = vmatprep.subr.bf16.mxu1 %v9982_v13  ;;  %v1502_v13 = vld [vmem:[#allocation4 + $0x308] sm:$0xff] }
 0x181   :  { %12014 = vst [vmem:[#allocation44_spill] sm:$0xff] %v9987_v32  ;;  %v10004_v22 = vcombine.low %v1502_v13, %v1506_v37  ;;  %v10006_v20 = vcombine.high %v1502_v13, %v1506_v37 }
 0x183   :  { %2194 = vmatpush1.bf16.msra.mxu0 %v9978_v24  ;;  %2235 = vmatpush1.bf16.msra.mxu1 %v9980_v34  ;;  %v1505_v24 = vld [vmem:[#allocation4 + $0x320] sm:$0xff]  ;;  %12020 = vst [vmem:[#allocation50_spill] sm:$0xff] %v10004_v22  ;;  %12021 = vst [vmem:[#allocation51_spill] sm:$0xff] %v10006_v20 }
 0x184   :  { %2195 = vmatprep.subr.bf16.mxu0 %v9987_v32  ;;  %2236 = vmatprep.subr.bf16.mxu1 %v9994_v21  ;;  %v9999_v11 = vcombine.high %v1501_v12, %v1505_v24  ;;  %v10002_v10 = vcombine.low %v1501_v12, %v1505_v24  ;;  %v1510_v21 = vld [vmem:[#allocation4 + $0x348] sm:$0xff]  ;;  %v1517_v24 = vld [vmem:[#allocation4 + $0x380] sm:$0xff] }
 0x185   :  { %v1521_v12 = vld [vmem:[#allocation4 + $0x3a0] sm:$0xff] }
 0x186   :  { %12018 = vst [vmem:[#allocation48_spill] sm:$0xff] %v9999_v11  ;;  %12019 = vst [vmem:[#allocation49_spill] sm:$0xff] %v10002_v10 }
 0x187   :  { %2196 = vmatpush1.bf16.msra.mxu0 %v9990_v14  ;;  %2237 = vmatpush1.bf16.msra.mxu1 %v9992_v31  ;;  %v1513_v14 = vld [vmem:[#allocation4 + $0x360] sm:$0xff]  ;;  %v1514_v31 = vld [vmem:[#allocation4 + $0x368] sm:$0xff] }
 0x188   :  { %2197 = vmatprep.subr.bf16.mxu0 %v9999_v11  ;;  %2238 = vmatprep.subr.bf16.mxu1 %v10006_v20  ;;  %v10011_v32 = vcombine.low %v1509_v0, %v1513_v14  ;;  %v10013_v34 = vcombine.high %v1509_v0, %v1513_v14  ;;  %v10016_v37 = vcombine.low %v1510_v21, %v1514_v31  ;;  %v1518_v20 = vld [vmem:[#allocation4 + $0x388] sm:$0xff]  ;;  %v1529_v14 = vld [vmem:[#allocation4 + $0x3e0] sm:$0xff] }
 0x189   :  { %v10018_v13 = vcombine.high %v1510_v21, %v1514_v31  ;;  %v10020_v11 = vcombine.high %v1517_v24, %v1521_v12  ;;  %v10027_v0 = vcombine.low %v1517_v24, %v1521_v12  ;;  %v10030_v31 = vcombine.high %v1525_v16, %v1529_v14  ;;  %v1408_v12 = vld [vmem:[#allocation4 + $0x18] sm:$0xff] }
 0x18a   :  { %12022 = vst [vmem:[#allocation52_spill] sm:$0xff] %v10011_v32  ;;  %12023 = vst [vmem:[#allocation53_spill] sm:$0xff] %v10013_v34 }
 0x18b   :  { %2198 = vmatpush1.bf16.msra.mxu0 %v10002_v10  ;;  %2239 = vmatpush1.bf16.msra.mxu1 %v10004_v22  ;;  %12024 = vst [vmem:[#allocation54_spill] sm:$0xff] %v10016_v37  ;;  %12025 = vst [vmem:[#allocation55_spill] sm:$0xff] %v10018_v13  ;;  %v1522_v10 = vld [vmem:[#allocation4 + $0x3a8] sm:$0xff] }
 0x18c   :  { %12026 = vst [vmem:[#allocation56_spill] sm:$0xff] %v10020_v11  ;;  %2199 = vmatprep.subr.bf16.mxu0 %v10013_v34  ;;  %v10023_v18 = vcombine.high %v1518_v20, %v1522_v10  ;;  %2240 = vmatprep.subr.bf16.mxu1 %v10018_v13  ;;  %12028 = vst [vmem:[#allocation58_spill] sm:$0xff] %v10027_v0  ;;  %v1526_v22 = vld [vmem:[#allocation4 + $0x3c8] sm:$0xff]  ;;  %v10033_v21 = vcombine.low %v1518_v20, %v1522_v10  ;;  %v1407_v10 = vld [vmem:[#allocation4 + $0x10] sm:$0xff] }
 0x18d   :  { %12029 = vst [vmem:[#allocation59_spill] sm:$0xff] %v10030_v31  ;;  %v10036_v34 = vcombine.high %v1526_v22, %v1530_v35  ;;  %v10039_v13 = vcombine.low %v1525_v16, %v1529_v14  ;;  %v10043_v24 = vcombine.low %v1526_v22, %v1530_v35  ;;  %v1411_v20 = vld [vmem:[#allocation4 + $0x30] sm:$0xff]  ;;  %v172_v35 = vadd.f32 %v9798_v8, %v9764_v28 }
 0x18e   :  { %12027 = vst [vmem:[#allocation57_spill] sm:$0xff] %v10023_v18  ;;  %12030 = vst [vmem:[#allocation60_spill] sm:$0xff] %v10033_v21  ;;  %v10050_v16 = vcombine.low %v1407_v10, %v1411_v20  ;;  %v285_v22 = vadd.f32 %v9802_v15, %v9774_v38 }
 0x18f   :  { %2200 = vmatpush1.bf16.msra.mxu0 %v10011_v32  ;;  %2241 = vmatpush1.bf16.msra.mxu1 %v10016_v37  ;;  %12031 = vst [vmem:[#allocation61_spill] sm:$0xff] %v10036_v34  ;;  %12032 = vst [vmem:[#allocation62_spill] sm:$0xff] %v10039_v13 }
 0x190   :  { %2201 = vmatprep.subr.bf16.mxu0 %v10020_v11  ;;  %2242 = vmatprep.subr.bf16.mxu1 %v10023_v18  ;;  %12033 = vst [vmem:[#allocation63_spill] sm:$0xff] %v10043_v24  ;;  %v10047_v18 = vcombine.high %v1407_v10, %v1411_v20  ;;  %v1412_v11 = vld [vmem:[#allocation4 + $0x38] sm:$0xff]  ;;  %v287_v10 = vadd.f32 %v9804_v17, %v9780_v42 }
 0x191   :  { %v10052_v14 = vcombine.low %v1408_v12, %v1412_v11 }
 0x192   :  { %12034 = vst [vmem:[#allocation64_spill] sm:$0xff] %v10047_v18 }
 0x193   :  { %2202 = vmatpush1.bf16.msra.mxu0 %v10027_v0  ;;  %2243 = vmatpush1.bf16.msra.mxu1 %v10033_v21 }
 0x194   :  { %2203 = vmatprep.subr.bf16.mxu0 %v10030_v31  ;;  %2244 = vmatprep.subr.bf16.mxu1 %v10036_v34  ;;  %v10054_v31 = vcombine.high %v1408_v12, %v1412_v11 }
 0x196   :  { %12035 = vst [vmem:[#allocation65_spill] sm:$0xff] %v10054_v31 }
 0x197   :  { %2204 = vmatpush1.bf16.msra.mxu0 %v10039_v13  ;;  %2245 = vmatpush1.bf16.msra.mxu1 %v10043_v24  ;;  %v174_v13 = vadd.f32 %v9800_v9, %v9767_v29 }
 0x198   :  { %2255 = vmatprep.subr.bf16.mxu0 %v10047_v18  ;;  %2296 = vmatprep.subr.bf16.mxu1 %v10054_v31 }
 0x1ed   :  { %v1189_v20 = vpop.f32.mrb[16].mxu0  ;;  %v1230_v24 = vpop.f32.mrb[16].mxu1 }
 0x1ee   :  { %v1374_v11 = vadd.f32 %v1189_v20, %v172_v35  ;;  %v1376_v12 = vadd.f32 %v1230_v24, %v285_v22  ;;  %v1191_v34 = vpop.f32.mrb[17].mxu0  ;;  %v1232_v18 = vpop.f32.mrb[17].mxu1 }
 0x1ef   :  { %v1375_v21 = vadd.f32 %v1191_v34, %v174_v13  ;;  %v1377_v31 = vadd.f32 %v1232_v18, %v287_v10  ;;  %v1193_v0 = vpop.f32.mrb[18].mxu0  ;;  %v1234_v37 = vpop.f32.mrb[18].mxu1 }
 0x1f0   :  { %v8337_v8 = vmul.f32 -1.442695, %v1374_v11  ;;  %v1194_v28 = vpop.f32.mrb[19].mxu0  ;;  %v1235_v32 = vpop.f32.mrb[19].mxu1 }
 0x1f1   :  { %v8338_v15 = vmul.f32 -1.442695, %v1375_v21  ;;  %v1319_v28 = vld [vmem:[%s11716_s4] sm:$0xf] }
 0x1f2   :  { %9349 = vpow2.f32 %v8337_v8  ;;  %v1324_v32 = vrot.slane %v1319_v28, %v9756_v25  ;;  %v1328_v13 = vrot.slane %v1319_v28, %v9761_v27 }
 0x1f3   :  { %9351 = vpow2.f32 %v8338_v15 }
 0x1f4   :  { %9353 = vtanh.f32 %v1377_v31 }
 0x1fc   :  { %v9350_v9 = vpop.eup %9349 }
 0x1fd   :  { %v1387_v29 = vadd.f32 1.0, %v9350_v9  ;;  %v9352_v38 = vpop.eup %9351 }
 0x1fe   :  { %v1388_v17 = vadd.f32 1.0, %v9352_v38  ;;  %v9354_v24 = vpop.eup %9353 }
 0x1ff   :  { %9355 = vrcp.f32 %v1387_v29 }
 0x200   :  { %9357 = vrcp.f32 %v1388_v17  ;;  %v1332_v17 = vrot.slane %v1319_v28, %v9769_v30 }
 0x209   :  { %v9356_v35 = vpop.eup %9355 }
 0x20a   :  { %v1398_v22 = vmul.f32 %v9356_v35, %v9354_v24  ;;  %v9358_v34 = vpop.eup %9357  ;;  %v1336_v24 = vrot.slane %v1319_v28, %v9776_v40 }
 0x20b   :  { %v1397_v18 = vmul.f32 %v9358_v34, %v9783_v56 }
 0x20d   :  { %v10067_v37 = vadd.f32 %v1398_v22, %v1397_v18  ;;  %v8339_v22 = vmul.f32 -1.442695, %v1376_v12 }
 0x22d   :  { %v1271_v0 = vpop.f32.mrb[20].mxu0  ;;  %v1312_v29 = vpop.f32.mrb[20].mxu1 }
 0x22e   :  { %v1341_v38 = vadd.f32 %v1324_v32, %v1271_v0  ;;  %v1273_v31 = vpop.f32.mrb[21].mxu0  ;;  %v1314_v21 = vpop.f32.mrb[21].mxu1  ;;  %v1343_v35 = vadd.f32 %v1332_v17, %v1312_v29 }
 0x22f   :  { %v1342_v10 = vadd.f32 %v1328_v13, %v1273_v31  ;;  %v1275_v20 = vpop.f32.mrb[22].mxu0  ;;  %v1316_v11 = vpop.f32.mrb[22].mxu1  ;;  %v1344_v34 = vadd.f32 %v1336_v24, %v1314_v21 }
 0x230   :  { %v8334_v8 = vmul.f32 -1.442695, %v1341_v38  ;;  %v1276_v56 = vpop.f32.mrb[23].mxu0  ;;  %v1317_v15 = vpop.f32.mrb[23].mxu1  ;;  %v8336_v18 = vmul.f32 -1.442695, %v1343_v35 }
 0x231   :  { %v8335_v9 = vmul.f32 -1.442695, %v1342_v10 }
 0x232   :  { %9359 = vpow2.f32 %v8334_v8 }
 0x233   :  { %9361 = vpow2.f32 %v8335_v9 }
 0x234   :  { %9363 = vpow2.f32 %v8339_v22 }
 0x235   :  { %9365 = vtanh.f32 %v1344_v34  ;;  %v1415_v34 = vld [vmem:[#allocation4 + $0x50] sm:$0xff] }
 0x236   :  { %9367 = vpow2.f32 %v8336_v18  ;;  %v1419_v18 = vld [vmem:[#allocation4 + $0x70] sm:$0xff] }
 0x23c   :  { %v9360_v32 = vpop.eup %9359 }
 0x23d   :  { %v1354_v0 = vadd.f32 1.0, %v9360_v32  ;;  %v9362_v13 = vpop.eup %9361  ;;  %v1416_v32 = vld [vmem:[#allocation4 + $0x58] sm:$0xff] }
 0x23e   :  { %v1355_v38 = vadd.f32 1.0, %v9362_v13  ;;  %v9364_v31 = vpop.eup %9363 }
 0x23f   :  { %9369 = vrcp.f32 %v1354_v0  ;;  %v9366_v10 = vpop.eup %9365  ;;  %v1389_v8 = vadd.f32 1.0, %v9364_v31  ;;  %v1420_v0 = vld [vmem:[#allocation4 + $0x78] sm:$0xff]  ;;  %v1423_v31 = vld [vmem:[#allocation4 + $0x90] sm:$0xff] }
 0x240   :  { %9371 = vrcp.f32 %v1355_v38  ;;  %v9368_v20 = vpop.eup %9367 }
 0x241   :  { %v1356_v29 = vadd.f32 1.0, %v9368_v20  ;;  %9373 = vtanh.f32 %v10067_v37  ;;  %v10088_v20 = vcombine.high %v1416_v32, %v1420_v0 }
 0x242   :  { %9375 = vrcp.f32 %v1389_v8  ;;  %v1424_v8 = vld [vmem:[#allocation4 + $0x98] sm:$0xff] }
 0x243   :  { %9377 = vrcp.f32 %v1356_v29  ;;  %12038 = vst [vmem:[#allocation68_spill] sm:$0xff] %v10088_v20  ;;  %v10096_v29 = vcombine.low %v1416_v32, %v1420_v0 }
 0x245   :  { %12040 = vst [vmem:[#allocation70_spill] sm:$0xff] %v10096_v29 }
 0x249   :  { %v9370_v11 = vpop.eup %9369 }
 0x24a   :  { %v1365_v56 = vmul.f32 %v9370_v11, %v9366_v10  ;;  %v9372_v28 = vpop.eup %9371  ;;  %v10086_v10 = vcombine.high %v1415_v34, %v1419_v18  ;;  %v1427_v11 = vld [vmem:[#allocation4 + $0xb0] sm:$0xff] }
 0x24b   :  { %v1364_v12 = vmul.f32 0.0, %v9372_v28  ;;  %v9374_v15 = vpop.eup %9373  ;;  %v10094_v28 = vcombine.low %v1415_v34, %v1419_v18  ;;  %v10106_v34 = vcombine.low %v1423_v31, %v1427_v11 }
 0x24c   :  { %v9376_v9 = vpop.eup %9375  ;;  %12037 = vst [vmem:[#allocation67_spill] sm:$0xff] %v10086_v10 }
 0x24d   :  { %v10077_v21 = vadd.f32 %v1365_v56, %v1364_v12  ;;  %v9378_v17 = vpop.eup %9377  ;;  %v1401_v35 = vmul.f32 %v9376_v9, %v9374_v15  ;;  %v1428_v56 = vld [vmem:[#allocation4 + $0xb8] sm:$0xff]  ;;  %12039 = vst [vmem:[#allocation69_spill] sm:$0xff] %v10094_v28  ;;  %v10098_v12 = vcombine.high %v1423_v31, %v1427_v11  ;;  %v1431_v9 = vld [vmem:[#allocation4 + $0xd0] sm:$0xff]  ;;  %12043 = vst [vmem:[#allocation73_spill] sm:$0xff] %v10106_v34 }
 0x24e   :  { %v10100_v15 = vcombine.high %v1424_v8, %v1428_v56  ;;  %v10108_v18 = vcombine.low %v1424_v8, %v1428_v56 }
 0x24f   :  { %9379 = vtanh.f32 %v10077_v21  ;;  %v10084_v38 = vpack.c.bf16 %v1401_v35, %v1401_v35  ;;  %12041 = vst [vmem:[#allocation71_spill] sm:$0xff] %v10098_v12  ;;  %v1436_v35 = vld [vmem:[#allocation4 + $0xf8] sm:$0xff] }
 0x250   :  { %12042 = vst [vmem:[#allocation72_spill] sm:$0xff] %v10100_v15  ;;  %12044 = vst [vmem:[#allocation74_spill] sm:$0xff] %v10108_v18 }
 0x259   :  { %v9380_v24 = vpop.eup %9379 }
 0x25a   :  { %v10080_v22 = vmul.f32 %v9380_v24, %v9378_v17  ;;  %v1435_v17 = vld [vmem:[#allocation4 + $0xf0] sm:$0xff]  ;;  %v1432_v24 = vld [vmem:[#allocation4 + $0xd8] sm:$0xff] }
 0x25b   :  { %v10112_v32 = vcombine.high %v1431_v9, %v1435_v17  ;;  %v10114_v0 = vcombine.high %v1432_v24, %v1436_v35  ;;  %v10118_v31 = vcombine.low %v1431_v9, %v1435_v17  ;;  %v10120_v11 = vcombine.low %v1432_v24, %v1436_v35 }
 0x25c   :  { %12036 = vst [vmem:[#allocation66_spill] sm:$0xff] %v10080_v22  ;;  %v1404_v13 = vpack.c.bf16 %v10080_v22, %v10080_v22  ;;  %v1443_v22 = vld [vmem:[#allocation4 + $0x130] sm:$0xff] }
 0x25d   :  { %12045 = vst [vmem:[#allocation75_spill] sm:$0xff] %v10112_v32  ;;  %12046 = vst [vmem:[#allocation76_spill] sm:$0xff] %v10114_v0 }
 0x25e   :  { %2205 = vmatprep.mubr.bf16.mxu0 %v1404_v13  ;;  %2246 = vmatprep.mubr.bf16.mxu1 %v1404_v13  ;;  %12047 = vst [vmem:[#allocation77_spill] sm:$0xff] %v10118_v31  ;;  %12048 = vst [vmem:[#allocation78_spill] sm:$0xff] %v10120_v11 }
 0x25f   :  { %2206 = vmatmul.mubr.bf16.vlgmr.msra.gmra.mrb[24].mxu0 %v10084_v38  ;;  %2247 = vmatmul.mubr.bf16.vlgmr.msra.gmra.mrb[24].mxu1 %v10084_v38 }
 0x260   :  { %2256 = vmatpush1.bf16.msra.mxu0 %v10050_v16  ;;  %2297 = vmatpush1.bf16.msra.mxu1 %v10052_v14 }
 0x261   :  { %2287 = vmatprep.mubr.bf16.mxu0 %v1404_v13  ;;  %2328 = vmatprep.mubr.bf16.mxu1 %v1404_v13  ;;  %v1439_v13 = vld [vmem:[#allocation4 + $0x110] sm:$0xff] }
 0x262   :  { %2257 = vmatprep.subr.bf16.mxu0 %v10086_v10  ;;  %2298 = vmatprep.subr.bf16.mxu1 %v10088_v20  ;;  %v1440_v20 = vld [vmem:[#allocation4 + $0x118] sm:$0xff]  ;;  %v10124_v8 = vcombine.high %v1439_v13, %v1443_v22  ;;  %v10130_v9 = vcombine.low %v1439_v13, %v1443_v22 }
 0x263   :  { %v1444_v10 = vld [vmem:[#allocation4 + $0x138] sm:$0xff] }
 0x264   :  { %2258 = vmatpush1.bf16.msra.mxu0 %v10094_v28  ;;  %2299 = vmatpush1.bf16.msra.mxu1 %v10096_v29  ;;  %12049 = vst [vmem:[#allocation79_spill] sm:$0xff] %v10124_v8  ;;  %v10126_v56 = vcombine.high %v1440_v20, %v1444_v10  ;;  %v1448_v29 = vld [vmem:[#allocation4 + $0x158] sm:$0xff]  ;;  %12051 = vst [vmem:[#allocation81_spill] sm:$0xff] %v10130_v9  ;;  %v10132_v17 = vcombine.low %v1440_v20, %v1444_v10 }
 0x265   :  { %2259 = vmatprep.subr.bf16.mxu0 %v10098_v12  ;;  %2300 = vmatprep.subr.bf16.mxu1 %v10100_v15  ;;  %v1447_v15 = vld [vmem:[#allocation4 + $0x150] sm:$0xff]  ;;  %v1452_v28 = vld [vmem:[#allocation4 + $0x178] sm:$0xff] }
 0x266   :  { %12050 = vst [vmem:[#allocation80_spill] sm:$0xff] %v10126_v56  ;;  %v1451_v12 = vld [vmem:[#allocation4 + $0x170] sm:$0xff]  ;;  %12052 = vst [vmem:[#allocation82_spill] sm:$0xff] %v10132_v17  ;;  %v10138_v35 = vcombine.high %v1448_v29, %v1452_v28  ;;  %v10144_v10 = vcombine.low %v1448_v29, %v1452_v28 }
 0x267   :  { %v10136_v24 = vcombine.high %v1447_v15, %v1451_v12  ;;  %v10142_v22 = vcombine.low %v1447_v15, %v1451_v12 }
 0x268   :  { %2260 = vmatpush1.bf16.msra.mxu0 %v10106_v34  ;;  %2301 = vmatpush1.bf16.msra.mxu1 %v10108_v18  ;;  %12054 = vst [vmem:[#allocation84_spill] sm:$0xff] %v10138_v35  ;;  %v1456_v18 = vld [vmem:[#allocation4 + $0x198] sm:$0xff]  ;;  %12056 = vst [vmem:[#allocation86_spill] sm:$0xff] %v10144_v10 }
 0x269   :  { %2261 = vmatprep.subr.bf16.mxu0 %v10112_v32  ;;  %2302 = vmatprep.subr.bf16.mxu1 %v10114_v0  ;;  %12053 = vst [vmem:[#allocation83_spill] sm:$0xff] %v10136_v24  ;;  %v1455_v0 = vld [vmem:[#allocation4 + $0x190] sm:$0xff]  ;;  %v1460_v34 = vld [vmem:[#allocation4 + $0x1b8] sm:$0xff]  ;;  %12055 = vst [vmem:[#allocation85_spill] sm:$0xff] %v10142_v22 }
 0x26a   :  { %v1459_v32 = vld [vmem:[#allocation4 + $0x1b0] sm:$0xff]  ;;  %v10150_v13 = vcombine.high %v1456_v18, %v1460_v34  ;;  %v10156_v28 = vcombine.low %v1456_v18, %v1460_v34 }
 0x26b   :  { %v10148_v20 = vcombine.high %v1455_v0, %v1459_v32  ;;  %v10154_v12 = vcombine.low %v1455_v0, %v1459_v32 }
 0x26c   :  { %2262 = vmatpush1.bf16.msra.mxu0 %v10118_v31  ;;  %2303 = vmatpush1.bf16.msra.mxu1 %v10120_v11  ;;  %12058 = vst [vmem:[#allocation88_spill] sm:$0xff] %v10150_v13  ;;  %v1464_v11 = vld [vmem:[#allocation4 + $0x1d8] sm:$0xff]  ;;  %12060 = vst [vmem:[#allocation90_spill] sm:$0xff] %v10156_v28 }
 0x26d   :  { %2263 = vmatprep.subr.bf16.mxu0 %v10124_v8  ;;  %2304 = vmatprep.subr.bf16.mxu1 %v10126_v56  ;;  %12057 = vst [vmem:[#allocation87_spill] sm:$0xff] %v10148_v20  ;;  %v1463_v56 = vld [vmem:[#allocation4 + $0x1d0] sm:$0xff]  ;;  %v1468_v31 = vld [vmem:[#allocation4 + $0x1f8] sm:$0xff]  ;;  %12059 = vst [vmem:[#allocation89_spill] sm:$0xff] %v10154_v12 }
 0x26e   :  { %v1467_v8 = vld [vmem:[#allocation4 + $0x1f0] sm:$0xff]  ;;  %v10162_v15 = vcombine.high %v1464_v11, %v1468_v31  ;;  %v10168_v34 = vcombine.low %v1464_v11, %v1468_v31 }
 0x26f   :  { %v10160_v29 = vcombine.high %v1463_v56, %v1467_v8  ;;  %v10166_v32 = vcombine.low %v1463_v56, %v1467_v8 }
 0x270   :  { %2264 = vmatpush1.bf16.msra.mxu0 %v10130_v9  ;;  %2305 = vmatpush1.bf16.msra.mxu1 %v10132_v17  ;;  %12062 = vst [vmem:[#allocation92_spill] sm:$0xff] %v10162_v15  ;;  %v1472_v17 = vld [vmem:[#allocation4 + $0x218] sm:$0xff]  ;;  %12064 = vst [vmem:[#allocation94_spill] sm:$0xff] %v10168_v34 }
 0x271   :  { %2265 = vmatprep.subr.bf16.mxu0 %v10136_v24  ;;  %2306 = vmatprep.subr.bf16.mxu1 %v10138_v35  ;;  %12061 = vst [vmem:[#allocation91_spill] sm:$0xff] %v10160_v29  ;;  %v1471_v35 = vld [vmem:[#allocation4 + $0x210] sm:$0xff]  ;;  %v1476_v9 = vld [vmem:[#allocation4 + $0x238] sm:$0xff]  ;;  %12063 = vst [vmem:[#allocation93_spill] sm:$0xff] %v10166_v32 }
 0x272   :  { %v1475_v24 = vld [vmem:[#allocation4 + $0x230] sm:$0xff]  ;;  %v10174_v0 = vcombine.high %v1472_v17, %v1476_v9  ;;  %v10180_v31 = vcombine.low %v1472_v17, %v1476_v9 }
 0x273   :  { %v10172_v18 = vcombine.high %v1471_v35, %v1475_v24  ;;  %v10178_v8 = vcombine.low %v1471_v35, %v1475_v24 }
 0x274   :  { %2266 = vmatpush1.bf16.msra.mxu0 %v10142_v22  ;;  %2307 = vmatpush1.bf16.msra.mxu1 %v10144_v10  ;;  %12066 = vst [vmem:[#allocation96_spill] sm:$0xff] %v10174_v0  ;;  %v1480_v10 = vld [vmem:[#allocation4 + $0x258] sm:$0xff]  ;;  %12068 = vst [vmem:[#allocation98_spill] sm:$0xff] %v10180_v31 }
 0x275   :  { %2267 = vmatprep.subr.bf16.mxu0 %v10148_v20  ;;  %2308 = vmatprep.subr.bf16.mxu1 %v10150_v13  ;;  %12065 = vst [vmem:[#allocation95_spill] sm:$0xff] %v10172_v18  ;;  %v1479_v13 = vld [vmem:[#allocation4 + $0x250] sm:$0xff]  ;;  %v1484_v22 = vld [vmem:[#allocation4 + $0x278] sm:$0xff]  ;;  %12067 = vst [vmem:[#allocation97_spill] sm:$0xff] %v10178_v8 }
 0x276   :  { %v1483_v20 = vld [vmem:[#allocation4 + $0x270] sm:$0xff]  ;;  %v10186_v56 = vcombine.high %v1480_v10, %v1484_v22  ;;  %v10192_v9 = vcombine.low %v1480_v10, %v1484_v22 }
 0x277   :  { %v10184_v11 = vcombine.high %v1479_v13, %v1483_v20  ;;  %v10190_v24 = vcombine.low %v1479_v13, %v1483_v20 }
 0x278   :  { %2268 = vmatpush1.bf16.msra.mxu0 %v10154_v12  ;;  %2309 = vmatpush1.bf16.msra.mxu1 %v10156_v28  ;;  %12070 = vst [vmem:[#allocation100_spill] sm:$0xff] %v10186_v56  ;;  %v1488_v28 = vld [vmem:[#allocation4 + $0x298] sm:$0xff]  ;;  %12072 = vst [vmem:[#allocation102_spill] sm:$0xff] %v10192_v9 }
 0x279   :  { %2269 = vmatprep.subr.bf16.mxu0 %v10160_v29  ;;  %2310 = vmatprep.subr.bf16.mxu1 %v10162_v15  ;;  %12069 = vst [vmem:[#allocation99_spill] sm:$0xff] %v10184_v11  ;;  %v1487_v15 = vld [vmem:[#allocation4 + $0x290] sm:$0xff]  ;;  %v1492_v12 = vld [vmem:[#allocation4 + $0x2b8] sm:$0xff]  ;;  %12071 = vst [vmem:[#allocation101_spill] sm:$0xff] %v10190_v24 }
 0x27a   :  { %v1491_v29 = vld [vmem:[#allocation4 + $0x2b0] sm:$0xff]  ;;  %v10198_v35 = vcombine.high %v1488_v28, %v1492_v12  ;;  %v10204_v22 = vcombine.low %v1488_v28, %v1492_v12 }
 0x27b   :  { %v10196_v17 = vcombine.high %v1487_v15, %v1491_v29  ;;  %v10202_v20 = vcombine.low %v1487_v15, %v1491_v29 }
 0x27c   :  { %2270 = vmatpush1.bf16.msra.mxu0 %v10166_v32  ;;  %2311 = vmatpush1.bf16.msra.mxu1 %v10168_v34  ;;  %12074 = vst [vmem:[#allocation104_spill] sm:$0xff] %v10198_v35  ;;  %v1496_v34 = vld [vmem:[#allocation4 + $0x2d8] sm:$0xff]  ;;  %12076 = vst [vmem:[#allocation106_spill] sm:$0xff] %v10204_v22 }
 0x27d   :  { %2271 = vmatprep.subr.bf16.mxu0 %v10172_v18  ;;  %2312 = vmatprep.subr.bf16.mxu1 %v10174_v0  ;;  %12073 = vst [vmem:[#allocation103_spill] sm:$0xff] %v10196_v17  ;;  %v1495_v0 = vld [vmem:[#allocation4 + $0x2d0] sm:$0xff]  ;;  %v1500_v32 = vld [vmem:[#allocation4 + $0x2f8] sm:$0xff]  ;;  %12075 = vst [vmem:[#allocation105_spill] sm:$0xff] %v10202_v20 }
 0x27e   :  { %v1499_v18 = vld [vmem:[#allocation4 + $0x2f0] sm:$0xff]  ;;  %v10210_v13 = vcombine.high %v1496_v34, %v1500_v32  ;;  %v10216_v12 = vcombine.low %v1496_v34, %v1500_v32 }
 0x27f   :  { %v10208_v10 = vcombine.high %v1495_v0, %v1499_v18  ;;  %v10214_v29 = vcombine.low %v1495_v0, %v1499_v18 }
 0x280   :  { %2272 = vmatpush1.bf16.msra.mxu0 %v10178_v8  ;;  %2313 = vmatpush1.bf16.msra.mxu1 %v10180_v31  ;;  %12078 = vst [vmem:[#allocation108_spill] sm:$0xff] %v10210_v13  ;;  %v1504_v31 = vld [vmem:[#allocation4 + $0x318] sm:$0xff]  ;;  %12080 = vst [vmem:[#allocation110_spill] sm:$0xff] %v10216_v12 }
 0x281   :  { %2273 = vmatprep.subr.bf16.mxu0 %v10184_v11  ;;  %2314 = vmatprep.subr.bf16.mxu1 %v10186_v56  ;;  %12077 = vst [vmem:[#allocation107_spill] sm:$0xff] %v10208_v10  ;;  %v1503_v56 = vld [vmem:[#allocation4 + $0x310] sm:$0xff]  ;;  %v1508_v8 = vld [vmem:[#allocation4 + $0x338] sm:$0xff]  ;;  %12079 = vst [vmem:[#allocation109_spill] sm:$0xff] %v10214_v29 }
 0x282   :  { %v1507_v11 = vld [vmem:[#allocation4 + $0x330] sm:$0xff]  ;;  %v10222_v15 = vcombine.high %v1504_v31, %v1508_v8  ;;  %v10228_v32 = vcombine.low %v1504_v31, %v1508_v8 }
 0x283   :  { %v10220_v28 = vcombine.high %v1503_v56, %v1507_v11  ;;  %v10226_v18 = vcombine.low %v1503_v56, %v1507_v11 }
 0x284   :  { %2274 = vmatpush1.bf16.msra.mxu0 %v10190_v24  ;;  %2315 = vmatpush1.bf16.msra.mxu1 %v10192_v9  ;;  %12082 = vst [vmem:[#allocation112_spill] sm:$0xff] %v10222_v15  ;;  %v1512_v9 = vld [vmem:[#allocation4 + $0x358] sm:$0xff] }
 0x285   :  { %2275 = vmatprep.subr.bf16.mxu0 %v10196_v17  ;;  %2316 = vmatprep.subr.bf16.mxu1 %v10198_v35  ;;  %12081 = vst [vmem:[#allocation111_spill] sm:$0xff] %v10220_v28  ;;  %v1511_v35 = vld [vmem:[#allocation4 + $0x350] sm:$0xff]  ;;  %v1516_v24 = vld [vmem:[#allocation4 + $0x378] sm:$0xff] }
 0x286   :  { %v1515_v17 = vld [vmem:[#allocation4 + $0x370] sm:$0xff]  ;;  %v10234_v0 = vcombine.high %v1512_v9, %v1516_v24  ;;  %v10240_v8 = vcombine.low %v1512_v9, %v1516_v24 }
 0x287   :  { %v10232_v34 = vcombine.high %v1511_v35, %v1515_v17  ;;  %v10238_v11 = vcombine.low %v1511_v35, %v1515_v17 }
 0x288   :  { %2276 = vmatpush1.bf16.msra.mxu0 %v10202_v20  ;;  %2317 = vmatpush1.bf16.msra.mxu1 %v10204_v22  ;;  %12083 = vst [vmem:[#allocation113_spill] sm:$0xff] %v10234_v0  ;;  %v1520_v22 = vld [vmem:[#allocation4 + $0x398] sm:$0xff] }
 0x289   :  { %2277 = vmatprep.subr.bf16.mxu0 %v10208_v10  ;;  %2318 = vmatprep.subr.bf16.mxu1 %v10210_v13  ;;  %v1519_v13 = vld [vmem:[#allocation4 + $0x390] sm:$0xff]  ;;  %v1524_v20 = vld [vmem:[#allocation4 + $0x3b8] sm:$0xff]  ;;  %12084 = vst [vmem:[#allocation114_spill] sm:$0xff] %v10238_v11 }
 0x28a   :  { %v1523_v10 = vld [vmem:[#allocation4 + $0x3b0] sm:$0xff]  ;;  %v10246_v56 = vcombine.high %v1520_v22, %v1524_v20  ;;  %v10252_v24 = vcombine.low %v1520_v22, %v1524_v20  ;;  %v12120_v22 = vld [vmem:[#allocation12_spill] sm:$0xff] }
 0x28b   :  { %v10244_v31 = vcombine.high %v1519_v13, %v1523_v10  ;;  %v10250_v17 = vcombine.low %v1519_v13, %v1523_v10  ;;  %v12119_v20 = vld [vmem:[#allocation9_spill] sm:$0xff]  ;;  %v12121_v13 = vld [vmem:[#allocation8_spill] sm:$0xff] }
 0x28c   :  { %2278 = vmatpush1.bf16.msra.mxu0 %v10214_v29  ;;  %2319 = vmatpush1.bf16.msra.mxu1 %v10216_v12  ;;  %v1528_v12 = vld [vmem:[#allocation4 + $0x3d8] sm:$0xff]  ;;  %v291_v10 = vadd.f32 %v12120_v22, %v12119_v20 }
 0x28d   :  { %2279 = vmatprep.subr.bf16.mxu0 %v10220_v28  ;;  %2320 = vmatprep.subr.bf16.mxu1 %v10222_v15  ;;  %v1527_v15 = vld [vmem:[#allocation4 + $0x3d0] sm:$0xff]  ;;  %v1532_v29 = vld [vmem:[#allocation4 + $0x3f8] sm:$0xff] }
 0x28e   :  { %v1531_v28 = vld [vmem:[#allocation4 + $0x3f0] sm:$0xff]  ;;  %v10258_v35 = vcombine.high %v1528_v12, %v1532_v29 }
 0x28f   :  { %v10256_v9 = vcombine.high %v1527_v15, %v1531_v28 }
 0x290   :  { %2280 = vmatpush1.bf16.msra.mxu0 %v10226_v18  ;;  %2321 = vmatpush1.bf16.msra.mxu1 %v10228_v32 }
 0x291   :  { %2281 = vmatprep.subr.bf16.mxu0 %v10232_v34  ;;  %2322 = vmatprep.subr.bf16.mxu1 %v10234_v0  ;;  %v10262_v0 = vcombine.low %v1527_v15, %v1531_v28  ;;  %v12123_v28 = vld [vmem:[#allocation13_spill] sm:$0xff] }
 0x292   :  { %v293_v15 = vadd.f32 %v12123_v28, %v9780_v42 }
 0x294   :  { %2282 = vmatpush1.bf16.msra.mxu0 %v10238_v11  ;;  %2323 = vmatpush1.bf16.msra.mxu1 %v10240_v8  ;;  %v10264_v11 = vcombine.low %v1528_v12, %v1532_v29  ;;  %v12122_v29 = vld [vmem:[#allocation11_spill] sm:$0xff] }
 0x295   :  { %2283 = vmatprep.subr.bf16.mxu0 %v10244_v31  ;;  %2324 = vmatprep.subr.bf16.mxu1 %v10246_v56  ;;  %v180_v12 = vadd.f32 %v12122_v29, %v12121_v13 }
 0x298   :  { %2284 = vmatpush1.bf16.msra.mxu0 %v10250_v17  ;;  %2325 = vmatpush1.bf16.msra.mxu1 %v10252_v24 }
 0x299   :  { %2285 = vmatprep.subr.bf16.mxu0 %v10256_v9  ;;  %2326 = vmatprep.subr.bf16.mxu1 %v10258_v35 }
 0x29c   :  { %2286 = vmatpush1.bf16.msra.mxu0 %v10262_v0  ;;  %2327 = vmatpush1.bf16.msra.mxu1 %v10264_v11 }
 0x29d   :  { %3192 = vmatprep.subr.bf16.mxu0 %v9858_v48  ;;  %3233 = vmatprep.subr.bf16.mxu1 %v9862_v53  ;;  %v12089_v48 = vld [vmem:[#allocation37_spill] sm:$0xff]  ;;  %v12092_v53 = vld [vmem:[#allocation43_spill] sm:$0xff] }
 0x29f   :  { %2288 = vmatmul.mubr.bf16.vlgmr.msra.gmra.mrb[28].mxu0 %v10084_v38  ;;  %2329 = vmatmul.mubr.bf16.vlgmr.msra.gmra.mrb[28].mxu1 %v10084_v38 }
 0x2a0   :  { %3193 = vmatpush1.bf16.msra.mxu0 %v9856_v47  ;;  %3234 = vmatpush1.bf16.msra.mxu1 %v9860_v52  ;;  %v12088_v47 = vld [vmem:[#allocation39_spill] sm:$0xff]  ;;  %v12091_v52 = vld [vmem:[#allocation40_spill] sm:$0xff] }
 0x2a1   :  { %3194 = vmatprep.subr.bf16.mxu0 %v9864_v54  ;;  %3235 = vmatprep.subr.bf16.mxu1 %v9867_v59  ;;  %v12093_v54 = vld [vmem:[#allocation41_spill] sm:$0xff]  ;;  %v12095_v59 = vld [vmem:[#allocation44_spill] sm:$0xff] }
 0x2a4   :  { %3195 = vmatpush1.bf16.msra.mxu0 %v9871_v63  ;;  %3236 = vmatpush1.bf16.msra.mxu1 %v9875_v2  ;;  %v12096_v63 = vld [vmem:[#allocation47_spill] sm:$0xff]  ;;  %v12097_v2 = vld [vmem:[#allocation45_spill] sm:$0xff] }
 0x2a5   :  { %3196 = vmatprep.subr.bf16.mxu0 %v9877_v3  ;;  %3237 = vmatprep.subr.bf16.mxu1 %v9880_v4  ;;  %v12098_v3 = vld [vmem:[#allocation46_spill] sm:$0xff]  ;;  %v12099_v4 = vld [vmem:[#allocation48_spill] sm:$0xff] }
 0x2a8   :  { %3197 = vmatpush1.bf16.msra.mxu0 %v9883_v19  ;;  %3238 = vmatpush1.bf16.msra.mxu1 %v9887_v44  ;;  %v12100_v19 = vld [vmem:[#allocation51_spill] sm:$0xff]  ;;  %v12101_v44 = vld [vmem:[#allocation49_spill] sm:$0xff] }
 0x2a9   :  { %3198 = vmatprep.subr.bf16.mxu0 %v9889_v45  ;;  %3239 = vmatprep.subr.bf16.mxu1 %v9892_v46  ;;  %v12102_v45 = vld [vmem:[#allocation50_spill] sm:$0xff]  ;;  %v12103_v46 = vld [vmem:[#allocation53_spill] sm:$0xff] }
 0x2ac   :  { %3199 = vmatpush1.bf16.msra.mxu0 %v9895_v49  ;;  %3240 = vmatpush1.bf16.msra.mxu1 %v9899_v50  ;;  %v12104_v49 = vld [vmem:[#allocation55_spill] sm:$0xff]  ;;  %v12105_v50 = vld [vmem:[#allocation52_spill] sm:$0xff] }
 0x2ad   :  { %3200 = vmatprep.subr.bf16.mxu0 %v9904_v58  ;;  %3241 = vmatprep.subr.bf16.mxu1 %v9911_v5  ;;  %v12106_v58 = vld [vmem:[#allocation54_spill] sm:$0xff] }
 0x2ae   :  { %v12109_v5 = vld [vmem:[#allocation58_spill] sm:$0xff] }
 0x2b0   :  { %3201 = vmatpush1.bf16.msra.mxu0 %v9906_v61  ;;  %3242 = vmatpush1.bf16.msra.mxu1 %v9908_v62  ;;  %v12107_v61 = vld [vmem:[#allocation56_spill] sm:$0xff]  ;;  %v12108_v62 = vld [vmem:[#allocation57_spill] sm:$0xff] }
 0x2b1   :  { %3202 = vmatprep.subr.bf16.mxu0 %v9915_v43  ;;  %3243 = vmatprep.subr.bf16.mxu1 %v9922_v41  ;;  %v12085_v41 = vld [vmem:[#allocation34_spill] sm:$0xff]  ;;  %v12087_v43 = vld [vmem:[#allocation36_spill] sm:$0xff] }
 0x2b4   :  { %3203 = vmatpush1.bf16.msra.mxu0 %v9918_v51  ;;  %3244 = vmatpush1.bf16.msra.mxu1 %v9920_v55  ;;  %v12110_v51 = vld [vmem:[#allocation60_spill] sm:$0xff]  ;;  %v12111_v55 = vld [vmem:[#allocation59_spill] sm:$0xff] }
 0x2b5   :  { %3204 = vmatprep.subr.bf16.mxu0 %v9927_v36  ;;  %3245 = vmatprep.subr.bf16.mxu1 %v9934_v39  ;;  %v12086_v36 = vld [vmem:[#allocation35_spill] sm:$0xff] }
 0x2b6   :  { %v12114_v39 = vld [vmem:[#allocation63_spill] sm:$0xff] }
 0x2b8   :  { %3205 = vmatpush1.bf16.msra.mxu0 %v9930_v6  ;;  %3246 = vmatpush1.bf16.msra.mxu1 %v9932_v7  ;;  %v12112_v6 = vld [vmem:[#allocation61_spill] sm:$0xff]  ;;  %v12113_v7 = vld [vmem:[#allocation62_spill] sm:$0xff] }
 0x2b9   :  { %3206 = vmatprep.subr.bf16.mxu0 %v9939_v33  ;;  %3247 = vmatprep.subr.bf16.mxu1 %v9946_v1  ;;  %v12090_v33 = vld [vmem:[#allocation38_spill] sm:$0xff]  ;;  %v12117_v1 = vld [vmem:[#allocation7_spill] sm:$0xff] }
 0x2bc   :  { %3207 = vmatpush1.bf16.msra.mxu0 %v9942_v57  ;;  %3248 = vmatpush1.bf16.msra.mxu1 %v9944_v60  ;;  %v12115_v57 = vld [vmem:[#allocation64_spill] sm:$0xff]  ;;  %v12116_v60 = vld [vmem:[#allocation65_spill] sm:$0xff] }
 0x2bd   :  { %3208 = vmatprep.subr.bf16.mxu0 %v9951_v26  ;;  %3249 = vmatprep.subr.bf16.mxu1 %v9958_v23  ;;  %v12094_v26 = vld [vmem:[#allocation42_spill] sm:$0xff] }
 0x2be   :  { %v12118_v23 = vld [vmem:[#allocation10_spill] sm:$0xff] }
 0x2bf   :  { %v178_v38 = vadd.f32 %v12118_v23, %v12117_v1 }
 0x2c0   :  { %3209 = vmatpush1.bf16.msra.mxu0 %v12085_v41  ;;  %3250 = vmatpush1.bf16.msra.mxu1 %v12086_v36 }
 0x2c1   :  { %3210 = vmatprep.subr.bf16.mxu0 %v12087_v43  ;;  %3251 = vmatprep.subr.bf16.mxu1 %v12088_v47 }
 0x2c4   :  { %3211 = vmatpush1.bf16.msra.mxu0 %v12089_v48  ;;  %3252 = vmatpush1.bf16.msra.mxu1 %v12090_v33 }
 0x2c5   :  { %3212 = vmatprep.subr.bf16.mxu0 %v12091_v52  ;;  %3253 = vmatprep.subr.bf16.mxu1 %v12092_v53 }
 0x2c8   :  { %3213 = vmatpush1.bf16.msra.mxu0 %v12093_v54  ;;  %3254 = vmatpush1.bf16.msra.mxu1 %v12094_v26 }
 0x2c9   :  { %3214 = vmatprep.subr.bf16.mxu0 %v12095_v59  ;;  %3255 = vmatprep.subr.bf16.mxu1 %v12096_v63 }
 0x2cc   :  { %3215 = vmatpush1.bf16.msra.mxu0 %v12097_v2  ;;  %3256 = vmatpush1.bf16.msra.mxu1 %v12098_v3 }
 0x2cd   :  { %3216 = vmatprep.subr.bf16.mxu0 %v12099_v4  ;;  %3257 = vmatprep.subr.bf16.mxu1 %v12100_v19 }
 0x2d0   :  { %3217 = vmatpush1.bf16.msra.mxu0 %v12101_v44  ;;  %3258 = vmatpush1.bf16.msra.mxu1 %v12102_v45 }
 0x2d1   :  { %3218 = vmatprep.subr.bf16.mxu0 %v12103_v46  ;;  %3259 = vmatprep.subr.bf16.mxu1 %v12104_v49 }
 0x2d4   :  { %3219 = vmatpush1.bf16.msra.mxu0 %v12105_v50  ;;  %3260 = vmatpush1.bf16.msra.mxu1 %v12106_v58 }
 0x2d5   :  { %3220 = vmatprep.subr.bf16.mxu0 %v12107_v61  ;;  %3261 = vmatprep.subr.bf16.mxu1 %v12108_v62 }
 0x2d8   :  { %3221 = vmatpush1.bf16.msra.mxu0 %v12109_v5  ;;  %3262 = vmatpush1.bf16.msra.mxu1 %v12110_v51  ;;  %v2337_v5 = vld [vmem:[%s11716_s4] sm:$0xf] }
 0x2d9   :  { %3222 = vmatprep.subr.bf16.mxu0 %v12111_v55  ;;  %3263 = vmatprep.subr.bf16.mxu1 %v12112_v6  ;;  %v2342_v51 = vrot.slane %v2337_v5, %v9756_v25  ;;  %v2346_v55 = vrot.slane %v2337_v5, %v9761_v27  ;;  %v2350_v28 = vrot.slane %v2337_v5, %v9769_v30 }
 0x2dc   :  { %3223 = vmatpush1.bf16.msra.mxu0 %v12113_v7  ;;  %3264 = vmatpush1.bf16.msra.mxu1 %v12114_v39 }
 0x2dd   :  { %3274 = vmatprep.subr.bf16.mxu0 %v12115_v57  ;;  %3315 = vmatprep.subr.bf16.mxu1 %v12116_v60 }
 0x332   :  { %v2207_v41 = vpop.f32.mrb[24].mxu0  ;;  %v2248_v36 = vpop.f32.mrb[24].mxu1 }
 0x333   :  { %v2392_v43 = vadd.f32 %v2207_v41, %v178_v38  ;;  %v2394_v47 = vadd.f32 %v2248_v36, %v291_v10  ;;  %v2209_v48 = vpop.f32.mrb[25].mxu0  ;;  %v2250_v33 = vpop.f32.mrb[25].mxu1 }
 0x334   :  { %v2393_v52 = vadd.f32 %v2209_v48, %v180_v12  ;;  %v2395_v53 = vadd.f32 %v2250_v33, %v293_v15  ;;  %v2211_v54 = vpop.f32.mrb[26].mxu0  ;;  %v2252_v26 = vpop.f32.mrb[26].mxu1  ;;  %v2354_v15 = vrot.slane %v2337_v5, %v9776_v40 }
 0x335   :  { %v8471_v59 = vmul.f32 -1.442695, %v2392_v43  ;;  %v2212_v63 = vpop.f32.mrb[27].mxu0  ;;  %v2253_v2 = vpop.f32.mrb[27].mxu1  ;;  %v8473_v36 = vmul.f32 -1.442695, %v2394_v47 }
 0x336   :  { %v8472_v3 = vmul.f32 -1.442695, %v2393_v52 }
 0x337   :  { %9381 = vpow2.f32 %v8471_v59 }
 0x338   :  { %9383 = vpow2.f32 %v8472_v3 }
 0x339   :  { %9385 = vtanh.f32 %v2395_v53 }
 0x341   :  { %v9382_v4 = vpop.eup %9381 }
 0x342   :  { %v2405_v19 = vadd.f32 1.0, %v9382_v4  ;;  %v9384_v44 = vpop.eup %9383 }
 0x343   :  { %v2406_v45 = vadd.f32 1.0, %v9384_v44  ;;  %v9386_v46 = vpop.eup %9385 }
 0x344   :  { %9387 = vrcp.f32 %v2405_v19 }
 0x345   :  { %9389 = vrcp.f32 %v2406_v45 }
 0x34e   :  { %v9388_v49 = vpop.eup %9387 }
 0x34f   :  { %v2416_v50 = vmul.f32 %v9388_v49, %v9386_v46  ;;  %v9390_v58 = vpop.eup %9389 }
 0x350   :  { %v2415_v61 = vmul.f32 %v9390_v58, %v10067_v37 }
 0x352   :  { %v10347_v62 = vadd.f32 %v2416_v50, %v2415_v61 }
 0x372   :  { %v2289_v6 = vpop.f32.mrb[28].mxu0  ;;  %v2330_v7 = vpop.f32.mrb[28].mxu1 }
 0x373   :  { %v2359_v39 = vadd.f32 %v2342_v51, %v2289_v6  ;;  %v2291_v57 = vpop.f32.mrb[29].mxu0  ;;  %v2332_v60 = vpop.f32.mrb[29].mxu1  ;;  %v2361_v41 = vadd.f32 %v2350_v28, %v2330_v7  ;;  %v12126_v6 = vld [vmem:[#allocation68_spill] sm:$0xff]  ;;  %v12127_v7 = vld [vmem:[#allocation69_spill] sm:$0xff]  ;;  %v12140_v28 = vld [vmem:[#allocation82_spill] sm:$0xff] }
 0x374   :  { %v2360_v23 = vadd.f32 %v2346_v55, %v2291_v57  ;;  %v2293_v38 = vpop.f32.mrb[30].mxu0  ;;  %v2334_v22 = vpop.f32.mrb[30].mxu1  ;;  %v2362_v43 = vadd.f32 %v2354_v15, %v2332_v60  ;;  %v12129_v57 = vld [vmem:[#allocation71_spill] sm:$0xff]  ;;  %v12130_v60 = vld [vmem:[#allocation72_spill] sm:$0xff] }
 0x375   :  { %v8468_v10 = vmul.f32 -1.442695, %v2359_v39  ;;  %v2294_v37 = vpop.f32.mrb[31].mxu0  ;;  %v2335_v29 = vpop.f32.mrb[31].mxu1  ;;  %v8470_v48 = vmul.f32 -1.442695, %v2361_v41 }
 0x376   :  { %v8469_v12 = vmul.f32 -1.442695, %v2360_v23  ;;  %v12128_v39 = vld [vmem:[#allocation70_spill] sm:$0xff]  ;;  %v12131_v23 = vld [vmem:[#allocation73_spill] sm:$0xff]  ;;  %v12137_v37 = vld [vmem:[#allocation79_spill] sm:$0xff] }
 0x377   :  { %9391 = vpow2.f32 %v8468_v10  ;;  %v12132_v38 = vld [vmem:[#allocation74_spill] sm:$0xff]  ;;  %v12135_v22 = vld [vmem:[#allocation77_spill] sm:$0xff]  ;;  %v12138_v29 = vld [vmem:[#allocation80_spill] sm:$0xff] }
 0x378   :  { %9393 = vpow2.f32 %v8469_v12  ;;  %v12136_v10 = vld [vmem:[#allocation78_spill] sm:$0xff]  ;;  %v12139_v12 = vld [vmem:[#allocation81_spill] sm:$0xff]  ;;  %v12141_v15 = vld [vmem:[#allocation83_spill] sm:$0xff] }
 0x379   :  { %9395 = vpow2.f32 %v8473_v36  ;;  %v12142_v41 = vld [vmem:[#allocation84_spill] sm:$0xff]  ;;  %v12143_v36 = vld [vmem:[#allocation85_spill] sm:$0xff] }
 0x37a   :  { %9397 = vtanh.f32 %v2362_v43  ;;  %v12144_v43 = vld [vmem:[#allocation86_spill] sm:$0xff] }
 0x37b   :  { %9399 = vpow2.f32 %v8470_v48  ;;  %v12145_v48 = vld [vmem:[#allocation87_spill] sm:$0xff] }
 0x381   :  { %v9392_v33 = vpop.eup %9391 }
 0x382   :  { %v2372_v52 = vadd.f32 1.0, %v9392_v33  ;;  %v9394_v53 = vpop.eup %9393  ;;  %v12146_v33 = vld [vmem:[#allocation88_spill] sm:$0xff] }
 0x383   :  { %v2373_v54 = vadd.f32 1.0, %v9394_v53  ;;  %v9396_v26 = vpop.eup %9395  ;;  %v12148_v53 = vld [vmem:[#allocation90_spill] sm:$0xff] }
 0x384   :  { %9401 = vrcp.f32 %v2372_v52  ;;  %v9398_v59 = vpop.eup %9397  ;;  %v2407_v3 = vadd.f32 1.0, %v9396_v26  ;;  %v12147_v52 = vld [vmem:[#allocation89_spill] sm:$0xff]  ;;  %v12150_v26 = vld [vmem:[#allocation92_spill] sm:$0xff] }
 0x385   :  { %9403 = vrcp.f32 %v2373_v54  ;;  %v9400_v63 = vpop.eup %9399  ;;  %v12149_v54 = vld [vmem:[#allocation91_spill] sm:$0xff] }
 0x386   :  { %v2374_v44 = vadd.f32 1.0, %v9400_v63  ;;  %9405 = vtanh.f32 %v10347_v62  ;;  %v12152_v63 = vld [vmem:[#allocation94_spill] sm:$0xff] }
 0x387   :  { %9407 = vrcp.f32 %v2407_v3  ;;  %v12154_v3 = vld [vmem:[#allocation96_spill] sm:$0xff] }
 0x388   :  { %9409 = vrcp.f32 %v2374_v44  ;;  %v12157_v44 = vld [vmem:[#allocation99_spill] sm:$0xff] }
 0x38e   :  { %v9402_v2 = vpop.eup %9401 }
 0x38f   :  { %v2383_v4 = vmul.f32 %v9402_v2, %v9398_v59  ;;  %v9404_v19 = vpop.eup %9403  ;;  %v12151_v59 = vld [vmem:[#allocation93_spill] sm:$0xff]  ;;  %v12153_v2 = vld [vmem:[#allocation95_spill] sm:$0xff] }
 0x390   :  { %v2382_v47 = vmul.f32 %v9404_v19, %v10077_v21  ;;  %v9406_v46 = vpop.eup %9405  ;;  %v12125_v21 = vld [vmem:[#allocation67_spill] sm:$0xff]  ;;  %v12156_v19 = vld [vmem:[#allocation98_spill] sm:$0xff] }
 0x391   :  { %v9408_v49 = vpop.eup %9407 }
 0x392   :  { %v10358_v45 = vadd.f32 %v2383_v4, %v2382_v47  ;;  %v9410_v50 = vpop.eup %9409  ;;  %v2419_v61 = vmul.f32 %v9408_v49, %v9406_v46  ;;  %v12155_v4 = vld [vmem:[#allocation97_spill] sm:$0xff]  ;;  %v12158_v47 = vld [vmem:[#allocation100_spill] sm:$0xff]  ;;  %v12160_v49 = vld [vmem:[#allocation102_spill] sm:$0xff] }
 0x393   :  { %v12159_v46 = vld [vmem:[#allocation101_spill] sm:$0xff] }
 0x394   :  { %9411 = vtanh.f32 %v10358_v45  ;;  %v10365_v55 = vpack.c.bf16 %v2419_v61, %v2419_v61  ;;  %v12163_v61 = vld [vmem:[#allocation105_spill] sm:$0xff] }
 0x39e   :  { %v9412_v58 = vpop.eup %9411 }
 0x39f   :  { %v10361_v5 = vmul.f32 %v9412_v58, %v9410_v50  ;;  %v12161_v50 = vld [vmem:[#allocation103_spill] sm:$0xff]  ;;  %v12162_v58 = vld [vmem:[#allocation104_spill] sm:$0xff] }
 0x3a1   :  { %12124 = vst [vmem:[#allocation34_spill] sm:$0xff] %v10361_v5  ;;  %v2423_v51 = vpack.c.bf16 %v10361_v5, %v10361_v5  ;;  %v3543_v5 = vld [vmem:[#allocation4 + $0x320] sm:$0xff] }
 0x3a3   :  { %3224 = vmatprep.mubr.bf16.mxu0 %v2423_v51  ;;  %3265 = vmatprep.mubr.bf16.mxu1 %v2423_v51 }
 0x3a4   :  { %3225 = vmatmul.mubr.bf16.vlgmr.msra.gmra.mrb[32].mxu0 %v10365_v55  ;;  %3266 = vmatmul.mubr.bf16.vlgmr.msra.gmra.mrb[32].mxu1 %v10365_v55 }
 0x3a5   :  { %3275 = vmatpush1.bf16.msra.mxu0 %v10050_v16  ;;  %3316 = vmatpush1.bf16.msra.mxu1 %v10052_v14  ;;  %v12133_v16 = vld [vmem:[#allocation75_spill] sm:$0xff]  ;;  %v12134_v14 = vld [vmem:[#allocation76_spill] sm:$0xff] }
 0x3a6   :  { %3306 = vmatprep.mubr.bf16.mxu0 %v2423_v51  ;;  %3347 = vmatprep.mubr.bf16.mxu1 %v2423_v51  ;;  %v12164_v51 = vld [vmem:[#allocation106_spill] sm:$0xff] }
 0x3a7   :  { %3276 = vmatprep.subr.bf16.mxu0 %v12125_v21  ;;  %3317 = vmatprep.subr.bf16.mxu1 %v12126_v6  ;;  %v12165_v21 = vld [vmem:[#allocation107_spill] sm:$0xff]  ;;  %v12166_v6 = vld [vmem:[#allocation108_spill] sm:$0xff] }
 0x3a9   :  { %3277 = vmatpush1.bf16.msra.mxu0 %v12127_v7  ;;  %3318 = vmatpush1.bf16.msra.mxu1 %v12128_v39  ;;  %v12167_v7 = vld [vmem:[#allocation109_spill] sm:$0xff]  ;;  %v12168_v39 = vld [vmem:[#allocation110_spill] sm:$0xff] }
 0x3aa   :  { %3278 = vmatprep.subr.bf16.mxu0 %v12129_v57  ;;  %3319 = vmatprep.subr.bf16.mxu1 %v12130_v60  ;;  %v12169_v57 = vld [vmem:[#allocation111_spill] sm:$0xff]  ;;  %v12170_v60 = vld [vmem:[#allocation112_spill] sm:$0xff] }
 0x3ad   :  { %3279 = vmatpush1.bf16.msra.mxu0 %v12131_v23  ;;  %3320 = vmatpush1.bf16.msra.mxu1 %v12132_v38  ;;  %v12171_v23 = vld [vmem:[#allocation113_spill] sm:$0xff]  ;;  %v12172_v38 = vld [vmem:[#allocation114_spill] sm:$0xff] }
 0x3ae   :  { %3280 = vmatprep.subr.bf16.mxu0 %v12133_v16  ;;  %3321 = vmatprep.subr.bf16.mxu1 %v12134_v14  ;;  %v3456_v16 = vld [vmem:[#allocation4 + $0x68] sm:$0xff]  ;;  %v3459_v14 = vld [vmem:[#allocation4 + $0x80] sm:$0xff] }
 0x3b1   :  { %3281 = vmatpush1.bf16.msra.mxu0 %v12135_v22  ;;  %3322 = vmatpush1.bf16.msra.mxu1 %v12136_v10  ;;  %v3463_v22 = vld [vmem:[#allocation4 + $0xa0] sm:$0xff]  ;;  %v3460_v10 = vld [vmem:[#allocation4 + $0x88] sm:$0xff] }
 0x3b2   :  { %3282 = vmatprep.subr.bf16.mxu0 %v12137_v37  ;;  %3323 = vmatprep.subr.bf16.mxu1 %v12138_v29  ;;  %v3464_v37 = vld [vmem:[#allocation4 + $0xa8] sm:$0xff] }
 0x3b5   :  { %3283 = vmatpush1.bf16.msra.mxu0 %v12139_v12  ;;  %3324 = vmatpush1.bf16.msra.mxu1 %v12140_v28  ;;  %v10454_v28 = vcombine.high %v3459_v14, %v3463_v22 }
 0x3b6   :  { %3284 = vmatprep.subr.bf16.mxu0 %v12141_v15  ;;  %3325 = vmatprep.subr.bf16.mxu1 %v12142_v41  ;;  %v10457_v15 = vcombine.high %v3460_v10, %v3464_v37  ;;  %v3467_v41 = vld [vmem:[#allocation4 + $0xc0] sm:$0xff] }
 0x3b9   :  { %3285 = vmatpush1.bf16.msra.mxu0 %v12143_v36  ;;  %3326 = vmatpush1.bf16.msra.mxu1 %v12144_v43  ;;  %v3471_v36 = vld [vmem:[#allocation4 + $0xe0] sm:$0xff]  ;;  %v3468_v43 = vld [vmem:[#allocation4 + $0xc8] sm:$0xff] }
 0x3ba   :  { %3286 = vmatprep.subr.bf16.mxu0 %v12145_v48  ;;  %3327 = vmatprep.subr.bf16.mxu1 %v12146_v33  ;;  %v3472_v48 = vld [vmem:[#allocation4 + $0xe8] sm:$0xff]  ;;  %v10460_v33 = vcombine.low %v3459_v14, %v3463_v22 }
 0x3bd   :  { %3287 = vmatpush1.bf16.msra.mxu0 %v12147_v52  ;;  %3328 = vmatpush1.bf16.msra.mxu1 %v12148_v53  ;;  %v10464_v52 = vcombine.low %v3460_v10, %v3464_v37  ;;  %v10466_v53 = vcombine.high %v3467_v41, %v3471_v36  ;;  %v3507_v37 = vld [vmem:[#allocation4 + $0x200] sm:$0xff] }
 0x3be   :  { %3288 = vmatprep.subr.bf16.mxu0 %v12149_v54  ;;  %3329 = vmatprep.subr.bf16.mxu1 %v12150_v26  ;;  %v10469_v54 = vcombine.high %v3468_v43, %v3472_v48  ;;  %v10472_v26 = vcombine.low %v3467_v41, %v3471_v36  ;;  %v3511_v41 = vld [vmem:[#allocation4 + $0x220] sm:$0xff]  ;;  %v3508_v36 = vld [vmem:[#allocation4 + $0x208] sm:$0xff] }
 0x3c1   :  { %3289 = vmatpush1.bf16.msra.mxu0 %v12151_v59  ;;  %3330 = vmatpush1.bf16.msra.mxu1 %v12152_v63  ;;  %v10476_v59 = vcombine.low %v3468_v43, %v3472_v48  ;;  %v3475_v63 = vld [vmem:[#allocation4 + $0x100] sm:$0xff]  ;;  %v10528_v43 = vcombine.high %v3507_v37, %v3511_v41  ;;  %v3512_v48 = vld [vmem:[#allocation4 + $0x228] sm:$0xff] }
 0x3c2   :  { %3290 = vmatprep.subr.bf16.mxu0 %v12153_v2  ;;  %3331 = vmatprep.subr.bf16.mxu1 %v12154_v3  ;;  %v3479_v2 = vld [vmem:[#allocation4 + $0x120] sm:$0xff]  ;;  %v3476_v3 = vld [vmem:[#allocation4 + $0x108] sm:$0xff] }
 0x3c5   :  { %3291 = vmatpush1.bf16.msra.mxu0 %v12155_v4  ;;  %3332 = vmatpush1.bf16.msra.mxu1 %v12156_v19  ;;  %v10481_v4 = vcombine.high %v3475_v63, %v3479_v2  ;;  %v3480_v19 = vld [vmem:[#allocation4 + $0x128] sm:$0xff] }
 0x3c6   :  { %3292 = vmatprep.subr.bf16.mxu0 %v12157_v44  ;;  %3333 = vmatprep.subr.bf16.mxu1 %v12158_v47  ;;  %v10483_v44 = vcombine.low %v3475_v63, %v3479_v2  ;;  %v10485_v47 = vcombine.low %v3476_v3, %v3480_v19  ;;  %v10531_v63 = vcombine.low %v3507_v37, %v3511_v41 }
 0x3c7   :  { %v10533_v2 = vcombine.low %v3508_v36, %v3512_v48 }
 0x3c8   :  { %12173 = vst [vmem:[#allocation35_spill] sm:$0xff] %v10531_v63 }
 0x3c9   :  { %3293 = vmatpush1.bf16.msra.mxu0 %v12159_v46  ;;  %3334 = vmatpush1.bf16.msra.mxu1 %v12160_v49  ;;  %v10488_v46 = vcombine.high %v3476_v3, %v3480_v19  ;;  %v3483_v49 = vld [vmem:[#allocation4 + $0x140] sm:$0xff]  ;;  %12174 = vst [vmem:[#allocation36_spill] sm:$0xff] %v10533_v2  ;;  %v10535_v3 = vcombine.high %v3508_v36, %v3512_v48 }
 0x3ca   :  { %3294 = vmatprep.subr.bf16.mxu0 %v12161_v50  ;;  %3335 = vmatprep.subr.bf16.mxu1 %v12162_v58  ;;  %v3487_v50 = vld [vmem:[#allocation4 + $0x160] sm:$0xff]  ;;  %v3484_v58 = vld [vmem:[#allocation4 + $0x148] sm:$0xff] }
 0x3cb   :  { %12175 = vst [vmem:[#allocation39_spill] sm:$0xff] %v10535_v3  ;;  %v3515_v19 = vld [vmem:[#allocation4 + $0x240] sm:$0xff] }
 0x3cc   :  { %v3531_v48 = vld [vmem:[#allocation4 + $0x2c0] sm:$0xff] }
 0x3cd   :  { %3295 = vmatpush1.bf16.msra.mxu0 %v12163_v61  ;;  %3336 = vmatpush1.bf16.msra.mxu1 %v12164_v51  ;;  %v10492_v61 = vcombine.high %v3483_v49, %v3487_v50  ;;  %v3488_v51 = vld [vmem:[#allocation4 + $0x168] sm:$0xff] }
 0x3ce   :  { %3296 = vmatprep.subr.bf16.mxu0 %v12165_v21  ;;  %3337 = vmatprep.subr.bf16.mxu1 %v12166_v6  ;;  %v10495_v21 = vcombine.low %v3483_v49, %v3487_v50  ;;  %v10497_v6 = vcombine.low %v3484_v58, %v3488_v51  ;;  %v3519_v49 = vld [vmem:[#allocation4 + $0x260] sm:$0xff]  ;;  %v3516_v50 = vld [vmem:[#allocation4 + $0x248] sm:$0xff] }
 0x3d1   :  { %3297 = vmatpush1.bf16.msra.mxu0 %v12167_v7  ;;  %3338 = vmatpush1.bf16.msra.mxu1 %v12168_v39  ;;  %v10499_v7 = vcombine.high %v3484_v58, %v3488_v51  ;;  %v3491_v39 = vld [vmem:[#allocation4 + $0x180] sm:$0xff]  ;;  %v10540_v58 = vcombine.high %v3515_v19, %v3519_v49  ;;  %v3520_v51 = vld [vmem:[#allocation4 + $0x268] sm:$0xff] }
 0x3d2   :  { %3298 = vmatprep.subr.bf16.mxu0 %v12169_v57  ;;  %3339 = vmatprep.subr.bf16.mxu1 %v12170_v60  ;;  %v3495_v57 = vld [vmem:[#allocation4 + $0x1a0] sm:$0xff]  ;;  %v3492_v60 = vld [vmem:[#allocation4 + $0x188] sm:$0xff] }
 0x3d3   :  { %12176 = vst [vmem:[#allocation37_spill] sm:$0xff] %v10540_v58 }
 0x3d5   :  { %3299 = vmatpush1.bf16.msra.mxu0 %v10226_v18  ;;  %3340 = vmatpush1.bf16.msra.mxu1 %v10228_v32  ;;  %v3443_v18 = vld [vmem:[#allocation4] sm:$0xff] }
 0x3d6   :  { %3300 = vmatprep.subr.bf16.mxu0 %v10232_v34  ;;  %3341 = vmatprep.subr.bf16.mxu1 %v12171_v23  ;;  %v3447_v32 = vld [vmem:[#allocation4 + $0x20] sm:$0xff]  ;;  %v3444_v34 = vld [vmem:[#allocation4 + $0x8] sm:$0xff]  ;;  %v10504_v23 = vcombine.high %v3491_v39, %v3495_v57 }
 0x3d9   :  { %3301 = vmatpush1.bf16.msra.mxu0 %v12172_v38  ;;  %3342 = vmatpush1.bf16.msra.mxu1 %v10240_v8  ;;  %v10433_v8 = vcombine.low %v3443_v18, %v3447_v32  ;;  %v3496_v38 = vld [vmem:[#allocation4 + $0x1a8] sm:$0xff] }
 0x3da   :  { %3302 = vmatprep.subr.bf16.mxu0 %v10244_v31  ;;  %3343 = vmatprep.subr.bf16.mxu1 %v10246_v56  ;;  %v10435_v31 = vcombine.high %v3443_v18, %v3447_v32  ;;  %v3448_v56 = vld [vmem:[#allocation4 + $0x28] sm:$0xff]  ;;  %v10507_v18 = vcombine.low %v3491_v39, %v3495_v57  ;;  %v10509_v32 = vcombine.low %v3492_v60, %v3496_v38 }
 0x3db   :  { %v10543_v39 = vcombine.low %v3515_v19, %v3519_v49  ;;  %v10545_v57 = vcombine.low %v3516_v50, %v3520_v51  ;;  %v3535_v19 = vld [vmem:[#allocation4 + $0x2e0] sm:$0xff]  ;;  %v3532_v49 = vld [vmem:[#allocation4 + $0x2c8] sm:$0xff] }
 0x3dd   :  { %3303 = vmatpush1.bf16.msra.mxu0 %v10250_v17  ;;  %3344 = vmatpush1.bf16.msra.mxu1 %v10252_v24  ;;  %v3451_v17 = vld [vmem:[#allocation4 + $0x40] sm:$0xff]  ;;  %12177 = vst [vmem:[#allocation38_spill] sm:$0xff] %v10543_v39  ;;  %12178 = vst [vmem:[#allocation40_spill] sm:$0xff] %v10545_v57 }
 0x3de   :  { %3304 = vmatprep.subr.bf16.mxu0 %v10256_v9  ;;  %3345 = vmatprep.subr.bf16.mxu1 %v10258_v35  ;;  %v3455_v24 = vld [vmem:[#allocation4 + $0x60] sm:$0xff]  ;;  %v10437_v9 = vcombine.low %v3444_v34, %v3448_v56  ;;  %v10439_v35 = vcombine.high %v3444_v34, %v3448_v56  ;;  %v10511_v34 = vcombine.high %v3492_v60, %v3496_v38 }
 0x3df   :  { %v10448_v29 = vcombine.low %v3451_v17, %v3455_v24  ;;  %v3499_v56 = vld [vmem:[#allocation4 + $0x1c0] sm:$0xff]  ;;  %v10547_v60 = vcombine.high %v3516_v50, %v3520_v51  ;;  %v10564_v50 = vcombine.high %v3531_v48, %v3535_v19  ;;  %v3536_v51 = vld [vmem:[#allocation4 + $0x2e8] sm:$0xff] }
 0x3e0   :  { %v3523_v38 = vld [vmem:[#allocation4 + $0x280] sm:$0xff] }
 0x3e1   :  { %3305 = vmatpush1.bf16.msra.mxu0 %v10262_v0  ;;  %3346 = vmatpush1.bf16.msra.mxu1 %v10264_v11  ;;  %v10441_v0 = vcombine.high %v3451_v17, %v3455_v24  ;;  %v3452_v11 = vld [vmem:[#allocation4 + $0x48] sm:$0xff]  ;;  %v3503_v17 = vld [vmem:[#allocation4 + $0x1e0] sm:$0xff]  ;;  %12179 = vst [vmem:[#allocation43_spill] sm:$0xff] %v10547_v60  ;;  %12184 = vst [vmem:[#allocation45_spill] sm:$0xff] %v10564_v50 }
 0x3e2   :  { %4211 = vmatprep.subr.bf16.mxu0 %v10435_v31  ;;  %4252 = vmatprep.subr.bf16.mxu1 %v10439_v35  ;;  %v10452_v12 = vcombine.low %v3452_v11, %v3456_v16  ;;  %v3500_v24 = vld [vmem:[#allocation4 + $0x1c8] sm:$0xff]  ;;  %v10519_v14 = vcombine.low %v3499_v56, %v3503_v17 }
 0x3e4   :  { %3307 = vmatmul.mubr.bf16.vlgmr.msra.gmra.mrb[36].mxu0 %v10365_v55  ;;  %3348 = vmatmul.mubr.bf16.vlgmr.msra.gmra.mrb[36].mxu1 %v10365_v55  ;;  %v10444_v55 = vcombine.high %v3452_v11, %v3456_v16  ;;  %v10516_v11 = vcombine.high %v3499_v56, %v3503_v17  ;;  %v3504_v16 = vld [vmem:[#allocation4 + $0x1e8] sm:$0xff]  ;;  %v3527_v56 = vld [vmem:[#allocation4 + $0x2a0] sm:$0xff] }
 0x3e5   :  { %4212 = vmatpush1.bf16.msra.mxu0 %v10433_v8  ;;  %4253 = vmatpush1.bf16.msra.mxu1 %v10437_v9  ;;  %v10521_v22 = vcombine.low %v3500_v24, %v3504_v16  ;;  %v10523_v10 = vcombine.high %v3500_v24, %v3504_v16  ;;  %v3524_v17 = vld [vmem:[#allocation4 + $0x288] sm:$0xff]  ;;  %v10552_v24 = vcombine.high %v3523_v38, %v3527_v56 }
 0x3e6   :  { %4213 = vmatprep.subr.bf16.mxu0 %v10441_v0  ;;  %4254 = vmatprep.subr.bf16.mxu1 %v10444_v55  ;;  %v3528_v16 = vld [vmem:[#allocation4 + $0x2a8] sm:$0xff]  ;;  %v10555_v37 = vcombine.low %v3523_v38, %v3527_v56  ;;  %v10567_v38 = vcombine.low %v3531_v48, %v3535_v19  ;;  %v10569_v56 = vcombine.low %v3532_v49, %v3536_v51 }
 0x3e7   :  { %12180 = vst [vmem:[#allocation41_spill] sm:$0xff] %v10552_v24  ;;  %v10557_v41 = vcombine.low %v3524_v17, %v3528_v16  ;;  %v10559_v36 = vcombine.high %v3524_v17, %v3528_v16  ;;  %v10571_v17 = vcombine.high %v3532_v49, %v3536_v51  ;;  %v3539_v16 = vld [vmem:[#allocation4 + $0x300] sm:$0xff] }
 0x3e8   :  { %12181 = vst [vmem:[#allocation42_spill] sm:$0xff] %v10555_v37  ;;  %12185 = vst [vmem:[#allocation46_spill] sm:$0xff] %v10567_v38  ;;  %v10579_v48 = vcombine.low %v3539_v16, %v3543_v5  ;;  %v3547_v51 = vld [vmem:[#allocation4 + $0x340] sm:$0xff] }
 0x3e9   :  { %4214 = vmatpush1.bf16.msra.mxu0 %v10448_v29  ;;  %4255 = vmatpush1.bf16.msra.mxu1 %v10452_v12  ;;  %12182 = vst [vmem:[#allocation44_spill] sm:$0xff] %v10557_v41  ;;  %12183 = vst [vmem:[#allocation47_spill] sm:$0xff] %v10559_v36 }
 0x3ea   :  { %4215 = vmatprep.subr.bf16.mxu0 %v10454_v28  ;;  %4256 = vmatprep.subr.bf16.mxu1 %v10457_v15  ;;  %12186 = vst [vmem:[#allocation48_spill] sm:$0xff] %v10569_v56  ;;  %12187 = vst [vmem:[#allocation51_spill] sm:$0xff] %v10571_v17 }
 0x3eb   :  { %12189 = vst [vmem:[#allocation50_spill] sm:$0xff] %v10579_v48 }
 0x3ed   :  { %4216 = vmatpush1.bf16.msra.mxu0 %v10460_v33  ;;  %4257 = vmatpush1.bf16.msra.mxu1 %v10464_v52 }
 0x3ee   :  { %4217 = vmatprep.subr.bf16.mxu0 %v10466_v53  ;;  %4258 = vmatprep.subr.bf16.mxu1 %v10469_v54 }
 0x3f1   :  { %4218 = vmatpush1.bf16.msra.mxu0 %v10472_v26  ;;  %4259 = vmatpush1.bf16.msra.mxu1 %v10476_v59 }
 0x3f2   :  { %4219 = vmatprep.subr.bf16.mxu0 %v10481_v4  ;;  %4260 = vmatprep.subr.bf16.mxu1 %v10488_v46 }
 0x3f5   :  { %4220 = vmatpush1.bf16.msra.mxu0 %v10483_v44  ;;  %4261 = vmatpush1.bf16.msra.mxu1 %v10485_v47 }
 0x3f6   :  { %4221 = vmatprep.subr.bf16.mxu0 %v10492_v61  ;;  %4262 = vmatprep.subr.bf16.mxu1 %v10499_v7 }
 0x3f9   :  { %4222 = vmatpush1.bf16.msra.mxu0 %v10495_v21  ;;  %4263 = vmatpush1.bf16.msra.mxu1 %v10497_v6 }
 0x3fa   :  { %4223 = vmatprep.subr.bf16.mxu0 %v10504_v23  ;;  %4264 = vmatprep.subr.bf16.mxu1 %v10511_v34 }
 0x3fd   :  { %4224 = vmatpush1.bf16.msra.mxu0 %v10507_v18  ;;  %4265 = vmatpush1.bf16.msra.mxu1 %v10509_v32 }
 0x3fe   :  { %4225 = vmatprep.subr.bf16.mxu0 %v10516_v11  ;;  %4266 = vmatprep.subr.bf16.mxu1 %v10523_v10 }
 0x401   :  { %4226 = vmatpush1.bf16.msra.mxu0 %v10519_v14  ;;  %4267 = vmatpush1.bf16.msra.mxu1 %v10521_v22 }
 0x402   :  { %4227 = vmatprep.subr.bf16.mxu0 %v10528_v43  ;;  %4268 = vmatprep.subr.bf16.mxu1 %v10535_v3 }
 0x405   :  { %4228 = vmatpush1.bf16.msra.mxu0 %v10531_v63  ;;  %4269 = vmatpush1.bf16.msra.mxu1 %v10533_v2 }
 0x406   :  { %4229 = vmatprep.subr.bf16.mxu0 %v10540_v58  ;;  %4270 = vmatprep.subr.bf16.mxu1 %v10547_v60  ;;  %v3568_v60 = vld [vmem:[#allocation4 + $0x3e8] sm:$0xff] }
 0x409   :  { %4230 = vmatpush1.bf16.msra.mxu0 %v10543_v39  ;;  %4271 = vmatpush1.bf16.msra.mxu1 %v10545_v57  ;;  %v3563_v57 = vld [vmem:[#allocation4 + $0x3c0] sm:$0xff] }
 0x40a   :  { %4231 = vmatprep.subr.bf16.mxu0 %v10552_v24  ;;  %4272 = vmatprep.subr.bf16.mxu1 %v10559_v36  ;;  %v10576_v36 = vcombine.high %v3539_v16, %v3543_v5  ;;  %v3544_v24 = vld [vmem:[#allocation4 + $0x328] sm:$0xff]  ;;  %v3555_v5 = vld [vmem:[#allocation4 + $0x380] sm:$0xff] }
 0x40b   :  { %v3559_v16 = vld [vmem:[#allocation4 + $0x3a0] sm:$0xff] }
 0x40c   :  { %12188 = vst [vmem:[#allocation49_spill] sm:$0xff] %v10576_v36 }
 0x40d   :  { %4232 = vmatpush1.bf16.msra.mxu0 %v10555_v37  ;;  %4273 = vmatpush1.bf16.msra.mxu1 %v10557_v41  ;;  %v3540_v37 = vld [vmem:[#allocation4 + $0x308] sm:$0xff] }
 0x40e   :  { %4233 = vmatprep.subr.bf16.mxu0 %v10564_v50  ;;  %4274 = vmatprep.subr.bf16.mxu1 %v10571_v17  ;;  %v10581_v19 = vcombine.low %v3540_v37, %v3544_v24  ;;  %v10583_v49 = vcombine.high %v3540_v37, %v3544_v24  ;;  %v3548_v17 = vld [vmem:[#allocation4 + $0x348] sm:$0xff] }
 0x410   :  { %12190 = vst [vmem:[#allocation53_spill] sm:$0xff] %v10581_v19  ;;  %12191 = vst [vmem:[#allocation55_spill] sm:$0xff] %v10583_v49 }
 0x411   :  { %4234 = vmatpush1.bf16.msra.mxu0 %v10567_v38  ;;  %4275 = vmatpush1.bf16.msra.mxu1 %v10569_v56  ;;  %v3551_v38 = vld [vmem:[#allocation4 + $0x360] sm:$0xff]  ;;  %v3552_v56 = vld [vmem:[#allocation4 + $0x368] sm:$0xff] }
 0x412   :  { %4235 = vmatprep.subr.bf16.mxu0 %v10576_v36  ;;  %4276 = vmatprep.subr.bf16.mxu1 %v10583_v49  ;;  %v10588_v50 = vcombine.low %v3547_v51, %v3551_v38  ;;  %v10590_v41 = vcombine.high %v3547_v51, %v3551_v38  ;;  %v10593_v24 = vcombine.low %v3548_v17, %v3552_v56  ;;  %v3556_v49 = vld [vmem:[#allocation4 + $0x388] sm:$0xff]  ;;  %v3567_v38 = vld [vmem:[#allocation4 + $0x3e0] sm:$0xff] }
 0x413   :  { %v10595_v37 = vcombine.high %v3548_v17, %v3552_v56  ;;  %v10597_v36 = vcombine.high %v3555_v5, %v3559_v16  ;;  %v10604_v51 = vcombine.low %v3555_v5, %v3559_v16  ;;  %v10607_v56 = vcombine.high %v3563_v57, %v3567_v38  ;;  %v3446_v16 = vld [vmem:[#allocation4 + $0x18] sm:$0xff] }
 0x414   :  { %12192 = vst [vmem:[#allocation52_spill] sm:$0xff] %v10588_v50  ;;  %12193 = vst [vmem:[#allocation54_spill] sm:$0xff] %v10590_v41 }
 0x415   :  { %4236 = vmatpush1.bf16.msra.mxu0 %v10579_v48  ;;  %4277 = vmatpush1.bf16.msra.mxu1 %v10581_v19  ;;  %12194 = vst [vmem:[#allocation56_spill] sm:$0xff] %v10593_v24  ;;  %12195 = vst [vmem:[#allocation57_spill] sm:$0xff] %v10595_v37  ;;  %v3560_v48 = vld [vmem:[#allocation4 + $0x3a8] sm:$0xff] }
 0x416   :  { %12196 = vst [vmem:[#allocation58_spill] sm:$0xff] %v10597_v36  ;;  %4237 = vmatprep.subr.bf16.mxu0 %v10590_v41  ;;  %v10600_v39 = vcombine.high %v3556_v49, %v3560_v48  ;;  %4278 = vmatprep.subr.bf16.mxu1 %v10595_v37  ;;  %12198 = vst [vmem:[#allocation59_spill] sm:$0xff] %v10604_v51  ;;  %v3564_v19 = vld [vmem:[#allocation4 + $0x3c8] sm:$0xff]  ;;  %v10610_v17 = vcombine.low %v3556_v49, %v3560_v48  ;;  %v3445_v48 = vld [vmem:[#allocation4 + $0x10] sm:$0xff] }
 0x417   :  { %12199 = vst [vmem:[#allocation61_spill] sm:$0xff] %v10607_v56  ;;  %v10613_v41 = vcombine.high %v3564_v19, %v3568_v60  ;;  %v10616_v37 = vcombine.low %v3563_v57, %v3567_v38  ;;  %v10620_v5 = vcombine.low %v3564_v19, %v3568_v60  ;;  %v3449_v49 = vld [vmem:[#allocation4 + $0x30] sm:$0xff]  ;;  %v12206_v60 = vld [vmem:[#allocation14_spill] sm:$0xff] }
 0x418   :  { %12197 = vst [vmem:[#allocation60_spill] sm:$0xff] %v10600_v39  ;;  %12200 = vst [vmem:[#allocation62_spill] sm:$0xff] %v10610_v17  ;;  %v10627_v57 = vcombine.low %v3445_v48, %v3449_v49  ;;  %v184_v19 = vadd.f32 %v12206_v60, %v12117_v1 }
 0x419   :  { %4238 = vmatpush1.bf16.msra.mxu0 %v10588_v50  ;;  %4279 = vmatpush1.bf16.msra.mxu1 %v10593_v24  ;;  %12201 = vst [vmem:[#allocation63_spill] sm:$0xff] %v10613_v41  ;;  %12202 = vst [vmem:[#allocation64_spill] sm:$0xff] %v10616_v37 }
 0x41a   :  { %4239 = vmatprep.subr.bf16.mxu0 %v10597_v36  ;;  %4280 = vmatprep.subr.bf16.mxu1 %v10600_v39  ;;  %12203 = vst [vmem:[#allocation65_spill] sm:$0xff] %v10620_v5  ;;  %v10624_v39 = vcombine.high %v3445_v48, %v3449_v49  ;;  %v3450_v36 = vld [vmem:[#allocation4 + $0x38] sm:$0xff]  ;;  %v12209_v48 = vld [vmem:[#allocation17_spill] sm:$0xff] }
 0x41b   :  { %v10629_v38 = vcombine.low %v3446_v16, %v3450_v36  ;;  %v299_v49 = vadd.f32 %v12209_v48, %v9780_v42 }
 0x41c   :  { %12204 = vst [vmem:[#allocation10_spill] sm:$0xff] %v10624_v39 }
 0x41d   :  { %4240 = vmatpush1.bf16.msra.mxu0 %v10604_v51  ;;  %4281 = vmatpush1.bf16.msra.mxu1 %v10610_v17  ;;  %v12208_v17 = vld [vmem:[#allocation15_spill] sm:$0xff] }
 0x41e   :  { %4241 = vmatprep.subr.bf16.mxu0 %v10607_v56  ;;  %4282 = vmatprep.subr.bf16.mxu1 %v10613_v41  ;;  %v10631_v56 = vcombine.high %v3446_v16, %v3450_v36  ;;  %v186_v51 = vadd.f32 %v12208_v17, %v12121_v13 }
 0x420   :  { %12205 = vst [vmem:[#allocation12_spill] sm:$0xff] %v10631_v56 }
 0x421   :  { %4242 = vmatpush1.bf16.msra.mxu0 %v10616_v37  ;;  %4283 = vmatpush1.bf16.msra.mxu1 %v10620_v5  ;;  %v12207_v37 = vld [vmem:[#allocation16_spill] sm:$0xff] }
 0x422   :  { %4293 = vmatprep.subr.bf16.mxu0 %v10624_v39  ;;  %4334 = vmatprep.subr.bf16.mxu1 %v10631_v56  ;;  %v297_v41 = vadd.f32 %v12207_v37, %v12119_v20 }
 0x477   :  { %v3226_v5 = vpop.f32.mrb[32].mxu0  ;;  %v3267_v24 = vpop.f32.mrb[32].mxu1 }
 0x478   :  { %v3411_v36 = vadd.f32 %v3226_v5, %v184_v19  ;;  %v3413_v16 = vadd.f32 %v3267_v24, %v297_v41  ;;  %v3228_v50 = vpop.f32.mrb[33].mxu0  ;;  %v3269_v39 = vpop.f32.mrb[33].mxu1 }
 0x479   :  { %v3412_v58 = vadd.f32 %v3228_v50, %v186_v51  ;;  %v3414_v56 = vadd.f32 %v3269_v39, %v299_v49  ;;  %v3230_v2 = vpop.f32.mrb[34].mxu0  ;;  %v3271_v63 = vpop.f32.mrb[34].mxu1 }
 0x47a   :  { %v8605_v60 = vmul.f32 -1.442695, %v3411_v36  ;;  %v3231_v1 = vpop.f32.mrb[35].mxu0  ;;  %v3272_v3 = vpop.f32.mrb[35].mxu1 }
 0x47b   :  { %v8606_v37 = vmul.f32 -1.442695, %v3412_v58  ;;  %v3356_v1 = vld [vmem:[%s11716_s4] sm:$0xf] }
 0x47c   :  { %9413 = vpow2.f32 %v8605_v60  ;;  %v3361_v3 = vrot.slane %v3356_v1, %v9756_v25  ;;  %v3365_v58 = vrot.slane %v3356_v1, %v9761_v27 }
 0x47d   :  { %9415 = vpow2.f32 %v8606_v37 }
 0x47e   :  { %9417 = vtanh.f32 %v3414_v56 }
 0x486   :  { %v9414_v17 = vpop.eup %9413 }
 0x487   :  { %v3424_v13 = vadd.f32 1.0, %v9414_v17  ;;  %v9416_v20 = vpop.eup %9415 }
 0x488   :  { %v3425_v48 = vadd.f32 1.0, %v9416_v20  ;;  %v9418_v41 = vpop.eup %9417 }
 0x489   :  { %9419 = vrcp.f32 %v3424_v13 }
 0x48a   :  { %9421 = vrcp.f32 %v3425_v48  ;;  %v3369_v48 = vrot.slane %v3356_v1, %v9769_v30 }
 0x493   :  { %v9420_v24 = vpop.eup %9419 }
 0x494   :  { %v3435_v5 = vmul.f32 %v9420_v24, %v9418_v41  ;;  %v9422_v50 = vpop.eup %9421  ;;  %v3373_v41 = vrot.slane %v3356_v1, %v9776_v40 }
 0x495   :  { %v3434_v2 = vmul.f32 %v9422_v50, %v10347_v62 }
 0x497   :  { %v10644_v63 = vadd.f32 %v3435_v5, %v3434_v2  ;;  %v8607_v5 = vmul.f32 -1.442695, %v3413_v16 }
 0x4b7   :  { %v3308_v39 = vpop.f32.mrb[36].mxu0  ;;  %v3349_v13 = vpop.f32.mrb[36].mxu1 }
 0x4b8   :  { %v3378_v20 = vadd.f32 %v3361_v3, %v3308_v39  ;;  %v3310_v51 = vpop.f32.mrb[37].mxu0  ;;  %v3351_v56 = vpop.f32.mrb[37].mxu1  ;;  %v3380_v24 = vadd.f32 %v3369_v48, %v3349_v13 }
 0x4b9   :  { %v3379_v19 = vadd.f32 %v3365_v58, %v3310_v51  ;;  %v3312_v49 = vpop.f32.mrb[38].mxu0  ;;  %v3353_v36 = vpop.f32.mrb[38].mxu1  ;;  %v3381_v50 = vadd.f32 %v3373_v41, %v3351_v56 }
 0x4ba   :  { %v8602_v60 = vmul.f32 -1.442695, %v3378_v20  ;;  %v3313_v62 = vpop.f32.mrb[39].mxu0  ;;  %v3354_v37 = vpop.f32.mrb[39].mxu1  ;;  %v8604_v2 = vmul.f32 -1.442695, %v3380_v24 }
 0x4bb   :  { %v8603_v17 = vmul.f32 -1.442695, %v3379_v19 }
 0x4bc   :  { %9423 = vpow2.f32 %v8602_v60 }
 0x4bd   :  { %9425 = vpow2.f32 %v8603_v17 }
 0x4be   :  { %9427 = vpow2.f32 %v8607_v5 }
 0x4bf   :  { %9429 = vtanh.f32 %v3381_v50  ;;  %v3453_v50 = vld [vmem:[#allocation4 + $0x50] sm:$0xff] }
 0x4c0   :  { %9431 = vpow2.f32 %v8604_v2  ;;  %v3457_v2 = vld [vmem:[#allocation4 + $0x70] sm:$0xff] }
 0x4c6   :  { %v9424_v3 = vpop.eup %9423 }
 0x4c7   :  { %v3391_v39 = vadd.f32 1.0, %v9424_v3  ;;  %v9426_v58 = vpop.eup %9425  ;;  %v3454_v3 = vld [vmem:[#allocation4 + $0x58] sm:$0xff] }
 0x4c8   :  { %v3392_v20 = vadd.f32 1.0, %v9426_v58  ;;  %v9428_v51 = vpop.eup %9427 }
 0x4c9   :  { %9433 = vrcp.f32 %v3391_v39  ;;  %v9430_v19 = vpop.eup %9429  ;;  %v3426_v60 = vadd.f32 1.0, %v9428_v51  ;;  %v3458_v39 = vld [vmem:[#allocation4 + $0x78] sm:$0xff]  ;;  %v10664_v51 = vcombine.high %v3453_v50, %v3457_v2 }
 0x4ca   :  { %9435 = vrcp.f32 %v3392_v20  ;;  %v9432_v49 = vpop.eup %9431  ;;  %v3461_v20 = vld [vmem:[#allocation4 + $0x90] sm:$0xff] }
 0x4cb   :  { %v3393_v13 = vadd.f32 1.0, %v9432_v49  ;;  %9437 = vtanh.f32 %v10644_v63  ;;  %v3465_v49 = vld [vmem:[#allocation4 + $0xb0] sm:$0xff] }
 0x4cc   :  { %9439 = vrcp.f32 %v3426_v60  ;;  %v3466_v60 = vld [vmem:[#allocation4 + $0xb8] sm:$0xff] }
 0x4cd   :  { %9441 = vrcp.f32 %v3393_v13  ;;  %v10676_v13 = vcombine.high %v3461_v20, %v3465_v49 }
 0x4cf   :  { %12214 = vst [vmem:[#allocation69_spill] sm:$0xff] %v10676_v13 }
 0x4d3   :  { %v9434_v36 = vpop.eup %9433 }
 0x4d4   :  { %v3402_v62 = vmul.f32 %v9434_v36, %v9430_v19  ;;  %v9436_v1 = vpop.eup %9435  ;;  %v10666_v19 = vcombine.high %v3454_v3, %v3458_v39  ;;  %v3462_v36 = vld [vmem:[#allocation4 + $0x98] sm:$0xff] }
 0x4d5   :  { %v3401_v16 = vmul.f32 %v9436_v1, %v10358_v45  ;;  %v9438_v37 = vpop.eup %9437  ;;  %v10674_v1 = vcombine.low %v3454_v3, %v3458_v39  ;;  %v3477_v39 = vld [vmem:[#allocation4 + $0x110] sm:$0xff] }
 0x4d6   :  { %v9440_v17 = vpop.eup %9439  ;;  %12211 = vst [vmem:[#allocation13_spill] sm:$0xff] %v10666_v19 }
 0x4d7   :  { %v10655_v56 = vadd.f32 %v3402_v62, %v3401_v16  ;;  %v9442_v48 = vpop.eup %9441  ;;  %v3438_v24 = vmul.f32 %v9440_v17, %v9438_v37  ;;  %v10672_v62 = vcombine.low %v3453_v50, %v3457_v2  ;;  %12213 = vst [vmem:[#allocation68_spill] sm:$0xff] %v10674_v1  ;;  %v10678_v16 = vcombine.high %v3462_v36, %v3466_v60  ;;  %v3469_v37 = vld [vmem:[#allocation4 + $0xd0] sm:$0xff] }
 0x4d8   :  { %v3473_v17 = vld [vmem:[#allocation4 + $0xf0] sm:$0xff]  ;;  %v10686_v50 = vcombine.low %v3462_v36, %v3466_v60 }
 0x4d9   :  { %9443 = vtanh.f32 %v10655_v56  ;;  %v10662_v58 = vpack.c.bf16 %v3438_v24, %v3438_v24  ;;  %12212 = vst [vmem:[#allocation67_spill] sm:$0xff] %v10672_v62  ;;  %12215 = vst [vmem:[#allocation70_spill] sm:$0xff] %v10678_v16  ;;  %v10684_v24 = vcombine.low %v3461_v20, %v3465_v49  ;;  %v10690_v2 = vcombine.high %v3469_v37, %v3473_v17 }
 0x4da   :  { %12217 = vst [vmem:[#allocation72_spill] sm:$0xff] %v10686_v50  ;;  %v10696_v20 = vcombine.low %v3469_v37, %v3473_v17 }
 0x4db   :  { %12216 = vst [vmem:[#allocation71_spill] sm:$0xff] %v10684_v24  ;;  %12218 = vst [vmem:[#allocation73_spill] sm:$0xff] %v10690_v2 }
 0x4dc   :  { %12220 = vst [vmem:[#allocation75_spill] sm:$0xff] %v10696_v20 }
 0x4e3   :  { %v9444_v41 = vpop.eup %9443 }
 0x4e4   :  { %v10658_v5 = vmul.f32 %v9444_v41, %v9442_v48  ;;  %v3470_v48 = vld [vmem:[#allocation4 + $0xd8] sm:$0xff] }
 0x4e5   :  { %v3474_v41 = vld [vmem:[#allocation4 + $0xf8] sm:$0xff] }
 0x4e6   :  { %12210 = vst [vmem:[#allocation11_spill] sm:$0xff] %v10658_v5  ;;  %v3442_v45 = vpack.c.bf16 %v10658_v5, %v10658_v5  ;;  %v10692_v3 = vcombine.high %v3470_v48, %v3474_v41  ;;  %v3478_v5 = vld [vmem:[#allocation4 + $0x118] sm:$0xff]  ;;  %v10698_v49 = vcombine.low %v3470_v48, %v3474_v41 }
 0x4e8   :  { %4243 = vmatprep.mubr.bf16.mxu0 %v3442_v45  ;;  %4284 = vmatprep.mubr.bf16.mxu1 %v3442_v45  ;;  %12219 = vst [vmem:[#allocation74_spill] sm:$0xff] %v10692_v3  ;;  %12221 = vst [vmem:[#allocation76_spill] sm:$0xff] %v10698_v49 }
 0x4e9   :  { %4244 = vmatmul.mubr.bf16.vlgmr.msra.gmra.mrb[40].mxu0 %v10662_v58  ;;  %4285 = vmatmul.mubr.bf16.vlgmr.msra.gmra.mrb[40].mxu1 %v10662_v58 }
 0x4ea   :  { %4294 = vmatpush1.bf16.msra.mxu0 %v10627_v57  ;;  %4335 = vmatpush1.bf16.msra.mxu1 %v10629_v38 }
 0x4eb   :  { %4325 = vmatprep.mubr.bf16.mxu0 %v3442_v45  ;;  %4366 = vmatprep.mubr.bf16.mxu1 %v3442_v45  ;;  %v3481_v45 = vld [vmem:[#allocation4 + $0x130] sm:$0xff] }
 0x4ec   :  { %4295 = vmatprep.subr.bf16.mxu0 %v10664_v51  ;;  %4336 = vmatprep.subr.bf16.mxu1 %v10666_v19  ;;  %v3482_v19 = vld [vmem:[#allocation4 + $0x138] sm:$0xff]  ;;  %v10702_v36 = vcombine.high %v3477_v39, %v3481_v45  ;;  %v10708_v37 = vcombine.low %v3477_v39, %v3481_v45 }
 0x4ed   :  { %v10704_v60 = vcombine.high %v3478_v5, %v3482_v19  ;;  %v10710_v17 = vcombine.low %v3478_v5, %v3482_v19 }
 0x4ee   :  { %4296 = vmatpush1.bf16.msra.mxu0 %v10672_v62  ;;  %4337 = vmatpush1.bf16.msra.mxu1 %v10674_v1  ;;  %12222 = vst [vmem:[#allocation77_spill] sm:$0xff] %v10702_v36  ;;  %v3486_v1 = vld [vmem:[#allocation4 + $0x158] sm:$0xff]  ;;  %12224 = vst [vmem:[#allocation79_spill] sm:$0xff] %v10708_v37 }
 0x4ef   :  { %4297 = vmatprep.subr.bf16.mxu0 %v10676_v13  ;;  %4338 = vmatprep.subr.bf16.mxu1 %v10678_v16  ;;  %12223 = vst [vmem:[#allocation78_spill] sm:$0xff] %v10704_v60  ;;  %v3485_v16 = vld [vmem:[#allocation4 + $0x150] sm:$0xff]  ;;  %v3490_v62 = vld [vmem:[#allocation4 + $0x178] sm:$0xff]  ;;  %12225 = vst [vmem:[#allocation80_spill] sm:$0xff] %v10710_v17 }
 0x4f0   :  { %v3489_v13 = vld [vmem:[#allocation4 + $0x170] sm:$0xff]  ;;  %v10716_v41 = vcombine.high %v3486_v1, %v3490_v62  ;;  %v10722_v5 = vcombine.low %v3486_v1, %v3490_v62 }
 0x4f1   :  { %v10714_v48 = vcombine.high %v3485_v16, %v3489_v13  ;;  %v10720_v39 = vcombine.low %v3485_v16, %v3489_v13 }
 0x4f2   :  { %4298 = vmatpush1.bf16.msra.mxu0 %v10684_v24  ;;  %4339 = vmatpush1.bf16.msra.mxu1 %v10686_v50  ;;  %12227 = vst [vmem:[#allocation82_spill] sm:$0xff] %v10716_v41  ;;  %v3494_v50 = vld [vmem:[#allocation4 + $0x198] sm:$0xff]  ;;  %12229 = vst [vmem:[#allocation84_spill] sm:$0xff] %v10722_v5 }
 0x4f3   :  { %4299 = vmatprep.subr.bf16.mxu0 %v10690_v2  ;;  %4340 = vmatprep.subr.bf16.mxu1 %v10692_v3  ;;  %12226 = vst [vmem:[#allocation81_spill] sm:$0xff] %v10714_v48  ;;  %v3493_v3 = vld [vmem:[#allocation4 + $0x190] sm:$0xff]  ;;  %v3498_v24 = vld [vmem:[#allocation4 + $0x1b8] sm:$0xff]  ;;  %12228 = vst [vmem:[#allocation83_spill] sm:$0xff] %v10720_v39 }
 0x4f4   :  { %v3497_v2 = vld [vmem:[#allocation4 + $0x1b0] sm:$0xff]  ;;  %v10728_v45 = vcombine.high %v3494_v50, %v3498_v24  ;;  %v10734_v62 = vcombine.low %v3494_v50, %v3498_v24 }
 0x4f5   :  { %v10726_v19 = vcombine.high %v3493_v3, %v3497_v2  ;;  %v10732_v13 = vcombine.low %v3493_v3, %v3497_v2 }
 0x4f6   :  { %4300 = vmatpush1.bf16.msra.mxu0 %v10696_v20  ;;  %4341 = vmatpush1.bf16.msra.mxu1 %v10698_v49  ;;  %12231 = vst [vmem:[#allocation86_spill] sm:$0xff] %v10728_v45  ;;  %v3502_v49 = vld [vmem:[#allocation4 + $0x1d8] sm:$0xff]  ;;  %12233 = vst [vmem:[#allocation88_spill] sm:$0xff] %v10734_v62 }
 0x4f7   :  { %4301 = vmatprep.subr.bf16.mxu0 %v10702_v36  ;;  %4342 = vmatprep.subr.bf16.mxu1 %v10704_v60  ;;  %12230 = vst [vmem:[#allocation85_spill] sm:$0xff] %v10726_v19  ;;  %v3501_v60 = vld [vmem:[#allocation4 + $0x1d0] sm:$0xff]  ;;  %v3506_v20 = vld [vmem:[#allocation4 + $0x1f8] sm:$0xff]  ;;  %12232 = vst [vmem:[#allocation87_spill] sm:$0xff] %v10732_v13 }
 0x4f8   :  { %v3505_v36 = vld [vmem:[#allocation4 + $0x1f0] sm:$0xff]  ;;  %v10740_v16 = vcombine.high %v3502_v49, %v3506_v20  ;;  %v10746_v24 = vcombine.low %v3502_v49, %v3506_v20 }
 0x4f9   :  { %v10738_v1 = vcombine.high %v3501_v60, %v3505_v36  ;;  %v10744_v2 = vcombine.low %v3501_v60, %v3505_v36 }
 0x4fa   :  { %4302 = vmatpush1.bf16.msra.mxu0 %v10708_v37  ;;  %4343 = vmatpush1.bf16.msra.mxu1 %v10710_v17  ;;  %12235 = vst [vmem:[#allocation90_spill] sm:$0xff] %v10740_v16  ;;  %v3510_v17 = vld [vmem:[#allocation4 + $0x218] sm:$0xff]  ;;  %12237 = vst [vmem:[#allocation92_spill] sm:$0xff] %v10746_v24 }
 0x4fb   :  { %4303 = vmatprep.subr.bf16.mxu0 %v10714_v48  ;;  %4344 = vmatprep.subr.bf16.mxu1 %v10716_v41  ;;  %12234 = vst [vmem:[#allocation89_spill] sm:$0xff] %v10738_v1  ;;  %v3509_v41 = vld [vmem:[#allocation4 + $0x210] sm:$0xff]  ;;  %v3514_v37 = vld [vmem:[#allocation4 + $0x238] sm:$0xff]  ;;  %12236 = vst [vmem:[#allocation91_spill] sm:$0xff] %v10744_v2 }
 0x4fc   :  { %v3513_v48 = vld [vmem:[#allocation4 + $0x230] sm:$0xff]  ;;  %v10752_v3 = vcombine.high %v3510_v17, %v3514_v37  ;;  %v10758_v20 = vcombine.low %v3510_v17, %v3514_v37 }
 0x4fd   :  { %v10750_v50 = vcombine.high %v3509_v41, %v3513_v48  ;;  %v10756_v36 = vcombine.low %v3509_v41, %v3513_v48 }
 0x4fe   :  { %4304 = vmatpush1.bf16.msra.mxu0 %v10720_v39  ;;  %4345 = vmatpush1.bf16.msra.mxu1 %v10722_v5  ;;  %12239 = vst [vmem:[#allocation94_spill] sm:$0xff] %v10752_v3  ;;  %v3518_v5 = vld [vmem:[#allocation4 + $0x258] sm:$0xff]  ;;  %12241 = vst [vmem:[#allocation96_spill] sm:$0xff] %v10758_v20 }
 0x4ff   :  { %4305 = vmatprep.subr.bf16.mxu0 %v10726_v19  ;;  %4346 = vmatprep.subr.bf16.mxu1 %v10728_v45  ;;  %12238 = vst [vmem:[#allocation93_spill] sm:$0xff] %v10750_v50  ;;  %v3517_v45 = vld [vmem:[#allocation4 + $0x250] sm:$0xff]  ;;  %v3522_v39 = vld [vmem:[#allocation4 + $0x278] sm:$0xff]  ;;  %12240 = vst [vmem:[#allocation95_spill] sm:$0xff] %v10756_v36 }
 0x500   :  { %v3521_v19 = vld [vmem:[#allocation4 + $0x270] sm:$0xff]  ;;  %v10764_v60 = vcombine.high %v3518_v5, %v3522_v39  ;;  %v10770_v37 = vcombine.low %v3518_v5, %v3522_v39 }
 0x501   :  { %v10762_v49 = vcombine.high %v3517_v45, %v3521_v19  ;;  %v10768_v48 = vcombine.low %v3517_v45, %v3521_v19 }
 0x502   :  { %4306 = vmatpush1.bf16.msra.mxu0 %v10732_v13  ;;  %4347 = vmatpush1.bf16.msra.mxu1 %v10734_v62  ;;  %12243 = vst [vmem:[#allocation98_spill] sm:$0xff] %v10764_v60  ;;  %v3526_v62 = vld [vmem:[#allocation4 + $0x298] sm:$0xff]  ;;  %12245 = vst [vmem:[#allocation100_spill] sm:$0xff] %v10770_v37 }
 0x503   :  { %4307 = vmatprep.subr.bf16.mxu0 %v10738_v1  ;;  %4348 = vmatprep.subr.bf16.mxu1 %v10740_v16  ;;  %12242 = vst [vmem:[#allocation97_spill] sm:$0xff] %v10762_v49  ;;  %v3525_v16 = vld [vmem:[#allocation4 + $0x290] sm:$0xff]  ;;  %v3530_v13 = vld [vmem:[#allocation4 + $0x2b8] sm:$0xff]  ;;  %12244 = vst [vmem:[#allocation99_spill] sm:$0xff] %v10768_v48 }
 0x504   :  { %v3529_v1 = vld [vmem:[#allocation4 + $0x2b0] sm:$0xff]  ;;  %v10776_v41 = vcombine.high %v3526_v62, %v3530_v13  ;;  %v10782_v39 = vcombine.low %v3526_v62, %v3530_v13 }
 0x505   :  { %v10774_v17 = vcombine.high %v3525_v16, %v3529_v1  ;;  %v10780_v19 = vcombine.low %v3525_v16, %v3529_v1 }
 0x506   :  { %4308 = vmatpush1.bf16.msra.mxu0 %v10744_v2  ;;  %4349 = vmatpush1.bf16.msra.mxu1 %v10746_v24  ;;  %12247 = vst [vmem:[#allocation102_spill] sm:$0xff] %v10776_v41  ;;  %v3534_v24 = vld [vmem:[#allocation4 + $0x2d8] sm:$0xff]  ;;  %12249 = vst [vmem:[#allocation104_spill] sm:$0xff] %v10782_v39 }
 0x507   :  { %4309 = vmatprep.subr.bf16.mxu0 %v10750_v50  ;;  %4350 = vmatprep.subr.bf16.mxu1 %v10752_v3  ;;  %12246 = vst [vmem:[#allocation101_spill] sm:$0xff] %v10774_v17  ;;  %v3533_v3 = vld [vmem:[#allocation4 + $0x2d0] sm:$0xff]  ;;  %v3538_v2 = vld [vmem:[#allocation4 + $0x2f8] sm:$0xff]  ;;  %12248 = vst [vmem:[#allocation103_spill] sm:$0xff] %v10780_v19 }
 0x508   :  { %v3537_v50 = vld [vmem:[#allocation4 + $0x2f0] sm:$0xff]  ;;  %v10788_v45 = vcombine.high %v3534_v24, %v3538_v2  ;;  %v10794_v13 = vcombine.low %v3534_v24, %v3538_v2 }
 0x509   :  { %v10786_v5 = vcombine.high %v3533_v3, %v3537_v50  ;;  %v10792_v1 = vcombine.low %v3533_v3, %v3537_v50 }
 0x50a   :  { %4310 = vmatpush1.bf16.msra.mxu0 %v10756_v36  ;;  %4351 = vmatpush1.bf16.msra.mxu1 %v10758_v20  ;;  %12251 = vst [vmem:[#allocation106_spill] sm:$0xff] %v10788_v45  ;;  %v3542_v20 = vld [vmem:[#allocation4 + $0x318] sm:$0xff]  ;;  %12253 = vst [vmem:[#allocation108_spill] sm:$0xff] %v10794_v13 }
 0x50b   :  { %4311 = vmatprep.subr.bf16.mxu0 %v10762_v49  ;;  %4352 = vmatprep.subr.bf16.mxu1 %v10764_v60  ;;  %12250 = vst [vmem:[#allocation105_spill] sm:$0xff] %v10786_v5  ;;  %v3541_v60 = vld [vmem:[#allocation4 + $0x310] sm:$0xff]  ;;  %v3546_v36 = vld [vmem:[#allocation4 + $0x338] sm:$0xff]  ;;  %12252 = vst [vmem:[#allocation107_spill] sm:$0xff] %v10792_v1 }
 0x50c   :  { %v3545_v49 = vld [vmem:[#allocation4 + $0x330] sm:$0xff]  ;;  %v10800_v16 = vcombine.high %v3542_v20, %v3546_v36  ;;  %v10806_v2 = vcombine.low %v3542_v20, %v3546_v36 }
 0x50d   :  { %v10798_v62 = vcombine.high %v3541_v60, %v3545_v49  ;;  %v10804_v50 = vcombine.low %v3541_v60, %v3545_v49 }
 0x50e   :  { %4312 = vmatpush1.bf16.msra.mxu0 %v10768_v48  ;;  %4353 = vmatpush1.bf16.msra.mxu1 %v10770_v37  ;;  %12255 = vst [vmem:[#allocation110_spill] sm:$0xff] %v10800_v16  ;;  %v3550_v37 = vld [vmem:[#allocation4 + $0x358] sm:$0xff] }
 0x50f   :  { %4313 = vmatprep.subr.bf16.mxu0 %v10774_v17  ;;  %4354 = vmatprep.subr.bf16.mxu1 %v10776_v41  ;;  %12254 = vst [vmem:[#allocation109_spill] sm:$0xff] %v10798_v62  ;;  %v3549_v41 = vld [vmem:[#allocation4 + $0x350] sm:$0xff]  ;;  %v3554_v48 = vld [vmem:[#allocation4 + $0x378] sm:$0xff] }
 0x510   :  { %v3553_v17 = vld [vmem:[#allocation4 + $0x370] sm:$0xff]  ;;  %v10812_v3 = vcombine.high %v3550_v37, %v3554_v48  ;;  %v10818_v36 = vcombine.low %v3550_v37, %v3554_v48 }
 0x511   :  { %v10810_v24 = vcombine.high %v3549_v41, %v3553_v17  ;;  %v10816_v49 = vcombine.low %v3549_v41, %v3553_v17 }
 0x512   :  { %4314 = vmatpush1.bf16.msra.mxu0 %v10780_v19  ;;  %4355 = vmatpush1.bf16.msra.mxu1 %v10782_v39  ;;  %12256 = vst [vmem:[#allocation111_spill] sm:$0xff] %v10812_v3  ;;  %v3558_v39 = vld [vmem:[#allocation4 + $0x398] sm:$0xff] }
 0x513   :  { %4315 = vmatprep.subr.bf16.mxu0 %v10786_v5  ;;  %4356 = vmatprep.subr.bf16.mxu1 %v10788_v45  ;;  %v3557_v45 = vld [vmem:[#allocation4 + $0x390] sm:$0xff]  ;;  %v3562_v19 = vld [vmem:[#allocation4 + $0x3b8] sm:$0xff]  ;;  %12257 = vst [vmem:[#allocation112_spill] sm:$0xff] %v10816_v49 }
 0x514   :  { %v3561_v5 = vld [vmem:[#allocation4 + $0x3b0] sm:$0xff]  ;;  %v10824_v60 = vcombine.high %v3558_v39, %v3562_v19  ;;  %v10830_v48 = vcombine.low %v3558_v39, %v3562_v19  ;;  %v12292_v19 = vld [vmem:[#allocation18_spill] sm:$0xff] }
 0x515   :  { %v10822_v20 = vcombine.high %v3557_v45, %v3561_v5  ;;  %v10828_v17 = vcombine.low %v3557_v45, %v3561_v5  ;;  %v12293_v5 = vld [vmem:[#allocation9_spill] sm:$0xff]  ;;  %v12294_v45 = vld [vmem:[#allocation20_spill] sm:$0xff] }
 0x516   :  { %4316 = vmatpush1.bf16.msra.mxu0 %v10792_v1  ;;  %4357 = vmatpush1.bf16.msra.mxu1 %v10794_v13  ;;  %v3566_v13 = vld [vmem:[#allocation4 + $0x3d8] sm:$0xff] }
 0x517   :  { %4317 = vmatprep.subr.bf16.mxu0 %v10798_v62  ;;  %4358 = vmatprep.subr.bf16.mxu1 %v10800_v16  ;;  %v3565_v16 = vld [vmem:[#allocation4 + $0x3d0] sm:$0xff]  ;;  %v3570_v1 = vld [vmem:[#allocation4 + $0x3f8] sm:$0xff] }
 0x518   :  { %v3569_v62 = vld [vmem:[#allocation4 + $0x3f0] sm:$0xff]  ;;  %v10836_v41 = vcombine.high %v3566_v13, %v3570_v1 }
 0x519   :  { %v10834_v37 = vcombine.high %v3565_v16, %v3569_v62 }
 0x51a   :  { %4318 = vmatpush1.bf16.msra.mxu0 %v10804_v50  ;;  %4359 = vmatpush1.bf16.msra.mxu1 %v10806_v2 }
 0x51b   :  { %4319 = vmatprep.subr.bf16.mxu0 %v10810_v24  ;;  %4360 = vmatprep.subr.bf16.mxu1 %v10812_v3  ;;  %v10840_v3 = vcombine.low %v3565_v16, %v3569_v62  ;;  %v12296_v62 = vld [vmem:[#allocation19_spill] sm:$0xff] }
 0x51e   :  { %4320 = vmatpush1.bf16.msra.mxu0 %v10816_v49  ;;  %4361 = vmatpush1.bf16.msra.mxu1 %v10818_v36  ;;  %v10842_v49 = vcombine.low %v3566_v13, %v3570_v1  ;;  %v303_v1 = vadd.f32 %v12294_v45, %v12293_v5  ;;  %v12295_v13 = vld [vmem:[#allocation8_spill] sm:$0xff] }
 0x51f   :  { %4321 = vmatprep.subr.bf16.mxu0 %v10822_v20  ;;  %4362 = vmatprep.subr.bf16.mxu1 %v10824_v60  ;;  %v192_v16 = vadd.f32 %v12296_v62, %v12295_v13 }
 0x522   :  { %4322 = vmatpush1.bf16.msra.mxu0 %v10828_v17  ;;  %4363 = vmatpush1.bf16.msra.mxu1 %v10830_v48 }
 0x523   :  { %4323 = vmatprep.subr.bf16.mxu0 %v10834_v37  ;;  %4364 = vmatprep.subr.bf16.mxu1 %v10836_v41 }
 0x526   :  { %4324 = vmatpush1.bf16.msra.mxu0 %v10840_v3  ;;  %4365 = vmatpush1.bf16.msra.mxu1 %v10842_v49 }
 0x527   :  { %5230 = vmatprep.subr.bf16.mxu0 %v10435_v31  ;;  %5271 = vmatprep.subr.bf16.mxu1 %v10439_v35  ;;  %v12259_v31 = vld [vmem:[#allocation35_spill] sm:$0xff]  ;;  %v12261_v35 = vld [vmem:[#allocation37_spill] sm:$0xff] }
 0x529   :  { %4326 = vmatmul.mubr.bf16.vlgmr.msra.gmra.mrb[44].mxu0 %v10662_v58  ;;  %4367 = vmatmul.mubr.bf16.vlgmr.msra.gmra.mrb[44].mxu1 %v10662_v58  ;;  %v12291_v58 = vld [vmem:[#allocation7_spill] sm:$0xff] }
 0x52a   :  { %5231 = vmatpush1.bf16.msra.mxu0 %v10433_v8  ;;  %5272 = vmatpush1.bf16.msra.mxu1 %v10437_v9  ;;  %v12258_v8 = vld [vmem:[#allocation39_spill] sm:$0xff]  ;;  %v12260_v9 = vld [vmem:[#allocation36_spill] sm:$0xff]  ;;  %v190_v39 = vadd.f32 %v12292_v19, %v12291_v58 }
 0x52b   :  { %5232 = vmatprep.subr.bf16.mxu0 %v10441_v0  ;;  %5273 = vmatprep.subr.bf16.mxu1 %v10444_v55  ;;  %v12262_v0 = vld [vmem:[#allocation43_spill] sm:$0xff]  ;;  %v12263_v55 = vld [vmem:[#allocation38_spill] sm:$0xff] }
 0x52e   :  { %5233 = vmatpush1.bf16.msra.mxu0 %v10448_v29  ;;  %5274 = vmatpush1.bf16.msra.mxu1 %v10452_v12  ;;  %v12264_v29 = vld [vmem:[#allocation40_spill] sm:$0xff]  ;;  %v12265_v12 = vld [vmem:[#allocation41_spill] sm:$0xff] }
 0x52f   :  { %5234 = vmatprep.subr.bf16.mxu0 %v10454_v28  ;;  %5275 = vmatprep.subr.bf16.mxu1 %v10457_v15  ;;  %v12266_v28 = vld [vmem:[#allocation47_spill] sm:$0xff]  ;;  %v12267_v15 = vld [vmem:[#allocation42_spill] sm:$0xff] }
 0x532   :  { %5235 = vmatpush1.bf16.msra.mxu0 %v10460_v33  ;;  %5276 = vmatpush1.bf16.msra.mxu1 %v10464_v52  ;;  %v12268_v33 = vld [vmem:[#allocation44_spill] sm:$0xff]  ;;  %v12269_v52 = vld [vmem:[#allocation45_spill] sm:$0xff] }
 0x533   :  { %5236 = vmatprep.subr.bf16.mxu0 %v10466_v53  ;;  %5277 = vmatprep.subr.bf16.mxu1 %v10469_v54  ;;  %v12270_v53 = vld [vmem:[#allocation51_spill] sm:$0xff]  ;;  %v12271_v54 = vld [vmem:[#allocation46_spill] sm:$0xff] }
 0x536   :  { %5237 = vmatpush1.bf16.msra.mxu0 %v10472_v26  ;;  %5278 = vmatpush1.bf16.msra.mxu1 %v10476_v59  ;;  %v12272_v26 = vld [vmem:[#allocation48_spill] sm:$0xff]  ;;  %v12273_v59 = vld [vmem:[#allocation49_spill] sm:$0xff] }
 0x537   :  { %5238 = vmatprep.subr.bf16.mxu0 %v10481_v4  ;;  %5279 = vmatprep.subr.bf16.mxu1 %v10488_v46  ;;  %v12274_v4 = vld [vmem:[#allocation55_spill] sm:$0xff]  ;;  %v12277_v46 = vld [vmem:[#allocation54_spill] sm:$0xff] }
 0x53a   :  { %5239 = vmatpush1.bf16.msra.mxu0 %v10483_v44  ;;  %5280 = vmatpush1.bf16.msra.mxu1 %v10485_v47  ;;  %v12275_v44 = vld [vmem:[#allocation50_spill] sm:$0xff]  ;;  %v12276_v47 = vld [vmem:[#allocation53_spill] sm:$0xff] }
 0x53b   :  { %5240 = vmatprep.subr.bf16.mxu0 %v10492_v61  ;;  %5281 = vmatprep.subr.bf16.mxu1 %v10499_v7  ;;  %v12278_v61 = vld [vmem:[#allocation57_spill] sm:$0xff]  ;;  %v12281_v7 = vld [vmem:[#allocation58_spill] sm:$0xff] }
 0x53e   :  { %5241 = vmatpush1.bf16.msra.mxu0 %v10495_v21  ;;  %5282 = vmatpush1.bf16.msra.mxu1 %v10497_v6  ;;  %v12279_v21 = vld [vmem:[#allocation52_spill] sm:$0xff] }
 0x53f   :  { %5242 = vmatprep.subr.bf16.mxu0 %v10504_v23  ;;  %5283 = vmatprep.subr.bf16.mxu1 %v10511_v34  ;;  %v12280_v6 = vld [vmem:[#allocation56_spill] sm:$0xff]  ;;  %v12285_v34 = vld [vmem:[#allocation61_spill] sm:$0xff] }
 0x540   :  { %v12282_v23 = vld [vmem:[#allocation60_spill] sm:$0xff] }
 0x542   :  { %5243 = vmatpush1.bf16.msra.mxu0 %v10507_v18  ;;  %5284 = vmatpush1.bf16.msra.mxu1 %v10509_v32  ;;  %v12283_v18 = vld [vmem:[#allocation59_spill] sm:$0xff]  ;;  %v12284_v32 = vld [vmem:[#allocation62_spill] sm:$0xff] }
 0x543   :  { %5244 = vmatprep.subr.bf16.mxu0 %v10516_v11  ;;  %5285 = vmatprep.subr.bf16.mxu1 %v10523_v10  ;;  %v12286_v11 = vld [vmem:[#allocation63_spill] sm:$0xff]  ;;  %v12289_v10 = vld [vmem:[#allocation10_spill] sm:$0xff] }
 0x546   :  { %5245 = vmatpush1.bf16.msra.mxu0 %v10519_v14  ;;  %5286 = vmatpush1.bf16.msra.mxu1 %v10521_v22  ;;  %v12287_v14 = vld [vmem:[#allocation64_spill] sm:$0xff]  ;;  %v12288_v22 = vld [vmem:[#allocation65_spill] sm:$0xff] }
 0x547   :  { %5246 = vmatprep.subr.bf16.mxu0 %v10528_v43  ;;  %5287 = vmatprep.subr.bf16.mxu1 %v12258_v8  ;;  %v12290_v43 = vld [vmem:[#allocation12_spill] sm:$0xff]  ;;  %v12297_v8 = vld [vmem:[#allocation21_spill] sm:$0xff] }
 0x54a   :  { %5247 = vmatpush1.bf16.msra.mxu0 %v12259_v31  ;;  %5288 = vmatpush1.bf16.msra.mxu1 %v12260_v9  ;;  %v305_v31 = vadd.f32 %v12297_v8, %v9780_v42 }
 0x54b   :  { %5248 = vmatprep.subr.bf16.mxu0 %v12261_v35  ;;  %5289 = vmatprep.subr.bf16.mxu1 %v12262_v0 }
 0x54e   :  { %5249 = vmatpush1.bf16.msra.mxu0 %v12263_v55  ;;  %5290 = vmatpush1.bf16.msra.mxu1 %v12264_v29 }
 0x54f   :  { %5250 = vmatprep.subr.bf16.mxu0 %v12265_v12  ;;  %5291 = vmatprep.subr.bf16.mxu1 %v12266_v28 }
 0x552   :  { %5251 = vmatpush1.bf16.msra.mxu0 %v12267_v15  ;;  %5292 = vmatpush1.bf16.msra.mxu1 %v12268_v33 }
 0x553   :  { %5252 = vmatprep.subr.bf16.mxu0 %v12269_v52  ;;  %5293 = vmatprep.subr.bf16.mxu1 %v12270_v53 }
 0x556   :  { %5253 = vmatpush1.bf16.msra.mxu0 %v12271_v54  ;;  %5294 = vmatpush1.bf16.msra.mxu1 %v12272_v26 }
 0x557   :  { %5254 = vmatprep.subr.bf16.mxu0 %v12273_v59  ;;  %5295 = vmatprep.subr.bf16.mxu1 %v12274_v4 }
 0x55a   :  { %5255 = vmatpush1.bf16.msra.mxu0 %v12275_v44  ;;  %5296 = vmatpush1.bf16.msra.mxu1 %v12276_v47 }
 0x55b   :  { %5256 = vmatprep.subr.bf16.mxu0 %v12277_v46  ;;  %5297 = vmatprep.subr.bf16.mxu1 %v12278_v61 }
 0x55e   :  { %5257 = vmatpush1.bf16.msra.mxu0 %v12279_v21  ;;  %5298 = vmatpush1.bf16.msra.mxu1 %v12280_v6 }
 0x55f   :  { %5258 = vmatprep.subr.bf16.mxu0 %v12281_v7  ;;  %5299 = vmatprep.subr.bf16.mxu1 %v12282_v23 }
 0x562   :  { %5259 = vmatpush1.bf16.msra.mxu0 %v12283_v18  ;;  %5300 = vmatpush1.bf16.msra.mxu1 %v12284_v32  ;;  %v4375_v32 = vld [vmem:[%s11716_s4] sm:$0xf] }
 0x563   :  { %5260 = vmatprep.subr.bf16.mxu0 %v12285_v34  ;;  %5301 = vmatprep.subr.bf16.mxu1 %v12286_v11  ;;  %v4380_v34 = vrot.slane %v4375_v32, %v9756_v25  ;;  %v4384_v11 = vrot.slane %v4375_v32, %v9761_v27 }
 0x566   :  { %5261 = vmatpush1.bf16.msra.mxu0 %v12287_v14  ;;  %5302 = vmatpush1.bf16.msra.mxu1 %v12288_v22 }
 0x567   :  { %5312 = vmatprep.subr.bf16.mxu0 %v12289_v10  ;;  %5353 = vmatprep.subr.bf16.mxu1 %v12290_v43 }
 0x5bc   :  { %v4245_v9 = vpop.f32.mrb[40].mxu0  ;;  %v4286_v35 = vpop.f32.mrb[40].mxu1 }
 0x5bd   :  { %v4430_v0 = vadd.f32 %v4245_v9, %v190_v39  ;;  %v4432_v55 = vadd.f32 %v4286_v35, %v303_v1  ;;  %v4247_v29 = vpop.f32.mrb[41].mxu0  ;;  %v4288_v12 = vpop.f32.mrb[41].mxu1  ;;  %v4392_v9 = vrot.slane %v4375_v32, %v9776_v40 }
 0x5be   :  { %v4431_v28 = vadd.f32 %v4247_v29, %v192_v16  ;;  %v4433_v15 = vadd.f32 %v4288_v12, %v305_v31  ;;  %v4249_v33 = vpop.f32.mrb[42].mxu0  ;;  %v4290_v52 = vpop.f32.mrb[42].mxu1  ;;  %v4388_v31 = vrot.slane %v4375_v32, %v9769_v30 }
 0x5bf   :  { %v8739_v53 = vmul.f32 -1.442695, %v4430_v0  ;;  %v4250_v54 = vpop.f32.mrb[43].mxu0  ;;  %v4291_v26 = vpop.f32.mrb[43].mxu1  ;;  %v8741_v0 = vmul.f32 -1.442695, %v4432_v55 }
 0x5c0   :  { %v8740_v59 = vmul.f32 -1.442695, %v4431_v28 }
 0x5c1   :  { %9445 = vpow2.f32 %v8739_v53 }
 0x5c2   :  { %9447 = vpow2.f32 %v8740_v59 }
 0x5c3   :  { %9449 = vtanh.f32 %v4433_v15 }
 0x5cb   :  { %v9446_v4 = vpop.eup %9445 }
 0x5cc   :  { %v4443_v44 = vadd.f32 1.0, %v9446_v4  ;;  %v9448_v47 = vpop.eup %9447 }
 0x5cd   :  { %v4444_v46 = vadd.f32 1.0, %v9448_v47  ;;  %v9450_v61 = vpop.eup %9449 }
 0x5ce   :  { %9451 = vrcp.f32 %v4443_v44 }
 0x5cf   :  { %9453 = vrcp.f32 %v4444_v46 }
 0x5d8   :  { %v9452_v21 = vpop.eup %9451 }
 0x5d9   :  { %v4454_v6 = vmul.f32 %v9452_v21, %v9450_v61  ;;  %v9454_v7 = vpop.eup %9453 }
 0x5da   :  { %v4453_v23 = vmul.f32 %v9454_v7, %v10644_v63 }
 0x5dc   :  { %v10925_v18 = vadd.f32 %v4454_v6, %v4453_v23 }
 0x5fc   :  { %v4327_v14 = vpop.f32.mrb[44].mxu0  ;;  %v4368_v22 = vpop.f32.mrb[44].mxu1 }
 0x5fd   :  { %v4397_v10 = vadd.f32 %v4380_v34, %v4327_v14  ;;  %v4329_v43 = vpop.f32.mrb[45].mxu0  ;;  %v4370_v19 = vpop.f32.mrb[45].mxu1  ;;  %v4399_v35 = vadd.f32 %v4388_v31, %v4368_v22  ;;  %v12300_v22 = vld [vmem:[#allocation67_spill] sm:$0xff]  ;;  %v12314_v31 = vld [vmem:[#allocation81_spill] sm:$0xff] }
 0x5fe   :  { %v4398_v39 = vadd.f32 %v4384_v11, %v4329_v43  ;;  %v4331_v45 = vpop.f32.mrb[46].mxu0  ;;  %v4372_v1 = vpop.f32.mrb[46].mxu1  ;;  %v4400_v29 = vadd.f32 %v4392_v9, %v4370_v19  ;;  %v12302_v43 = vld [vmem:[#allocation69_spill] sm:$0xff]  ;;  %v12303_v19 = vld [vmem:[#allocation70_spill] sm:$0xff] }
 0x5ff   :  { %v8736_v62 = vmul.f32 -1.442695, %v4397_v10  ;;  %v4332_v63 = vpop.f32.mrb[47].mxu0  ;;  %v4373_v16 = vpop.f32.mrb[47].mxu1  ;;  %v8738_v12 = vmul.f32 -1.442695, %v4399_v35 }
 0x600   :  { %v8737_v8 = vmul.f32 -1.442695, %v4398_v39  ;;  %v12301_v10 = vld [vmem:[#allocation68_spill] sm:$0xff]  ;;  %v12304_v39 = vld [vmem:[#allocation71_spill] sm:$0xff]  ;;  %v12311_v63 = vld [vmem:[#allocation78_spill] sm:$0xff] }
 0x601   :  { %9455 = vpow2.f32 %v8736_v62  ;;  %v12305_v45 = vld [vmem:[#allocation72_spill] sm:$0xff]  ;;  %v12308_v1 = vld [vmem:[#allocation75_spill] sm:$0xff]  ;;  %v12310_v62 = vld [vmem:[#allocation77_spill] sm:$0xff] }
 0x602   :  { %9457 = vpow2.f32 %v8737_v8  ;;  %v12312_v16 = vld [vmem:[#allocation79_spill] sm:$0xff]  ;;  %v12313_v8 = vld [vmem:[#allocation80_spill] sm:$0xff]  ;;  %v12315_v9 = vld [vmem:[#allocation82_spill] sm:$0xff] }
 0x603   :  { %9459 = vpow2.f32 %v8741_v0  ;;  %v12316_v35 = vld [vmem:[#allocation83_spill] sm:$0xff]  ;;  %v12317_v0 = vld [vmem:[#allocation84_spill] sm:$0xff] }
 0x604   :  { %9461 = vtanh.f32 %v4400_v29  ;;  %v12318_v29 = vld [vmem:[#allocation85_spill] sm:$0xff] }
 0x605   :  { %9463 = vpow2.f32 %v8738_v12  ;;  %v12319_v12 = vld [vmem:[#allocation86_spill] sm:$0xff] }
 0x60b   :  { %v9456_v28 = vpop.eup %9455 }
 0x60c   :  { %v4410_v15 = vadd.f32 1.0, %v9456_v28  ;;  %v9458_v33 = vpop.eup %9457  ;;  %v12320_v28 = vld [vmem:[#allocation87_spill] sm:$0xff] }
 0x60d   :  { %v4411_v52 = vadd.f32 1.0, %v9458_v33  ;;  %v9460_v53 = vpop.eup %9459  ;;  %v12322_v33 = vld [vmem:[#allocation89_spill] sm:$0xff] }
 0x60e   :  { %9465 = vrcp.f32 %v4410_v15  ;;  %v9462_v54 = vpop.eup %9461  ;;  %v4445_v4 = vadd.f32 1.0, %v9460_v53  ;;  %v12321_v15 = vld [vmem:[#allocation88_spill] sm:$0xff]  ;;  %v12324_v53 = vld [vmem:[#allocation91_spill] sm:$0xff] }
 0x60f   :  { %9467 = vrcp.f32 %v4411_v52  ;;  %v9464_v26 = vpop.eup %9463  ;;  %v12323_v52 = vld [vmem:[#allocation90_spill] sm:$0xff] }
 0x610   :  { %v4412_v46 = vadd.f32 1.0, %v9464_v26  ;;  %9469 = vtanh.f32 %v10925_v18  ;;  %v12326_v26 = vld [vmem:[#allocation93_spill] sm:$0xff] }
 0x611   :  { %9471 = vrcp.f32 %v4445_v4  ;;  %v12328_v4 = vld [vmem:[#allocation95_spill] sm:$0xff] }
 0x612   :  { %9473 = vrcp.f32 %v4412_v46  ;;  %v12331_v46 = vld [vmem:[#allocation98_spill] sm:$0xff] }
 0x618   :  { %v9466_v59 = vpop.eup %9465 }
 0x619   :  { %v4421_v44 = vmul.f32 %v9466_v59, %v9462_v54  ;;  %v9468_v47 = vpop.eup %9467  ;;  %v12325_v54 = vld [vmem:[#allocation92_spill] sm:$0xff]  ;;  %v12327_v59 = vld [vmem:[#allocation94_spill] sm:$0xff] }
 0x61a   :  { %v4420_v55 = vmul.f32 %v9468_v47, %v10655_v56  ;;  %v9470_v21 = vpop.eup %9469  ;;  %v12299_v56 = vld [vmem:[#allocation13_spill] sm:$0xff] }
 0x61b   :  { %v9472_v6 = vpop.eup %9471  ;;  %v12330_v47 = vld [vmem:[#allocation97_spill] sm:$0xff] }
 0x61c   :  { %v10936_v61 = vadd.f32 %v4421_v44, %v4420_v55  ;;  %v9474_v7 = vpop.eup %9473  ;;  %v4457_v32 = vmul.f32 %v9472_v6, %v9470_v21  ;;  %v12329_v44 = vld [vmem:[#allocation96_spill] sm:$0xff]  ;;  %v12332_v55 = vld [vmem:[#allocation99_spill] sm:$0xff]  ;;  %v12334_v6 = vld [vmem:[#allocation101_spill] sm:$0xff] }
 0x61d   :  { %v12333_v21 = vld [vmem:[#allocation100_spill] sm:$0xff] }
 0x61e   :  { %9475 = vtanh.f32 %v10936_v61  ;;  %v10943_v14 = vpack.c.bf16 %v4457_v32, %v4457_v32  ;;  %v12337_v32 = vld [vmem:[#allocation104_spill] sm:$0xff] }
 0x628   :  { %v9476_v23 = vpop.eup %9475 }
 0x629   :  { %v10939_v34 = vmul.f32 %v9476_v23, %v9474_v7  ;;  %v12335_v7 = vld [vmem:[#allocation102_spill] sm:$0xff]  ;;  %v12336_v23 = vld [vmem:[#allocation103_spill] sm:$0xff] }
 0x62b   :  { %12298 = vst [vmem:[#allocation113_spill] sm:$0xff] %v10939_v34  ;;  %v4461_v11 = vpack.c.bf16 %v10939_v34, %v10939_v34  ;;  %v5581_v34 = vld [vmem:[#allocation4 + $0x320] sm:$0xff] }
 0x62d   :  { %5262 = vmatprep.mubr.bf16.mxu0 %v4461_v11  ;;  %5303 = vmatprep.mubr.bf16.mxu1 %v4461_v11 }
 0x62e   :  { %5263 = vmatmul.mubr.bf16.vlgmr.msra.gmra.mrb[48].mxu0 %v10943_v14  ;;  %5304 = vmatmul.mubr.bf16.vlgmr.msra.gmra.mrb[48].mxu1 %v10943_v14 }
 0x62f   :  { %5313 = vmatpush1.bf16.msra.mxu0 %v10627_v57  ;;  %5354 = vmatpush1.bf16.msra.mxu1 %v10629_v38  ;;  %v12306_v57 = vld [vmem:[#allocation73_spill] sm:$0xff]  ;;  %v12307_v38 = vld [vmem:[#allocation74_spill] sm:$0xff] }
 0x630   :  { %5344 = vmatprep.mubr.bf16.mxu0 %v4461_v11  ;;  %5385 = vmatprep.mubr.bf16.mxu1 %v4461_v11  ;;  %v12338_v11 = vld [vmem:[#allocation105_spill] sm:$0xff] }
 0x631   :  { %5314 = vmatprep.subr.bf16.mxu0 %v10664_v51  ;;  %5355 = vmatprep.subr.bf16.mxu1 %v12299_v56  ;;  %v12309_v51 = vld [vmem:[#allocation76_spill] sm:$0xff]  ;;  %v12339_v56 = vld [vmem:[#allocation106_spill] sm:$0xff] }
 0x633   :  { %5315 = vmatpush1.bf16.msra.mxu0 %v12300_v22  ;;  %5356 = vmatpush1.bf16.msra.mxu1 %v12301_v10  ;;  %v12340_v22 = vld [vmem:[#allocation107_spill] sm:$0xff]  ;;  %v12341_v10 = vld [vmem:[#allocation108_spill] sm:$0xff] }
 0x634   :  { %5316 = vmatprep.subr.bf16.mxu0 %v12302_v43  ;;  %5357 = vmatprep.subr.bf16.mxu1 %v12303_v19  ;;  %v12342_v43 = vld [vmem:[#allocation109_spill] sm:$0xff]  ;;  %v12343_v19 = vld [vmem:[#allocation110_spill] sm:$0xff] }
 0x637   :  { %5317 = vmatpush1.bf16.msra.mxu0 %v12304_v39  ;;  %5358 = vmatpush1.bf16.msra.mxu1 %v12305_v45  ;;  %v12344_v39 = vld [vmem:[#allocation111_spill] sm:$0xff]  ;;  %v12345_v45 = vld [vmem:[#allocation112_spill] sm:$0xff] }
 0x638   :  { %5318 = vmatprep.subr.bf16.mxu0 %v12306_v57  ;;  %5359 = vmatprep.subr.bf16.mxu1 %v12307_v38  ;;  %v5494_v57 = vld [vmem:[#allocation4 + $0x68] sm:$0xff]  ;;  %v5497_v38 = vld [vmem:[#allocation4 + $0x80] sm:$0xff] }
 0x63b   :  { %5319 = vmatpush1.bf16.msra.mxu0 %v12308_v1  ;;  %5360 = vmatpush1.bf16.msra.mxu1 %v12309_v51  ;;  %v5501_v1 = vld [vmem:[#allocation4 + $0xa0] sm:$0xff]  ;;  %v5498_v51 = vld [vmem:[#allocation4 + $0x88] sm:$0xff] }
 0x63c   :  { %5320 = vmatprep.subr.bf16.mxu0 %v12310_v62  ;;  %5361 = vmatprep.subr.bf16.mxu1 %v12311_v63  ;;  %v5502_v62 = vld [vmem:[#allocation4 + $0xa8] sm:$0xff] }
 0x63f   :  { %5321 = vmatpush1.bf16.msra.mxu0 %v12312_v16  ;;  %5362 = vmatpush1.bf16.msra.mxu1 %v12313_v8  ;;  %v11032_v8 = vcombine.high %v5497_v38, %v5501_v1 }
 0x640   :  { %5322 = vmatprep.subr.bf16.mxu0 %v12314_v31  ;;  %5363 = vmatprep.subr.bf16.mxu1 %v12315_v9  ;;  %v11035_v31 = vcombine.high %v5498_v51, %v5502_v62  ;;  %v5505_v9 = vld [vmem:[#allocation4 + $0xc0] sm:$0xff] }
 0x643   :  { %5323 = vmatpush1.bf16.msra.mxu0 %v12316_v35  ;;  %5364 = vmatpush1.bf16.msra.mxu1 %v12317_v0  ;;  %v5509_v35 = vld [vmem:[#allocation4 + $0xe0] sm:$0xff]  ;;  %v5506_v0 = vld [vmem:[#allocation4 + $0xc8] sm:$0xff] }
 0x644   :  { %5324 = vmatprep.subr.bf16.mxu0 %v12318_v29  ;;  %5365 = vmatprep.subr.bf16.mxu1 %v12319_v12  ;;  %v5510_v29 = vld [vmem:[#allocation4 + $0xe8] sm:$0xff]  ;;  %v11038_v12 = vcombine.low %v5497_v38, %v5501_v1 }
 0x647   :  { %5325 = vmatpush1.bf16.msra.mxu0 %v12320_v28  ;;  %5366 = vmatpush1.bf16.msra.mxu1 %v12321_v15  ;;  %v11042_v28 = vcombine.low %v5498_v51, %v5502_v62  ;;  %v11044_v15 = vcombine.high %v5505_v9, %v5509_v35  ;;  %v5545_v62 = vld [vmem:[#allocation4 + $0x200] sm:$0xff] }
 0x648   :  { %5326 = vmatprep.subr.bf16.mxu0 %v12322_v33  ;;  %5367 = vmatprep.subr.bf16.mxu1 %v12323_v52  ;;  %v11047_v33 = vcombine.high %v5506_v0, %v5510_v29  ;;  %v11050_v52 = vcombine.low %v5505_v9, %v5509_v35  ;;  %v5549_v9 = vld [vmem:[#allocation4 + $0x220] sm:$0xff]  ;;  %v5546_v35 = vld [vmem:[#allocation4 + $0x208] sm:$0xff] }
 0x64b   :  { %5327 = vmatpush1.bf16.msra.mxu0 %v12324_v53  ;;  %5368 = vmatpush1.bf16.msra.mxu1 %v12325_v54  ;;  %v11054_v53 = vcombine.low %v5506_v0, %v5510_v29  ;;  %v5513_v54 = vld [vmem:[#allocation4 + $0x100] sm:$0xff]  ;;  %v11106_v0 = vcombine.high %v5545_v62, %v5549_v9  ;;  %v5550_v29 = vld [vmem:[#allocation4 + $0x228] sm:$0xff] }
 0x64c   :  { %5328 = vmatprep.subr.bf16.mxu0 %v12326_v26  ;;  %5369 = vmatprep.subr.bf16.mxu1 %v12327_v59  ;;  %v5517_v26 = vld [vmem:[#allocation4 + $0x120] sm:$0xff]  ;;  %v5514_v59 = vld [vmem:[#allocation4 + $0x108] sm:$0xff] }
 0x64f   :  { %5329 = vmatpush1.bf16.msra.mxu0 %v12328_v4  ;;  %5370 = vmatpush1.bf16.msra.mxu1 %v12329_v44  ;;  %v11059_v4 = vcombine.high %v5513_v54, %v5517_v26  ;;  %v5518_v44 = vld [vmem:[#allocation4 + $0x128] sm:$0xff] }
 0x650   :  { %5330 = vmatprep.subr.bf16.mxu0 %v12330_v47  ;;  %5371 = vmatprep.subr.bf16.mxu1 %v12331_v46  ;;  %v11061_v47 = vcombine.low %v5513_v54, %v5517_v26  ;;  %v11063_v46 = vcombine.low %v5514_v59, %v5518_v44  ;;  %v11109_v54 = vcombine.low %v5545_v62, %v5549_v9 }
 0x651   :  { %v11111_v26 = vcombine.low %v5546_v35, %v5550_v29 }
 0x652   :  { %12346 = vst [vmem:[#allocation114_spill] sm:$0xff] %v11109_v54 }
 0x653   :  { %5331 = vmatpush1.bf16.msra.mxu0 %v12332_v55  ;;  %5372 = vmatpush1.bf16.msra.mxu1 %v12333_v21  ;;  %v11066_v55 = vcombine.high %v5514_v59, %v5518_v44  ;;  %v5521_v21 = vld [vmem:[#allocation4 + $0x140] sm:$0xff]  ;;  %12347 = vst [vmem:[#allocation14_spill] sm:$0xff] %v11111_v26  ;;  %v11113_v59 = vcombine.high %v5546_v35, %v5550_v29 }
 0x654   :  { %5332 = vmatprep.subr.bf16.mxu0 %v12334_v6  ;;  %5373 = vmatprep.subr.bf16.mxu1 %v12335_v7  ;;  %v5525_v6 = vld [vmem:[#allocation4 + $0x160] sm:$0xff]  ;;  %v5522_v7 = vld [vmem:[#allocation4 + $0x148] sm:$0xff] }
 0x655   :  { %12348 = vst [vmem:[#allocation16_spill] sm:$0xff] %v11113_v59  ;;  %v5553_v44 = vld [vmem:[#allocation4 + $0x240] sm:$0xff] }
 0x656   :  { %v5569_v29 = vld [vmem:[#allocation4 + $0x2c0] sm:$0xff] }
 0x657   :  { %5333 = vmatpush1.bf16.msra.mxu0 %v12336_v23  ;;  %5374 = vmatpush1.bf16.msra.mxu1 %v12337_v32  ;;  %v11070_v23 = vcombine.high %v5521_v21, %v5525_v6  ;;  %v5526_v32 = vld [vmem:[#allocation4 + $0x168] sm:$0xff] }
 0x658   :  { %5334 = vmatprep.subr.bf16.mxu0 %v12338_v11  ;;  %5375 = vmatprep.subr.bf16.mxu1 %v12339_v56  ;;  %v11073_v11 = vcombine.low %v5521_v21, %v5525_v6  ;;  %v11075_v56 = vcombine.low %v5522_v7, %v5526_v32  ;;  %v5557_v21 = vld [vmem:[#allocation4 + $0x260] sm:$0xff]  ;;  %v5554_v6 = vld [vmem:[#allocation4 + $0x248] sm:$0xff] }
 0x65b   :  { %5335 = vmatpush1.bf16.msra.mxu0 %v12340_v22  ;;  %5376 = vmatpush1.bf16.msra.mxu1 %v12341_v10  ;;  %v11077_v22 = vcombine.high %v5522_v7, %v5526_v32  ;;  %v5529_v10 = vld [vmem:[#allocation4 + $0x180] sm:$0xff]  ;;  %v11118_v7 = vcombine.high %v5553_v44, %v5557_v21  ;;  %v5558_v32 = vld [vmem:[#allocation4 + $0x268] sm:$0xff] }
 0x65c   :  { %5336 = vmatprep.subr.bf16.mxu0 %v12342_v43  ;;  %5377 = vmatprep.subr.bf16.mxu1 %v12343_v19  ;;  %v5533_v43 = vld [vmem:[#allocation4 + $0x1a0] sm:$0xff]  ;;  %v5530_v19 = vld [vmem:[#allocation4 + $0x188] sm:$0xff] }
 0x65d   :  { %12349 = vst [vmem:[#allocation15_spill] sm:$0xff] %v11118_v7 }
 0x65f   :  { %5337 = vmatpush1.bf16.msra.mxu0 %v10804_v50  ;;  %5378 = vmatpush1.bf16.msra.mxu1 %v10806_v2  ;;  %v5481_v50 = vld [vmem:[#allocation4] sm:$0xff] }
 0x660   :  { %5338 = vmatprep.subr.bf16.mxu0 %v10810_v24  ;;  %5379 = vmatprep.subr.bf16.mxu1 %v12344_v39  ;;  %v5485_v2 = vld [vmem:[#allocation4 + $0x20] sm:$0xff]  ;;  %v5482_v24 = vld [vmem:[#allocation4 + $0x8] sm:$0xff]  ;;  %v11082_v39 = vcombine.high %v5529_v10, %v5533_v43 }
 0x663   :  { %5339 = vmatpush1.bf16.msra.mxu0 %v12345_v45  ;;  %5380 = vmatpush1.bf16.msra.mxu1 %v10818_v36  ;;  %v11011_v36 = vcombine.low %v5481_v50, %v5485_v2  ;;  %v5534_v45 = vld [vmem:[#allocation4 + $0x1a8] sm:$0xff] }
 0x664   :  { %5340 = vmatprep.subr.bf16.mxu0 %v10822_v20  ;;  %5381 = vmatprep.subr.bf16.mxu1 %v10824_v60  ;;  %v11013_v20 = vcombine.high %v5481_v50, %v5485_v2  ;;  %v5486_v60 = vld [vmem:[#allocation4 + $0x28] sm:$0xff]  ;;  %v11085_v50 = vcombine.low %v5529_v10, %v5533_v43  ;;  %v11087_v2 = vcombine.low %v5530_v19, %v5534_v45 }
 0x665   :  { %v11121_v10 = vcombine.low %v5553_v44, %v5557_v21  ;;  %v11123_v43 = vcombine.low %v5554_v6, %v5558_v32  ;;  %v5573_v44 = vld [vmem:[#allocation4 + $0x2e0] sm:$0xff]  ;;  %v5570_v21 = vld [vmem:[#allocation4 + $0x2c8] sm:$0xff] }
 0x667   :  { %5341 = vmatpush1.bf16.msra.mxu0 %v10828_v17  ;;  %5382 = vmatpush1.bf16.msra.mxu1 %v10830_v48  ;;  %v5489_v17 = vld [vmem:[#allocation4 + $0x40] sm:$0xff]  ;;  %12350 = vst [vmem:[#allocation17_spill] sm:$0xff] %v11121_v10  ;;  %12351 = vst [vmem:[#allocation39_spill] sm:$0xff] %v11123_v43 }
 0x668   :  { %5342 = vmatprep.subr.bf16.mxu0 %v10834_v37  ;;  %5383 = vmatprep.subr.bf16.mxu1 %v10836_v41  ;;  %v5493_v48 = vld [vmem:[#allocation4 + $0x60] sm:$0xff]  ;;  %v11015_v37 = vcombine.low %v5482_v24, %v5486_v60  ;;  %v11017_v41 = vcombine.high %v5482_v24, %v5486_v60  ;;  %v11089_v24 = vcombine.high %v5530_v19, %v5534_v45 }
 0x669   :  { %v11026_v63 = vcombine.low %v5489_v17, %v5493_v48  ;;  %v5537_v60 = vld [vmem:[#allocation4 + $0x1c0] sm:$0xff]  ;;  %v11125_v19 = vcombine.high %v5554_v6, %v5558_v32  ;;  %v11142_v6 = vcombine.high %v5569_v29, %v5573_v44  ;;  %v5574_v32 = vld [vmem:[#allocation4 + $0x2e8] sm:$0xff] }
 0x66a   :  { %v5561_v45 = vld [vmem:[#allocation4 + $0x280] sm:$0xff] }
 0x66b   :  { %5343 = vmatpush1.bf16.msra.mxu0 %v10840_v3  ;;  %5384 = vmatpush1.bf16.msra.mxu1 %v10842_v49  ;;  %v11019_v3 = vcombine.high %v5489_v17, %v5493_v48  ;;  %v5490_v49 = vld [vmem:[#allocation4 + $0x48] sm:$0xff]  ;;  %v5541_v17 = vld [vmem:[#allocation4 + $0x1e0] sm:$0xff]  ;;  %12352 = vst [vmem:[#allocation35_spill] sm:$0xff] %v11125_v19  ;;  %12357 = vst [vmem:[#allocation40_spill] sm:$0xff] %v11142_v6 }
 0x66c   :  { %6249 = vmatprep.subr.bf16.mxu0 %v11013_v20  ;;  %6290 = vmatprep.subr.bf16.mxu1 %v11017_v41  ;;  %v11030_v16 = vcombine.low %v5490_v49, %v5494_v57  ;;  %v5538_v48 = vld [vmem:[#allocation4 + $0x1c8] sm:$0xff]  ;;  %v11097_v38 = vcombine.low %v5537_v60, %v5541_v17 }
 0x66e   :  { %5345 = vmatmul.mubr.bf16.vlgmr.msra.gmra.mrb[52].mxu0 %v10943_v14  ;;  %5386 = vmatmul.mubr.bf16.vlgmr.msra.gmra.mrb[52].mxu1 %v10943_v14  ;;  %v11022_v14 = vcombine.high %v5490_v49, %v5494_v57  ;;  %v11094_v49 = vcombine.high %v5537_v60, %v5541_v17  ;;  %v5542_v57 = vld [vmem:[#allocation4 + $0x1e8] sm:$0xff]  ;;  %v5565_v60 = vld [vmem:[#allocation4 + $0x2a0] sm:$0xff] }
 0x66f   :  { %6250 = vmatpush1.bf16.msra.mxu0 %v11011_v36  ;;  %6291 = vmatpush1.bf16.msra.mxu1 %v11015_v37  ;;  %v11099_v1 = vcombine.low %v5538_v48, %v5542_v57  ;;  %v11101_v51 = vcombine.high %v5538_v48, %v5542_v57  ;;  %v5562_v17 = vld [vmem:[#allocation4 + $0x288] sm:$0xff]  ;;  %v11130_v48 = vcombine.high %v5561_v45, %v5565_v60 }
 0x670   :  { %6251 = vmatprep.subr.bf16.mxu0 %v11019_v3  ;;  %6292 = vmatprep.subr.bf16.mxu1 %v11022_v14  ;;  %v5566_v57 = vld [vmem:[#allocation4 + $0x2a8] sm:$0xff]  ;;  %v11133_v62 = vcombine.low %v5561_v45, %v5565_v60  ;;  %v11145_v45 = vcombine.low %v5569_v29, %v5573_v44  ;;  %v11147_v60 = vcombine.low %v5570_v21, %v5574_v32 }
 0x671   :  { %12353 = vst [vmem:[#allocation36_spill] sm:$0xff] %v11130_v48  ;;  %v11135_v9 = vcombine.low %v5562_v17, %v5566_v57  ;;  %v11137_v35 = vcombine.high %v5562_v17, %v5566_v57  ;;  %v11149_v17 = vcombine.high %v5570_v21, %v5574_v32  ;;  %v5577_v57 = vld [vmem:[#allocation4 + $0x300] sm:$0xff] }
 0x672   :  { %12354 = vst [vmem:[#allocation37_spill] sm:$0xff] %v11133_v62  ;;  %12358 = vst [vmem:[#allocation41_spill] sm:$0xff] %v11145_v45  ;;  %v11157_v29 = vcombine.low %v5577_v57, %v5581_v34  ;;  %v5585_v32 = vld [vmem:[#allocation4 + $0x340] sm:$0xff] }
 0x673   :  { %6252 = vmatpush1.bf16.msra.mxu0 %v11026_v63  ;;  %6293 = vmatpush1.bf16.msra.mxu1 %v11030_v16  ;;  %12355 = vst [vmem:[#allocation43_spill] sm:$0xff] %v11135_v9  ;;  %12356 = vst [vmem:[#allocation38_spill] sm:$0xff] %v11137_v35 }
 0x674   :  { %6253 = vmatprep.subr.bf16.mxu0 %v11032_v8  ;;  %6294 = vmatprep.subr.bf16.mxu1 %v11035_v31  ;;  %12359 = vst [vmem:[#allocation47_spill] sm:$0xff] %v11147_v60  ;;  %12360 = vst [vmem:[#allocation42_spill] sm:$0xff] %v11149_v17 }
 0x675   :  { %12362 = vst [vmem:[#allocation45_spill] sm:$0xff] %v11157_v29 }
 0x677   :  { %6254 = vmatpush1.bf16.msra.mxu0 %v11038_v12  ;;  %6295 = vmatpush1.bf16.msra.mxu1 %v11042_v28 }
 0x678   :  { %6255 = vmatprep.subr.bf16.mxu0 %v11044_v15  ;;  %6296 = vmatprep.subr.bf16.mxu1 %v11047_v33 }
 0x67b   :  { %6256 = vmatpush1.bf16.msra.mxu0 %v11050_v52  ;;  %6297 = vmatpush1.bf16.msra.mxu1 %v11054_v53 }
 0x67c   :  { %6257 = vmatprep.subr.bf16.mxu0 %v11059_v4  ;;  %6298 = vmatprep.subr.bf16.mxu1 %v11066_v55 }
 0x67f   :  { %6258 = vmatpush1.bf16.msra.mxu0 %v11061_v47  ;;  %6299 = vmatpush1.bf16.msra.mxu1 %v11063_v46 }
 0x680   :  { %6259 = vmatprep.subr.bf16.mxu0 %v11070_v23  ;;  %6300 = vmatprep.subr.bf16.mxu1 %v11077_v22 }
 0x683   :  { %6260 = vmatpush1.bf16.msra.mxu0 %v11073_v11  ;;  %6301 = vmatpush1.bf16.msra.mxu1 %v11075_v56 }
 0x684   :  { %6261 = vmatprep.subr.bf16.mxu0 %v11082_v39  ;;  %6302 = vmatprep.subr.bf16.mxu1 %v11089_v24 }
 0x687   :  { %6262 = vmatpush1.bf16.msra.mxu0 %v11085_v50  ;;  %6303 = vmatpush1.bf16.msra.mxu1 %v11087_v2 }
 0x688   :  { %6263 = vmatprep.subr.bf16.mxu0 %v11094_v49  ;;  %6304 = vmatprep.subr.bf16.mxu1 %v11101_v51 }
 0x68b   :  { %6264 = vmatpush1.bf16.msra.mxu0 %v11097_v38  ;;  %6305 = vmatpush1.bf16.msra.mxu1 %v11099_v1 }
 0x68c   :  { %6265 = vmatprep.subr.bf16.mxu0 %v11106_v0  ;;  %6306 = vmatprep.subr.bf16.mxu1 %v11113_v59 }
 0x68f   :  { %6266 = vmatpush1.bf16.msra.mxu0 %v11109_v54  ;;  %6307 = vmatpush1.bf16.msra.mxu1 %v11111_v26 }
 0x690   :  { %6267 = vmatprep.subr.bf16.mxu0 %v11118_v7  ;;  %6308 = vmatprep.subr.bf16.mxu1 %v11125_v19  ;;  %v5606_v19 = vld [vmem:[#allocation4 + $0x3e8] sm:$0xff] }
 0x693   :  { %6268 = vmatpush1.bf16.msra.mxu0 %v11121_v10  ;;  %6309 = vmatpush1.bf16.msra.mxu1 %v11123_v43  ;;  %v5601_v43 = vld [vmem:[#allocation4 + $0x3c0] sm:$0xff] }
 0x694   :  { %6269 = vmatprep.subr.bf16.mxu0 %v11130_v48  ;;  %6310 = vmatprep.subr.bf16.mxu1 %v11137_v35  ;;  %v11154_v35 = vcombine.high %v5577_v57, %v5581_v34  ;;  %v5582_v48 = vld [vmem:[#allocation4 + $0x328] sm:$0xff]  ;;  %v5593_v34 = vld [vmem:[#allocation4 + $0x380] sm:$0xff] }
 0x695   :  { %v5597_v57 = vld [vmem:[#allocation4 + $0x3a0] sm:$0xff] }
 0x696   :  { %12361 = vst [vmem:[#allocation44_spill] sm:$0xff] %v11154_v35 }
 0x697   :  { %6270 = vmatpush1.bf16.msra.mxu0 %v11133_v62  ;;  %6311 = vmatpush1.bf16.msra.mxu1 %v11135_v9  ;;  %v5578_v62 = vld [vmem:[#allocation4 + $0x308] sm:$0xff] }
 0x698   :  { %6271 = vmatprep.subr.bf16.mxu0 %v11142_v6  ;;  %6312 = vmatprep.subr.bf16.mxu1 %v11149_v17  ;;  %v11159_v44 = vcombine.low %v5578_v62, %v5582_v48  ;;  %v11161_v21 = vcombine.high %v5578_v62, %v5582_v48  ;;  %v5586_v17 = vld [vmem:[#allocation4 + $0x348] sm:$0xff] }
 0x69a   :  { %12363 = vst [vmem:[#allocation51_spill] sm:$0xff] %v11159_v44  ;;  %12364 = vst [vmem:[#allocation46_spill] sm:$0xff] %v11161_v21 }
 0x69b   :  { %6272 = vmatpush1.bf16.msra.mxu0 %v11145_v45  ;;  %6313 = vmatpush1.bf16.msra.mxu1 %v11147_v60  ;;  %v5589_v45 = vld [vmem:[#allocation4 + $0x360] sm:$0xff]  ;;  %v5590_v60 = vld [vmem:[#allocation4 + $0x368] sm:$0xff] }
 0x69c   :  { %6273 = vmatprep.subr.bf16.mxu0 %v11154_v35  ;;  %6314 = vmatprep.subr.bf16.mxu1 %v11161_v21  ;;  %v11166_v6 = vcombine.low %v5585_v32, %v5589_v45  ;;  %v11168_v9 = vcombine.high %v5585_v32, %v5589_v45  ;;  %v11171_v48 = vcombine.low %v5586_v17, %v5590_v60  ;;  %v5594_v21 = vld [vmem:[#allocation4 + $0x388] sm:$0xff]  ;;  %v5605_v45 = vld [vmem:[#allocation4 + $0x3e0] sm:$0xff] }
 0x69d   :  { %v11173_v62 = vcombine.high %v5586_v17, %v5590_v60  ;;  %v11175_v35 = vcombine.high %v5593_v34, %v5597_v57  ;;  %v11182_v32 = vcombine.low %v5593_v34, %v5597_v57  ;;  %v11185_v60 = vcombine.high %v5601_v43, %v5605_v45  ;;  %v5484_v57 = vld [vmem:[#allocation4 + $0x18] sm:$0xff] }
 0x69e   :  { %12365 = vst [vmem:[#allocation48_spill] sm:$0xff] %v11166_v6  ;;  %12366 = vst [vmem:[#allocation49_spill] sm:$0xff] %v11168_v9 }
 0x69f   :  { %6274 = vmatpush1.bf16.msra.mxu0 %v11157_v29  ;;  %6315 = vmatpush1.bf16.msra.mxu1 %v11159_v44  ;;  %12367 = vst [vmem:[#allocation55_spill] sm:$0xff] %v11171_v48  ;;  %12368 = vst [vmem:[#allocation50_spill] sm:$0xff] %v11173_v62  ;;  %v5598_v29 = vld [vmem:[#allocation4 + $0x3a8] sm:$0xff] }
 0x6a0   :  { %12369 = vst [vmem:[#allocation53_spill] sm:$0xff] %v11175_v35  ;;  %6275 = vmatprep.subr.bf16.mxu0 %v11168_v9  ;;  %v11178_v10 = vcombine.high %v5594_v21, %v5598_v29  ;;  %6316 = vmatprep.subr.bf16.mxu1 %v11173_v62  ;;  %12371 = vst [vmem:[#allocation57_spill] sm:$0xff] %v11182_v32  ;;  %v5602_v44 = vld [vmem:[#allocation4 + $0x3c8] sm:$0xff]  ;;  %v11188_v17 = vcombine.low %v5594_v21, %v5598_v29  ;;  %v5483_v29 = vld [vmem:[#allocation4 + $0x10] sm:$0xff] }
 0x6a1   :  { %12372 = vst [vmem:[#allocation52_spill] sm:$0xff] %v11185_v60  ;;  %v11191_v9 = vcombine.high %v5602_v44, %v5606_v19  ;;  %v11194_v62 = vcombine.low %v5601_v43, %v5605_v45  ;;  %v11198_v34 = vcombine.low %v5602_v44, %v5606_v19  ;;  %v5487_v21 = vld [vmem:[#allocation4 + $0x30] sm:$0xff]  ;;  %v12379_v19 = vld [vmem:[#allocation22_spill] sm:$0xff] }
 0x6a2   :  { %12370 = vst [vmem:[#allocation54_spill] sm:$0xff] %v11178_v10  ;;  %12373 = vst [vmem:[#allocation56_spill] sm:$0xff] %v11188_v17  ;;  %v11205_v43 = vcombine.low %v5483_v29, %v5487_v21  ;;  %v196_v44 = vadd.f32 %v12379_v19, %v12291_v58 }
 0x6a3   :  { %6276 = vmatpush1.bf16.msra.mxu0 %v11166_v6  ;;  %6317 = vmatpush1.bf16.msra.mxu1 %v11171_v48  ;;  %12374 = vst [vmem:[#allocation58_spill] sm:$0xff] %v11191_v9  ;;  %12375 = vst [vmem:[#allocation60_spill] sm:$0xff] %v11194_v62 }
 0x6a4   :  { %6277 = vmatprep.subr.bf16.mxu0 %v11175_v35  ;;  %6318 = vmatprep.subr.bf16.mxu1 %v11178_v10  ;;  %12376 = vst [vmem:[#allocation59_spill] sm:$0xff] %v11198_v34  ;;  %v11202_v10 = vcombine.high %v5483_v29, %v5487_v21  ;;  %v5488_v35 = vld [vmem:[#allocation4 + $0x38] sm:$0xff]  ;;  %v12382_v29 = vld [vmem:[#allocation25_spill] sm:$0xff] }
 0x6a5   :  { %v11207_v45 = vcombine.low %v5484_v57, %v5488_v35  ;;  %v311_v21 = vadd.f32 %v12382_v29, %v9780_v42 }
 0x6a6   :  { %12377 = vst [vmem:[#allocation62_spill] sm:$0xff] %v11202_v10 }
 0x6a7   :  { %6278 = vmatpush1.bf16.msra.mxu0 %v11182_v32  ;;  %6319 = vmatpush1.bf16.msra.mxu1 %v11188_v17  ;;  %v12381_v17 = vld [vmem:[#allocation23_spill] sm:$0xff] }
 0x6a8   :  { %6279 = vmatprep.subr.bf16.mxu0 %v11185_v60  ;;  %6320 = vmatprep.subr.bf16.mxu1 %v11191_v9  ;;  %v11209_v60 = vcombine.high %v5484_v57, %v5488_v35  ;;  %v198_v32 = vadd.f32 %v12381_v17, %v12295_v13 }
 0x6aa   :  { %12378 = vst [vmem:[#allocation61_spill] sm:$0xff] %v11209_v60 }
 0x6ab   :  { %6280 = vmatpush1.bf16.msra.mxu0 %v11194_v62  ;;  %6321 = vmatpush1.bf16.msra.mxu1 %v11198_v34  ;;  %v12380_v62 = vld [vmem:[#allocation24_spill] sm:$0xff] }
 0x6ac   :  { %6331 = vmatprep.subr.bf16.mxu0 %v11202_v10  ;;  %6372 = vmatprep.subr.bf16.mxu1 %v11209_v60  ;;  %v309_v9 = vadd.f32 %v12380_v62, %v12293_v5 }
 0x701   :  { %v5264_v34 = vpop.f32.mrb[48].mxu0  ;;  %v5305_v48 = vpop.f32.mrb[48].mxu1 }
 0x702   :  { %v5449_v35 = vadd.f32 %v5264_v34, %v196_v44  ;;  %v5451_v57 = vadd.f32 %v5305_v48, %v309_v9  ;;  %v5266_v6 = vpop.f32.mrb[49].mxu0  ;;  %v5307_v10 = vpop.f32.mrb[49].mxu1 }
 0x703   :  { %v5450_v7 = vadd.f32 %v5266_v6, %v198_v32  ;;  %v5452_v60 = vadd.f32 %v5307_v10, %v311_v21  ;;  %v5268_v26 = vpop.f32.mrb[50].mxu0  ;;  %v5309_v54 = vpop.f32.mrb[50].mxu1 }
 0x704   :  { %v8873_v19 = vmul.f32 -1.442695, %v5449_v35  ;;  %v5269_v58 = vpop.f32.mrb[51].mxu0  ;;  %v5310_v59 = vpop.f32.mrb[51].mxu1 }
 0x705   :  { %v8874_v62 = vmul.f32 -1.442695, %v5450_v7  ;;  %v5394_v58 = vld [vmem:[%s11716_s4] sm:$0xf] }
 0x706   :  { %9477 = vpow2.f32 %v8873_v19  ;;  %v5399_v59 = vrot.slane %v5394_v58, %v9756_v25  ;;  %v5403_v7 = vrot.slane %v5394_v58, %v9761_v27 }
 0x707   :  { %9479 = vpow2.f32 %v8874_v62 }
 0x708   :  { %9481 = vtanh.f32 %v5452_v60 }
 0x710   :  { %v9478_v17 = vpop.eup %9477 }
 0x711   :  { %v5462_v13 = vadd.f32 1.0, %v9478_v17  ;;  %v9480_v5 = vpop.eup %9479 }
 0x712   :  { %v5463_v29 = vadd.f32 1.0, %v9480_v5  ;;  %v9482_v9 = vpop.eup %9481 }
 0x713   :  { %9483 = vrcp.f32 %v5462_v13 }
 0x714   :  { %9485 = vrcp.f32 %v5463_v29  ;;  %v5407_v29 = vrot.slane %v5394_v58, %v9769_v30 }
 0x71d   :  { %v9484_v48 = vpop.eup %9483 }
 0x71e   :  { %v5473_v34 = vmul.f32 %v9484_v48, %v9482_v9  ;;  %v9486_v6 = vpop.eup %9485  ;;  %v5411_v9 = vrot.slane %v5394_v58, %v9776_v40 }
 0x71f   :  { %v5472_v26 = vmul.f32 %v9486_v6, %v10925_v18 }
 0x721   :  { %v11222_v54 = vadd.f32 %v5473_v34, %v5472_v26  ;;  %v8875_v34 = vmul.f32 -1.442695, %v5451_v57 }
 0x741   :  { %v5346_v10 = vpop.f32.mrb[52].mxu0  ;;  %v5387_v13 = vpop.f32.mrb[52].mxu1 }
 0x742   :  { %v5416_v5 = vadd.f32 %v5399_v59, %v5346_v10  ;;  %v5348_v32 = vpop.f32.mrb[53].mxu0  ;;  %v5389_v60 = vpop.f32.mrb[53].mxu1  ;;  %v5418_v48 = vadd.f32 %v5407_v29, %v5387_v13 }
 0x743   :  { %v5417_v44 = vadd.f32 %v5403_v7, %v5348_v32  ;;  %v5350_v21 = vpop.f32.mrb[54].mxu0  ;;  %v5391_v35 = vpop.f32.mrb[54].mxu1  ;;  %v5419_v6 = vadd.f32 %v5411_v9, %v5389_v60 }
 0x744   :  { %v8870_v19 = vmul.f32 -1.442695, %v5416_v5  ;;  %v5351_v18 = vpop.f32.mrb[55].mxu0  ;;  %v5392_v62 = vpop.f32.mrb[55].mxu1  ;;  %v8872_v26 = vmul.f32 -1.442695, %v5418_v48 }
 0x745   :  { %v8871_v17 = vmul.f32 -1.442695, %v5417_v44 }
 0x746   :  { %9487 = vpow2.f32 %v8870_v19 }
 0x747   :  { %9489 = vpow2.f32 %v8871_v17 }
 0x748   :  { %9491 = vpow2.f32 %v8875_v34 }
 0x749   :  { %9493 = vtanh.f32 %v5419_v6  ;;  %v5491_v6 = vld [vmem:[#allocation4 + $0x50] sm:$0xff] }
 0x74a   :  { %9495 = vpow2.f32 %v8872_v26  ;;  %v5495_v26 = vld [vmem:[#allocation4 + $0x70] sm:$0xff] }
 0x750   :  { %v9488_v59 = vpop.eup %9487 }
 0x751   :  { %v5429_v10 = vadd.f32 1.0, %v9488_v59  ;;  %v9490_v7 = vpop.eup %9489  ;;  %v5492_v59 = vld [vmem:[#allocation4 + $0x58] sm:$0xff] }
 0x752   :  { %v5430_v5 = vadd.f32 1.0, %v9490_v7  ;;  %v9492_v32 = vpop.eup %9491 }
 0x753   :  { %9497 = vrcp.f32 %v5429_v10  ;;  %v9494_v44 = vpop.eup %9493  ;;  %v5464_v19 = vadd.f32 1.0, %v9492_v32  ;;  %v5496_v10 = vld [vmem:[#allocation4 + $0x78] sm:$0xff]  ;;  %v11242_v32 = vcombine.high %v5491_v6, %v5495_v26 }
 0x754   :  { %9499 = vrcp.f32 %v5430_v5  ;;  %v9496_v21 = vpop.eup %9495  ;;  %v5499_v5 = vld [vmem:[#allocation4 + $0x90] sm:$0xff] }
 0x755   :  { %v5431_v13 = vadd.f32 1.0, %v9496_v21  ;;  %9501 = vtanh.f32 %v11222_v54  ;;  %v5503_v21 = vld [vmem:[#allocation4 + $0xb0] sm:$0xff] }
 0x756   :  { %9503 = vrcp.f32 %v5464_v19  ;;  %v5504_v19 = vld [vmem:[#allocation4 + $0xb8] sm:$0xff] }
 0x757   :  { %9505 = vrcp.f32 %v5431_v13  ;;  %v11254_v13 = vcombine.high %v5499_v5, %v5503_v21 }
 0x759   :  { %12387 = vst [vmem:[#allocation12_spill] sm:$0xff] %v11254_v13 }
 0x75d   :  { %v9498_v35 = vpop.eup %9497 }
 0x75e   :  { %v5440_v18 = vmul.f32 %v9498_v35, %v9494_v44  ;;  %v9500_v58 = vpop.eup %9499  ;;  %v11244_v44 = vcombine.high %v5492_v59, %v5496_v10  ;;  %v5500_v35 = vld [vmem:[#allocation4 + $0x98] sm:$0xff] }
 0x75f   :  { %v5439_v57 = vmul.f32 %v9500_v58, %v10936_v61  ;;  %v9502_v62 = vpop.eup %9501  ;;  %v11252_v58 = vcombine.low %v5492_v59, %v5496_v10  ;;  %v5515_v10 = vld [vmem:[#allocation4 + $0x110] sm:$0xff] }
 0x760   :  { %v9504_v17 = vpop.eup %9503  ;;  %12384 = vst [vmem:[#allocation64_spill] sm:$0xff] %v11244_v44 }
 0x761   :  { %v11233_v60 = vadd.f32 %v5440_v18, %v5439_v57  ;;  %v9506_v29 = vpop.eup %9505  ;;  %v5476_v48 = vmul.f32 %v9504_v17, %v9502_v62  ;;  %v11250_v18 = vcombine.low %v5491_v6, %v5495_v26  ;;  %12386 = vst [vmem:[#allocation10_spill] sm:$0xff] %v11252_v58  ;;  %v11256_v57 = vcombine.high %v5500_v35, %v5504_v19  ;;  %v5507_v62 = vld [vmem:[#allocation4 + $0xd0] sm:$0xff] }
 0x762   :  { %v5511_v17 = vld [vmem:[#allocation4 + $0xf0] sm:$0xff]  ;;  %v11264_v6 = vcombine.low %v5500_v35, %v5504_v19 }
 0x763   :  { %9507 = vtanh.f32 %v11233_v60  ;;  %v11240_v7 = vpack.c.bf16 %v5476_v48, %v5476_v48  ;;  %12385 = vst [vmem:[#allocation65_spill] sm:$0xff] %v11250_v18  ;;  %12388 = vst [vmem:[#allocation18_spill] sm:$0xff] %v11256_v57  ;;  %v11262_v48 = vcombine.low %v5499_v5, %v5503_v21  ;;  %v11268_v26 = vcombine.high %v5507_v62, %v5511_v17 }
 0x764   :  { %12390 = vst [vmem:[#allocation19_spill] sm:$0xff] %v11264_v6  ;;  %v11274_v5 = vcombine.low %v5507_v62, %v5511_v17 }
 0x765   :  { %12389 = vst [vmem:[#allocation20_spill] sm:$0xff] %v11262_v48  ;;  %12391 = vst [vmem:[#allocation21_spill] sm:$0xff] %v11268_v26 }
 0x766   :  { %12393 = vst [vmem:[#allocation67_spill] sm:$0xff] %v11274_v5 }
 0x76d   :  { %v9508_v9 = vpop.eup %9507 }
 0x76e   :  { %v11236_v34 = vmul.f32 %v9508_v9, %v9506_v29  ;;  %v5508_v29 = vld [vmem:[#allocation4 + $0xd8] sm:$0xff] }
 0x76f   :  { %v5512_v9 = vld [vmem:[#allocation4 + $0xf8] sm:$0xff] }
 0x770   :  { %12383 = vst [vmem:[#allocation63_spill] sm:$0xff] %v11236_v34  ;;  %v5480_v61 = vpack.c.bf16 %v11236_v34, %v11236_v34  ;;  %v11270_v59 = vcombine.high %v5508_v29, %v5512_v9  ;;  %v5516_v34 = vld [vmem:[#allocation4 + $0x118] sm:$0xff]  ;;  %v11276_v21 = vcombine.low %v5508_v29, %v5512_v9 }
 0x772   :  { %6281 = vmatprep.mubr.bf16.mxu0 %v5480_v61  ;;  %6322 = vmatprep.mubr.bf16.mxu1 %v5480_v61  ;;  %12392 = vst [vmem:[#allocation13_spill] sm:$0xff] %v11270_v59  ;;  %12394 = vst [vmem:[#allocation68_spill] sm:$0xff] %v11276_v21 }
 0x773   :  { %6282 = vmatmul.mubr.bf16.vlgmr.msra.gmra.mrb[56].mxu0 %v11240_v7  ;;  %6323 = vmatmul.mubr.bf16.vlgmr.msra.gmra.mrb[56].mxu1 %v11240_v7 }
 0x774   :  { %6332 = vmatpush1.bf16.msra.mxu0 %v11205_v43  ;;  %6373 = vmatpush1.bf16.msra.mxu1 %v11207_v45 }
 0x775   :  { %6363 = vmatprep.mubr.bf16.mxu0 %v5480_v61  ;;  %6404 = vmatprep.mubr.bf16.mxu1 %v5480_v61  ;;  %v5519_v61 = vld [vmem:[#allocation4 + $0x130] sm:$0xff] }
 0x776   :  { %6333 = vmatprep.subr.bf16.mxu0 %v11242_v32  ;;  %6374 = vmatprep.subr.bf16.mxu1 %v11244_v44  ;;  %v5520_v44 = vld [vmem:[#allocation4 + $0x138] sm:$0xff]  ;;  %v11280_v35 = vcombine.high %v5515_v10, %v5519_v61  ;;  %v11286_v62 = vcombine.low %v5515_v10, %v5519_v61 }
 0x777   :  { %v11282_v19 = vcombine.high %v5516_v34, %v5520_v44  ;;  %v11288_v17 = vcombine.low %v5516_v34, %v5520_v44 }
 0x778   :  { %6334 = vmatpush1.bf16.msra.mxu0 %v11250_v18  ;;  %6375 = vmatpush1.bf16.msra.mxu1 %v11252_v58  ;;  %12395 = vst [vmem:[#allocation69_spill] sm:$0xff] %v11280_v35  ;;  %v5524_v58 = vld [vmem:[#allocation4 + $0x158] sm:$0xff]  ;;  %12397 = vst [vmem:[#allocation71_spill] sm:$0xff] %v11286_v62 }
 0x779   :  { %6335 = vmatprep.subr.bf16.mxu0 %v11254_v13  ;;  %6376 = vmatprep.subr.bf16.mxu1 %v11256_v57  ;;  %12396 = vst [vmem:[#allocation70_spill] sm:$0xff] %v11282_v19  ;;  %v5523_v57 = vld [vmem:[#allocation4 + $0x150] sm:$0xff]  ;;  %v5528_v18 = vld [vmem:[#allocation4 + $0x178] sm:$0xff]  ;;  %12398 = vst [vmem:[#allocation72_spill] sm:$0xff] %v11288_v17 }
 0x77a   :  { %v5527_v13 = vld [vmem:[#allocation4 + $0x170] sm:$0xff]  ;;  %v11294_v9 = vcombine.high %v5524_v58, %v5528_v18  ;;  %v11300_v34 = vcombine.low %v5524_v58, %v5528_v18 }
 0x77b   :  { %v11292_v29 = vcombine.high %v5523_v57, %v5527_v13  ;;  %v11298_v10 = vcombine.low %v5523_v57, %v5527_v13 }
 0x77c   :  { %6336 = vmatpush1.bf16.msra.mxu0 %v11262_v48  ;;  %6377 = vmatpush1.bf16.msra.mxu1 %v11264_v6  ;;  %12400 = vst [vmem:[#allocation74_spill] sm:$0xff] %v11294_v9  ;;  %v5532_v6 = vld [vmem:[#allocation4 + $0x198] sm:$0xff]  ;;  %12402 = vst [vmem:[#allocation76_spill] sm:$0xff] %v11300_v34 }
 0x77d   :  { %6337 = vmatprep.subr.bf16.mxu0 %v11268_v26  ;;  %6378 = vmatprep.subr.bf16.mxu1 %v11270_v59  ;;  %12399 = vst [vmem:[#allocation73_spill] sm:$0xff] %v11292_v29  ;;  %v5531_v59 = vld [vmem:[#allocation4 + $0x190] sm:$0xff]  ;;  %v5536_v48 = vld [vmem:[#allocation4 + $0x1b8] sm:$0xff]  ;;  %12401 = vst [vmem:[#allocation75_spill] sm:$0xff] %v11298_v10 }
 0x77e   :  { %v5535_v26 = vld [vmem:[#allocation4 + $0x1b0] sm:$0xff]  ;;  %v11306_v61 = vcombine.high %v5532_v6, %v5536_v48  ;;  %v11312_v18 = vcombine.low %v5532_v6, %v5536_v48 }
 0x77f   :  { %v11304_v44 = vcombine.high %v5531_v59, %v5535_v26  ;;  %v11310_v13 = vcombine.low %v5531_v59, %v5535_v26 }
 0x780   :  { %6338 = vmatpush1.bf16.msra.mxu0 %v11274_v5  ;;  %6379 = vmatpush1.bf16.msra.mxu1 %v11276_v21  ;;  %12404 = vst [vmem:[#allocation78_spill] sm:$0xff] %v11306_v61  ;;  %v5540_v21 = vld [vmem:[#allocation4 + $0x1d8] sm:$0xff]  ;;  %12406 = vst [vmem:[#allocation80_spill] sm:$0xff] %v11312_v18 }
 0x781   :  { %6339 = vmatprep.subr.bf16.mxu0 %v11280_v35  ;;  %6380 = vmatprep.subr.bf16.mxu1 %v11282_v19  ;;  %12403 = vst [vmem:[#allocation77_spill] sm:$0xff] %v11304_v44  ;;  %v5539_v19 = vld [vmem:[#allocation4 + $0x1d0] sm:$0xff]  ;;  %v5544_v5 = vld [vmem:[#allocation4 + $0x1f8] sm:$0xff]  ;;  %12405 = vst [vmem:[#allocation79_spill] sm:$0xff] %v11310_v13 }
 0x782   :  { %v5543_v35 = vld [vmem:[#allocation4 + $0x1f0] sm:$0xff]  ;;  %v11318_v57 = vcombine.high %v5540_v21, %v5544_v5  ;;  %v11324_v48 = vcombine.low %v5540_v21, %v5544_v5 }
 0x783   :  { %v11316_v58 = vcombine.high %v5539_v19, %v5543_v35  ;;  %v11322_v26 = vcombine.low %v5539_v19, %v5543_v35 }
 0x784   :  { %6340 = vmatpush1.bf16.msra.mxu0 %v11286_v62  ;;  %6381 = vmatpush1.bf16.msra.mxu1 %v11288_v17  ;;  %12408 = vst [vmem:[#allocation82_spill] sm:$0xff] %v11318_v57  ;;  %v5548_v17 = vld [vmem:[#allocation4 + $0x218] sm:$0xff]  ;;  %12410 = vst [vmem:[#allocation84_spill] sm:$0xff] %v11324_v48 }
 0x785   :  { %6341 = vmatprep.subr.bf16.mxu0 %v11292_v29  ;;  %6382 = vmatprep.subr.bf16.mxu1 %v11294_v9  ;;  %12407 = vst [vmem:[#allocation81_spill] sm:$0xff] %v11316_v58  ;;  %v5547_v9 = vld [vmem:[#allocation4 + $0x210] sm:$0xff]  ;;  %v5552_v62 = vld [vmem:[#allocation4 + $0x238] sm:$0xff]  ;;  %12409 = vst [vmem:[#allocation83_spill] sm:$0xff] %v11322_v26 }
 0x786   :  { %v5551_v29 = vld [vmem:[#allocation4 + $0x230] sm:$0xff]  ;;  %v11330_v59 = vcombine.high %v5548_v17, %v5552_v62  ;;  %v11336_v5 = vcombine.low %v5548_v17, %v5552_v62 }
 0x787   :  { %v11328_v6 = vcombine.high %v5547_v9, %v5551_v29  ;;  %v11334_v35 = vcombine.low %v5547_v9, %v5551_v29 }
 0x788   :  { %6342 = vmatpush1.bf16.msra.mxu0 %v11298_v10  ;;  %6383 = vmatpush1.bf16.msra.mxu1 %v11300_v34  ;;  %12412 = vst [vmem:[#allocation86_spill] sm:$0xff] %v11330_v59  ;;  %v5556_v34 = vld [vmem:[#allocation4 + $0x258] sm:$0xff]  ;;  %12414 = vst [vmem:[#allocation88_spill] sm:$0xff] %v11336_v5 }
 0x789   :  { %6343 = vmatprep.subr.bf16.mxu0 %v11304_v44  ;;  %6384 = vmatprep.subr.bf16.mxu1 %v11306_v61  ;;  %12411 = vst [vmem:[#allocation85_spill] sm:$0xff] %v11328_v6  ;;  %v5555_v61 = vld [vmem:[#allocation4 + $0x250] sm:$0xff]  ;;  %v5560_v10 = vld [vmem:[#allocation4 + $0x278] sm:$0xff]  ;;  %12413 = vst [vmem:[#allocation87_spill] sm:$0xff] %v11334_v35 }
 0x78a   :  { %v5559_v44 = vld [vmem:[#allocation4 + $0x270] sm:$0xff]  ;;  %v11342_v19 = vcombine.high %v5556_v34, %v5560_v10  ;;  %v11348_v62 = vcombine.low %v5556_v34, %v5560_v10 }
 0x78b   :  { %v11340_v21 = vcombine.high %v5555_v61, %v5559_v44  ;;  %v11346_v29 = vcombine.low %v5555_v61, %v5559_v44 }
 0x78c   :  { %6344 = vmatpush1.bf16.msra.mxu0 %v11310_v13  ;;  %6385 = vmatpush1.bf16.msra.mxu1 %v11312_v18  ;;  %12416 = vst [vmem:[#allocation90_spill] sm:$0xff] %v11342_v19  ;;  %v5564_v18 = vld [vmem:[#allocation4 + $0x298] sm:$0xff]  ;;  %12418 = vst [vmem:[#allocation92_spill] sm:$0xff] %v11348_v62 }
 0x78d   :  { %6345 = vmatprep.subr.bf16.mxu0 %v11316_v58  ;;  %6386 = vmatprep.subr.bf16.mxu1 %v11318_v57  ;;  %12415 = vst [vmem:[#allocation89_spill] sm:$0xff] %v11340_v21  ;;  %v5563_v57 = vld [vmem:[#allocation4 + $0x290] sm:$0xff]  ;;  %v5568_v13 = vld [vmem:[#allocation4 + $0x2b8] sm:$0xff]  ;;  %12417 = vst [vmem:[#allocation91_spill] sm:$0xff] %v11346_v29 }
 0x78e   :  { %v5567_v58 = vld [vmem:[#allocation4 + $0x2b0] sm:$0xff]  ;;  %v11354_v9 = vcombine.high %v5564_v18, %v5568_v13  ;;  %v11360_v10 = vcombine.low %v5564_v18, %v5568_v13 }
 0x78f   :  { %v11352_v17 = vcombine.high %v5563_v57, %v5567_v58  ;;  %v11358_v44 = vcombine.low %v5563_v57, %v5567_v58 }
 0x790   :  { %6346 = vmatpush1.bf16.msra.mxu0 %v11322_v26  ;;  %6387 = vmatpush1.bf16.msra.mxu1 %v11324_v48  ;;  %12420 = vst [vmem:[#allocation94_spill] sm:$0xff] %v11354_v9  ;;  %v5572_v48 = vld [vmem:[#allocation4 + $0x2d8] sm:$0xff]  ;;  %12422 = vst [vmem:[#allocation96_spill] sm:$0xff] %v11360_v10 }
 0x791   :  { %6347 = vmatprep.subr.bf16.mxu0 %v11328_v6  ;;  %6388 = vmatprep.subr.bf16.mxu1 %v11330_v59  ;;  %12419 = vst [vmem:[#allocation93_spill] sm:$0xff] %v11352_v17  ;;  %v5571_v59 = vld [vmem:[#allocation4 + $0x2d0] sm:$0xff]  ;;  %v5576_v26 = vld [vmem:[#allocation4 + $0x2f8] sm:$0xff]  ;;  %12421 = vst [vmem:[#allocation95_spill] sm:$0xff] %v11358_v44 }
 0x792   :  { %v5575_v6 = vld [vmem:[#allocation4 + $0x2f0] sm:$0xff]  ;;  %v11366_v61 = vcombine.high %v5572_v48, %v5576_v26  ;;  %v11372_v13 = vcombine.low %v5572_v48, %v5576_v26 }
 0x793   :  { %v11364_v34 = vcombine.high %v5571_v59, %v5575_v6  ;;  %v11370_v58 = vcombine.low %v5571_v59, %v5575_v6 }
 0x794   :  { %6348 = vmatpush1.bf16.msra.mxu0 %v11334_v35  ;;  %6389 = vmatpush1.bf16.msra.mxu1 %v11336_v5  ;;  %12424 = vst [vmem:[#allocation98_spill] sm:$0xff] %v11366_v61  ;;  %v5580_v5 = vld [vmem:[#allocation4 + $0x318] sm:$0xff]  ;;  %12426 = vst [vmem:[#allocation100_spill] sm:$0xff] %v11372_v13 }
 0x795   :  { %6349 = vmatprep.subr.bf16.mxu0 %v11340_v21  ;;  %6390 = vmatprep.subr.bf16.mxu1 %v11342_v19  ;;  %12423 = vst [vmem:[#allocation97_spill] sm:$0xff] %v11364_v34  ;;  %v5579_v19 = vld [vmem:[#allocation4 + $0x310] sm:$0xff]  ;;  %v5584_v35 = vld [vmem:[#allocation4 + $0x338] sm:$0xff]  ;;  %12425 = vst [vmem:[#allocation99_spill] sm:$0xff] %v11370_v58 }
 0x796   :  { %v5583_v21 = vld [vmem:[#allocation4 + $0x330] sm:$0xff]  ;;  %v11378_v57 = vcombine.high %v5580_v5, %v5584_v35  ;;  %v11384_v26 = vcombine.low %v5580_v5, %v5584_v35 }
 0x797   :  { %v11376_v18 = vcombine.high %v5579_v19, %v5583_v21  ;;  %v11382_v6 = vcombine.low %v5579_v19, %v5583_v21 }
 0x798   :  { %6350 = vmatpush1.bf16.msra.mxu0 %v11346_v29  ;;  %6391 = vmatpush1.bf16.msra.mxu1 %v11348_v62  ;;  %12428 = vst [vmem:[#allocation102_spill] sm:$0xff] %v11378_v57  ;;  %v5588_v62 = vld [vmem:[#allocation4 + $0x358] sm:$0xff] }
 0x799   :  { %6351 = vmatprep.subr.bf16.mxu0 %v11352_v17  ;;  %6392 = vmatprep.subr.bf16.mxu1 %v11354_v9  ;;  %12427 = vst [vmem:[#allocation101_spill] sm:$0xff] %v11376_v18  ;;  %v5587_v9 = vld [vmem:[#allocation4 + $0x350] sm:$0xff]  ;;  %v5592_v29 = vld [vmem:[#allocation4 + $0x378] sm:$0xff] }
 0x79a   :  { %v5591_v17 = vld [vmem:[#allocation4 + $0x370] sm:$0xff]  ;;  %v11390_v59 = vcombine.high %v5588_v62, %v5592_v29  ;;  %v11396_v35 = vcombine.low %v5588_v62, %v5592_v29 }
 0x79b   :  { %v11388_v48 = vcombine.high %v5587_v9, %v5591_v17  ;;  %v11394_v21 = vcombine.low %v5587_v9, %v5591_v17 }
 0x79c   :  { %6352 = vmatpush1.bf16.msra.mxu0 %v11358_v44  ;;  %6393 = vmatpush1.bf16.msra.mxu1 %v11360_v10  ;;  %12429 = vst [vmem:[#allocation103_spill] sm:$0xff] %v11390_v59  ;;  %v5596_v10 = vld [vmem:[#allocation4 + $0x398] sm:$0xff] }
 0x79d   :  { %6353 = vmatprep.subr.bf16.mxu0 %v11364_v34  ;;  %6394 = vmatprep.subr.bf16.mxu1 %v11366_v61  ;;  %v5595_v61 = vld [vmem:[#allocation4 + $0x390] sm:$0xff]  ;;  %v5600_v44 = vld [vmem:[#allocation4 + $0x3b8] sm:$0xff]  ;;  %12430 = vst [vmem:[#allocation104_spill] sm:$0xff] %v11394_v21 }
 0x79e   :  { %v5599_v34 = vld [vmem:[#allocation4 + $0x3b0] sm:$0xff]  ;;  %v11402_v19 = vcombine.high %v5596_v10, %v5600_v44  ;;  %v11408_v29 = vcombine.low %v5596_v10, %v5600_v44  ;;  %v12465_v44 = vld [vmem:[#allocation26_spill] sm:$0xff] }
 0x79f   :  { %v11400_v5 = vcombine.high %v5595_v61, %v5599_v34  ;;  %v11406_v17 = vcombine.low %v5595_v61, %v5599_v34  ;;  %v12466_v34 = vld [vmem:[#allocation9_spill] sm:$0xff]  ;;  %v12467_v61 = vld [vmem:[#allocation28_spill] sm:$0xff] }
 0x7a0   :  { %6354 = vmatpush1.bf16.msra.mxu0 %v11370_v58  ;;  %6395 = vmatpush1.bf16.msra.mxu1 %v11372_v13  ;;  %v5604_v13 = vld [vmem:[#allocation4 + $0x3d8] sm:$0xff] }
 0x7a1   :  { %6355 = vmatprep.subr.bf16.mxu0 %v11376_v18  ;;  %6396 = vmatprep.subr.bf16.mxu1 %v11378_v57  ;;  %v5603_v57 = vld [vmem:[#allocation4 + $0x3d0] sm:$0xff]  ;;  %v5608_v58 = vld [vmem:[#allocation4 + $0x3f8] sm:$0xff] }
 0x7a2   :  { %v5607_v18 = vld [vmem:[#allocation4 + $0x3f0] sm:$0xff]  ;;  %v11414_v9 = vcombine.high %v5604_v13, %v5608_v58 }
 0x7a3   :  { %v11412_v62 = vcombine.high %v5603_v57, %v5607_v18 }
 0x7a4   :  { %6356 = vmatpush1.bf16.msra.mxu0 %v11382_v6  ;;  %6397 = vmatpush1.bf16.msra.mxu1 %v11384_v26 }
 0x7a5   :  { %6357 = vmatprep.subr.bf16.mxu0 %v11388_v48  ;;  %6398 = vmatprep.subr.bf16.mxu1 %v11390_v59  ;;  %v11418_v59 = vcombine.low %v5603_v57, %v5607_v18  ;;  %v12469_v18 = vld [vmem:[#allocation27_spill] sm:$0xff] }
 0x7a8   :  { %6358 = vmatpush1.bf16.msra.mxu0 %v11394_v21  ;;  %6399 = vmatpush1.bf16.msra.mxu1 %v11396_v35  ;;  %v11420_v21 = vcombine.low %v5604_v13, %v5608_v58  ;;  %v315_v58 = vadd.f32 %v12467_v61, %v12466_v34  ;;  %v12468_v13 = vld [vmem:[#allocation8_spill] sm:$0xff] }
 0x7a9   :  { %6359 = vmatprep.subr.bf16.mxu0 %v11400_v5  ;;  %6400 = vmatprep.subr.bf16.mxu1 %v11402_v19  ;;  %v204_v57 = vadd.f32 %v12469_v18, %v12468_v13 }
 0x7ac   :  { %6360 = vmatpush1.bf16.msra.mxu0 %v11406_v17  ;;  %6401 = vmatpush1.bf16.msra.mxu1 %v11408_v29 }
 0x7ad   :  { %6361 = vmatprep.subr.bf16.mxu0 %v11412_v62  ;;  %6402 = vmatprep.subr.bf16.mxu1 %v11414_v9 }
 0x7b0   :  { %6362 = vmatpush1.bf16.msra.mxu0 %v11418_v59  ;;  %6403 = vmatpush1.bf16.msra.mxu1 %v11420_v21 }
 0x7b1   :  { %7268 = vmatprep.subr.bf16.mxu0 %v11013_v20  ;;  %7309 = vmatprep.subr.bf16.mxu1 %v11017_v41  ;;  %v12432_v20 = vld [vmem:[#allocation114_spill] sm:$0xff]  ;;  %v12434_v41 = vld [vmem:[#allocation15_spill] sm:$0xff] }
 0x7b3   :  { %6364 = vmatmul.mubr.bf16.vlgmr.msra.gmra.mrb[60].mxu0 %v11240_v7  ;;  %6405 = vmatmul.mubr.bf16.vlgmr.msra.gmra.mrb[60].mxu1 %v11240_v7  ;;  %v12464_v7 = vld [vmem:[#allocation7_spill] sm:$0xff] }
 0x7b4   :  { %7269 = vmatpush1.bf16.msra.mxu0 %v11011_v36  ;;  %7310 = vmatpush1.bf16.msra.mxu1 %v11015_v37  ;;  %v12431_v36 = vld [vmem:[#allocation16_spill] sm:$0xff]  ;;  %v12433_v37 = vld [vmem:[#allocation14_spill] sm:$0xff]  ;;  %v202_v10 = vadd.f32 %v12465_v44, %v12464_v7 }
 0x7b5   :  { %7270 = vmatprep.subr.bf16.mxu0 %v11019_v3  ;;  %7311 = vmatprep.subr.bf16.mxu1 %v11022_v14  ;;  %v12435_v3 = vld [vmem:[#allocation35_spill] sm:$0xff]  ;;  %v12436_v14 = vld [vmem:[#allocation17_spill] sm:$0xff] }
 0x7b8   :  { %7271 = vmatpush1.bf16.msra.mxu0 %v11026_v63  ;;  %7312 = vmatpush1.bf16.msra.mxu1 %v11030_v16  ;;  %v12437_v63 = vld [vmem:[#allocation39_spill] sm:$0xff]  ;;  %v12438_v16 = vld [vmem:[#allocation36_spill] sm:$0xff] }
 0x7b9   :  { %7272 = vmatprep.subr.bf16.mxu0 %v11032_v8  ;;  %7313 = vmatprep.subr.bf16.mxu1 %v11035_v31  ;;  %v12439_v8 = vld [vmem:[#allocation38_spill] sm:$0xff]  ;;  %v12440_v31 = vld [vmem:[#allocation37_spill] sm:$0xff] }
 0x7bc   :  { %7273 = vmatpush1.bf16.msra.mxu0 %v11038_v12  ;;  %7314 = vmatpush1.bf16.msra.mxu1 %v11042_v28  ;;  %v12441_v12 = vld [vmem:[#allocation43_spill] sm:$0xff]  ;;  %v12442_v28 = vld [vmem:[#allocation40_spill] sm:$0xff] }
 0x7bd   :  { %7274 = vmatprep.subr.bf16.mxu0 %v11044_v15  ;;  %7315 = vmatprep.subr.bf16.mxu1 %v11047_v33  ;;  %v12443_v15 = vld [vmem:[#allocation42_spill] sm:$0xff]  ;;  %v12444_v33 = vld [vmem:[#allocation41_spill] sm:$0xff] }
 0x7c0   :  { %7275 = vmatpush1.bf16.msra.mxu0 %v11050_v52  ;;  %7316 = vmatpush1.bf16.msra.mxu1 %v11054_v53  ;;  %v12445_v52 = vld [vmem:[#allocation47_spill] sm:$0xff]  ;;  %v12446_v53 = vld [vmem:[#allocation44_spill] sm:$0xff] }
 0x7c1   :  { %7276 = vmatprep.subr.bf16.mxu0 %v11059_v4  ;;  %7317 = vmatprep.subr.bf16.mxu1 %v11066_v55  ;;  %v12447_v4 = vld [vmem:[#allocation46_spill] sm:$0xff]  ;;  %v12450_v55 = vld [vmem:[#allocation49_spill] sm:$0xff] }
 0x7c4   :  { %7277 = vmatpush1.bf16.msra.mxu0 %v11061_v47  ;;  %7318 = vmatpush1.bf16.msra.mxu1 %v11063_v46  ;;  %v12448_v47 = vld [vmem:[#allocation45_spill] sm:$0xff]  ;;  %v12449_v46 = vld [vmem:[#allocation51_spill] sm:$0xff] }
 0x7c5   :  { %7278 = vmatprep.subr.bf16.mxu0 %v11070_v23  ;;  %7319 = vmatprep.subr.bf16.mxu1 %v11077_v22  ;;  %v12451_v23 = vld [vmem:[#allocation50_spill] sm:$0xff]  ;;  %v12454_v22 = vld [vmem:[#allocation53_spill] sm:$0xff] }
 0x7c8   :  { %7279 = vmatpush1.bf16.msra.mxu0 %v11073_v11  ;;  %7320 = vmatpush1.bf16.msra.mxu1 %v11075_v56  ;;  %v12452_v11 = vld [vmem:[#allocation48_spill] sm:$0xff]  ;;  %v12453_v56 = vld [vmem:[#allocation55_spill] sm:$0xff] }
 0x7c9   :  { %7280 = vmatprep.subr.bf16.mxu0 %v11082_v39  ;;  %7321 = vmatprep.subr.bf16.mxu1 %v11089_v24  ;;  %v12455_v39 = vld [vmem:[#allocation54_spill] sm:$0xff]  ;;  %v12458_v24 = vld [vmem:[#allocation52_spill] sm:$0xff] }
 0x7cc   :  { %7281 = vmatpush1.bf16.msra.mxu0 %v11085_v50  ;;  %7322 = vmatpush1.bf16.msra.mxu1 %v11087_v2  ;;  %v12456_v50 = vld [vmem:[#allocation57_spill] sm:$0xff]  ;;  %v12457_v2 = vld [vmem:[#allocation56_spill] sm:$0xff] }
 0x7cd   :  { %7282 = vmatprep.subr.bf16.mxu0 %v11094_v49  ;;  %7323 = vmatprep.subr.bf16.mxu1 %v11101_v51  ;;  %v12459_v49 = vld [vmem:[#allocation58_spill] sm:$0xff] }
 0x7ce   :  { %v12462_v51 = vld [vmem:[#allocation62_spill] sm:$0xff] }
 0x7d0   :  { %7283 = vmatpush1.bf16.msra.mxu0 %v11097_v38  ;;  %7324 = vmatpush1.bf16.msra.mxu1 %v11099_v1  ;;  %v12460_v38 = vld [vmem:[#allocation60_spill] sm:$0xff]  ;;  %v12461_v1 = vld [vmem:[#allocation59_spill] sm:$0xff] }
 0x7d1   :  { %7284 = vmatprep.subr.bf16.mxu0 %v11106_v0  ;;  %7325 = vmatprep.subr.bf16.mxu1 %v12431_v36  ;;  %v12463_v0 = vld [vmem:[#allocation61_spill] sm:$0xff] }
 0x7d2   :  { %v12470_v36 = vld [vmem:[#allocation29_spill] sm:$0xff] }
 0x7d4   :  { %7285 = vmatpush1.bf16.msra.mxu0 %v12432_v20  ;;  %7326 = vmatpush1.bf16.msra.mxu1 %v12433_v37  ;;  %v317_v20 = vadd.f32 %v12470_v36, %v9780_v42 }
 0x7d5   :  { %7286 = vmatprep.subr.bf16.mxu0 %v12434_v41  ;;  %7327 = vmatprep.subr.bf16.mxu1 %v12435_v3 }
 0x7d8   :  { %7287 = vmatpush1.bf16.msra.mxu0 %v12436_v14  ;;  %7328 = vmatpush1.bf16.msra.mxu1 %v12437_v63 }
 0x7d9   :  { %7288 = vmatprep.subr.bf16.mxu0 %v12438_v16  ;;  %7329 = vmatprep.subr.bf16.mxu1 %v12439_v8 }
 0x7dc   :  { %7289 = vmatpush1.bf16.msra.mxu0 %v12440_v31  ;;  %7330 = vmatpush1.bf16.msra.mxu1 %v12441_v12 }
 0x7dd   :  { %7290 = vmatprep.subr.bf16.mxu0 %v12442_v28  ;;  %7331 = vmatprep.subr.bf16.mxu1 %v12443_v15 }
 0x7e0   :  { %7291 = vmatpush1.bf16.msra.mxu0 %v12444_v33  ;;  %7332 = vmatpush1.bf16.msra.mxu1 %v12445_v52 }
 0x7e1   :  { %7292 = vmatprep.subr.bf16.mxu0 %v12446_v53  ;;  %7333 = vmatprep.subr.bf16.mxu1 %v12447_v4 }
 0x7e4   :  { %7293 = vmatpush1.bf16.msra.mxu0 %v12448_v47  ;;  %7334 = vmatpush1.bf16.msra.mxu1 %v12449_v46 }
 0x7e5   :  { %7294 = vmatprep.subr.bf16.mxu0 %v12450_v55  ;;  %7335 = vmatprep.subr.bf16.mxu1 %v12451_v23 }
 0x7e8   :  { %7295 = vmatpush1.bf16.msra.mxu0 %v12452_v11  ;;  %7336 = vmatpush1.bf16.msra.mxu1 %v12453_v56 }
 0x7e9   :  { %7296 = vmatprep.subr.bf16.mxu0 %v12454_v22  ;;  %7337 = vmatprep.subr.bf16.mxu1 %v12455_v39 }
 0x7ec   :  { %7297 = vmatpush1.bf16.msra.mxu0 %v12456_v50  ;;  %7338 = vmatpush1.bf16.msra.mxu1 %v12457_v2  ;;  %v6413_v2 = vld [vmem:[%s11716_s4] sm:$0xf] }
 0x7ed   :  { %7298 = vmatprep.subr.bf16.mxu0 %v12458_v24  ;;  %7339 = vmatprep.subr.bf16.mxu1 %v12459_v49  ;;  %v6418_v24 = vrot.slane %v6413_v2, %v9756_v25  ;;  %v6422_v49 = vrot.slane %v6413_v2, %v9761_v27 }
 0x7f0   :  { %7299 = vmatpush1.bf16.msra.mxu0 %v12460_v38  ;;  %7340 = vmatpush1.bf16.msra.mxu1 %v12461_v1 }
 0x7f1   :  { %7350 = vmatprep.subr.bf16.mxu0 %v12462_v51  ;;  %7391 = vmatprep.subr.bf16.mxu1 %v12463_v0 }
 0x846   :  { %v6283_v37 = vpop.f32.mrb[56].mxu0  ;;  %v6324_v41 = vpop.f32.mrb[56].mxu1 }
 0x847   :  { %v6468_v3 = vadd.f32 %v6283_v37, %v202_v10  ;;  %v6470_v14 = vadd.f32 %v6324_v41, %v315_v58  ;;  %v6285_v63 = vpop.f32.mrb[57].mxu0  ;;  %v6326_v16 = vpop.f32.mrb[57].mxu1  ;;  %v6430_v37 = vrot.slane %v6413_v2, %v9776_v40 }
 0x848   :  { %v6469_v8 = vadd.f32 %v6285_v63, %v204_v57  ;;  %v6471_v31 = vadd.f32 %v6326_v16, %v317_v20  ;;  %v6287_v12 = vpop.f32.mrb[58].mxu0  ;;  %v6328_v28 = vpop.f32.mrb[58].mxu1  ;;  %v6426_v20 = vrot.slane %v6413_v2, %v9769_v30 }
 0x849   :  { %v9007_v15 = vmul.f32 -1.442695, %v6468_v3  ;;  %v6288_v33 = vpop.f32.mrb[59].mxu0  ;;  %v6329_v52 = vpop.f32.mrb[59].mxu1  ;;  %v9009_v3 = vmul.f32 -1.442695, %v6470_v14 }
 0x84a   :  { %v9008_v53 = vmul.f32 -1.442695, %v6469_v8 }
 0x84b   :  { %9509 = vpow2.f32 %v9007_v15 }
 0x84c   :  { %9511 = vpow2.f32 %v9008_v53 }
 0x84d   :  { %9513 = vtanh.f32 %v6471_v31 }
 0x855   :  { %v9510_v4 = vpop.eup %9509 }
 0x856   :  { %v6481_v47 = vadd.f32 1.0, %v9510_v4  ;;  %v9512_v46 = vpop.eup %9511 }
 0x857   :  { %v6482_v55 = vadd.f32 1.0, %v9512_v46  ;;  %v9514_v23 = vpop.eup %9513 }
 0x858   :  { %9515 = vrcp.f32 %v6481_v47 }
 0x859   :  { %9517 = vrcp.f32 %v6482_v55 }
 0x862   :  { %v9516_v11 = vpop.eup %9515 }
 0x863   :  { %v6492_v56 = vmul.f32 %v9516_v11, %v9514_v23  ;;  %v9518_v22 = vpop.eup %9517 }
 0x864   :  { %v6491_v39 = vmul.f32 %v9518_v22, %v11222_v54 }
 0x866   :  { %v11503_v50 = vadd.f32 %v6492_v56, %v6491_v39 }
 0x886   :  { %v6365_v38 = vpop.f32.mrb[60].mxu0  ;;  %v6406_v1 = vpop.f32.mrb[60].mxu1 }
 0x887   :  { %v6435_v51 = vadd.f32 %v6418_v24, %v6365_v38  ;;  %v6367_v0 = vpop.f32.mrb[61].mxu0  ;;  %v6408_v44 = vpop.f32.mrb[61].mxu1  ;;  %v6437_v41 = vadd.f32 %v6426_v20, %v6406_v1  ;;  %v12472_v1 = vld [vmem:[#allocation65_spill] sm:$0xff] }
 0x888   :  { %v6436_v10 = vadd.f32 %v6422_v49, %v6367_v0  ;;  %v6369_v61 = vpop.f32.mrb[62].mxu0  ;;  %v6410_v58 = vpop.f32.mrb[62].mxu1  ;;  %v6438_v63 = vadd.f32 %v6430_v37, %v6408_v44  ;;  %v12474_v0 = vld [vmem:[#allocation12_spill] sm:$0xff]  ;;  %v12475_v44 = vld [vmem:[#allocation18_spill] sm:$0xff]  ;;  %v12486_v20 = vld [vmem:[#allocation73_spill] sm:$0xff] }
 0x889   :  { %v9004_v18 = vmul.f32 -1.442695, %v6435_v51  ;;  %v6370_v54 = vpop.f32.mrb[63].mxu0  ;;  %v6411_v57 = vpop.f32.mrb[63].mxu1  ;;  %v9006_v16 = vmul.f32 -1.442695, %v6437_v41 }
 0x88a   :  { %v9005_v36 = vmul.f32 -1.442695, %v6436_v10  ;;  %v12473_v51 = vld [vmem:[#allocation10_spill] sm:$0xff]  ;;  %v12476_v10 = vld [vmem:[#allocation20_spill] sm:$0xff]  ;;  %v12477_v61 = vld [vmem:[#allocation19_spill] sm:$0xff] }
 0x88b   :  { %9519 = vpow2.f32 %v9004_v18  ;;  %v12480_v58 = vld [vmem:[#allocation67_spill] sm:$0xff]  ;;  %v12482_v18 = vld [vmem:[#allocation69_spill] sm:$0xff]  ;;  %v12483_v54 = vld [vmem:[#allocation70_spill] sm:$0xff] }
 0x88c   :  { %9521 = vpow2.f32 %v9005_v36  ;;  %v12484_v57 = vld [vmem:[#allocation71_spill] sm:$0xff]  ;;  %v12485_v36 = vld [vmem:[#allocation72_spill] sm:$0xff]  ;;  %v12487_v37 = vld [vmem:[#allocation74_spill] sm:$0xff] }
 0x88d   :  { %9523 = vpow2.f32 %v9009_v3  ;;  %v12488_v41 = vld [vmem:[#allocation75_spill] sm:$0xff]  ;;  %v12489_v3 = vld [vmem:[#allocation76_spill] sm:$0xff] }
 0x88e   :  { %9525 = vtanh.f32 %v6438_v63  ;;  %v12490_v63 = vld [vmem:[#allocation77_spill] sm:$0xff] }
 0x88f   :  { %9527 = vpow2.f32 %v9006_v16  ;;  %v12491_v16 = vld [vmem:[#allocation78_spill] sm:$0xff] }
 0x895   :  { %v9520_v8 = vpop.eup %9519 }
 0x896   :  { %v6448_v31 = vadd.f32 1.0, %v9520_v8  ;;  %v9522_v12 = vpop.eup %9521  ;;  %v12492_v8 = vld [vmem:[#allocation79_spill] sm:$0xff] }
 0x897   :  { %v6449_v28 = vadd.f32 1.0, %v9522_v12  ;;  %v9524_v15 = vpop.eup %9523  ;;  %v12494_v12 = vld [vmem:[#allocation81_spill] sm:$0xff] }
 0x898   :  { %9529 = vrcp.f32 %v6448_v31  ;;  %v9526_v33 = vpop.eup %9525  ;;  %v6483_v4 = vadd.f32 1.0, %v9524_v15  ;;  %v12493_v31 = vld [vmem:[#allocation80_spill] sm:$0xff]  ;;  %v12496_v15 = vld [vmem:[#allocation83_spill] sm:$0xff] }
 0x899   :  { %9531 = vrcp.f32 %v6449_v28  ;;  %v9528_v52 = vpop.eup %9527  ;;  %v12495_v28 = vld [vmem:[#allocation82_spill] sm:$0xff] }
 0x89a   :  { %v6450_v55 = vadd.f32 1.0, %v9528_v52  ;;  %9533 = vtanh.f32 %v11503_v50  ;;  %v12498_v52 = vld [vmem:[#allocation85_spill] sm:$0xff] }
 0x89b   :  { %9535 = vrcp.f32 %v6483_v4  ;;  %v12500_v4 = vld [vmem:[#allocation87_spill] sm:$0xff] }
 0x89c   :  { %9537 = vrcp.f32 %v6450_v55  ;;  %v12503_v55 = vld [vmem:[#allocation90_spill] sm:$0xff] }
 0x8a2   :  { %v9530_v53 = vpop.eup %9529 }
 0x8a3   :  { %v6459_v47 = vmul.f32 %v9530_v53, %v9526_v33  ;;  %v9532_v46 = vpop.eup %9531  ;;  %v12497_v33 = vld [vmem:[#allocation84_spill] sm:$0xff]  ;;  %v12499_v53 = vld [vmem:[#allocation86_spill] sm:$0xff] }
 0x8a4   :  { %v6458_v14 = vmul.f32 %v9532_v46, %v11233_v60  ;;  %v9534_v11 = vpop.eup %9533  ;;  %v12471_v60 = vld [vmem:[#allocation64_spill] sm:$0xff]  ;;  %v12502_v46 = vld [vmem:[#allocation89_spill] sm:$0xff] }
 0x8a5   :  { %v9536_v56 = vpop.eup %9535 }
 0x8a6   :  { %v11514_v23 = vadd.f32 %v6459_v47, %v6458_v14  ;;  %v9538_v22 = vpop.eup %9537  ;;  %v6495_v2 = vmul.f32 %v9536_v56, %v9534_v11  ;;  %v12501_v47 = vld [vmem:[#allocation88_spill] sm:$0xff]  ;;  %v12504_v14 = vld [vmem:[#allocation91_spill] sm:$0xff]  ;;  %v12506_v56 = vld [vmem:[#allocation93_spill] sm:$0xff] }
 0x8a7   :  { %v12505_v11 = vld [vmem:[#allocation92_spill] sm:$0xff] }
 0x8a8   :  { %9539 = vtanh.f32 %v11514_v23  ;;  %v11521_v38 = vpack.c.bf16 %v6495_v2, %v6495_v2  ;;  %v12509_v2 = vld [vmem:[#allocation96_spill] sm:$0xff] }
 0x8b2   :  { %v9540_v39 = vpop.eup %9539 }
 0x8b3   :  { %v11517_v24 = vmul.f32 %v9540_v39, %v9538_v22  ;;  %v12507_v22 = vld [vmem:[#allocation94_spill] sm:$0xff]  ;;  %v12508_v39 = vld [vmem:[#allocation95_spill] sm:$0xff] }
 0x8b5   :  { %v6499_v49 = vpack.c.bf16 %v11517_v24, %v11517_v24 }
 0x8b7   :  { %7300 = vmatprep.mubr.bf16.mxu0 %v6499_v49  ;;  %7341 = vmatprep.mubr.bf16.mxu1 %v6499_v49 }
 0x8b8   :  { %7301 = vmatmul.mubr.bf16.vlgmr.msra.gmra.mrb[64].mxu0 %v11521_v38  ;;  %7342 = vmatmul.mubr.bf16.vlgmr.msra.gmra.mrb[64].mxu1 %v11521_v38 }
 0x8b9   :  { %7351 = vmatpush1.bf16.msra.mxu0 %v11205_v43  ;;  %7392 = vmatpush1.bf16.msra.mxu1 %v11207_v45  ;;  %v12478_v43 = vld [vmem:[#allocation21_spill] sm:$0xff] }
 0x8ba   :  { %7382 = vmatprep.mubr.bf16.mxu0 %v6499_v49  ;;  %7423 = vmatprep.mubr.bf16.mxu1 %v6499_v49  ;;  %v12479_v45 = vld [vmem:[#allocation13_spill] sm:$0xff] }
 0x8bb   :  { %7352 = vmatprep.subr.bf16.mxu0 %v11242_v32  ;;  %7393 = vmatprep.subr.bf16.mxu1 %v12471_v60  ;;  %v12481_v32 = vld [vmem:[#allocation68_spill] sm:$0xff]  ;;  %v12510_v49 = vld [vmem:[#allocation97_spill] sm:$0xff]  ;;  %v12511_v60 = vld [vmem:[#allocation98_spill] sm:$0xff] }
 0x8bd   :  { %7353 = vmatpush1.bf16.msra.mxu0 %v12472_v1  ;;  %7394 = vmatpush1.bf16.msra.mxu1 %v12473_v51  ;;  %v12512_v1 = vld [vmem:[#allocation99_spill] sm:$0xff]  ;;  %v12513_v51 = vld [vmem:[#allocation100_spill] sm:$0xff] }
 0x8be   :  { %7354 = vmatprep.subr.bf16.mxu0 %v12474_v0  ;;  %7395 = vmatprep.subr.bf16.mxu1 %v12475_v44  ;;  %v12514_v0 = vld [vmem:[#allocation101_spill] sm:$0xff]  ;;  %v12515_v44 = vld [vmem:[#allocation102_spill] sm:$0xff] }
 0x8c1   :  { %7355 = vmatpush1.bf16.msra.mxu0 %v12476_v10  ;;  %7396 = vmatpush1.bf16.msra.mxu1 %v12477_v61  ;;  %v12516_v10 = vld [vmem:[#allocation103_spill] sm:$0xff]  ;;  %v12517_v61 = vld [vmem:[#allocation104_spill] sm:$0xff] }
 0x8c2   :  { %7356 = vmatprep.subr.bf16.mxu0 %v12478_v43  ;;  %7397 = vmatprep.subr.bf16.mxu1 %v12479_v45 }
 0x8c5   :  { %7357 = vmatpush1.bf16.msra.mxu0 %v12480_v58  ;;  %7398 = vmatpush1.bf16.msra.mxu1 %v12481_v32  ;;  %v7526_v58 = vld [vmem:[#allocation4 + $0x78] sm:$0xff]  ;;  %v7529_v32 = vld [vmem:[#allocation4 + $0xb0] sm:$0xff] }
 0x8c6   :  { %7358 = vmatprep.subr.bf16.mxu0 %v12482_v18  ;;  %7399 = vmatprep.subr.bf16.mxu1 %v12483_v54  ;;  %v7528_v18 = vld [vmem:[#allocation4 + $0x98] sm:$0xff] }
 0x8c7   :  { %v7530_v54 = vld [vmem:[#allocation4 + $0xb8] sm:$0xff] }
 0x8c9   :  { %7359 = vmatpush1.bf16.msra.mxu0 %v12484_v57  ;;  %7400 = vmatpush1.bf16.msra.mxu1 %v12485_v36 }
 0x8ca   :  { %7360 = vmatprep.subr.bf16.mxu0 %v12486_v20  ;;  %7401 = vmatprep.subr.bf16.mxu1 %v12487_v37  ;;  %v9155_v20 = vcombine.high %v7528_v18, %v7530_v54  ;;  %v7531_v37 = vld [vmem:[#allocation4 + $0xd0] sm:$0xff] }
 0x8cd   :  { %7361 = vmatpush1.bf16.msra.mxu0 %v12488_v41  ;;  %7402 = vmatpush1.bf16.msra.mxu1 %v12489_v3  ;;  %v7533_v41 = vld [vmem:[#allocation4 + $0xf0] sm:$0xff]  ;;  %v7532_v3 = vld [vmem:[#allocation4 + $0xd8] sm:$0xff] }
 0x8ce   :  { %7362 = vmatprep.subr.bf16.mxu0 %v12490_v63  ;;  %7403 = vmatprep.subr.bf16.mxu1 %v12491_v16  ;;  %v7534_v63 = vld [vmem:[#allocation4 + $0xf8] sm:$0xff] }
 0x8d1   :  { %7363 = vmatpush1.bf16.msra.mxu0 %v12492_v8  ;;  %7404 = vmatpush1.bf16.msra.mxu1 %v12493_v31  ;;  %v9154_v8 = vcombine.low %v7528_v18, %v7530_v54  ;;  %v9157_v31 = vcombine.high %v7531_v37, %v7533_v41 }
 0x8d2   :  { %7364 = vmatprep.subr.bf16.mxu0 %v12494_v12  ;;  %7405 = vmatprep.subr.bf16.mxu1 %v12495_v28  ;;  %v9159_v12 = vcombine.high %v7532_v3, %v7534_v63  ;;  %v9156_v28 = vcombine.low %v7531_v37, %v7533_v41  ;;  %v7558_v41 = vld [vmem:[#allocation4 + $0x278] sm:$0xff] }
 0x8d5   :  { %7365 = vmatpush1.bf16.msra.mxu0 %v12496_v15  ;;  %7406 = vmatpush1.bf16.msra.mxu1 %v12497_v33  ;;  %v9158_v15 = vcombine.low %v7532_v3, %v7534_v63  ;;  %v7535_v33 = vld [vmem:[#allocation4 + $0x110] sm:$0xff] }
 0x8d6   :  { %7366 = vmatprep.subr.bf16.mxu0 %v12498_v52  ;;  %7407 = vmatprep.subr.bf16.mxu1 %v12499_v53  ;;  %v7537_v52 = vld [vmem:[#allocation4 + $0x130] sm:$0xff]  ;;  %v7536_v53 = vld [vmem:[#allocation4 + $0x118] sm:$0xff] }
 0x8d9   :  { %7367 = vmatpush1.bf16.msra.mxu0 %v12500_v4  ;;  %7408 = vmatpush1.bf16.msra.mxu1 %v12501_v47  ;;  %v9161_v4 = vcombine.high %v7535_v33, %v7537_v52  ;;  %v7538_v47 = vld [vmem:[#allocation4 + $0x138] sm:$0xff] }
 0x8da   :  { %7368 = vmatprep.subr.bf16.mxu0 %v12502_v46  ;;  %7409 = vmatprep.subr.bf16.mxu1 %v12503_v55  ;;  %v9160_v46 = vcombine.low %v7535_v33, %v7537_v52  ;;  %v9162_v55 = vcombine.low %v7536_v53, %v7538_v47 }
 0x8dd   :  { %7369 = vmatpush1.bf16.msra.mxu0 %v12504_v14  ;;  %7410 = vmatpush1.bf16.msra.mxu1 %v12505_v11  ;;  %v9163_v14 = vcombine.high %v7536_v53, %v7538_v47  ;;  %v7539_v11 = vld [vmem:[#allocation4 + $0x150] sm:$0xff] }
 0x8de   :  { %7370 = vmatprep.subr.bf16.mxu0 %v12506_v56  ;;  %7411 = vmatprep.subr.bf16.mxu1 %v12507_v22  ;;  %v7541_v56 = vld [vmem:[#allocation4 + $0x170] sm:$0xff]  ;;  %v7540_v22 = vld [vmem:[#allocation4 + $0x158] sm:$0xff] }
 0x8df   :  { %v7565_v47 = vld [vmem:[#allocation4 + $0x2f0] sm:$0xff] }
 0x8e1   :  { %7371 = vmatpush1.bf16.msra.mxu0 %v12508_v39  ;;  %7412 = vmatpush1.bf16.msra.mxu1 %v12509_v2  ;;  %v9165_v39 = vcombine.high %v7539_v11, %v7541_v56  ;;  %v7542_v2 = vld [vmem:[#allocation4 + $0x178] sm:$0xff] }
 0x8e2   :  { %7372 = vmatprep.subr.bf16.mxu0 %v12510_v49  ;;  %7413 = vmatprep.subr.bf16.mxu1 %v12511_v60  ;;  %v9164_v49 = vcombine.low %v7539_v11, %v7541_v56  ;;  %v9166_v60 = vcombine.low %v7540_v22, %v7542_v2 }
 0x8e5   :  { %7373 = vmatpush1.bf16.msra.mxu0 %v12512_v1  ;;  %7414 = vmatpush1.bf16.msra.mxu1 %v12513_v51  ;;  %v9167_v1 = vcombine.high %v7540_v22, %v7542_v2  ;;  %v7543_v51 = vld [vmem:[#allocation4 + $0x190] sm:$0xff] }
 0x8e6   :  { %7374 = vmatprep.subr.bf16.mxu0 %v12514_v0  ;;  %7415 = vmatprep.subr.bf16.mxu1 %v12515_v44  ;;  %v7545_v0 = vld [vmem:[#allocation4 + $0x1b0] sm:$0xff]  ;;  %v7544_v44 = vld [vmem:[#allocation4 + $0x198] sm:$0xff] }
 0x8e7   :  { %v7569_v2 = vld [vmem:[#allocation4 + $0x330] sm:$0xff] }
 0x8e9   :  { %7375 = vmatpush1.bf16.msra.mxu0 %v11382_v6  ;;  %7416 = vmatpush1.bf16.msra.mxu1 %v11384_v26  ;;  %v7519_v6 = vld [vmem:[#allocation4 + $0x10] sm:$0xff] }
 0x8ea   :  { %7376 = vmatprep.subr.bf16.mxu0 %v11388_v48  ;;  %7417 = vmatprep.subr.bf16.mxu1 %v12516_v10  ;;  %v7521_v26 = vld [vmem:[#allocation4 + $0x30] sm:$0xff]  ;;  %v7520_v48 = vld [vmem:[#allocation4 + $0x18] sm:$0xff]  ;;  %v9169_v10 = vcombine.high %v7543_v51, %v7545_v0 }
 0x8ed   :  { %7377 = vmatpush1.bf16.msra.mxu0 %v12517_v61  ;;  %7418 = vmatpush1.bf16.msra.mxu1 %v11396_v35  ;;  %v9144_v35 = vcombine.low %v7519_v6, %v7521_v26  ;;  %v7546_v61 = vld [vmem:[#allocation4 + $0x1b8] sm:$0xff] }
 0x8ee   :  { %7378 = vmatprep.subr.bf16.mxu0 %v11400_v5  ;;  %7419 = vmatprep.subr.bf16.mxu1 %v11402_v19  ;;  %v9145_v5 = vcombine.high %v7519_v6, %v7521_v26  ;;  %v7522_v19 = vld [vmem:[#allocation4 + $0x38] sm:$0xff]  ;;  %v9168_v6 = vcombine.low %v7543_v51, %v7545_v0  ;;  %v9170_v26 = vcombine.low %v7544_v44, %v7546_v61 }
 0x8ef   :  { %v9146_v43 = vcombine.low %v7520_v48, %v7522_v19 }
 0x8f1   :  { %7379 = vmatpush1.bf16.msra.mxu0 %v11406_v17  ;;  %7420 = vmatpush1.bf16.msra.mxu1 %v11408_v29  ;;  %v7523_v17 = vld [vmem:[#allocation4 + $0x50] sm:$0xff] }
 0x8f2   :  { %7380 = vmatprep.subr.bf16.mxu0 %v11412_v62  ;;  %7421 = vmatprep.subr.bf16.mxu1 %v11414_v9  ;;  %v7525_v29 = vld [vmem:[#allocation4 + $0x70] sm:$0xff]  ;;  %v9147_v62 = vcombine.high %v7520_v48, %v7522_v19  ;;  %v7524_v9 = vld [vmem:[#allocation4 + $0x58] sm:$0xff]  ;;  %v9171_v48 = vcombine.high %v7544_v44, %v7546_v61 }
 0x8f3   :  { %v9149_v45 = vcombine.high %v7523_v17, %v7525_v29  ;;  %v9150_v57 = vcombine.low %v7524_v9, %v7526_v58  ;;  %v7548_v19 = vld [vmem:[#allocation4 + $0x1d8] sm:$0xff]  ;;  %v7573_v61 = vld [vmem:[#allocation4 + $0x370] sm:$0xff] }
 0x8f5   :  { %7381 = vmatpush1.bf16.msra.mxu0 %v11418_v59  ;;  %7422 = vmatpush1.bf16.msra.mxu1 %v11420_v21  ;;  %v7527_v59 = vld [vmem:[#allocation4 + $0x90] sm:$0xff]  ;;  %v9151_v21 = vcombine.high %v7524_v9, %v7526_v58 }
 0x8f6   :  { %7903 = vmatprep.subr.bf16.mxu0 %v9145_v5  ;;  %7944 = vmatprep.subr.bf16.mxu1 %v9147_v62  ;;  %v9153_v36 = vcombine.high %v7527_v59, %v7529_v32  ;;  %v9152_v16 = vcombine.low %v7527_v59, %v7529_v32  ;;  %v7549_v5 = vld [vmem:[#allocation4 + $0x1f0] sm:$0xff]  ;;  %v7552_v59 = vld [vmem:[#allocation4 + $0x218] sm:$0xff] }
 0x8f7   :  { %v7551_v9 = vld [vmem:[#allocation4 + $0x210] sm:$0xff]  ;;  %v7554_v32 = vld [vmem:[#allocation4 + $0x238] sm:$0xff] }
 0x8f8   :  { %7383 = vmatmul.mubr.bf16.vlgmr.msra.gmra.mrb[68].mxu0 %v11521_v38  ;;  %7424 = vmatmul.mubr.bf16.vlgmr.msra.gmra.mrb[68].mxu1 %v11521_v38  ;;  %v9148_v38 = vcombine.low %v7523_v17, %v7525_v29  ;;  %v7550_v29 = vld [vmem:[#allocation4 + $0x1f8] sm:$0xff]  ;;  %v7553_v58 = vld [vmem:[#allocation4 + $0x230] sm:$0xff]  ;;  %v9178_v54 = vcombine.low %v7552_v59, %v7554_v32 }
 0x8f9   :  { %7904 = vmatpush1.bf16.msra.mxu0 %v9144_v35  ;;  %7945 = vmatpush1.bf16.msra.mxu1 %v9146_v43  ;;  %v7547_v35 = vld [vmem:[#allocation4 + $0x1d0] sm:$0xff]  ;;  %v9174_v62 = vcombine.low %v7548_v19, %v7550_v29  ;;  %v9176_v18 = vcombine.low %v7551_v9, %v7553_v58 }
 0x8fa   :  { %7905 = vmatprep.subr.bf16.mxu0 %v9149_v45  ;;  %7946 = vmatprep.subr.bf16.mxu1 %v9151_v21  ;;  %v9173_v17 = vcombine.high %v7547_v35, %v7549_v5  ;;  %v9172_v43 = vcombine.low %v7547_v35, %v7549_v5  ;;  %v9175_v45 = vcombine.high %v7548_v19, %v7550_v29  ;;  %v7574_v35 = vld [vmem:[#allocation4 + $0x378] sm:$0xff]  ;;  %v7575_v5 = vld [vmem:[#allocation4 + $0x390] sm:$0xff] }
 0x8fb   :  { %v9177_v21 = vcombine.high %v7551_v9, %v7553_v58  ;;  %v7577_v19 = vld [vmem:[#allocation4 + $0x3b0] sm:$0xff] }
 0x8fc   :  { %v7579_v9 = vld [vmem:[#allocation4 + $0x3d0] sm:$0xff] }
 0x8fd   :  { %7906 = vmatpush1.bf16.msra.mxu0 %v9148_v38  ;;  %7947 = vmatpush1.bf16.msra.mxu1 %v9150_v57  ;;  %v9179_v38 = vcombine.high %v7552_v59, %v7554_v32  ;;  %v7555_v57 = vld [vmem:[#allocation4 + $0x250] sm:$0xff]  ;;  %v7580_v32 = vld [vmem:[#allocation4 + $0x3d8] sm:$0xff] }
 0x8fe   :  { %7907 = vmatprep.subr.bf16.mxu0 %v9153_v36  ;;  %7948 = vmatprep.subr.bf16.mxu1 %v9155_v20  ;;  %v7557_v36 = vld [vmem:[#allocation4 + $0x270] sm:$0xff]  ;;  %v7556_v20 = vld [vmem:[#allocation4 + $0x258] sm:$0xff] }
 0x8ff   :  { %v9181_v37 = vcombine.high %v7555_v57, %v7557_v36  ;;  %v9180_v3 = vcombine.low %v7555_v57, %v7557_v36  ;;  %v9182_v63 = vcombine.low %v7556_v20, %v7558_v41  ;;  %v7581_v59 = vld [vmem:[#allocation4 + $0x3f0] sm:$0xff] }
 0x900   :  { %v9204_v36 = vcombine.low %v7579_v9, %v7581_v59 }
 0x901   :  { %7908 = vmatpush1.bf16.msra.mxu0 %v9152_v16  ;;  %7949 = vmatpush1.bf16.msra.mxu1 %v9154_v8  ;;  %v9183_v16 = vcombine.high %v7556_v20, %v7558_v41  ;;  %v7559_v8 = vld [vmem:[#allocation4 + $0x290] sm:$0xff]  ;;  %v8046_v41 = vld [vmem:[%s11717_s5 + $0x8] sm:$0xff] }
 0x902   :  { %7909 = vmatprep.subr.bf16.mxu0 %v9157_v31  ;;  %7950 = vmatprep.subr.bf16.mxu1 %v9159_v12  ;;  %v7561_v31 = vld [vmem:[#allocation4 + $0x2b0] sm:$0xff]  ;;  %v7560_v12 = vld [vmem:[#allocation4 + $0x298] sm:$0xff] }
 0x903   :  { %v9184_v33 = vcombine.low %v7559_v8, %v7561_v31 }
 0x905   :  { %7910 = vmatpush1.bf16.msra.mxu0 %v9156_v28  ;;  %7951 = vmatpush1.bf16.msra.mxu1 %v9158_v15  ;;  %v9185_v28 = vcombine.high %v7559_v8, %v7561_v31  ;;  %v7562_v15 = vld [vmem:[#allocation4 + $0x2b8] sm:$0xff]  ;;  %v12519_v8 = vld [vmem:[#allocation32_spill] sm:$0xff] }
 0x906   :  { %7911 = vmatprep.subr.bf16.mxu0 %v9161_v4  ;;  %7952 = vmatprep.subr.bf16.mxu1 %v9163_v14  ;;  %v9186_v52 = vcombine.low %v7560_v12, %v7562_v15  ;;  %v9187_v53 = vcombine.high %v7560_v12, %v7562_v15  ;;  %v7563_v4 = vld [vmem:[#allocation4 + $0x2d0] sm:$0xff]  ;;  %v7566_v14 = vld [vmem:[#allocation4 + $0x2f8] sm:$0xff]  ;;  %v321_v31 = vadd.f32 %v12519_v8, %v12466_v34  ;;  %v12520_v12 = vld [vmem:[#allocation31_spill] sm:$0xff] }
 0x907   :  { %v9188_v11 = vcombine.low %v7563_v4, %v7565_v47  ;;  %v12521_v15 = vld [vmem:[#allocation33_spill] sm:$0xff] }
 0x909   :  { %7912 = vmatpush1.bf16.msra.mxu0 %v9160_v46  ;;  %7953 = vmatpush1.bf16.msra.mxu1 %v9162_v55  ;;  %v7564_v46 = vld [vmem:[#allocation4 + $0x2d8] sm:$0xff]  ;;  %v9189_v55 = vcombine.high %v7563_v4, %v7565_v47 }
 0x90a   :  { %7913 = vmatprep.subr.bf16.mxu0 %v9165_v39  ;;  %7954 = vmatprep.subr.bf16.mxu1 %v9167_v1  ;;  %v9190_v56 = vcombine.low %v7564_v46, %v7566_v14  ;;  %v9191_v22 = vcombine.high %v7564_v46, %v7566_v14  ;;  %v7567_v39 = vld [vmem:[#allocation4 + $0x310] sm:$0xff]  ;;  %v7570_v1 = vld [vmem:[#allocation4 + $0x338] sm:$0xff] }
 0x90b   :  { %v9192_v51 = vcombine.low %v7567_v39, %v7569_v2 }
 0x90d   :  { %7914 = vmatpush1.bf16.msra.mxu0 %v9164_v49  ;;  %7955 = vmatpush1.bf16.msra.mxu1 %v9166_v60  ;;  %v7568_v49 = vld [vmem:[#allocation4 + $0x318] sm:$0xff]  ;;  %v9193_v60 = vcombine.high %v7567_v39, %v7569_v2 }
 0x90e   :  { %7915 = vmatprep.subr.bf16.mxu0 %v9169_v10  ;;  %7956 = vmatprep.subr.bf16.mxu1 %v9171_v48  ;;  %v9194_v0 = vcombine.low %v7568_v49, %v7570_v1  ;;  %v9195_v44 = vcombine.high %v7568_v49, %v7570_v1  ;;  %v7571_v10 = vld [vmem:[#allocation4 + $0x350] sm:$0xff] }
 0x90f   :  { %v9197_v48 = vcombine.high %v7571_v10, %v7573_v61 }
 0x911   :  { %7916 = vmatpush1.bf16.msra.mxu0 %v9168_v6  ;;  %7957 = vmatpush1.bf16.msra.mxu1 %v9170_v26  ;;  %v7572_v6 = vld [vmem:[#allocation4 + $0x358] sm:$0xff]  ;;  %v9196_v26 = vcombine.low %v7571_v10, %v7573_v61 }
 0x912   :  { %7917 = vmatprep.subr.bf16.mxu0 %v9173_v17  ;;  %7958 = vmatprep.subr.bf16.mxu1 %v9175_v45  ;;  %v9198_v17 = vcombine.low %v7572_v6, %v7574_v35  ;;  %v9199_v29 = vcombine.high %v7572_v6, %v7574_v35  ;;  %v7578_v45 = vld [vmem:[#allocation4 + $0x3b8] sm:$0xff] }
 0x915   :  { %7918 = vmatpush1.bf16.msra.mxu0 %v9172_v43  ;;  %7959 = vmatpush1.bf16.msra.mxu1 %v9174_v62  ;;  %v9201_v43 = vcombine.high %v7575_v5, %v7577_v19  ;;  %v7576_v62 = vld [vmem:[#allocation4 + $0x398] sm:$0xff] }
 0x916   :  { %7919 = vmatprep.subr.bf16.mxu0 %v9177_v21  ;;  %7960 = vmatprep.subr.bf16.mxu1 %v9179_v38  ;;  %v9203_v58 = vcombine.high %v7576_v62, %v7578_v45  ;;  %v9200_v21 = vcombine.low %v7575_v5, %v7577_v19  ;;  %v9202_v38 = vcombine.low %v7576_v62, %v7578_v45 }
 0x919   :  { %7920 = vmatpush1.bf16.msra.mxu0 %v9176_v18  ;;  %7961 = vmatpush1.bf16.msra.mxu1 %v9178_v54  ;;  %v7582_v18 = vld [vmem:[#allocation4 + $0x3f8] sm:$0xff]  ;;  %v9205_v54 = vcombine.high %v7579_v9, %v7581_v59 }
 0x91a   :  { %7921 = vmatprep.subr.bf16.mxu0 %v9181_v37  ;;  %7962 = vmatprep.subr.bf16.mxu1 %v9183_v16  ;;  %v9207_v57 = vcombine.high %v7580_v32, %v7582_v18  ;;  %v9206_v20 = vcombine.low %v7580_v32, %v7582_v18  ;;  %v8045_v37 = vld [vmem:[%s11717_s5] sm:$0xff] }
 0x91d   :  { %7922 = vmatpush1.bf16.msra.mxu0 %v9180_v3  ;;  %7963 = vmatpush1.bf16.msra.mxu1 %v9182_v63  ;;  %v11595_v3 = vpack.c.bf16 %v8046_v41, %v8045_v37  ;;  %v12518_v63 = vld [vmem:[#allocation30_spill] sm:$0xff] }
 0x91e   :  { %7923 = vmatprep.subr.bf16.mxu0 %v9185_v28  ;;  %7964 = vmatprep.subr.bf16.mxu1 %v9187_v53  ;;  %v208_v16 = vadd.f32 %v12518_v63, %v12464_v7  ;;  %v210_v28 = vadd.f32 %v12520_v12, %v12468_v13 }
 0x921   :  { %7924 = vmatpush1.bf16.msra.mxu0 %v9184_v33  ;;  %7965 = vmatpush1.bf16.msra.mxu1 %v9186_v52  ;;  %v323_v33 = vadd.f32 %v12521_v15, %v9780_v42 }
 0x922   :  { %7925 = vmatprep.subr.bf16.mxu0 %v9189_v55  ;;  %7966 = vmatprep.subr.bf16.mxu1 %v9191_v22 }
 0x925   :  { %7926 = vmatpush1.bf16.msra.mxu0 %v9188_v11  ;;  %7967 = vmatpush1.bf16.msra.mxu1 %v9190_v56 }
 0x926   :  { %7927 = vmatprep.subr.bf16.mxu0 %v9193_v60  ;;  %7968 = vmatprep.subr.bf16.mxu1 %v9195_v44 }
 0x929   :  { %7928 = vmatpush1.bf16.msra.mxu0 %v9192_v51  ;;  %7969 = vmatpush1.bf16.msra.mxu1 %v9194_v0 }
 0x92a   :  { %7929 = vmatprep.subr.bf16.mxu0 %v9197_v48  ;;  %7970 = vmatprep.subr.bf16.mxu1 %v9199_v29 }
 0x92d   :  { %7930 = vmatpush1.bf16.msra.mxu0 %v9196_v26  ;;  %7971 = vmatpush1.bf16.msra.mxu1 %v9198_v17  ;;  %v7432_v17 = vld [vmem:[%s11716_s4] sm:$0xf] }
 0x92e   :  { %7931 = vmatprep.subr.bf16.mxu0 %v9201_v43  ;;  %7972 = vmatprep.subr.bf16.mxu1 %v9203_v58  ;;  %v7437_v29 = vrot.slane %v7432_v17, %v9756_v25  ;;  %v7441_v43 = vrot.slane %v7432_v17, %v9761_v27 }
 0x931   :  { %7932 = vmatpush1.bf16.msra.mxu0 %v9200_v21  ;;  %7973 = vmatpush1.bf16.msra.mxu1 %v9202_v38 }
 0x932   :  { %7933 = vmatprep.subr.bf16.mxu0 %v9205_v54  ;;  %7974 = vmatprep.subr.bf16.mxu1 %v9207_v57 }
 0x935   :  { %7934 = vmatpush1.bf16.msra.mxu0 %v9204_v36  ;;  %7975 = vmatpush1.bf16.msra.mxu1 %v9206_v20  ;;  %v7445_v36 = vrot.slane %v7432_v17, %v9769_v30  ;;  %v7449_v20 = vrot.slane %v7432_v17, %v9776_v40 }
 0x936   :  { %9281 = vmatprep.subr.bf16.mxu0 %v11595_v3  ;;  %9312 = vmatprep.subr.bf16.mxu1 %v11595_v3 }
 0x98b   :  { %v7302_v52 = vpop.f32.mrb[64].mxu0  ;;  %v7343_v53 = vpop.f32.mrb[64].mxu1 }
 0x98c   :  { %v7487_v4 = vadd.f32 %v7302_v52, %v208_v16  ;;  %v7489_v47 = vadd.f32 %v7343_v53, %v321_v31  ;;  %v7304_v46 = vpop.f32.mrb[65].mxu0  ;;  %v7345_v55 = vpop.f32.mrb[65].mxu1 }
 0x98d   :  { %v7488_v14 = vadd.f32 %v7304_v46, %v210_v28  ;;  %v7490_v11 = vadd.f32 %v7345_v55, %v323_v33  ;;  %v7306_v56 = vpop.f32.mrb[66].mxu0  ;;  %v7347_v22 = vpop.f32.mrb[66].mxu1 }
 0x98e   :  { %v9141_v7 = vmul.f32 -1.442695, %v7487_v4  ;;  %v7307_v39 = vpop.f32.mrb[67].mxu0  ;;  %v7348_v2 = vpop.f32.mrb[67].mxu1  ;;  %v9143_v13 = vmul.f32 -1.442695, %v7489_v47 }
 0x98f   :  { %v9142_v34 = vmul.f32 -1.442695, %v7488_v14  ;;  %v8047_v56 = vld [vmem:[%s11717_s5 + $0x10] sm:$0xff]  ;;  %v8048_v22 = vld [vmem:[%s11717_s5 + $0x18] sm:$0xff]  ;;  %v8049_v2 = vld [vmem:[%s11717_s5 + $0x20] sm:$0xff] }
 0x990   :  { %9541 = vpow2.f32 %v9141_v7 }
 0x991   :  { %9543 = vpow2.f32 %v9142_v34  ;;  %v8050_v34 = vld [vmem:[%s11717_s5 + $0x28] sm:$0xff] }
 0x992   :  { %9545 = vtanh.f32 %v7490_v11 }
 0x993   :  { %9547 = vpow2.f32 %v9143_v13  ;;  %v12522_v13 = vld [vmem:[#allocation66_spill] sm:$0xff] }
 0x99a   :  { %v9542_v49 = vpop.eup %9541 }
 0x99b   :  { %v7500_v60 = vadd.f32 1.0, %v9542_v49  ;;  %v9544_v42 = vpop.eup %9543  ;;  %v12523_v49 = vld [vmem:[#allocation63_spill] sm:$0xff] }
 0x99c   :  { %v7501_v1 = vadd.f32 1.0, %v9544_v42  ;;  %v9546_v51 = vpop.eup %9545  ;;  %v8051_v42 = vld [vmem:[%s11717_s5 + $0x30] sm:$0xff] }
 0x99d   :  { %9549 = vrcp.f32 %v7500_v60  ;;  %v9548_v0 = vpop.eup %9547  ;;  %v9288_v60 = vpack.c.bf16 %v8050_v34, %v8049_v2 }
 0x99e   :  { %9551 = vrcp.f32 %v7501_v1  ;;  %v7502_v6 = vadd.f32 1.0, %v9548_v0  ;;  %v8052_v1 = vld [vmem:[%s11717_s5 + $0x38] sm:$0xff]  ;;  %v8054_v0 = vld [vmem:[%s11717_s5 + $0x48] sm:$0xff] }
 0x9a0   :  { %9553 = vrcp.f32 %v7502_v6 }
 0x9a7   :  { %v9550_v44 = vpop.eup %9549 }
 0x9a8   :  { %v7511_v10 = vmul.f32 %v9550_v44, %v9546_v51  ;;  %v9552_v61 = vpop.eup %9551  ;;  %v8053_v51 = vld [vmem:[%s11717_s5 + $0x40] sm:$0xff] }
 0x9a9   :  { %v7510_v26 = vmul.f32 %v9552_v61, %v11503_v50  ;;  %v9296_v44 = vpack.c.bf16 %v8054_v0, %v8053_v51  ;;  %v8056_v61 = vld [vmem:[%s11717_s5 + $0x58] sm:$0xff] }
 0x9aa   :  { %v9554_v35 = vpop.eup %9553 }
 0x9ab   :  { %v7512_v48 = vadd.f32 %v7511_v10, %v7510_v26  ;;  %v8055_v10 = vld [vmem:[%s11717_s5 + $0x50] sm:$0xff]  ;;  %v8057_v26 = vld [vmem:[%s11717_s5 + $0x60] sm:$0xff] }
 0x9ac   :  { %v9300_v6 = vpack.c.bf16 %v8056_v61, %v8055_v10 }
 0x9ad   :  { %9555 = vtanh.f32 %v7512_v48  ;;  %v8058_v48 = vld [vmem:[%s11717_s5 + $0x68] sm:$0xff] }
 0x9b7   :  { %v9556_v5 = vpop.eup %9555 }
 0x9b8   :  { %v7514_v19 = vmul.f32 %v9556_v5, %v9554_v35  ;;  %v9304_v35 = vpack.c.bf16 %v8058_v48, %v8057_v26  ;;  %v8059_v5 = vld [vmem:[%s11717_s5 + $0x70] sm:$0xff] }
 0x9ba   :  { %v7517_v39 = vpack.c.bf16 %v7514_v19, %v7514_v19  ;;  %v8060_v19 = vld [vmem:[%s11717_s5 + $0x78] sm:$0xff] }
 0x9bb   :  { %v9308_v17 = vpack.c.bf16 %v8060_v19, %v8059_v5 }
 0x9cb   :  { %v7384_v62 = vpop.f32.mrb[68].mxu0  ;;  %v7425_v45 = vpop.f32.mrb[68].mxu1 }
 0x9cc   :  { %v7454_v9 = vadd.f32 %v7437_v29, %v7384_v62  ;;  %v7386_v58 = vpop.f32.mrb[69].mxu0  ;;  %v7427_v59 = vpop.f32.mrb[69].mxu1  ;;  %v7456_v37 = vadd.f32 %v7445_v36, %v7425_v45  ;;  %v12524_v29 = vld [vmem:[#allocation34_spill] sm:$0xff]  ;;  %v12526_v62 = vld [vmem:[#allocation113_spill] sm:$0xff]  ;;  %v7985_v45 = vld [vmem:[%s11716_s4] sm:$0xf] }
 0x9cd   :  { %v7455_v50 = vadd.f32 %v7441_v43, %v7386_v58  ;;  %v7388_v21 = vpop.f32.mrb[70].mxu0  ;;  %v7429_v32 = vpop.f32.mrb[70].mxu1  ;;  %v7457_v41 = vadd.f32 %v7449_v20, %v7427_v59  ;;  %v12525_v43 = vld [vmem:[#allocation11_spill] sm:$0xff]  ;;  %v7994_v58 = vrot.slane %v7985_v45, %v9761_v27 }
 0x9ce   :  { %v9138_v18 = vmul.f32 -1.442695, %v7454_v9  ;;  %v7389_v54 = vpop.f32.mrb[71].mxu0  ;;  %v7430_v38 = vpop.f32.mrb[71].mxu1  ;;  %v9140_v63 = vmul.f32 -1.442695, %v7456_v37  ;;  %v7990_v9 = vrot.slane %v7985_v45, %v9756_v25  ;;  %v8002_v25 = vrot.slane %v7985_v45, %v9776_v40 }
 0x9cf   :  { %v9139_v57 = vmul.f32 -1.442695, %v7455_v50  ;;  %v9211_v40 = vld [vmem:[%s11718_s6] ss:$0 sm:$0xff] }
 0x9d0   :  { %9557 = vpow2.f32 %v9138_v18 }
 0x9d1   :  { %9559 = vpow2.f32 %v9139_v57 }
 0x9d2   :  { %9561 = vtanh.f32 %v7457_v41  ;;  %v7998_v41 = vrot.slane %v7985_v45, %v9769_v30 }
 0x9d3   :  { %9563 = vpow2.f32 %v9140_v63 }
 0x9da   :  { %v9558_v16 = vpop.eup %9557 }
 0x9db   :  { %v7467_v8 = vadd.f32 1.0, %v9558_v16  ;;  %v9560_v31 = vpop.eup %9559 }
 0x9dc   :  { %v7468_v12 = vadd.f32 1.0, %v9560_v31  ;;  %v9562_v28 = vpop.eup %9561 }
 0x9dd   :  { %9565 = vrcp.f32 %v7467_v8  ;;  %v9564_v15 = vpop.eup %9563 }
 0x9de   :  { %9567 = vrcp.f32 %v7468_v12  ;;  %v7469_v4 = vadd.f32 1.0, %v9564_v15 }
 0x9e0   :  { %9569 = vrcp.f32 %v7469_v4 }
 0x9e7   :  { %v9566_v33 = vpop.eup %9565 }
 0x9e8   :  { %v7478_v52 = vmul.f32 %v9566_v33, %v9562_v28  ;;  %v9568_v53 = vpop.eup %9567 }
 0x9e9   :  { %v7477_v47 = vmul.f32 %v9568_v53, %v11514_v23  ;;  %v9284_v23 = vpack.c.bf16 %v8048_v22, %v8047_v56 }
 0x9ea   :  { %v9570_v55 = vpop.eup %9569 }
 0x9eb   :  { %v11616_v46 = vadd.f32 %v7478_v52, %v7477_v47 }
 0x9ed   :  { %9571 = vtanh.f32 %v11616_v46 }
 0x9f7   :  { %v9572_v14 = vpop.eup %9571 }
 0x9f8   :  { %v7481_v11 = vmul.f32 %v9572_v14, %v9570_v55 }
 0x9fa   :  { %v7518_v7 = vpack.c.bf16 %v7481_v11, %v7481_v11 }
 0x9fc   :  { %7935 = vmatprep.mubr.bf16.mxu0 %v7518_v7  ;;  %7976 = vmatprep.mubr.bf16.mxu1 %v7518_v7 }
 0x9fd   :  { %7936 = vmatmul.mubr.bf16.vlgmr.msra.gmra.mrb[72].mxu0 %v7517_v39  ;;  %7977 = vmatmul.mubr.bf16.vlgmr.msra.gmra.mrb[72].mxu1 %v7517_v39 }
 0x9fe   :  { %9283 = vmatpush3.bf16.msra.mxu0 %v11595_v3  ;;  %9320 = vmatpush3.bf16.msra.mxu1 %v11595_v3  ;;  %v9292_v3 = vpack.c.bf16 %v8052_v1, %v8051_v42 }
 0x9ff   :  { %9268 = vmatprep.mubr.f32.mxu0 %v12522_v13  ;;  %9274 = vmatprep.mubr.f32.mxu1 %v12523_v49 }
 0xa00   :  { %9285 = vmatprep.subr.bf16.mxu0 %v9284_v23  ;;  %9313 = vmatprep.subr.bf16.mxu1 %v9284_v23 }
 0xa02   :  { %9287 = vmatpush3.bf16.msra.mxu0 %v9284_v23  ;;  %9321 = vmatpush3.bf16.msra.mxu1 %v9284_v23 }
 0xa03   :  { %9289 = vmatprep.subr.bf16.mxu0 %v9288_v60  ;;  %9314 = vmatprep.subr.bf16.mxu1 %v9288_v60 }
 0xa06   :  { %9291 = vmatpush3.bf16.msra.mxu0 %v9288_v60  ;;  %9322 = vmatpush3.bf16.msra.mxu1 %v9288_v60 }
 0xa07   :  { %9293 = vmatprep.subr.bf16.mxu0 %v9292_v3  ;;  %9315 = vmatprep.subr.bf16.mxu1 %v9292_v3 }
 0xa0a   :  { %9295 = vmatpush3.bf16.msra.mxu0 %v9292_v3  ;;  %9323 = vmatpush3.bf16.msra.mxu1 %v9292_v3 }
 0xa0b   :  { %9297 = vmatprep.subr.bf16.mxu0 %v9296_v44  ;;  %9316 = vmatprep.subr.bf16.mxu1 %v9296_v44 }
 0xa0e   :  { %9299 = vmatpush3.bf16.msra.mxu0 %v9296_v44  ;;  %9324 = vmatpush3.bf16.msra.mxu1 %v9296_v44 }
 0xa0f   :  { %9301 = vmatprep.subr.bf16.mxu0 %v9300_v6  ;;  %9317 = vmatprep.subr.bf16.mxu1 %v9300_v6 }
 0xa12   :  { %9303 = vmatpush3.bf16.msra.mxu0 %v9300_v6  ;;  %9325 = vmatpush3.bf16.msra.mxu1 %v9300_v6 }
 0xa13   :  { %9305 = vmatprep.subr.bf16.mxu0 %v9304_v35  ;;  %9318 = vmatprep.subr.bf16.mxu1 %v9304_v35 }
 0xa16   :  { %9307 = vmatpush3.bf16.msra.mxu0 %v9304_v35  ;;  %9326 = vmatpush3.bf16.msra.mxu1 %v9304_v35 }
 0xa17   :  { %9309 = vmatprep.subr.bf16.mxu0 %v9308_v17  ;;  %9319 = vmatprep.subr.bf16.mxu1 %v9308_v17 }
 0xa1a   :  { %9311 = vmatpush3.bf16.msra.mxu0 %v9308_v17  ;;  %9327 = vmatpush3.bf16.msra.mxu1 %v9308_v17 }
 0xa1d   :  { %9269 = vmatmul.mubr.f32.vlgmr.msra.gmra.mrb[76].mxu0 %v12524_v29  ;;  %9275 = vmatmul.mubr.f32.vlgmr.msra.gmra.mrb[76].mxu1 %v11517_v24 }
 0xa1e   :  { %9271 = vmatprep.mubr.f32.mxu0 %v12525_v43  ;;  %9277 = vmatprep.mubr.f32.mxu1 %v7481_v11 }
 0xa21   :  { %9272 = vmatmul.mubr.f32.gmra.mrb[78].mxu0 %v12526_v62 }
 0xad0   :  { %v7937_v59 = vpop.f32.mrb[72].mxu0  ;;  %v7978_v50 = vpop.f32.mrb[72].mxu1 }
 0xad1   :  { %v8007_v21 = vadd.f32 %v7990_v9, %v7937_v59  ;;  %v7939_v32 = vpop.f32.mrb[73].mxu0  ;;  %v7980_v18 = vpop.f32.mrb[73].mxu1  ;;  %v8009_v63 = vadd.f32 %v7998_v41, %v7978_v50 }
 0xad2   :  { %v8008_v54 = vadd.f32 %v7994_v58, %v7939_v32  ;;  %v7941_v24 = vpop.f32.mrb[74].mxu0  ;;  %v7982_v38 = vpop.f32.mrb[74].mxu1  ;;  %v8010_v27 = vadd.f32 %v8002_v25, %v7980_v18 }
 0xad3   :  { %v9208_v57 = vmul.f32 -1.442695, %v8007_v21  ;;  %v7942_v36 = vpop.f32.mrb[75].mxu0  ;;  %v7983_v20 = vpop.f32.mrb[75].mxu1  ;;  %v9210_v16 = vmul.f32 -1.442695, %v8009_v63 }
 0xad4   :  { %v9209_v37 = vmul.f32 -1.442695, %v8008_v54 }
 0xad5   :  { %9573 = vpow2.f32 %v9208_v57 }
 0xad6   :  { %9575 = vpow2.f32 %v9209_v37 }
 0xad7   :  { %9577 = vtanh.f32 %v8010_v27 }
 0xad8   :  { %9579 = vpow2.f32 %v9210_v16 }
 0xadf   :  { %v9574_v8 = vpop.eup %9573 }
 0xae0   :  { %v8020_v31 = vadd.f32 1.0, %v9574_v8  ;;  %v9576_v12 = vpop.eup %9575 }
 0xae1   :  { %v8021_v28 = vadd.f32 1.0, %v9576_v12  ;;  %v9578_v15 = vpop.eup %9577 }
 0xae2   :  { %9581 = vrcp.f32 %v8020_v31  ;;  %v9580_v33 = vpop.eup %9579 }
 0xae3   :  { %9583 = vrcp.f32 %v8021_v28  ;;  %v8022_v30 = vadd.f32 1.0, %v9580_v33 }
 0xae5   :  { %9585 = vrcp.f32 %v8022_v30 }
 0xaec   :  { %v9582_v52 = vpop.eup %9581 }
 0xaed   :  { %v8031_v53 = vmul.f32 %v9582_v52, %v9578_v15  ;;  %v9584_v4 = vpop.eup %9583 }
 0xaee   :  { %v8030_v47 = vmul.f32 %v9584_v4, %v11616_v46 }
 0xaef   :  { %v9586_v60 = vpop.eup %9585 }
 0xaf0   :  { %v9270_v55 = vpop.f32.mrb[76].mxu0  ;;  %v9276_v14 = vpop.f32.mrb[76].mxu1  ;;  %v8032_v11 = vadd.f32 %v8031_v53, %v8030_v47 }
 0xaf1   :  { %v8140_v56 = vadd.f32 %v9270_v55, %v9211_v40  ;;  %v8160_v22 = vadd.f32 %v9276_v14, %v9211_v40  ;;  %v8134_v7 = vpop.f32.mrb[77].mxu0  ;;  %v8154_v39 = vpop.f32.mrb[77].mxu1 }
 0xaf2   :  { %v8135_v23 = vadd.f32 %v9211_v40, %v8134_v7  ;;  %v8155_v2 = vadd.f32 %v9211_v40, %v8154_v39  ;;  %9587 = vtanh.f32 %v8032_v11 }
 0xaf3   :  { %8175 = vst.msk [vmem:[%s11719_s7 + $0x8] sm:$0xff] %vm8173_vm1, %v8140_v56  ;;  %8179 = vst.msk [vmem:[%s11719_s7 + $0x28] sm:$0xff] %vm8173_vm1, %v8160_v22 }
 0xaf4   :  { %8174 = vst.msk [vmem:[%s11719_s7] sm:$0xff] %vm8173_vm1, %v8135_v23  ;;  %8178 = vst.msk [vmem:[%s11719_s7 + $0x20] sm:$0xff] %vm8173_vm1, %v8155_v2  ;;  %v9273_v46 = vpop.f32.mrb[78].mxu0 }
 0xaf5   :  { %v8150_v34 = vadd.f32 %v9273_v46, %v9211_v40  ;;  %v8144_v13 = vpop.f32.mrb[79].mxu0 }
 0xaf6   :  { %v8145_v49 = vadd.f32 %v9211_v40, %v8144_v13 }
 0xaf7   :  { %8177 = vst.msk [vmem:[%s11719_s7 + $0x18] sm:$0xff] %vm8173_vm1, %v8150_v34 }
 0xaf8   :  { %8176 = vst.msk [vmem:[%s11719_s7 + $0x10] sm:$0xff] %vm8173_vm1, %v8145_v49 }
 0xafc   :  { %v9588_v42 = vpop.eup %9587 }
 0xafd   :  { %v8034_v1 = vmul.f32 %v9588_v42, %v9586_v60 }
 0xaff   :  { %9278 = vmatmul.mubr.f32.gmra.mrb[78].mxu1 %v8034_v1 }
 0xbd2   :  { %v9279_v3 = vpop.f32.mrb[78].mxu1 }
 0xbd3   :  { %v8170_v51 = vadd.f32 %v9279_v3, %v9211_v40  ;;  %v8164_v0 = vpop.f32.mrb[79].mxu1 }
 0xbd4   :  { %v8165_v44 = vadd.f32 %v9211_v40, %v8164_v0 }
 0xbd5   :  { %8181 = vst.msk [vmem:[%s11719_s7 + $0x38] sm:$0xff] %vm8173_vm1, %v8170_v51 }
 0xbd6   :  { %8180 = vst.msk [vmem:[%s11719_s7 + $0x30] sm:$0xff] %vm8173_vm1, %v8165_v44 }
 0xbd7   :  { %8186 = vsyncpa [#allocation5], 1 }

</bundles_post_ra>
